<compile_context>
chip_gen: v6e
topology: v6e:2x2x1
jax: 0.10.0
libtpu: 0.0.40
codegen_flags: <defaults>
</compile_context>

<pallas_src>
import numpy as np
import jax
import jax.numpy as jnp
from jax.experimental import pallas as pl
from jax.experimental.pallas import tpu as pltpu


# ----------------------------- Pallas kernels ------------------------------

def _lstm_cell(gates, c_prev, H):
    """Standard LSTM cell from pre-activation gates (PyTorch order i,f,g,o).
    H is a multiple of 128, so every gate slice is lane-group aligned."""
    i = jax.nn.sigmoid(gates[:, 0:H])
    f = jax.nn.sigmoid(gates[:, H:2 * H])
    g = jnp.tanh(gates[:, 2 * H:3 * H])
    o = jax.nn.sigmoid(gates[:, 3 * H:4 * H])
    c = f * c_prev + i * g
    h = o * jnp.tanh(c)
    return h, c


def make_fused_lstm_kernel(T, B, E, H, num_layers):
    """Fused multi-layer LSTM over the whole (host-static) sequence.

    Inputs (all VMEM resident):
      x_ref     : (T*B, E)  time-major flattened inputs (compute dtype)
      layer 0   : w_ih0 (E,4H), w_hh0 (H,4H), b0 (1,4H) f32
      layer l>0 : w_cat_l (2H,4H) = [W_ih_l^T ; W_hh_l^T], b_l (1,4H) f32
    Output:
      out_ref   : (T, B, H) f32 last-layer hidden states (aligned stores)
    Scratch:
      pre0_ref  : (T*B, 4H) f32 hoisted layer-0 input projection
    """
    n_w = 3 + 2 * (num_layers - 1)

    def kernel(x_ref, *refs):
        w_refs = refs[:n_w]
        out_ref = refs[n_w]
        pre0_ref = refs[n_w + 1]

        w_ih0_ref, w_hh0_ref, b0_ref = w_refs[0], w_refs[1], w_refs[2]
        upper = [(w_refs[3 + 2 * li], w_refs[4 + 2 * li])
                 for li in range(num_layers - 1)]

        # Hoisted layer-0 input projection for ALL timesteps: one big MXU
        # matmul, written straight into a VMEM scratch (not an SSA value that
        # would live across the unrolled loop).
        pre0_ref[...] = (
            jnp.dot(x_ref[...], w_ih0_ref[...],
                    preferred_element_type=jnp.float32)
            + b0_ref[...])

        # Hoist the (tiny) upper-layer bias broadcasts out of the time loop.
        upper_bias = [jnp.broadcast_to(b_ref[...], (B, 4 * H))
                      for (_, b_ref) in upper]

        h = [jnp.zeros((B, H), jnp.float32) for _ in range(num_layers)]
        c = [jnp.zeros((B, H), jnp.float32) for _ in range(num_layers)]

        for t in range(T):                       # host-static unroll (small T)
            # Layer 0: only h @ W_hh is on the recurrent critical path.
            g0 = pre0_ref[pl.ds(t * B, B), :] + jnp.dot(
                h[0].astype(w_hh0_ref.dtype), w_hh0_ref[...],
                preferred_element_type=jnp.float32)
            h[0], c[0] = _lstm_cell(g0, c[0], H)

            # Upper layers: single fused (B,2H)@(2H,4H) gate matmul.
            for li, (w_cat_ref, _) in enumerate(upper):
                l = li + 1
                hx = jnp.concatenate([h[l - 1], h[l]], axis=-1)
                gl = jnp.dot(hx.astype(w_cat_ref.dtype), w_cat_ref[...],
                             preferred_element_type=jnp.float32) + upper_bias[li]
                h[l], c[l] = _lstm_cell(gl, c[l], H)

            # Full aligned (B,H) store for this timestep (no masked vst).
            out_ref[t] = h[-1].astype(out_ref.dtype)

    return kernel


def fused_lstm(x2d, flat_weights, T, B, E, H, num_layers):
    """One ungridded pallas_call for the whole LSTM stack (VMEM resident)."""
    kernel = make_fused_lstm_kernel(T, B, E, H, num_layers)
    return pl.pallas_call(
        kernel,
        out_shape=jax.ShapeDtypeStruct((T, B, H), jnp.float32),
        scratch_shapes=[pltpu.VMEM((T * B, 4 * H), jnp.float32)],
        compiler_params=pltpu.CompilerParams(
            vmem_limit_bytes=32 * 1024 * 1024),     # explicit budget (v7x safe)
    )(x2d, *flat_weights)


def linear_kernel(h_ref, w_ref, b_ref, o_ref):
    # h is already in the compute dtype (cast once outside the kernel).
    o_ref[...] = (jnp.dot(h_ref[...], w_ref[...],
                          preferred_element_type=jnp.float32)
                  + b_ref[...]).astype(o_ref.dtype)


def _round_up(a, m):
    return (a + m - 1) // m * m


def linear_projection(h_packed, w_t, b, compute_dtype,
                      *, block_n=256, block_v=512):
    """Vocab projection tiled over (packed rows, vocab) with a parallel grid.
    Both axes are padded so blocks always divide evenly (no untiled fallback)."""
    N, H = h_packed.shape
    V = w_t.shape[1]
    bn = min(block_n, _round_up(N, 8))
    bv = min(block_v, _round_up(V, 128))
    N_pad = _round_up(N, bn)
    V_pad = _round_up(V, bv)

    h_p = jnp.pad(h_packed, ((0, N_pad - N), (0, 0))).astype(compute_dtype)
    w_p = jnp.pad(w_t, ((0, 0), (0, V_pad - V))).astype(compute_dtype)
    b_p = jnp.pad(b.reshape(1, V), ((0, 0), (0, V_pad - V)))

    out = pl.pallas_call(
        linear_kernel,
        out_shape=jax.ShapeDtypeStruct((N_pad, V_pad), jnp.float32),
        grid_spec=pltpu.PrefetchScalarGridSpec(
            num_scalar_prefetch=0,
            grid=(N_pad // bn, V_pad // bv),
            in_specs=[pl.BlockSpec((bn, H), lambda i, j: (i, 0)),
                      pl.BlockSpec((H, bv), lambda i, j: (0, j)),
                      pl.BlockSpec((1, bv), lambda i, j: (0, j))],
            out_specs=pl.BlockSpec((bn, bv), lambda i, j: (i, j)),
        ),
        compiler_params=pltpu.CompilerParams(
            dimension_semantics=("parallel", "parallel")),
    )(h_p, w_p, b_p)
    return out[:N, :V]


# ------------------------------ parameters ---------------------------------

def init_params(key, embed_size, hidden_size, vocab_size, num_layers):
    keys = jax.random.split(key, 2 + num_layers)
    params = {
        # embed.weight.data.uniform_(-0.1, 0.1)
        "embed": jax.random.uniform(keys[0], (vocab_size, embed_size),
                                    jnp.float32, -0.1, 0.1),
        # linear.weight uniform(-0.1, 0.1), bias = 0
        "linear_w": jax.random.uniform(keys[1], (vocab_size, hidden_size),
                                       jnp.float32, -0.1, 0.1),
        "linear_b": jnp.zeros((vocab_size,), jnp.float32),
    }
    k = 1.0 / np.sqrt(hidden_size)   # PyTorch default LSTM init range
    lstm = []
    for l in range(num_layers):
        in_dim = embed_size if l == 0 else hidden_size
        kw = jax.random.split(keys[2 + l], 4)
        lstm.append(dict(
            w_ih=jax.random.uniform(kw[0], (4 * hidden_size, in_dim),
                                    jnp.float32, -k, k),
            w_hh=jax.random.uniform(kw[1], (4 * hidden_size, hidden_size),
                                    jnp.float32, -k, k),
            b_ih=jax.random.uniform(kw[2], (4 * hidden_size,), jnp.float32, -k, k),
            b_hh=jax.random.uniform(kw[3], (4 * hidden_size,), jnp.float32, -k, k),
        ))
    params["lstm"] = lstm
    return params


# ------------------------------- packing -----------------------------------

def packed_indices(lengths, max_len, batch):
    """(t, b) index lists in PackedSequence order (batch_first=True input,
    lengths sorted descending, like torch pack_padded_sequence)."""
    t_idx, b_idx = [], []
    for t in range(max_len):
        for b in range(batch):
            if lengths[b] > t:
                t_idx.append(t)
                b_idx.append(b)
    return np.asarray(t_idx, np.int32), np.asarray(b_idx, np.int32)


# ------------------------------- forward ------------------------------------

def decoder_forward(params, features, captions, lengths, hidden_size,
                    compute_dtype=jnp.bfloat16):
    """compute_dtype casts only the matmul operands (bf16 is MXU-native on
    v5e/v6e/v7x); accumulation, biases, gate math and h/c stay float32."""
    lengths = [int(L) for L in lengths]
    # PyTorch pack_padded_sequence(enforce_sorted=True) semantics.
    assert all(lengths[i] >= lengths[i + 1] for i in range(len(lengths) - 1)), \
        "lengths must be sorted in descending order"

    # embeddings = embed(captions); cat features as first timestep (XLA side).
    emb = jnp.take(params["embed"], captions, axis=0)            # (B, Tc, E)
    emb = jnp.concatenate([features[:, None, :], emb], axis=1)   # (B, T, E)
    x = jnp.transpose(emb, (1, 0, 2))                            # (T, B, E)
    T, B, E = x.shape
    H = hidden_size
    x2d = x.reshape(T * B, E).astype(compute_dtype)

    # Weight prep (host side, once): layer 0 split, upper layers pre-stacked.
    lstm = params["lstm"]
    flat = [
        jnp.transpose(lstm[0]["w_ih"]).astype(compute_dtype),    # (E, 4H)
        jnp.transpose(lstm[0]["w_hh"]).astype(compute_dtype),    # (H, 4H)
        (lstm[0]["b_ih"] + lstm[0]["b_hh"]).reshape(1, 4 * H),   # (1, 4H) f32
    ]
    for lyr in lstm[1:]:
        w_cat = jnp.concatenate(
            [jnp.transpose(lyr["w_ih"]), jnp.transpose(lyr["w_hh"])],
            axis=0).astype(compute_dtype)                        # (2H, 4H)
        flat += [w_cat, (lyr["b_ih"] + lyr["b_hh"]).reshape(1, 4 * H)]

    # Fused LSTM stack -> full (T, B, H) hidden states (aligned stores).
    h_all = fused_lstm(x2d, flat, T, B, E, H, len(lstm))

    # Packed-sequence row selection (PackedSequence order) via XLA gather.
    t_idx, b_idx = packed_indices(lengths, T, B)
    flat_idx = jnp.asarray(t_idx * B + b_idx, jnp.int32)
    h_packed = jnp.take(h_all.reshape(T * B, H), flat_idx, axis=0)

    # outputs = linear(hiddens[0]) : tiled vocab projection.
    return linear_projection(h_packed,
                             jnp.transpose(params["linear_w"]),
                             params["linear_b"], compute_dtype)


# ------------------------------ pure-JAX ref ---------------------------------

def decoder_forward_ref(params, features, captions, lengths, hidden_size):
    P = jax.lax.Precision.HIGHEST
    emb = jnp.take(params["embed"], captions, axis=0)
    emb = jnp.concatenate([features[:, None, :], emb], axis=1)
    x = jnp.transpose(emb, (1, 0, 2))
    B = x.shape[1]
    for layer in params["lstm"]:
        w_ih, w_hh = layer["w_ih"], layer["w_hh"]
        b = layer["b_ih"] + layer["b_hh"]

        def step(carry, xt):
            h, c = carry
            gates = (jnp.dot(xt, w_ih.T, precision=P)
                     + jnp.dot(h, w_hh.T, precision=P) + b)
            i, f, g, o = jnp.split(gates, 4, axis=-1)
            i, f, o = jax.nn.sigmoid(i), jax.nn.sigmoid(f), jax.nn.sigmoid(o)
            g = jnp.tanh(g)
            c = f * c + i * g
            h = o * jnp.tanh(c)
            return (h, c), h

        init = (jnp.zeros((B, hidden_size), jnp.float32),
                jnp.zeros((B, hidden_size), jnp.float32))
        _, x = jax.lax.scan(step, init, x)
    T = x.shape[0]
    t_idx, b_idx = packed_indices(lengths, T, B)
    h_packed = x[t_idx, b_idx, :]
    return (jnp.dot(h_packed, params["linear_w"].T, precision=P)
            + params["linear_b"])


# --------------------------------- main --------------------------------------

if __name__ == "__main__":
    # Lane/sublane-friendly small shapes: B=8 (full sublanes), H=E=128 and
    # V=256 (multiples of 128) so gate splits and output stores are lane-dense.
    embed_size, hidden_size, vocab_size, num_layers = 128, 128, 256, 2
    batch, cap_len = 8, 7
    lengths = [8, 8, 7, 6, 5, 4, 3, 2]   # descending; for [features|captions]

    key = jax.random.PRNGKey(0)
    kp, kf, kc = jax.random.split(key, 3)
    params = init_params(kp, embed_size, hidden_size, vocab_size, num_layers)

    features = jax.random.normal(kf, (batch, embed_size), jnp.float32)
    captions = jax.random.randint(kc, (batch, cap_len), 0, vocab_size, jnp.int32)

    ref = decoder_forward_ref(params, features, captions, lengths, hidden_size)

    # float32 matmul operands: tight check against the HIGHEST-precision ref.
    out_f32 = decoder_forward(params, features, captions, lengths, hidden_size,
                              compute_dtype=jnp.float32)
    out_f32 = jax.block_until_ready(out_f32)
    assert out_f32.shape == (sum(lengths), vocab_size), out_f32.shape
    np.testing.assert_allclose(np.asarray(out_f32), np.asarray(ref),
                               rtol=1e-3, atol=1e-3)

    # default bf16 matmul operands: looser tolerance (recurrent bf16 rounding).
    out_bf16 = decoder_forward(params, features, captions, lengths, hidden_size)
    out_bf16 = jax.block_until_ready(out_bf16)
    assert out_bf16.shape == (sum(lengths), vocab_size), out_bf16.shape
    np.testing.assert_allclose(np.asarray(out_bf16), np.asarray(ref),
                               rtol=2e-2, atol=2e-2)

    print("KERNEL_OK")
</pallas_src>

<mosaic_0001>
module attributes {stable_mosaic.version = 11 : i64} {
  func.func @kernel(%arg0: memref<64x128xf32, #tpu.memory_space<vmem>>, %arg1: memref<128x512xf32, #tpu.memory_space<vmem>>, %arg2: memref<128x512xf32, #tpu.memory_space<vmem>>, %arg3: memref<1x512xf32, #tpu.memory_space<vmem>>, %arg4: memref<256x512xf32, #tpu.memory_space<vmem>>, %arg5: memref<1x512xf32, #tpu.memory_space<vmem>>, %arg6: memref<8x8x128xf32, #tpu.memory_space<vmem>>, %arg7: memref<64x512xf32, #tpu.memory_space<vmem>>) attributes {dimension_semantics = [], scalar_prefetch = 0 : i64, scratch_operands = 1 : i64, tpu.core_type = #tpu.core_type<tc>} {
    %c0 = arith.constant 0 : index
    %c0_0 = arith.constant 0 : index
    %0 = vector.load %arg0[%c0, %c0_0] : memref<64x128xf32, #tpu.memory_space<vmem>>, vector<64x128xf32>
    %c0_1 = arith.constant 0 : index
    %c0_2 = arith.constant 0 : index
    %1 = vector.load %arg1[%c0_1, %c0_2] : memref<128x512xf32, #tpu.memory_space<vmem>>, vector<128x512xf32>
    %cst = arith.constant dense<0.000000e+00> : vector<64x512xf32>
    %2 = tpu.matmul %0, %1, %cst {dimension_numbers = #tpu.dot_dimension_numbers<[1], [0], [0], [1], [0, 0, 1, 1], [], []>} : vector<64x128xf32>, vector<128x512xf32>, vector<64x512xf32> -> vector<64x512xf32>
    %c0_3 = arith.constant 0 : index
    %c0_4 = arith.constant 0 : index
    %3 = vector.load %arg3[%c0_3, %c0_4] : memref<1x512xf32, #tpu.memory_space<vmem>>, vector<1x512xf32>
    %4 = vector.broadcast %3 : vector<1x512xf32> to vector<64x512xf32>
    %5 = arith.addf %2, %4 : vector<64x512xf32>
    %c0_5 = arith.constant 0 : index
    %c0_6 = arith.constant 0 : index
    %6 = vector.load %arg7[%c0_5, %c0_6] : memref<64x512xf32, #tpu.memory_space<vmem>>, vector<64x512xf32>
    tpu.vector_store %arg7[%c0_5, %c0_6], %5 {strides = array<i32>} : memref<64x512xf32, #tpu.memory_space<vmem>>, vector<64x512xf32>,
    %c0_7 = arith.constant 0 : index
    %c0_8 = arith.constant 0 : index
    %7 = vector.load %arg5[%c0_7, %c0_8] : memref<1x512xf32, #tpu.memory_space<vmem>>, vector<1x512xf32>
    %8 = vector.shape_cast %7 : vector<1x512xf32> to vector<1x512xf32>
    %9 = vector.broadcast %8 : vector<1x512xf32> to vector<8x512xf32>
    %cst_9 = arith.constant 0.000000e+00 : f32
    %10 = vector.broadcast %cst_9 : f32 to vector<8x128xf32>
    %cst_10 = arith.constant 0.000000e+00 : f32
    %11 = vector.broadcast %cst_10 : f32 to vector<8x128xf32>
    %cst_11 = arith.constant 0.000000e+00 : f32
    %12 = vector.broadcast %cst_11 : f32 to vector<8x128xf32>
    %cst_12 = arith.constant 0.000000e+00 : f32
    %13 = vector.broadcast %cst_12 : f32 to vector<8x128xf32>
    %c0_13 = arith.constant 0 : index
    %c0_14 = arith.constant 0 : index
    %14 = vector.load %arg7[%c0_13, %c0_14] : memref<64x512xf32, #tpu.memory_space<vmem>>, vector<8x512xf32>
    %c0_15 = arith.constant 0 : index
    %c0_16 = arith.constant 0 : index
    %15 = vector.load %arg2[%c0_15, %c0_16] : memref<128x512xf32, #tpu.memory_space<vmem>>, vector<128x512xf32>
    %cst_17 = arith.constant dense<0.000000e+00> : vector<8x512xf32>
    %16 = tpu.matmul %10, %15, %cst_17 {dimension_numbers = #tpu.dot_dimension_numbers<[1], [0], [0], [1], [0, 0, 1, 1], [], []>} : vector<8x128xf32>, vector<128x512xf32>, vector<8x512xf32> -> vector<8x512xf32>
    %17 = arith.addf %14, %16 : vector<8x512xf32>
    %18 = vector.extract_strided_slice %17 {offsets = [0, 0], sizes = [8, 128], strides = [1, 1]} : vector<8x512xf32> to vector<8x128xf32>
    %19 = arith.negf %18 : vector<8x128xf32>
    %20 = math.exp %19 : vector<8x128xf32>
    %cst_18 = arith.constant 1.000000e+00 : f32
    %21 = vector.broadcast %cst_18 : f32 to vector<8x128xf32>
    %22 = arith.addf %21, %20 : vector<8x128xf32>
    %23 = arith.divf %21, %22 : vector<8x128xf32>
    %24 = vector.extract_strided_slice %17 {offsets = [0, 128], sizes = [8, 128], strides = [1, 1]} : vector<8x512xf32> to vector<8x128xf32>
    %25 = arith.negf %24 : vector<8x128xf32>
    %26 = math.exp %25 : vector<8x128xf32>
    %cst_19 = arith.constant 1.000000e+00 : f32
    %27 = vector.broadcast %cst_19 : f32 to vector<8x128xf32>
    %28 = arith.addf %27, %26 : vector<8x128xf32>
    %29 = arith.divf %27, %28 : vector<8x128xf32>
    %30 = vector.extract_strided_slice %17 {offsets = [0, 256], sizes = [8, 128], strides = [1, 1]} : vector<8x512xf32> to vector<8x128xf32>
    %31 = math.tanh %30 : vector<8x128xf32>
    %32 = vector.extract_strided_slice %17 {offsets = [0, 384], sizes = [8, 128], strides = [1, 1]} : vector<8x512xf32> to vector<8x128xf32>
    %33 = arith.negf %32 : vector<8x128xf32>
    %34 = math.exp %33 : vector<8x128xf32>
    %cst_20 = arith.constant 1.000000e+00 : f32
    %35 = vector.broadcast %cst_20 : f32 to vector<8x128xf32>
    %36 = arith.addf %35, %34 : vector<8x128xf32>
    %37 = arith.divf %35, %36 : vector<8x128xf32>
    %38 = arith.mulf %29, %12 : vector<8x128xf32>
    %39 = arith.mulf %23, %31 : vector<8x128xf32>
    %40 = arith.addf %38, %39 : vector<8x128xf32>
    %41 = math.tanh %40 : vector<8x128xf32>
    %42 = arith.mulf %37, %41 : vector<8x128xf32>
    %43 = tpu.concatenate %42, %11 in 1 : vector<8x128xf32>, vector<8x128xf32> -> vector<8x256xf32>
    %c0_21 = arith.constant 0 : index
    %c0_22 = arith.constant 0 : index
    %44 = vector.load %arg4[%c0_21, %c0_22] : memref<256x512xf32, #tpu.memory_space<vmem>>, vector<256x512xf32>
    %cst_23 = arith.constant dense<0.000000e+00> : vector<8x512xf32>
    %45 = tpu.matmul %43, %44, %cst_23 {dimension_numbers = #tpu.dot_dimension_numbers<[1], [0], [0], [1], [0, 0, 1, 1], [], []>} : vector<8x256xf32>, vector<256x512xf32>, vector<8x512xf32> -> vector<8x512xf32>
    %46 = arith.addf %45, %9 : vector<8x512xf32>
    %47 = vector.extract_strided_slice %46 {offsets = [0, 0], sizes = [8, 128], strides = [1, 1]} : vector<8x512xf32> to vector<8x128xf32>
    %48 = arith.negf %47 : vector<8x128xf32>
    %49 = math.exp %48 : vector<8x128xf32>
    %cst_24 = arith.constant 1.000000e+00 : f32
    %50 = vector.broadcast %cst_24 : f32 to vector<8x128xf32>
    %51 = arith.addf %50, %49 : vector<8x128xf32>
    %52 = arith.divf %50, %51 : vector<8x128xf32>
    %53 = vector.extract_strided_slice %46 {offsets = [0, 128], sizes = [8, 128], strides = [1, 1]} : vector<8x512xf32> to vector<8x128xf32>
    %54 = arith.negf %53 : vector<8x128xf32>
    %55 = math.exp %54 : vector<8x128xf32>
    %cst_25 = arith.constant 1.000000e+00 : f32
    %56 = vector.broadcast %cst_25 : f32 to vector<8x128xf32>
    %57 = arith.addf %56, %55 : vector<8x128xf32>
    %58 = arith.divf %56, %57 : vector<8x128xf32>
    %59 = vector.extract_strided_slice %46 {offsets = [0, 256], sizes = [8, 128], strides = [1, 1]} : vector<8x512xf32> to vector<8x128xf32>
    %60 = math.tanh %59 : vector<8x128xf32>
    %61 = vector.extract_strided_slice %46 {offsets = [0, 384], sizes = [8, 128], strides = [1, 1]} : vector<8x512xf32> to vector<8x128xf32>
    %62 = arith.negf %61 : vector<8x128xf32>
    %63 = math.exp %62 : vector<8x128xf32>
    %cst_26 = arith.constant 1.000000e+00 : f32
    %64 = vector.broadcast %cst_26 : f32 to vector<8x128xf32>
    %65 = arith.addf %64, %63 : vector<8x128xf32>
    %66 = arith.divf %64, %65 : vector<8x128xf32>
    %67 = arith.mulf %58, %13 : vector<8x128xf32>
    %68 = arith.mulf %52, %60 : vector<8x128xf32>
    %69 = arith.addf %67, %68 : vector<8x128xf32>
    %70 = math.tanh %69 : vector<8x128xf32>
    %71 = arith.mulf %66, %70 : vector<8x128xf32>
    %c0_27 = arith.constant 0 : index
    %c0_28 = arith.constant 0 : index
    %c0_29 = arith.constant 0 : index
    %72 = vector.load %arg6[%c0_27, %c0_28, %c0_29] : memref<8x8x128xf32, #tpu.memory_space<vmem>>, vector<1x8x128xf32>
    %73 = vector.shape_cast %72 : vector<1x8x128xf32> to vector<8x128xf32>
    %74 = vector.shape_cast %71 : vector<8x128xf32> to vector<1x8x128xf32>
    tpu.vector_store %arg6[%c0_27, %c0_28, %c0_29], %74 {strides = array<i32>} : memref<8x8x128xf32, #tpu.memory_space<vmem>>, vector<1x8x128xf32>,
    %c8 = arith.constant 8 : index
    %c0_30 = arith.constant 0 : index
    %75 = vector.load %arg7[%c8, %c0_30] : memref<64x512xf32, #tpu.memory_space<vmem>>, vector<8x512xf32>
    %c0_31 = arith.constant 0 : index
    %c0_32 = arith.constant 0 : index
    %76 = vector.load %arg2[%c0_31, %c0_32] : memref<128x512xf32, #tpu.memory_space<vmem>>, vector<128x512xf32>
    %cst_33 = arith.constant dense<0.000000e+00> : vector<8x512xf32>
    %77 = tpu.matmul %42, %76, %cst_33 {dimension_numbers = #tpu.dot_dimension_numbers<[1], [0], [0], [1], [0, 0, 1, 1], [], []>} : vector<8x128xf32>, vector<128x512xf32>, vector<8x512xf32> -> vector<8x512xf32>
    %78 = arith.addf %75, %77 : vector<8x512xf32>
    %79 = vector.extract_strided_slice %78 {offsets = [0, 0], sizes = [8, 128], strides = [1, 1]} : vector<8x512xf32> to vector<8x128xf32>
    %80 = arith.negf %79 : vector<8x128xf32>
    %81 = math.exp %80 : vector<8x128xf32>
    %cst_34 = arith.constant 1.000000e+00 : f32
    %82 = vector.broadcast %cst_34 : f32 to vector<8x128xf32>
    %83 = arith.addf %82, %81 : vector<8x128xf32>
    %84 = arith.divf %82, %83 : vector<8x128xf32>
    %85 = vector.extract_strided_slice %78 {offsets = [0, 128], sizes = [8, 128], strides = [1, 1]} : vector<8x512xf32> to vector<8x128xf32>
    %86 = arith.negf %85 : vector<8x128xf32>
    %87 = math.exp %86 : vector<8x128xf32>
    %cst_35 = arith.constant 1.000000e+00 : f32
    %88 = vector.broadcast %cst_35 : f32 to vector<8x128xf32>
    %89 = arith.addf %88, %87 : vector<8x128xf32>
    %90 = arith.divf %88, %89 : vector<8x128xf32>
    %91 = vector.extract_strided_slice %78 {offsets = [0, 256], sizes = [8, 128], strides = [1, 1]} : vector<8x512xf32> to vector<8x128xf32>
    %92 = math.tanh %91 : vector<8x128xf32>
    %93 = vector.extract_strided_slice %78 {offsets = [0, 384], sizes = [8, 128], strides = [1, 1]} : vector<8x512xf32> to vector<8x128xf32>
    %94 = arith.negf %93 : vector<8x128xf32>
    %95 = math.exp %94 : vector<8x128xf32>
    %cst_36 = arith.constant 1.000000e+00 : f32
    %96 = vector.broadcast %cst_36 : f32 to vector<8x128xf32>
    %97 = arith.addf %96, %95 : vector<8x128xf32>
    %98 = arith.divf %96, %97 : vector<8x128xf32>
    %99 = arith.mulf %90, %40 : vector<8x128xf32>
    %100 = arith.mulf %84, %92 : vector<8x128xf32>
    %101 = arith.addf %99, %100 : vector<8x128xf32>
    %102 = math.tanh %101 : vector<8x128xf32>
    %103 = arith.mulf %98, %102 : vector<8x128xf32>
    %104 = tpu.concatenate %103, %71 in 1 : vector<8x128xf32>, vector<8x128xf32> -> vector<8x256xf32>
    %c0_37 = arith.constant 0 : index
    %c0_38 = arith.constant 0 : index
    %105 = vector.load %arg4[%c0_37, %c0_38] : memref<256x512xf32, #tpu.memory_space<vmem>>, vector<256x512xf32>
    %cst_39 = arith.constant dense<0.000000e+00> : vector<8x512xf32>
    %106 = tpu.matmul %104, %105, %cst_39 {dimension_numbers = #tpu.dot_dimension_numbers<[1], [0], [0], [1], [0, 0, 1, 1], [], []>} : vector<8x256xf32>, vector<256x512xf32>, vector<8x512xf32> -> vector<8x512xf32>
    %107 = arith.addf %106, %9 : vector<8x512xf32>
    %108 = vector.extract_strided_slice %107 {offsets = [0, 0], sizes = [8, 128], strides = [1, 1]} : vector<8x512xf32> to vector<8x128xf32>
    %109 = arith.negf %108 : vector<8x128xf32>
    %110 = math.exp %109 : vector<8x128xf32>
    %cst_40 = arith.constant 1.000000e+00 : f32
    %111 = vector.broadcast %cst_40 : f32 to vector<8x128xf32>
    %112 = arith.addf %111, %110 : vector<8x128xf32>
    %113 = arith.divf %111, %112 : vector<8x128xf32>
    %114 = vector.extract_strided_slice %107 {offsets = [0, 128], sizes = [8, 128], strides = [1, 1]} : vector<8x512xf32> to vector<8x128xf32>
    %115 = arith.negf %114 : vector<8x128xf32>
    %116 = math.exp %115 : vector<8x128xf32>
    %cst_41 = arith.constant 1.000000e+00 : f32
    %117 = vector.broadcast %cst_41 : f32 to vector<8x128xf32>
    %118 = arith.addf %117, %116 : vector<8x128xf32>
    %119 = arith.divf %117, %118 : vector<8x128xf32>
    %120 = vector.extract_strided_slice %107 {offsets = [0, 256], sizes = [8, 128], strides = [1, 1]} : vector<8x512xf32> to vector<8x128xf32>
    %121 = math.tanh %120 : vector<8x128xf32>
    %122 = vector.extract_strided_slice %107 {offsets = [0, 384], sizes = [8, 128], strides = [1, 1]} : vector<8x512xf32> to vector<8x128xf32>
    %123 = arith.negf %122 : vector<8x128xf32>
    %124 = math.exp %123 : vector<8x128xf32>
    %cst_42 = arith.constant 1.000000e+00 : f32
    %125 = vector.broadcast %cst_42 : f32 to vector<8x128xf32>
    %126 = arith.addf %125, %124 : vector<8x128xf32>
    %127 = arith.divf %125, %126 : vector<8x128xf32>
    %128 = arith.mulf %119, %69 : vector<8x128xf32>
    %129 = arith.mulf %113, %121 : vector<8x128xf32>
    %130 = arith.addf %128, %129 : vector<8x128xf32>
    %131 = math.tanh %130 : vector<8x128xf32>
    %132 = arith.mulf %127, %131 : vector<8x128xf32>
    %c1 = arith.constant 1 : index
    %c0_43 = arith.constant 0 : index
    %c0_44 = arith.constant 0 : index
    %133 = vector.load %arg6[%c1, %c0_43, %c0_44] : memref<8x8x128xf32, #tpu.memory_space<vmem>>, vector<1x8x128xf32>
    %134 = vector.shape_cast %133 : vector<1x8x128xf32> to vector<8x128xf32>
    %135 = vector.shape_cast %132 : vector<8x128xf32> to vector<1x8x128xf32>
    tpu.vector_store %arg6[%c1, %c0_43, %c0_44], %135 {strides = array<i32>} : memref<8x8x128xf32, #tpu.memory_space<vmem>>, vector<1x8x128xf32>,
    %c16 = arith.constant 16 : index
    %c0_45 = arith.constant 0 : index
    %136 = vector.load %arg7[%c16, %c0_45] : memref<64x512xf32, #tpu.memory_space<vmem>>, vector<8x512xf32>
    %c0_46 = arith.constant 0 : index
    %c0_47 = arith.constant 0 : index
    %137 = vector.load %arg2[%c0_46, %c0_47] : memref<128x512xf32, #tpu.memory_space<vmem>>, vector<128x512xf32>
    %cst_48 = arith.constant dense<0.000000e+00> : vector<8x512xf32>
    %138 = tpu.matmul %103, %137, %cst_48 {dimension_numbers = #tpu.dot_dimension_numbers<[1], [0], [0], [1], [0, 0, 1, 1], [], []>} : vector<8x128xf32>, vector<128x512xf32>, vector<8x512xf32> -> vector<8x512xf32>
    %139 = arith.addf %136, %138 : vector<8x512xf32>
    %140 = vector.extract_strided_slice %139 {offsets = [0, 0], sizes = [8, 128], strides = [1, 1]} : vector<8x512xf32> to vector<8x128xf32>
    %141 = arith.negf %140 : vector<8x128xf32>
    %142 = math.exp %141 : vector<8x128xf32>
    %cst_49 = arith.constant 1.000000e+00 : f32
    %143 = vector.broadcast %cst_49 : f32 to vector<8x128xf32>
    %144 = arith.addf %143, %142 : vector<8x128xf32>
    %145 = arith.divf %143, %144 : vector<8x128xf32>
    %146 = vector.extract_strided_slice %139 {offsets = [0, 128], sizes = [8, 128], strides = [1, 1]} : vector<8x512xf32> to vector<8x128xf32>
    %147 = arith.negf %146 : vector<8x128xf32>
    %148 = math.exp %147 : vector<8x128xf32>
    %cst_50 = arith.constant 1.000000e+00 : f32
    %149 = vector.broadcast %cst_50 : f32 to vector<8x128xf32>
    %150 = arith.addf %149, %148 : vector<8x128xf32>
    %151 = arith.divf %149, %150 : vector<8x128xf32>
    %152 = vector.extract_strided_slice %139 {offsets = [0, 256], sizes = [8, 128], strides = [1, 1]} : vector<8x512xf32> to vector<8x128xf32>
    %153 = math.tanh %152 : vector<8x128xf32>
    %154 = vector.extract_strided_slice %139 {offsets = [0, 384], sizes = [8, 128], strides = [1, 1]} : vector<8x512xf32> to vector<8x128xf32>
    %155 = arith.negf %154 : vector<8x128xf32>
    %156 = math.exp %155 : vector<8x128xf32>
    %cst_51 = arith.constant 1.000000e+00 : f32
    %157 = vector.broadcast %cst_51 : f32 to vector<8x128xf32>
    %158 = arith.addf %157, %156 : vector<8x128xf32>
    %159 = arith.divf %157, %158 : vector<8x128xf32>
    %160 = arith.mulf %151, %101 : vector<8x128xf32>
    %161 = arith.mulf %145, %153 : vector<8x128xf32>
    %162 = arith.addf %160, %161 : vector<8x128xf32>
    %163 = math.tanh %162 : vector<8x128xf32>
    %164 = arith.mulf %159, %163 : vector<8x128xf32>
    %165 = tpu.concatenate %164, %132 in 1 : vector<8x128xf32>, vector<8x128xf32> -> vector<8x256xf32>
    %c0_52 = arith.constant 0 : index
    %c0_53 = arith.constant 0 : index
    %166 = vector.load %arg4[%c0_52, %c0_53] : memref<256x512xf32, #tpu.memory_space<vmem>>, vector<256x512xf32>
    %cst_54 = arith.constant dense<0.000000e+00> : vector<8x512xf32>
    %167 = tpu.matmul %165, %166, %cst_54 {dimension_numbers = #tpu.dot_dimension_numbers<[1], [0], [0], [1], [0, 0, 1, 1], [], []>} : vector<8x256xf32>, vector<256x512xf32>, vector<8x512xf32> -> vector<8x512xf32>
    %168 = arith.addf %167, %9 : vector<8x512xf32>
    %169 = vector.extract_strided_slice %168 {offsets = [0, 0], sizes = [8, 128], strides = [1, 1]} : vector<8x512xf32> to vector<8x128xf32>
    %170 = arith.negf %169 : vector<8x128xf32>
    %171 = math.exp %170 : vector<8x128xf32>
    %cst_55 = arith.constant 1.000000e+00 : f32
    %172 = vector.broadcast %cst_55 : f32 to vector<8x128xf32>
    %173 = arith.addf %172, %171 : vector<8x128xf32>
    %174 = arith.divf %172, %173 : vector<8x128xf32>
    %175 = vector.extract_strided_slice %168 {offsets = [0, 128], sizes = [8, 128], strides = [1, 1]} : vector<8x512xf32> to vector<8x128xf32>
    %176 = arith.negf %175 : vector<8x128xf32>
    %177 = math.exp %176 : vector<8x128xf32>
    %cst_56 = arith.constant 1.000000e+00 : f32
    %178 = vector.broadcast %cst_56 : f32 to vector<8x128xf32>
    %179 = arith.addf %178, %177 : vector<8x128xf32>
    %180 = arith.divf %178, %179 : vector<8x128xf32>
    %181 = vector.extract_strided_slice %168 {offsets = [0, 256], sizes = [8, 128], strides = [1, 1]} : vector<8x512xf32> to vector<8x128xf32>
    %182 = math.tanh %181 : vector<8x128xf32>
    %183 = vector.extract_strided_slice %168 {offsets = [0, 384], sizes = [8, 128], strides = [1, 1]} : vector<8x512xf32> to vector<8x128xf32>
    %184 = arith.negf %183 : vector<8x128xf32>
    %185 = math.exp %184 : vector<8x128xf32>
    %cst_57 = arith.constant 1.000000e+00 : f32
    %186 = vector.broadcast %cst_57 : f32 to vector<8x128xf32>
    %187 = arith.addf %186, %185 : vector<8x128xf32>
    %188 = arith.divf %186, %187 : vector<8x128xf32>
    %189 = arith.mulf %180, %130 : vector<8x128xf32>
    %190 = arith.mulf %174, %182 : vector<8x128xf32>
    %191 = arith.addf %189, %190 : vector<8x128xf32>
    %192 = math.tanh %191 : vector<8x128xf32>
    %193 = arith.mulf %188, %192 : vector<8x128xf32>
    %c2 = arith.constant 2 : index
    %c0_58 = arith.constant 0 : index
    %c0_59 = arith.constant 0 : index
    %194 = vector.load %arg6[%c2, %c0_58, %c0_59] : memref<8x8x128xf32, #tpu.memory_space<vmem>>, vector<1x8x128xf32>
    %195 = vector.shape_cast %194 : vector<1x8x128xf32> to vector<8x128xf32>
    %196 = vector.shape_cast %193 : vector<8x128xf32> to vector<1x8x128xf32>
    tpu.vector_store %arg6[%c2, %c0_58, %c0_59], %196 {strides = array<i32>} : memref<8x8x128xf32, #tpu.memory_space<vmem>>, vector<1x8x128xf32>,
    %c24 = arith.constant 24 : index
    %c0_60 = arith.constant 0 : index
    %197 = vector.load %arg7[%c24, %c0_60] : memref<64x512xf32, #tpu.memory_space<vmem>>, vector<8x512xf32>
    %c0_61 = arith.constant 0 : index
    %c0_62 = arith.constant 0 : index
    %198 = vector.load %arg2[%c0_61, %c0_62] : memref<128x512xf32, #tpu.memory_space<vmem>>, vector<128x512xf32>
    %cst_63 = arith.constant dense<0.000000e+00> : vector<8x512xf32>
    %199 = tpu.matmul %164, %198, %cst_63 {dimension_numbers = #tpu.dot_dimension_numbers<[1], [0], [0], [1], [0, 0, 1, 1], [], []>} : vector<8x128xf32>, vector<128x512xf32>, vector<8x512xf32> -> vector<8x512xf32>
    %200 = arith.addf %197, %199 : vector<8x512xf32>
    %201 = vector.extract_strided_slice %200 {offsets = [0, 0], sizes = [8, 128], strides = [1, 1]} : vector<8x512xf32> to vector<8x128xf32>
    %202 = arith.negf %201 : vector<8x128xf32>
    %203 = math.exp %202 : vector<8x128xf32>
    %cst_64 = arith.constant 1.000000e+00 : f32
    %204 = vector.broadcast %cst_64 : f32 to vector<8x128xf32>
    %205 = arith.addf %204, %203 : vector<8x128xf32>
    %206 = arith.divf %204, %205 : vector<8x128xf32>
    %207 = vector.extract_strided_slice %200 {offsets = [0, 128], sizes = [8, 128], strides = [1, 1]} : vector<8x512xf32> to vector<8x128xf32>
    %208 = arith.negf %207 : vector<8x128xf32>
    %209 = math.exp %208 : vector<8x128xf32>
    %cst_65 = arith.constant 1.000000e+00 : f32
    %210 = vector.broadcast %cst_65 : f32 to vector<8x128xf32>
    %211 = arith.addf %210, %209 : vector<8x128xf32>
    %212 = arith.divf %210, %211 : vector<8x128xf32>
    %213 = vector.extract_strided_slice %200 {offsets = [0, 256], sizes = [8, 128], strides = [1, 1]} : vector<8x512xf32> to vector<8x128xf32>
    %214 = math.tanh %213 : vector<8x128xf32>
    %215 = vector.extract_strided_slice %200 {offsets = [0, 384], sizes = [8, 128], strides = [1, 1]} : vector<8x512xf32> to vector<8x128xf32>
    %216 = arith.negf %215 : vector<8x128xf32>
    %217 = math.exp %216 : vector<8x128xf32>
    %cst_66 = arith.constant 1.000000e+00 : f32
    %218 = vector.broadcast %cst_66 : f32 to vector<8x128xf32>
    %219 = arith.addf %218, %217 : vector<8x128xf32>
    %220 = arith.divf %218, %219 : vector<8x128xf32>
    %221 = arith.mulf %212, %162 : vector<8x128xf32>
    %222 = arith.mulf %206, %214 : vector<8x128xf32>
    %223 = arith.addf %221, %222 : vector<8x128xf32>
    %224 = math.tanh %223 : vector<8x128xf32>
    %225 = arith.mulf %220, %224 : vector<8x128xf32>
    %226 = tpu.concatenate %225, %193 in 1 : vector<8x128xf32>, vector<8x128xf32> -> vector<8x256xf32>
    %c0_67 = arith.constant 0 : index
    %c0_68 = arith.constant 0 : index
    %227 = vector.load %arg4[%c0_67, %c0_68] : memref<256x512xf32, #tpu.memory_space<vmem>>, vector<256x512xf32>
    %cst_69 = arith.constant dense<0.000000e+00> : vector<8x512xf32>
    %228 = tpu.matmul %226, %227, %cst_69 {dimension_numbers = #tpu.dot_dimension_numbers<[1], [0], [0], [1], [0, 0, 1, 1], [], []>} : vector<8x256xf32>, vector<256x512xf32>, vector<8x512xf32> -> vector<8x512xf32>
    %229 = arith.addf %228, %9 : vector<8x512xf32>
    %230 = vector.extract_strided_slice %229 {offsets = [0, 0], sizes = [8, 128], strides = [1, 1]} : vector<8x512xf32> to vector<8x128xf32>
    %231 = arith.negf %230 : vector<8x128xf32>
    %232 = math.exp %231 : vector<8x128xf32>
    %cst_70 = arith.constant 1.000000e+00 : f32
    %233 = vector.broadcast %cst_70 : f32 to vector<8x128xf32>
    %234 = arith.addf %233, %232 : vector<8x128xf32>
    %235 = arith.divf %233, %234 : vector<8x128xf32>
    %236 = vector.extract_strided_slice %229 {offsets = [0, 128], sizes = [8, 128], strides = [1, 1]} : vector<8x512xf32> to vector<8x128xf32>
    %237 = arith.negf %236 : vector<8x128xf32>
    %238 = math.exp %237 : vector<8x128xf32>
    %cst_71 = arith.constant 1.000000e+00 : f32
    %239 = vector.broadcast %cst_71 : f32 to vector<8x128xf32>
    %240 = arith.addf %239, %238 : vector<8x128xf32>
    %241 = arith.divf %239, %240 : vector<8x128xf32>
    %242 = vector.extract_strided_slice %229 {offsets = [0, 256], sizes = [8, 128], strides = [1, 1]} : vector<8x512xf32> to vector<8x128xf32>
    %243 = math.tanh %242 : vector<8x128xf32>
    %244 = vector.extract_strided_slice %229 {offsets = [0, 384], sizes = [8, 128], strides = [1, 1]} : vector<8x512xf32> to vector<8x128xf32>
    %245 = arith.negf %244 : vector<8x128xf32>
    %246 = math.exp %245 : vector<8x128xf32>
    %cst_72 = arith.constant 1.000000e+00 : f32
    %247 = vector.broadcast %cst_72 : f32 to vector<8x128xf32>
    %248 = arith.addf %247, %246 : vector<8x128xf32>
    %249 = arith.divf %247, %248 : vector<8x128xf32>
    %250 = arith.mulf %241, %191 : vector<8x128xf32>
    %251 = arith.mulf %235, %243 : vector<8x128xf32>
    %252 = arith.addf %250, %251 : vector<8x128xf32>
    %253 = math.tanh %252 : vector<8x128xf32>
    %254 = arith.mulf %249, %253 : vector<8x128xf32>
    %c3 = arith.constant 3 : index
    %c0_73 = arith.constant 0 : index
    %c0_74 = arith.constant 0 : index
    %255 = vector.load %arg6[%c3, %c0_73, %c0_74] : memref<8x8x128xf32, #tpu.memory_space<vmem>>, vector<1x8x128xf32>
    %256 = vector.shape_cast %255 : vector<1x8x128xf32> to vector<8x128xf32>
    %257 = vector.shape_cast %254 : vector<8x128xf32> to vector<1x8x128xf32>
    tpu.vector_store %arg6[%c3, %c0_73, %c0_74], %257 {strides = array<i32>} : memref<8x8x128xf32, #tpu.memory_space<vmem>>, vector<1x8x128xf32>,
    %c32 = arith.constant 32 : index
    %c0_75 = arith.constant 0 : index
    %258 = vector.load %arg7[%c32, %c0_75] : memref<64x512xf32, #tpu.memory_space<vmem>>, vector<8x512xf32>
    %c0_76 = arith.constant 0 : index
    %c0_77 = arith.constant 0 : index
    %259 = vector.load %arg2[%c0_76, %c0_77] : memref<128x512xf32, #tpu.memory_space<vmem>>, vector<128x512xf32>
    %cst_78 = arith.constant dense<0.000000e+00> : vector<8x512xf32>
    %260 = tpu.matmul %225, %259, %cst_78 {dimension_numbers = #tpu.dot_dimension_numbers<[1], [0], [0], [1], [0, 0, 1, 1], [], []>} : vector<8x128xf32>, vector<128x512xf32>, vector<8x512xf32> -> vector<8x512xf32>
    %261 = arith.addf %258, %260 : vector<8x512xf32>
    %262 = vector.extract_strided_slice %261 {offsets = [0, 0], sizes = [8, 128], strides = [1, 1]} : vector<8x512xf32> to vector<8x128xf32>
    %263 = arith.negf %262 : vector<8x128xf32>
    %264 = math.exp %263 : vector<8x128xf32>
    %cst_79 = arith.constant 1.000000e+00 : f32
    %265 = vector.broadcast %cst_79 : f32 to vector<8x128xf32>
    %266 = arith.addf %265, %264 : vector<8x128xf32>
    %267 = arith.divf %265, %266 : vector<8x128xf32>
    %268 = vector.extract_strided_slice %261 {offsets = [0, 128], sizes = [8, 128], strides = [1, 1]} : vector<8x512xf32> to vector<8x128xf32>
    %269 = arith.negf %268 : vector<8x128xf32>
    %270 = math.exp %269 : vector<8x128xf32>
    %cst_80 = arith.constant 1.000000e+00 : f32
    %271 = vector.broadcast %cst_80 : f32 to vector<8x128xf32>
    %272 = arith.addf %271, %270 : vector<8x128xf32>
    %273 = arith.divf %271, %272 : vector<8x128xf32>
    %274 = vector.extract_strided_slice %261 {offsets = [0, 256], sizes = [8, 128], strides = [1, 1]} : vector<8x512xf32> to vector<8x128xf32>
    %275 = math.tanh %274 : vector<8x128xf32>
    %276 = vector.extract_strided_slice %261 {offsets = [0, 384], sizes = [8, 128], strides = [1, 1]} : vector<8x512xf32> to vector<8x128xf32>
    %277 = arith.negf %276 : vector<8x128xf32>
    %278 = math.exp %277 : vector<8x128xf32>
    %cst_81 = arith.constant 1.000000e+00 : f32
    %279 = vector.broadcast %cst_81 : f32 to vector<8x128xf32>
    %280 = arith.addf %279, %278 : vector<8x128xf32>
    %281 = arith.divf %279, %280 : vector<8x128xf32>
    %282 = arith.mulf %273, %223 : vector<8x128xf32>
    %283 = arith.mulf %267, %275 : vector<8x128xf32>
    %284 = arith.addf %282, %283 : vector<8x128xf32>
    %285 = math.tanh %284 : vector<8x128xf32>
    %286 = arith.mulf %281, %285 : vector<8x128xf32>
    %287 = tpu.concatenate %286, %254 in 1 : vector<8x128xf32>, vector<8x128xf32> -> vector<8x256xf32>
    %c0_82 = arith.constant 0 : index
    %c0_83 = arith.constant 0 : index
    %288 = vector.load %arg4[%c0_82, %c0_83] : memref<256x512xf32, #tpu.memory_space<vmem>>, vector<256x512xf32>
    %cst_84 = arith.constant dense<0.000000e+00> : vector<8x512xf32>
    %289 = tpu.matmul %287, %288, %cst_84 {dimension_numbers = #tpu.dot_dimension_numbers<[1], [0], [0], [1], [0, 0, 1, 1], [], []>} : vector<8x256xf32>, vector<256x512xf32>, vector<8x512xf32> -> vector<8x512xf32>
    %290 = arith.addf %289, %9 : vector<8x512xf32>
    %291 = vector.extract_strided_slice %290 {offsets = [0, 0], sizes = [8, 128], strides = [1, 1]} : vector<8x512xf32> to vector<8x128xf32>
    %292 = arith.negf %291 : vector<8x128xf32>
    %293 = math.exp %292 : vector<8x128xf32>
    %cst_85 = arith.constant 1.000000e+00 : f32
    %294 = vector.broadcast %cst_85 : f32 to vector<8x128xf32>
    %295 = arith.addf %294, %293 : vector<8x128xf32>
    %296 = arith.divf %294, %295 : vector<8x128xf32>
    %297 = vector.extract_strided_slice %290 {offsets = [0, 128], sizes = [8, 128], strides = [1, 1]} : vector<8x512xf32> to vector<8x128xf32>
    %298 = arith.negf %297 : vector<8x128xf32>
    %299 = math.exp %298 : vector<8x128xf32>
    %cst_86 = arith.constant 1.000000e+00 : f32
    %300 = vector.broadcast %cst_86 : f32 to vector<8x128xf32>
    %301 = arith.addf %300, %299 : vector<8x128xf32>
    %302 = arith.divf %300, %301 : vector<8x128xf32>
    %303 = vector.extract_strided_slice %290 {offsets = [0, 256], sizes = [8, 128], strides = [1, 1]} : vector<8x512xf32> to vector<8x128xf32>
    %304 = math.tanh %303 : vector<8x128xf32>
    %305 = vector.extract_strided_slice %290 {offsets = [0, 384], sizes = [8, 128], strides = [1, 1]} : vector<8x512xf32> to vector<8x128xf32>
    %306 = arith.negf %305 : vector<8x128xf32>
    %307 = math.exp %306 : vector<8x128xf32>
    %cst_87 = arith.constant 1.000000e+00 : f32
    %308 = vector.broadcast %cst_87 : f32 to vector<8x128xf32>
    %309 = arith.addf %308, %307 : vector<8x128xf32>
    %310 = arith.divf %308, %309 : vector<8x128xf32>
    %311 = arith.mulf %302, %252 : vector<8x128xf32>
    %312 = arith.mulf %296, %304 : vector<8x128xf32>
    %313 = arith.addf %311, %312 : vector<8x128xf32>
    %314 = math.tanh %313 : vector<8x128xf32>
    %315 = arith.mulf %310, %314 : vector<8x128xf32>
    %c4 = arith.constant 4 : index
    %c0_88 = arith.constant 0 : index
    %c0_89 = arith.constant 0 : index
    %316 = vector.load %arg6[%c4, %c0_88, %c0_89] : memref<8x8x128xf32, #tpu.memory_space<vmem>>, vector<1x8x128xf32>
    %317 = vector.shape_cast %316 : vector<1x8x128xf32> to vector<8x128xf32>
    %318 = vector.shape_cast %315 : vector<8x128xf32> to vector<1x8x128xf32>
    tpu.vector_store %arg6[%c4, %c0_88, %c0_89], %318 {strides = array<i32>} : memref<8x8x128xf32, #tpu.memory_space<vmem>>, vector<1x8x128xf32>,
    %c40 = arith.constant 40 : index
    %c0_90 = arith.constant 0 : index
    %319 = vector.load %arg7[%c40, %c0_90] : memref<64x512xf32, #tpu.memory_space<vmem>>, vector<8x512xf32>
    %c0_91 = arith.constant 0 : index
    %c0_92 = arith.constant 0 : index
    %320 = vector.load %arg2[%c0_91, %c0_92] : memref<128x512xf32, #tpu.memory_space<vmem>>, vector<128x512xf32>
    %cst_93 = arith.constant dense<0.000000e+00> : vector<8x512xf32>
    %321 = tpu.matmul %286, %320, %cst_93 {dimension_numbers = #tpu.dot_dimension_numbers<[1], [0], [0], [1], [0, 0, 1, 1], [], []>} : vector<8x128xf32>, vector<128x512xf32>, vector<8x512xf32> -> vector<8x512xf32>
    %322 = arith.addf %319, %321 : vector<8x512xf32>
    %323 = vector.extract_strided_slice %322 {offsets = [0, 0], sizes = [8, 128], strides = [1, 1]} : vector<8x512xf32> to vector<8x128xf32>
    %324 = arith.negf %323 : vector<8x128xf32>
    %325 = math.exp %324 : vector<8x128xf32>
    %cst_94 = arith.constant 1.000000e+00 : f32
    %326 = vector.broadcast %cst_94 : f32 to vector<8x128xf32>
    %327 = arith.addf %326, %325 : vector<8x128xf32>
    %328 = arith.divf %326, %327 : vector<8x128xf32>
    %329 = vector.extract_strided_slice %322 {offsets = [0, 128], sizes = [8, 128], strides = [1, 1]} : vector<8x512xf32> to vector<8x128xf32>
    %330 = arith.negf %329 : vector<8x128xf32>
    %331 = math.exp %330 : vector<8x128xf32>
    %cst_95 = arith.constant 1.000000e+00 : f32
    %332 = vector.broadcast %cst_95 : f32 to vector<8x128xf32>
    %333 = arith.addf %332, %331 : vector<8x128xf32>
    %334 = arith.divf %332, %333 : vector<8x128xf32>
    %335 = vector.extract_strided_slice %322 {offsets = [0, 256], sizes = [8, 128], strides = [1, 1]} : vector<8x512xf32> to vector<8x128xf32>
    %336 = math.tanh %335 : vector<8x128xf32>
    %337 = vector.extract_strided_slice %322 {offsets = [0, 384], sizes = [8, 128], strides = [1, 1]} : vector<8x512xf32> to vector<8x128xf32>
    %338 = arith.negf %337 : vector<8x128xf32>
    %339 = math.exp %338 : vector<8x128xf32>
    %cst_96 = arith.constant 1.000000e+00 : f32
    %340 = vector.broadcast %cst_96 : f32 to vector<8x128xf32>
    %341 = arith.addf %340, %339 : vector<8x128xf32>
    %342 = arith.divf %340, %341 : vector<8x128xf32>
    %343 = arith.mulf %334, %284 : vector<8x128xf32>
    %344 = arith.mulf %328, %336 : vector<8x128xf32>
    %345 = arith.addf %343, %344 : vector<8x128xf32>
    %346 = math.tanh %345 : vector<8x128xf32>
    %347 = arith.mulf %342, %346 : vector<8x128xf32>
    %348 = tpu.concatenate %347, %315 in 1 : vector<8x128xf32>, vector<8x128xf32> -> vector<8x256xf32>
    %c0_97 = arith.constant 0 : index
    %c0_98 = arith.constant 0 : index
    %349 = vector.load %arg4[%c0_97, %c0_98] : memref<256x512xf32, #tpu.memory_space<vmem>>, vector<256x512xf32>
    %cst_99 = arith.constant dense<0.000000e+00> : vector<8x512xf32>
    %350 = tpu.matmul %348, %349, %cst_99 {dimension_numbers = #tpu.dot_dimension_numbers<[1], [0], [0], [1], [0, 0, 1, 1], [], []>} : vector<8x256xf32>, vector<256x512xf32>, vector<8x512xf32> -> vector<8x512xf32>
    %351 = arith.addf %350, %9 : vector<8x512xf32>
    %352 = vector.extract_strided_slice %351 {offsets = [0, 0], sizes = [8, 128], strides = [1, 1]} : vector<8x512xf32> to vector<8x128xf32>
    %353 = arith.negf %352 : vector<8x128xf32>
    %354 = math.exp %353 : vector<8x128xf32>
    %cst_100 = arith.constant 1.000000e+00 : f32
    %355 = vector.broadcast %cst_100 : f32 to vector<8x128xf32>
    %356 = arith.addf %355, %354 : vector<8x128xf32>
    %357 = arith.divf %355, %356 : vector<8x128xf32>
    %358 = vector.extract_strided_slice %351 {offsets = [0, 128], sizes = [8, 128], strides = [1, 1]} : vector<8x512xf32> to vector<8x128xf32>
    %359 = arith.negf %358 : vector<8x128xf32>
    %360 = math.exp %359 : vector<8x128xf32>
    %cst_101 = arith.constant 1.000000e+00 : f32
    %361 = vector.broadcast %cst_101 : f32 to vector<8x128xf32>
    %362 = arith.addf %361, %360 : vector<8x128xf32>
    %363 = arith.divf %361, %362 : vector<8x128xf32>
    %364 = vector.extract_strided_slice %351 {offsets = [0, 256], sizes = [8, 128], strides = [1, 1]} : vector<8x512xf32> to vector<8x128xf32>
    %365 = math.tanh %364 : vector<8x128xf32>
    %366 = vector.extract_strided_slice %351 {offsets = [0, 384], sizes = [8, 128], strides = [1, 1]} : vector<8x512xf32> to vector<8x128xf32>
    %367 = arith.negf %366 : vector<8x128xf32>
    %368 = math.exp %367 : vector<8x128xf32>
    %cst_102 = arith.constant 1.000000e+00 : f32
    %369 = vector.broadcast %cst_102 : f32 to vector<8x128xf32>
    %370 = arith.addf %369, %368 : vector<8x128xf32>
    %371 = arith.divf %369, %370 : vector<8x128xf32>
    %372 = arith.mulf %363, %313 : vector<8x128xf32>
    %373 = arith.mulf %357, %365 : vector<8x128xf32>
    %374 = arith.addf %372, %373 : vector<8x128xf32>
    %375 = math.tanh %374 : vector<8x128xf32>
    %376 = arith.mulf %371, %375 : vector<8x128xf32>
    %c5 = arith.constant 5 : index
    %c0_103 = arith.constant 0 : index
    %c0_104 = arith.constant 0 : index
    %377 = vector.load %arg6[%c5, %c0_103, %c0_104] : memref<8x8x128xf32, #tpu.memory_space<vmem>>, vector<1x8x128xf32>
    %378 = vector.shape_cast %377 : vector<1x8x128xf32> to vector<8x128xf32>
    %379 = vector.shape_cast %376 : vector<8x128xf32> to vector<1x8x128xf32>
    tpu.vector_store %arg6[%c5, %c0_103, %c0_104], %379 {strides = array<i32>} : memref<8x8x128xf32, #tpu.memory_space<vmem>>, vector<1x8x128xf32>,
    %c48 = arith.constant 48 : index
    %c0_105 = arith.constant 0 : index
    %380 = vector.load %arg7[%c48, %c0_105] : memref<64x512xf32, #tpu.memory_space<vmem>>, vector<8x512xf32>
    %c0_106 = arith.constant 0 : index
    %c0_107 = arith.constant 0 : index
    %381 = vector.load %arg2[%c0_106, %c0_107] : memref<128x512xf32, #tpu.memory_space<vmem>>, vector<128x512xf32>
    %cst_108 = arith.constant dense<0.000000e+00> : vector<8x512xf32>
    %382 = tpu.matmul %347, %381, %cst_108 {dimension_numbers = #tpu.dot_dimension_numbers<[1], [0], [0], [1], [0, 0, 1, 1], [], []>} : vector<8x128xf32>, vector<128x512xf32>, vector<8x512xf32> -> vector<8x512xf32>
    %383 = arith.addf %380, %382 : vector<8x512xf32>
    %384 = vector.extract_strided_slice %383 {offsets = [0, 0], sizes = [8, 128], strides = [1, 1]} : vector<8x512xf32> to vector<8x128xf32>
    %385 = arith.negf %384 : vector<8x128xf32>
    %386 = math.exp %385 : vector<8x128xf32>
    %cst_109 = arith.constant 1.000000e+00 : f32
    %387 = vector.broadcast %cst_109 : f32 to vector<8x128xf32>
    %388 = arith.addf %387, %386 : vector<8x128xf32>
    %389 = arith.divf %387, %388 : vector<8x128xf32>
    %390 = vector.extract_strided_slice %383 {offsets = [0, 128], sizes = [8, 128], strides = [1, 1]} : vector<8x512xf32> to vector<8x128xf32>
    %391 = arith.negf %390 : vector<8x128xf32>
    %392 = math.exp %391 : vector<8x128xf32>
    %cst_110 = arith.constant 1.000000e+00 : f32
    %393 = vector.broadcast %cst_110 : f32 to vector<8x128xf32>
    %394 = arith.addf %393, %392 : vector<8x128xf32>
    %395 = arith.divf %393, %394 : vector<8x128xf32>
    %396 = vector.extract_strided_slice %383 {offsets = [0, 256], sizes = [8, 128], strides = [1, 1]} : vector<8x512xf32> to vector<8x128xf32>
    %397 = math.tanh %396 : vector<8x128xf32>
    %398 = vector.extract_strided_slice %383 {offsets = [0, 384], sizes = [8, 128], strides = [1, 1]} : vector<8x512xf32> to vector<8x128xf32>
    %399 = arith.negf %398 : vector<8x128xf32>
    %400 = math.exp %399 : vector<8x128xf32>
    %cst_111 = arith.constant 1.000000e+00 : f32
    %401 = vector.broadcast %cst_111 : f32 to vector<8x128xf32>
    %402 = arith.addf %401, %400 : vector<8x128xf32>
    %403 = arith.divf %401, %402 : vector<8x128xf32>
    %404 = arith.mulf %395, %345 : vector<8x128xf32>
    %405 = arith.mulf %389, %397 : vector<8x128xf32>
    %406 = arith.addf %404, %405 : vector<8x128xf32>
    %407 = math.tanh %406 : vector<8x128xf32>
    %408 = arith.mulf %403, %407 : vector<8x128xf32>
    %409 = tpu.concatenate %408, %376 in 1 : vector<8x128xf32>, vector<8x128xf32> -> vector<8x256xf32>
    %c0_112 = arith.constant 0 : index
    %c0_113 = arith.constant 0 : index
    %410 = vector.load %arg4[%c0_112, %c0_113] : memref<256x512xf32, #tpu.memory_space<vmem>>, vector<256x512xf32>
    %cst_114 = arith.constant dense<0.000000e+00> : vector<8x512xf32>
    %411 = tpu.matmul %409, %410, %cst_114 {dimension_numbers = #tpu.dot_dimension_numbers<[1], [0], [0], [1], [0, 0, 1, 1], [], []>} : vector<8x256xf32>, vector<256x512xf32>, vector<8x512xf32> -> vector<8x512xf32>
    %412 = arith.addf %411, %9 : vector<8x512xf32>
    %413 = vector.extract_strided_slice %412 {offsets = [0, 0], sizes = [8, 128], strides = [1, 1]} : vector<8x512xf32> to vector<8x128xf32>
    %414 = arith.negf %413 : vector<8x128xf32>
    %415 = math.exp %414 : vector<8x128xf32>
    %cst_115 = arith.constant 1.000000e+00 : f32
    %416 = vector.broadcast %cst_115 : f32 to vector<8x128xf32>
    %417 = arith.addf %416, %415 : vector<8x128xf32>
    %418 = arith.divf %416, %417 : vector<8x128xf32>
    %419 = vector.extract_strided_slice %412 {offsets = [0, 128], sizes = [8, 128], strides = [1, 1]} : vector<8x512xf32> to vector<8x128xf32>
    %420 = arith.negf %419 : vector<8x128xf32>
    %421 = math.exp %420 : vector<8x128xf32>
    %cst_116 = arith.constant 1.000000e+00 : f32
    %422 = vector.broadcast %cst_116 : f32 to vector<8x128xf32>
    %423 = arith.addf %422, %421 : vector<8x128xf32>
    %424 = arith.divf %422, %423 : vector<8x128xf32>
    %425 = vector.extract_strided_slice %412 {offsets = [0, 256], sizes = [8, 128], strides = [1, 1]} : vector<8x512xf32> to vector<8x128xf32>
    %426 = math.tanh %425 : vector<8x128xf32>
    %427 = vector.extract_strided_slice %412 {offsets = [0, 384], sizes = [8, 128], strides = [1, 1]} : vector<8x512xf32> to vector<8x128xf32>
    %428 = arith.negf %427 : vector<8x128xf32>
    %429 = math.exp %428 : vector<8x128xf32>
    %cst_117 = arith.constant 1.000000e+00 : f32
    %430 = vector.broadcast %cst_117 : f32 to vector<8x128xf32>
    %431 = arith.addf %430, %429 : vector<8x128xf32>
    %432 = arith.divf %430, %431 : vector<8x128xf32>
    %433 = arith.mulf %424, %374 : vector<8x128xf32>
    %434 = arith.mulf %418, %426 : vector<8x128xf32>
    %435 = arith.addf %433, %434 : vector<8x128xf32>
    %436 = math.tanh %435 : vector<8x128xf32>
    %437 = arith.mulf %432, %436 : vector<8x128xf32>
    %c6 = arith.constant 6 : index
    %c0_118 = arith.constant 0 : index
    %c0_119 = arith.constant 0 : index
    %438 = vector.load %arg6[%c6, %c0_118, %c0_119] : memref<8x8x128xf32, #tpu.memory_space<vmem>>, vector<1x8x128xf32>
    %439 = vector.shape_cast %438 : vector<1x8x128xf32> to vector<8x128xf32>
    %440 = vector.shape_cast %437 : vector<8x128xf32> to vector<1x8x128xf32>
    tpu.vector_store %arg6[%c6, %c0_118, %c0_119], %440 {strides = array<i32>} : memref<8x8x128xf32, #tpu.memory_space<vmem>>, vector<1x8x128xf32>,
    %c56 = arith.constant 56 : index
    %c0_120 = arith.constant 0 : index
    %441 = vector.load %arg7[%c56, %c0_120] : memref<64x512xf32, #tpu.memory_space<vmem>>, vector<8x512xf32>
    %c0_121 = arith.constant 0 : index
    %c0_122 = arith.constant 0 : index
    %442 = vector.load %arg2[%c0_121, %c0_122] : memref<128x512xf32, #tpu.memory_space<vmem>>, vector<128x512xf32>
    %cst_123 = arith.constant dense<0.000000e+00> : vector<8x512xf32>
    %443 = tpu.matmul %408, %442, %cst_123 {dimension_numbers = #tpu.dot_dimension_numbers<[1], [0], [0], [1], [0, 0, 1, 1], [], []>} : vector<8x128xf32>, vector<128x512xf32>, vector<8x512xf32> -> vector<8x512xf32>
    %444 = arith.addf %441, %443 : vector<8x512xf32>
    %445 = vector.extract_strided_slice %444 {offsets = [0, 0], sizes = [8, 128], strides = [1, 1]} : vector<8x512xf32> to vector<8x128xf32>
    %446 = arith.negf %445 : vector<8x128xf32>
    %447 = math.exp %446 : vector<8x128xf32>
    %cst_124 = arith.constant 1.000000e+00 : f32
    %448 = vector.broadcast %cst_124 : f32 to vector<8x128xf32>
    %449 = arith.addf %448, %447 : vector<8x128xf32>
    %450 = arith.divf %448, %449 : vector<8x128xf32>
    %451 = vector.extract_strided_slice %444 {offsets = [0, 128], sizes = [8, 128], strides = [1, 1]} : vector<8x512xf32> to vector<8x128xf32>
    %452 = arith.negf %451 : vector<8x128xf32>
    %453 = math.exp %452 : vector<8x128xf32>
    %cst_125 = arith.constant 1.000000e+00 : f32
    %454 = vector.broadcast %cst_125 : f32 to vector<8x128xf32>
    %455 = arith.addf %454, %453 : vector<8x128xf32>
    %456 = arith.divf %454, %455 : vector<8x128xf32>
    %457 = vector.extract_strided_slice %444 {offsets = [0, 256], sizes = [8, 128], strides = [1, 1]} : vector<8x512xf32> to vector<8x128xf32>
    %458 = math.tanh %457 : vector<8x128xf32>
    %459 = vector.extract_strided_slice %444 {offsets = [0, 384], sizes = [8, 128], strides = [1, 1]} : vector<8x512xf32> to vector<8x128xf32>
    %460 = arith.negf %459 : vector<8x128xf32>
    %461 = math.exp %460 : vector<8x128xf32>
    %cst_126 = arith.constant 1.000000e+00 : f32
    %462 = vector.broadcast %cst_126 : f32 to vector<8x128xf32>
    %463 = arith.addf %462, %461 : vector<8x128xf32>
    %464 = arith.divf %462, %463 : vector<8x128xf32>
    %465 = arith.mulf %456, %406 : vector<8x128xf32>
    %466 = arith.mulf %450, %458 : vector<8x128xf32>
    %467 = arith.addf %465, %466 : vector<8x128xf32>
    %468 = math.tanh %467 : vector<8x128xf32>
    %469 = arith.mulf %464, %468 : vector<8x128xf32>
    %470 = tpu.concatenate %469, %437 in 1 : vector<8x128xf32>, vector<8x128xf32> -> vector<8x256xf32>
    %c0_127 = arith.constant 0 : index
    %c0_128 = arith.constant 0 : index
    %471 = vector.load %arg4[%c0_127, %c0_128] : memref<256x512xf32, #tpu.memory_space<vmem>>, vector<256x512xf32>
    %cst_129 = arith.constant dense<0.000000e+00> : vector<8x512xf32>
    %472 = tpu.matmul %470, %471, %cst_129 {dimension_numbers = #tpu.dot_dimension_numbers<[1], [0], [0], [1], [0, 0, 1, 1], [], []>} : vector<8x256xf32>, vector<256x512xf32>, vector<8x512xf32> -> vector<8x512xf32>
    %473 = arith.addf %472, %9 : vector<8x512xf32>
    %474 = vector.extract_strided_slice %473 {offsets = [0, 0], sizes = [8, 128], strides = [1, 1]} : vector<8x512xf32> to vector<8x128xf32>
    %475 = arith.negf %474 : vector<8x128xf32>
    %476 = math.exp %475 : vector<8x128xf32>
    %cst_130 = arith.constant 1.000000e+00 : f32
    %477 = vector.broadcast %cst_130 : f32 to vector<8x128xf32>
    %478 = arith.addf %477, %476 : vector<8x128xf32>
    %479 = arith.divf %477, %478 : vector<8x128xf32>
    %480 = vector.extract_strided_slice %473 {offsets = [0, 128], sizes = [8, 128], strides = [1, 1]} : vector<8x512xf32> to vector<8x128xf32>
    %481 = arith.negf %480 : vector<8x128xf32>
    %482 = math.exp %481 : vector<8x128xf32>
    %cst_131 = arith.constant 1.000000e+00 : f32
    %483 = vector.broadcast %cst_131 : f32 to vector<8x128xf32>
    %484 = arith.addf %483, %482 : vector<8x128xf32>
    %485 = arith.divf %483, %484 : vector<8x128xf32>
    %486 = vector.extract_strided_slice %473 {offsets = [0, 256], sizes = [8, 128], strides = [1, 1]} : vector<8x512xf32> to vector<8x128xf32>
    %487 = math.tanh %486 : vector<8x128xf32>
    %488 = vector.extract_strided_slice %473 {offsets = [0, 384], sizes = [8, 128], strides = [1, 1]} : vector<8x512xf32> to vector<8x128xf32>
    %489 = arith.negf %488 : vector<8x128xf32>
    %490 = math.exp %489 : vector<8x128xf32>
    %cst_132 = arith.constant 1.000000e+00 : f32
    %491 = vector.broadcast %cst_132 : f32 to vector<8x128xf32>
    %492 = arith.addf %491, %490 : vector<8x128xf32>
    %493 = arith.divf %491, %492 : vector<8x128xf32>
    %494 = arith.mulf %485, %435 : vector<8x128xf32>
    %495 = arith.mulf %479, %487 : vector<8x128xf32>
    %496 = arith.addf %494, %495 : vector<8x128xf32>
    %497 = math.tanh %496 : vector<8x128xf32>
    %498 = arith.mulf %493, %497 : vector<8x128xf32>
    %c7 = arith.constant 7 : index
    %c0_133 = arith.constant 0 : index
    %c0_134 = arith.constant 0 : index
    %499 = vector.load %arg6[%c7, %c0_133, %c0_134] : memref<8x8x128xf32, #tpu.memory_space<vmem>>, vector<1x8x128xf32>
    %500 = vector.shape_cast %499 : vector<1x8x128xf32> to vector<8x128xf32>
    %501 = vector.shape_cast %498 : vector<8x128xf32> to vector<1x8x128xf32>
    tpu.vector_store %arg6[%c7, %c0_133, %c0_134], %501 {strides = array<i32>} : memref<8x8x128xf32, #tpu.memory_space<vmem>>, vector<1x8x128xf32>,
    return
  }
}

</mosaic_0001>

<bundles_post_ra>
// kernel: tpu_custom_call.1
= control target key start
LH: loop header
LB: loop body
LE: loop exit
PB: predicated region body
PF: predicated region fallthrough
CT: control target
= control target key end

     0   :  { %11 = vsyncpa [#allocation4], 0  ;;  %s8486_s0 = inlined_call_operand.hbm [shape: f32[64,128], index: 0, kind: input, shape index: {}]   ;;  %s8487_s1 = inlined_call_operand.hbm [shape: f32[128,512], index: 1, kind: input, shape index: {}]   ;;  %s8488_s2 = inlined_call_operand.hbm [shape: f32[128,512], index: 2, kind: input, shape index: {}]   ;;  %s8489_s3 = inlined_call_operand.vmem [shape: f32[1,512], index: 3, kind: input, shape index: {}]   ;;  %s8490_s4 = inlined_call_operand.hbm [shape: f32[256,512], index: 4, kind: input, shape index: {}]   ;;  %s8491_s5 = inlined_call_operand.vmem [shape: f32[1,512], index: 5, kind: input, shape index: {}]   ;;  %s8492_s6 = inlined_call_operand.hbm [shape: f32[8,8,128], index: 6, kind: output, shape index: {}]  }
   0x1   :  { %12 = vsyncpa [#allocation7], 0 }
   0x2   :  { %13 = vsyncpa [#allocation10], 0 }
   0x3   :  { %14 = vsyncpa [#allocation5], 0  ;;  %s5173_s21 = smov [#allocation6]  }
   0x4   :  { %s32_s22 = sshll.u32 %s5173_s21, 4  ;;  %s33_s22 = int_to_ptr.vmem [resolvable:$true] %s32_s22 }
   0x5   :  { %s5073_s23 = scalar_lea.vmem %s33_s22, 8192  ;;  %p5078_p1 = scmp.lt.s32.totalorder %s33_s22, %s33_s22 }
   0x6   :  { %p5074_p0 = scmp.ne.s32.totalorder %s33_s22, %s5073_s23  ;;  %p5079_p2 = scmp.lt.s32.totalorder %s5073_s23, %s5073_s23 }
   0x8   :  { %p5080_p3 = por %p5079_p2, %p5078_p1 }
   0xa   :  { %p5081_p4 = pnand %p5080_p3, %p5074_p0 }
   0xc   :  { %5084 = shalt.err (!%p5081_p4)
}
   0xd   :  { %s5174_s24 = smov 512   ;;  %s5175_s25 = smov 32  }
   0xe   :  { %38 = dma.hbm_to_vmem [thread:$0]  %s8487_s1, 8192, %s33_s22, [#allocation7], %s5174_s24, %s5174_s24, %s5175_s25  }
   0xf   :  { %s5176_s28 = smov [#allocation3]  }
  0x10   :  { %s20_s29 = sshll.u32 %s5176_s28, 4  ;;  %s21_s29 = int_to_ptr.vmem [resolvable:$true] %s20_s29 }
  0x11   :  { %s5093_s30 = scalar_lea.vmem %s21_s29, 1024  ;;  %p5098_p6 = scmp.lt.s32.totalorder %s21_s29, %s21_s29 }
  0x12   :  { %p5094_p5 = scmp.ne.s32.totalorder %s21_s29, %s5093_s30  ;;  %p5099_p7 = scmp.lt.s32.totalorder %s5093_s30, %s5093_s30 }
  0x14   :  { %p5100_p8 = por %p5099_p7, %p5098_p6 }
  0x16   :  { %p5101_p9 = pnand %p5100_p8, %p5094_p5 }
  0x18   :  { %5104 = shalt.err (!%p5101_p9)
}
  0x19   :  { %s5177_s7 = smov 128   ;;  %s5178_s8 = smov 8  }
  0x1a   :  { %26 = dma.hbm_to_vmem [thread:$0]  %s8486_s0, 1024, %s21_s29, [#allocation4], %s5177_s7, %s5177_s7, %s5178_s8  }
  0x1b   :  { %s5179_s1 = smov [#allocation8]   ;;  %s5180_s12 = smov [#allocation9]  }
  0x1c   :  { %s44_s11 = sshll.u32 %s5179_s1, 4  ;;  %s58_s13 = sshll.u32 %s5180_s12, 4  ;;  %s45_s11 = int_to_ptr.vmem [resolvable:$true] %s44_s11  ;;  %s59_s13 = int_to_ptr.vmem [resolvable:$true] %s58_s13 }
  0x1d   :  { %s5113_s14 = scalar_lea.vmem %s45_s11, 8192  ;;  %p5118_p11 = scmp.lt.s32.totalorder %s45_s11, %s45_s11 }
  0x1e   :  { %p5114_p10 = scmp.ne.s32.totalorder %s45_s11, %s5113_s14  ;;  %p5119_p12 = scmp.lt.s32.totalorder %s5113_s14, %s5113_s14 }
  0x20   :  { %p5120_p13 = por %p5119_p12, %p5118_p11 }
  0x22   :  { %p5121_p0 = pnand %p5120_p13, %p5114_p10 }
  0x24   :  { %5124 = shalt.err (!%p5121_p0)
}
  0x25   :  { %50 = dma.hbm_to_vmem [thread:$0]  %s8488_s2, 8192, %s45_s11, [#allocation7], %s5174_s24, %s5174_s24, %s5175_s25  }
  0x26   :  { %s5133_s0 = scalar_lea.vmem %s59_s13, 16384  ;;  %p5138_p2 = scmp.lt.s32.totalorder %s59_s13, %s59_s13 }
  0x27   :  { %p5134_p1 = scmp.ne.s32.totalorder %s59_s13, %s5133_s0  ;;  %p5139_p3 = scmp.lt.s32.totalorder %s5133_s0, %s5133_s0 }
  0x29   :  { %p5140_p4 = por %p5139_p3, %p5138_p2 }
  0x2b   :  { %p5141_p5 = pnand %p5140_p4, %p5134_p1 }
  0x2d   :  { %5144 = shalt.err (!%p5141_p5)
}
  0x2e   :  { %64 = dma.hbm_to_vmem [thread:$0]  %s8490_s4, 16384, %s59_s13, [#allocation10], %s5174_s24, %s5174_s24, %s5175_s25  }
  0x2f   :  { %5165 = dma.done.wait [#allocation4], 1024  }
  0x30   :  { %5166 = vsyncadd [#allocation4], 4294966272 }
  0x31   :  { %5167 = dma.done.wait [#allocation7], 16384  }
  0x32   :  { %5168 = vsyncadd [#allocation7], 4294950912 }
  0x33   :  { %5169 = dma.done.wait [#allocation10], 16384  }
  0x34   :  { %5170 = vsyncadd [#allocation10], 4294950912  ;;  %v8493_v0 = vmov 0.0   ;;  %v148_v1 = vld [vmem:[#allocation6 + $0x1e8] sm:$0xff]  ;;  %v150_v2 = vld [vmem:[#allocation6 + $0x1f8] sm:$0xff] }
  0x35   :  { %237 = vmatprep.mubr.f32.mxu0 %v8493_v0  ;;  %350 = vmatprep.mubr.f32.mxu1 %v8493_v0  ;;  %v147_v3 = vld [vmem:[#allocation6 + $0x1e0] sm:$0xff]  ;;  %v149_v4 = vld [vmem:[#allocation6 + $0x1f0] sm:$0xff]  ;;  %v144_v5 = vld [vmem:[#allocation6 + $0x1c8] sm:$0xff] }
  0x36   :  { %173 = vmatprep.subr.mxu0 %v148_v1  ;;  %286 = vmatprep.subr.mxu1 %v150_v2  ;;  %v146_v6 = vld [vmem:[#allocation6 + $0x1d8] sm:$0xff]  ;;  %v143_v7 = vld [vmem:[#allocation6 + $0x1c0] sm:$0xff]  ;;  %v145_v8 = vld [vmem:[#allocation6 + $0x1d0] sm:$0xff] }
  0x37   :  { %174 = vmatpush1.msra.mxu0 %v147_v3  ;;  %287 = vmatpush1.msra.mxu1 %v149_v4  ;;  %v140_v9 = vld [vmem:[#allocation6 + $0x1a8] sm:$0xff]  ;;  %v142_v10 = vld [vmem:[#allocation6 + $0x1b8] sm:$0xff]  ;;  %v139_v11 = vld [vmem:[#allocation6 + $0x1a0] sm:$0xff] }
  0x38   :  { %175 = vmatprep.subr.mxu0 %v144_v5  ;;  %288 = vmatprep.subr.mxu1 %v146_v6  ;;  %v141_v12 = vld [vmem:[#allocation6 + $0x1b0] sm:$0xff]  ;;  %v136_v13 = vld [vmem:[#allocation6 + $0x188] sm:$0xff]  ;;  %v138_v14 = vld [vmem:[#allocation6 + $0x198] sm:$0xff] }
  0x39   :  { %176 = vmatpush1.msra.mxu0 %v143_v7  ;;  %289 = vmatpush1.msra.mxu1 %v145_v8  ;;  %v135_v15 = vld [vmem:[#allocation6 + $0x180] sm:$0xff]  ;;  %v137_v16 = vld [vmem:[#allocation6 + $0x190] sm:$0xff]  ;;  %v132_v17 = vld [vmem:[#allocation6 + $0x168] sm:$0xff] }
  0x3a   :  { %177 = vmatprep.subr.mxu0 %v140_v9  ;;  %290 = vmatprep.subr.mxu1 %v142_v10  ;;  %v134_v18 = vld [vmem:[#allocation6 + $0x178] sm:$0xff]  ;;  %v131_v19 = vld [vmem:[#allocation6 + $0x160] sm:$0xff]  ;;  %v133_v20 = vld [vmem:[#allocation6 + $0x170] sm:$0xff] }
  0x3b   :  { %178 = vmatpush1.msra.mxu0 %v139_v11  ;;  %291 = vmatpush1.msra.mxu1 %v141_v12  ;;  %v128_v21 = vld [vmem:[#allocation6 + $0x148] sm:$0xff]  ;;  %v130_v22 = vld [vmem:[#allocation6 + $0x158] sm:$0xff]  ;;  %v127_v23 = vld [vmem:[#allocation6 + $0x140] sm:$0xff] }
  0x3c   :  { %179 = vmatprep.subr.mxu0 %v136_v13  ;;  %292 = vmatprep.subr.mxu1 %v138_v14  ;;  %v129_v24 = vld [vmem:[#allocation6 + $0x150] sm:$0xff]  ;;  %v124_v25 = vld [vmem:[#allocation6 + $0x128] sm:$0xff]  ;;  %v126_v26 = vld [vmem:[#allocation6 + $0x138] sm:$0xff] }
  0x3d   :  { %180 = vmatpush1.msra.mxu0 %v135_v15  ;;  %293 = vmatpush1.msra.mxu1 %v137_v16  ;;  %v123_v27 = vld [vmem:[#allocation6 + $0x120] sm:$0xff]  ;;  %v125_v28 = vld [vmem:[#allocation6 + $0x130] sm:$0xff]  ;;  %v120_v29 = vld [vmem:[#allocation6 + $0x108] sm:$0xff] }
  0x3e   :  { %181 = vmatprep.subr.mxu0 %v132_v17  ;;  %294 = vmatprep.subr.mxu1 %v134_v18  ;;  %v122_v30 = vld [vmem:[#allocation6 + $0x118] sm:$0xff]  ;;  %v119_v31 = vld [vmem:[#allocation6 + $0x100] sm:$0xff]  ;;  %v121_v32 = vld [vmem:[#allocation6 + $0x110] sm:$0xff] }
  0x3f   :  { %182 = vmatpush1.msra.mxu0 %v131_v19  ;;  %295 = vmatpush1.msra.mxu1 %v133_v20  ;;  %v116_v33 = vld [vmem:[#allocation6 + $0xe8] sm:$0xff]  ;;  %v118_v34 = vld [vmem:[#allocation6 + $0xf8] sm:$0xff]  ;;  %v115_v35 = vld [vmem:[#allocation6 + $0xe0] sm:$0xff] }
  0x40   :  { %183 = vmatprep.subr.mxu0 %v128_v21  ;;  %296 = vmatprep.subr.mxu1 %v130_v22  ;;  %v117_v36 = vld [vmem:[#allocation6 + $0xf0] sm:$0xff]  ;;  %v112_v37 = vld [vmem:[#allocation6 + $0xc8] sm:$0xff]  ;;  %v114_v38 = vld [vmem:[#allocation6 + $0xd8] sm:$0xff] }
  0x41   :  { %184 = vmatpush1.msra.mxu0 %v127_v23  ;;  %297 = vmatpush1.msra.mxu1 %v129_v24  ;;  %v111_v39 = vld [vmem:[#allocation6 + $0xc0] sm:$0xff]  ;;  %v113_v40 = vld [vmem:[#allocation6 + $0xd0] sm:$0xff]  ;;  %v108_v41 = vld [vmem:[#allocation6 + $0xa8] sm:$0xff] }
  0x42   :  { %185 = vmatprep.subr.mxu0 %v124_v25  ;;  %298 = vmatprep.subr.mxu1 %v126_v26  ;;  %v110_v42 = vld [vmem:[#allocation6 + $0xb8] sm:$0xff]  ;;  %v107_v43 = vld [vmem:[#allocation6 + $0xa0] sm:$0xff]  ;;  %v109_v44 = vld [vmem:[#allocation6 + $0xb0] sm:$0xff] }
  0x43   :  { %186 = vmatpush1.msra.mxu0 %v123_v27  ;;  %299 = vmatpush1.msra.mxu1 %v125_v28  ;;  %v104_v45 = vld [vmem:[#allocation6 + $0x88] sm:$0xff]  ;;  %v106_v46 = vld [vmem:[#allocation6 + $0x98] sm:$0xff]  ;;  %v103_v47 = vld [vmem:[#allocation6 + $0x80] sm:$0xff] }
  0x44   :  { %187 = vmatprep.subr.mxu0 %v120_v29  ;;  %300 = vmatprep.subr.mxu1 %v122_v30  ;;  %v105_v48 = vld [vmem:[#allocation6 + $0x90] sm:$0xff]  ;;  %v100_v49 = vld [vmem:[#allocation6 + $0x68] sm:$0xff]  ;;  %v102_v50 = vld [vmem:[#allocation6 + $0x78] sm:$0xff] }
  0x45   :  { %188 = vmatpush1.msra.mxu0 %v119_v31  ;;  %301 = vmatpush1.msra.mxu1 %v121_v32  ;;  %v99_v51 = vld [vmem:[#allocation6 + $0x60] sm:$0xff]  ;;  %v101_v52 = vld [vmem:[#allocation6 + $0x70] sm:$0xff]  ;;  %v96_v53 = vld [vmem:[#allocation6 + $0x48] sm:$0xff] }
  0x46   :  { %189 = vmatprep.subr.mxu0 %v116_v33  ;;  %302 = vmatprep.subr.mxu1 %v118_v34  ;;  %v98_v54 = vld [vmem:[#allocation6 + $0x58] sm:$0xff]  ;;  %v95_v55 = vld [vmem:[#allocation6 + $0x40] sm:$0xff]  ;;  %v97_v56 = vld [vmem:[#allocation6 + $0x50] sm:$0xff] }
  0x47   :  { %190 = vmatpush1.msra.mxu0 %v115_v35  ;;  %303 = vmatpush1.msra.mxu1 %v117_v36  ;;  %v92_v57 = vld [vmem:[#allocation6 + $0x28] sm:$0xff]  ;;  %v94_v58 = vld [vmem:[#allocation6 + $0x38] sm:$0xff]  ;;  %v91_v59 = vld [vmem:[#allocation6 + $0x20] sm:$0xff] }
  0x48   :  { %191 = vmatprep.subr.mxu0 %v112_v37  ;;  %304 = vmatprep.subr.mxu1 %v114_v38  ;;  %v93_v60 = vld [vmem:[#allocation6 + $0x30] sm:$0xff]  ;;  %v88_v61 = vld [vmem:[#allocation6 + $0x8] sm:$0xff]  ;;  %v90_v62 = vld [vmem:[#allocation6 + $0x18] sm:$0xff] }
  0x49   :  { %192 = vmatpush1.msra.mxu0 %v111_v39  ;;  %305 = vmatpush1.msra.mxu1 %v113_v40  ;;  %v87_v63 = vld [vmem:[#allocation6] sm:$0xff]  ;;  %v89_v1 = vld [vmem:[#allocation6 + $0x10] sm:$0xff]  ;;  %v518_v3 = vld [vmem:[#allocation8 + $0x1e8] sm:$0xff] }
  0x4a   :  { %193 = vmatprep.subr.mxu0 %v108_v41  ;;  %306 = vmatprep.subr.mxu1 %v110_v42  ;;  %v79_v2 = vld [vmem:[#allocation3] sm:$0xff]  ;;  %v520_v4 = vld [vmem:[#allocation8 + $0x1f8] sm:$0xff]  ;;  %v519_v6 = vld [vmem:[#allocation8 + $0x1f0] sm:$0xff] }
  0x4b   :  { %194 = vmatpush1.msra.mxu0 %v107_v43  ;;  %307 = vmatpush1.msra.mxu1 %v109_v44  ;;  %v517_v5 = vld [vmem:[#allocation8 + $0x1e0] sm:$0xff]  ;;  %v514_v7 = vld [vmem:[#allocation8 + $0x1c8] sm:$0xff]  ;;  %v516_v8 = vld [vmem:[#allocation8 + $0x1d8] sm:$0xff] }
  0x4c   :  { %195 = vmatprep.subr.mxu0 %v104_v45  ;;  %308 = vmatprep.subr.mxu1 %v106_v46  ;;  %v513_v9 = vld [vmem:[#allocation8 + $0x1c0] sm:$0xff]  ;;  %v515_v10 = vld [vmem:[#allocation8 + $0x1d0] sm:$0xff]  ;;  %v80_v11 = vld [vmem:[#allocation3 + $0x8] sm:$0xff] }
  0x4d   :  { %196 = vmatpush1.msra.mxu0 %v103_v47  ;;  %309 = vmatpush1.msra.mxu1 %v105_v48  ;;  %v510_v12 = vld [vmem:[#allocation8 + $0x1a8] sm:$0xff]  ;;  %v512_v13 = vld [vmem:[#allocation8 + $0x1b8] sm:$0xff]  ;;  %v509_v14 = vld [vmem:[#allocation8 + $0x1a0] sm:$0xff] }
  0x4e   :  { %197 = vmatprep.subr.mxu0 %v100_v49  ;;  %310 = vmatprep.subr.mxu1 %v102_v50  ;;  %v511_v15 = vld [vmem:[#allocation8 + $0x1b0] sm:$0xff]  ;;  %v506_v16 = vld [vmem:[#allocation8 + $0x188] sm:$0xff]  ;;  %v508_v17 = vld [vmem:[#allocation8 + $0x198] sm:$0xff] }
  0x4f   :  { %198 = vmatpush1.msra.mxu0 %v99_v51  ;;  %311 = vmatpush1.msra.mxu1 %v101_v52  ;;  %v505_v18 = vld [vmem:[#allocation8 + $0x180] sm:$0xff]  ;;  %v507_v19 = vld [vmem:[#allocation8 + $0x190] sm:$0xff]  ;;  %v502_v21 = vld [vmem:[#allocation8 + $0x168] sm:$0xff] }
  0x50   :  { %199 = vmatprep.subr.mxu0 %v96_v53  ;;  %312 = vmatprep.subr.mxu1 %v98_v54  ;;  %v81_v20 = vld [vmem:[#allocation3 + $0x10] sm:$0xff]  ;;  %v504_v22 = vld [vmem:[#allocation8 + $0x178] sm:$0xff]  ;;  %v501_v23 = vld [vmem:[#allocation8 + $0x160] sm:$0xff] }
  0x51   :  { %200 = vmatpush1.msra.mxu0 %v95_v55  ;;  %313 = vmatpush1.msra.mxu1 %v97_v56  ;;  %v503_v24 = vld [vmem:[#allocation8 + $0x170] sm:$0xff]  ;;  %v498_v25 = vld [vmem:[#allocation8 + $0x148] sm:$0xff]  ;;  %v500_v26 = vld [vmem:[#allocation8 + $0x158] sm:$0xff] }
  0x52   :  { %201 = vmatprep.subr.mxu0 %v92_v57  ;;  %314 = vmatprep.subr.mxu1 %v94_v58  ;;  %v497_v27 = vld [vmem:[#allocation8 + $0x140] sm:$0xff]  ;;  %v499_v28 = vld [vmem:[#allocation8 + $0x150] sm:$0xff]  ;;  %v82_v29 = vld [vmem:[#allocation3 + $0x18] sm:$0xff] }
  0x53   :  { %202 = vmatpush1.msra.mxu0 %v91_v59  ;;  %315 = vmatpush1.msra.mxu1 %v93_v60  ;;  %v494_v30 = vld [vmem:[#allocation8 + $0x128] sm:$0xff]  ;;  %v496_v31 = vld [vmem:[#allocation8 + $0x138] sm:$0xff]  ;;  %v493_v32 = vld [vmem:[#allocation8 + $0x120] sm:$0xff] }
  0x54   :  { %203 = vmatprep.subr.mxu0 %v88_v61  ;;  %316 = vmatprep.subr.mxu1 %v90_v62  ;;  %v495_v33 = vld [vmem:[#allocation8 + $0x130] sm:$0xff]  ;;  %v490_v34 = vld [vmem:[#allocation8 + $0x108] sm:$0xff]  ;;  %v492_v35 = vld [vmem:[#allocation8 + $0x118] sm:$0xff] }
  0x55   :  { %204 = vmatpush1.msra.mxu0 %v87_v63  ;;  %317 = vmatpush1.msra.mxu1 %v89_v1  ;;  %v489_v36 = vld [vmem:[#allocation8 + $0x100] sm:$0xff]  ;;  %v491_v37 = vld [vmem:[#allocation8 + $0x110] sm:$0xff]  ;;  %v486_v39 = vld [vmem:[#allocation8 + $0xe8] sm:$0xff] }
  0x56   :  { %238 = vmatmul.mubr.f32.vlgmr.msra.gmra.mxu0 %v79_v2  ;;  %351 = vmatmul.mubr.f32.vlgmr.msra.gmra.mxu1 %v79_v2  ;;  %v83_v38 = vld [vmem:[#allocation3 + $0x20] sm:$0xff]  ;;  %v488_v40 = vld [vmem:[#allocation8 + $0xf8] sm:$0xff]  ;;  %v487_v42 = vld [vmem:[#allocation8 + $0xf0] sm:$0xff] }
  0x57   :  { %521 = vmatprep.subr.mxu0 %v518_v3  ;;  %592 = vmatprep.subr.mxu1 %v520_v4  ;;  %v485_v41 = vld [vmem:[#allocation8 + $0xe0] sm:$0xff]  ;;  %v482_v43 = vld [vmem:[#allocation8 + $0xc8] sm:$0xff]  ;;  %v484_v44 = vld [vmem:[#allocation8 + $0xd8] sm:$0xff] }
  0x58   :  { %522 = vmatpush1.msra.mxu0 %v517_v5  ;;  %593 = vmatpush1.msra.mxu1 %v519_v6  ;;  %v5252_v45 = vld [vmem:[#allocation8 + $0xc0] sm:$0xff]  ;;  %v5254_v46 = vld [vmem:[#allocation8 + $0xd0] sm:$0xff]  ;;  %v84_v47 = vld [vmem:[#allocation3 + $0x28] sm:$0xff] }
  0x59   :  { %523 = vmatprep.subr.mxu0 %v514_v7  ;;  %594 = vmatprep.subr.mxu1 %v516_v8  ;;  %v5258_v48 = vld [vmem:[#allocation8 + $0xa8] sm:$0xff]  ;;  %v5260_v49 = vld [vmem:[#allocation8 + $0xb8] sm:$0xff]  ;;  %v5264_v50 = vld [vmem:[#allocation8 + $0xa0] sm:$0xff] }
  0x5a   :  { %243 = vmatprep.mubr.f32.mxu0 %v8493_v0  ;;  %356 = vmatprep.mubr.f32.mxu1 %v8493_v0  ;;  %v5266_v51 = vld [vmem:[#allocation8 + $0xb0] sm:$0xff]  ;;  %v5268_v52 = vld [vmem:[#allocation8 + $0x88] sm:$0xff]  ;;  %v5270_v53 = vld [vmem:[#allocation8 + $0x98] sm:$0xff] }
  0x5b   :  { %524 = vmatpush1.msra.mxu0 %v513_v9  ;;  %595 = vmatpush1.msra.mxu1 %v515_v10  ;;  %v5276_v54 = vld [vmem:[#allocation8 + $0x80] sm:$0xff]  ;;  %v5278_v55 = vld [vmem:[#allocation8 + $0x90] sm:$0xff]  ;;  %v5284_v57 = vld [vmem:[#allocation8 + $0x68] sm:$0xff] }
  0x5c   :  { %244 = vmatmul.mubr.f32.gmra.mxu0 %v80_v11  ;;  %357 = vmatmul.mubr.f32.gmra.mxu1 %v80_v11  ;;  %v85_v56 = vld [vmem:[#allocation3 + $0x30] sm:$0xff]  ;;  %v5286_v58 = vld [vmem:[#allocation8 + $0x78] sm:$0xff]  ;;  %v5290_v59 = vld [vmem:[#allocation8 + $0x60] sm:$0xff] }
  0x5d   :  { %525 = vmatprep.subr.mxu0 %v510_v12  ;;  %596 = vmatprep.subr.mxu1 %v512_v13  ;;  %v5292_v60 = vld [vmem:[#allocation8 + $0x70] sm:$0xff]  ;;  %v5294_v61 = vld [vmem:[#allocation8 + $0x48] sm:$0xff]  ;;  %v5296_v62 = vld [vmem:[#allocation8 + $0x58] sm:$0xff] }
  0x5e   :  { %526 = vmatpush1.msra.mxu0 %v509_v14  ;;  %597 = vmatpush1.msra.mxu1 %v511_v15  ;;  %v5302_v63 = vld [vmem:[#allocation8 + $0x40] sm:$0xff]  ;;  %v5304_v1 = vld [vmem:[#allocation8 + $0x50] sm:$0xff]  ;;  %v86_v2 = vld [vmem:[#allocation3 + $0x38] sm:$0xff] }
  0x5f   :  { %527 = vmatprep.subr.mxu0 %v506_v16  ;;  %598 = vmatprep.subr.mxu1 %v508_v17  ;;  %v5310_v3 = vld [vmem:[#allocation8 + $0x28] sm:$0xff]  ;;  %v5312_v4 = vld [vmem:[#allocation8 + $0x38] sm:$0xff]  ;;  %v5316_v5 = vld [vmem:[#allocation8 + $0x20] sm:$0xff] }
  0x60   :  { %249 = vmatprep.mubr.f32.mxu0 %v8493_v0  ;;  %362 = vmatprep.mubr.f32.mxu1 %v8493_v0  ;;  %v5318_v6 = vld [vmem:[#allocation8 + $0x30] sm:$0xff]  ;;  %v5320_v7 = vld [vmem:[#allocation8 + $0x8] sm:$0xff]  ;;  %v5322_v8 = vld [vmem:[#allocation8 + $0x18] sm:$0xff] }
  0x61   :  { %528 = vmatpush1.msra.mxu0 %v505_v18  ;;  %599 = vmatpush1.msra.mxu1 %v507_v19  ;;  %v5326_v9 = vld [vmem:[#allocation8] sm:$0xff]  ;;  %v5330_v10 = vld [vmem:[#allocation8 + $0x10] sm:$0xff]  ;;  %v5342_v11 = vld [vmem:[#allocation9 + $0x1e8] sm:$0xff] }
  0x62   :  { %250 = vmatmul.mubr.f32.gmra.mxu0 %v81_v20  ;;  %363 = vmatmul.mubr.f32.gmra.mxu1 %v81_v20  ;;  %v5344_v12 = vld [vmem:[#allocation9 + $0x1f8] sm:$0xff]  ;;  %v5346_v13 = vld [vmem:[#allocation9 + $0x1e0] sm:$0xff]  ;;  %v5350_v14 = vld [vmem:[#allocation9 + $0x1f0] sm:$0xff] }
  0x63   :  { %529 = vmatprep.subr.mxu0 %v502_v21  ;;  %600 = vmatprep.subr.mxu1 %v504_v22  ;;  %v5354_v15 = vld [vmem:[#allocation9 + $0x1c8] sm:$0xff]  ;;  %v5356_v16 = vld [vmem:[#allocation9 + $0x1d8] sm:$0xff]  ;;  %v5358_v17 = vld [vmem:[#allocation9 + $0x1c0] sm:$0xff] }
  0x64   :  { %530 = vmatpush1.msra.mxu0 %v501_v23  ;;  %601 = vmatpush1.msra.mxu1 %v503_v24  ;;  %v5362_v18 = vld [vmem:[#allocation9 + $0x1d0] sm:$0xff]  ;;  %v5366_v19 = vld [vmem:[#allocation9 + $0x1a8] sm:$0xff]  ;;  %v5368_v20 = vld [vmem:[#allocation9 + $0x1b8] sm:$0xff] }
  0x65   :  { %531 = vmatprep.subr.mxu0 %v498_v25  ;;  %602 = vmatprep.subr.mxu1 %v500_v26  ;;  %v5370_v21 = vld [vmem:[#allocation9 + $0x1a0] sm:$0xff]  ;;  %v5374_v22 = vld [vmem:[#allocation9 + $0x1b0] sm:$0xff]  ;;  %v5378_v23 = vld [vmem:[#allocation9 + $0x188] sm:$0xff] }
  0x66   :  { %255 = vmatprep.mubr.f32.mxu0 %v8493_v0  ;;  %368 = vmatprep.mubr.f32.mxu1 %v8493_v0  ;;  %v5380_v24 = vld [vmem:[#allocation9 + $0x198] sm:$0xff]  ;;  %v5382_v25 = vld [vmem:[#allocation9 + $0x180] sm:$0xff]  ;;  %v5386_v26 = vld [vmem:[#allocation9 + $0x190] sm:$0xff] }
  0x67   :  { %532 = vmatpush1.msra.mxu0 %v497_v27  ;;  %603 = vmatpush1.msra.mxu1 %v499_v28  ;;  %9031 = vst [vmem:[#allocation16_spill] sm:$0xff] %v5386_v26  ;;  %v5390_v27 = vld [vmem:[#allocation9 + $0x168] sm:$0xff]  ;;  %v5392_v28 = vld [vmem:[#allocation9 + $0x178] sm:$0xff] }
  0x68   :  { %256 = vmatmul.mubr.f32.gmra.mxu0 %v82_v29  ;;  %369 = vmatmul.mubr.f32.gmra.mxu1 %v82_v29  ;;  %9032 = vst [vmem:[#allocation17_spill] sm:$0xff] %v5390_v27  ;;  %9033 = vst [vmem:[#allocation18_spill] sm:$0xff] %v5392_v28  ;;  %v5396_v29 = vld [vmem:[#allocation9 + $0x160] sm:$0xff] }
  0x69   :  { %533 = vmatprep.subr.mxu0 %v494_v30  ;;  %604 = vmatprep.subr.mxu1 %v496_v31  ;;  %9034 = vst [vmem:[#allocation19_spill] sm:$0xff] %v5396_v29  ;;  %v5398_v30 = vld [vmem:[#allocation9 + $0x170] sm:$0xff]  ;;  %v5402_v31 = vld [vmem:[#allocation9 + $0x148] sm:$0xff] }
  0x6a   :  { %534 = vmatpush1.msra.mxu0 %v493_v32  ;;  %605 = vmatpush1.msra.mxu1 %v495_v33  ;;  %9035 = vst [vmem:[#allocation20_spill] sm:$0xff] %v5398_v30  ;;  %9036 = vst [vmem:[#allocation21_spill] sm:$0xff] %v5402_v31  ;;  %v5404_v32 = vld [vmem:[#allocation9 + $0x158] sm:$0xff]  ;;  %v5408_v33 = vld [vmem:[#allocation9 + $0x140] sm:$0xff] }
  0x6b   :  { %535 = vmatprep.subr.mxu0 %v490_v34  ;;  %606 = vmatprep.subr.mxu1 %v492_v35  ;;  %9037 = vst [vmem:[#allocation22_spill] sm:$0xff] %v5404_v32  ;;  %9038 = vst [vmem:[#allocation23_spill] sm:$0xff] %v5408_v33  ;;  %v5410_v34 = vld [vmem:[#allocation9 + $0x150] sm:$0xff]  ;;  %v5414_v35 = vld [vmem:[#allocation9 + $0x128] sm:$0xff] }
  0x6c   :  { %261 = vmatprep.mubr.f32.mxu0 %v8493_v0  ;;  %374 = vmatprep.mubr.f32.mxu1 %v8493_v0  ;;  %9039 = vst [vmem:[#allocation24_spill] sm:$0xff] %v5410_v34  ;;  %9040 = vst [vmem:[#allocation25_spill] sm:$0xff] %v5414_v35 }
  0x6d   :  { %536 = vmatpush1.msra.mxu0 %v489_v36  ;;  %607 = vmatpush1.msra.mxu1 %v491_v37  ;;  %v5416_v36 = vld [vmem:[#allocation9 + $0x138] sm:$0xff]  ;;  %v5420_v37 = vld [vmem:[#allocation9 + $0x120] sm:$0xff] }
  0x6e   :  { %262 = vmatmul.mubr.f32.gmra.mxu0 %v83_v38  ;;  %375 = vmatmul.mubr.f32.gmra.mxu1 %v83_v38  ;;  %9041 = vst [vmem:[#allocation26_spill] sm:$0xff] %v5416_v36  ;;  %9042 = vst [vmem:[#allocation27_spill] sm:$0xff] %v5420_v37  ;;  %v5422_v38 = vld [vmem:[#allocation9 + $0x130] sm:$0xff] }
  0x6f   :  { %537 = vmatprep.subr.mxu0 %v486_v39  ;;  %608 = vmatprep.subr.mxu1 %v488_v40  ;;  %9043 = vst [vmem:[#allocation28_spill] sm:$0xff] %v5422_v38  ;;  %v5426_v39 = vld [vmem:[#allocation9 + $0x108] sm:$0xff]  ;;  %v5428_v40 = vld [vmem:[#allocation9 + $0x118] sm:$0xff] }
  0x70   :  { %538 = vmatpush1.msra.mxu0 %v485_v41  ;;  %609 = vmatpush1.msra.mxu1 %v487_v42  ;;  %9044 = vst [vmem:[#allocation29_spill] sm:$0xff] %v5426_v39  ;;  %9045 = vst [vmem:[#allocation30_spill] sm:$0xff] %v5428_v40  ;;  %v5432_v41 = vld [vmem:[#allocation9 + $0x100] sm:$0xff]  ;;  %v5434_v42 = vld [vmem:[#allocation9 + $0x110] sm:$0xff] }
  0x71   :  { %539 = vmatprep.subr.mxu0 %v482_v43  ;;  %610 = vmatprep.subr.mxu1 %v484_v44  ;;  %9046 = vst [vmem:[#allocation31_spill] sm:$0xff] %v5432_v41  ;;  %9047 = vst [vmem:[#allocation32_spill] sm:$0xff] %v5434_v42  ;;  %v5438_v43 = vld [vmem:[#allocation9 + $0xe8] sm:$0xff]  ;;  %v5440_v44 = vld [vmem:[#allocation9 + $0xf8] sm:$0xff] }
  0x72   :  { %267 = vmatprep.mubr.f32.mxu0 %v8493_v0  ;;  %380 = vmatprep.mubr.f32.mxu1 %v8493_v0  ;;  %9048 = vst [vmem:[#allocation33_spill] sm:$0xff] %v5438_v43  ;;  %9049 = vst [vmem:[#allocation34_spill] sm:$0xff] %v5440_v44 }
  0x73   :  { %540 = vmatpush1.msra.mxu0 %v5252_v45  ;;  %611 = vmatpush1.msra.mxu1 %v5254_v46 }
  0x74   :  { %268 = vmatmul.mubr.f32.gmra.mxu0 %v84_v47  ;;  %381 = vmatmul.mubr.f32.gmra.mxu1 %v84_v47  ;;  %v5444_v47 = vld [vmem:[#allocation9 + $0xe0] sm:$0xff] }
  0x75   :  { %541 = vmatprep.subr.mxu0 %v5258_v48  ;;  %612 = vmatprep.subr.mxu1 %v5260_v49  ;;  %9050 = vst [vmem:[#allocation35_spill] sm:$0xff] %v5444_v47 }
  0x76   :  { %542 = vmatpush1.msra.mxu0 %v5264_v50  ;;  %613 = vmatpush1.msra.mxu1 %v5266_v51 }
  0x77   :  { %543 = vmatprep.subr.mxu0 %v5268_v52  ;;  %614 = vmatprep.subr.mxu1 %v5270_v53 }
  0x78   :  { %273 = vmatprep.mubr.f32.mxu0 %v8493_v0  ;;  %386 = vmatprep.mubr.f32.mxu1 %v8493_v0 }
  0x79   :  { %544 = vmatpush1.msra.mxu0 %v5276_v54  ;;  %615 = vmatpush1.msra.mxu1 %v5278_v55 }
  0x7a   :  { %274 = vmatmul.mubr.f32.gmra.mxu0 %v85_v56  ;;  %387 = vmatmul.mubr.f32.gmra.mxu1 %v85_v56  ;;  %v5446_v56 = vld [vmem:[#allocation9 + $0xf0] sm:$0xff] }
  0x7b   :  { %545 = vmatprep.subr.mxu0 %v5284_v57  ;;  %616 = vmatprep.subr.mxu1 %v5286_v58  ;;  %9051 = vst [vmem:[#allocation36_spill] sm:$0xff] %v5446_v56 }
  0x7c   :  { %546 = vmatpush1.msra.mxu0 %v5290_v59  ;;  %617 = vmatpush1.msra.mxu1 %v5292_v60 }
  0x7d   :  { %547 = vmatprep.subr.mxu0 %v5294_v61  ;;  %618 = vmatprep.subr.mxu1 %v5296_v62 }
  0x7e   :  { %279 = vmatprep.mubr.f32.mxu0 %v8493_v0  ;;  %392 = vmatprep.mubr.f32.mxu1 %v8493_v0 }
  0x7f   :  { %548 = vmatpush1.msra.mxu0 %v5302_v63  ;;  %619 = vmatpush1.msra.mxu1 %v5304_v1 }
  0x80   :  { %280 = vmatmul.mubr.f32.gmra.mxu0 %v86_v2  ;;  %393 = vmatmul.mubr.f32.gmra.mxu1 %v86_v2  ;;  %v5450_v2 = vld [vmem:[#allocation9 + $0xc8] sm:$0xff] }
  0x81   :  { %549 = vmatprep.subr.mxu0 %v5310_v3  ;;  %620 = vmatprep.subr.mxu1 %v5312_v4  ;;  %9052 = vst [vmem:[#allocation37_spill] sm:$0xff] %v5450_v2 }
  0x82   :  { %550 = vmatpush1.msra.mxu0 %v5316_v5  ;;  %621 = vmatpush1.msra.mxu1 %v5318_v6 }
  0x83   :  { %551 = vmatprep.subr.mxu0 %v5320_v7  ;;  %622 = vmatprep.subr.mxu1 %v5322_v8 }
  0x84   :  { %552 = vmatpush1.msra.mxu0 %v5326_v9  ;;  %585 = vmatprep.mubr.f32.mxu0 %v8493_v0 }
  0x85   :  { %623 = vmatpush1.msra.mxu1 %v5330_v10  ;;  %656 = vmatprep.mubr.f32.mxu1 %v8493_v0 }
  0x86   :  { %586 = vmatmul.mubr.f32.vlgmr.msra.gmra.mxu0 %v8493_v0  ;;  %657 = vmatmul.mubr.f32.vlgmr.msra.gmra.mxu1 %v8493_v0 }
  0x87   :  { %883 = vmatprep.mubr.f32.mxu0 %v8493_v0  ;;  %954 = vmatprep.mubr.f32.mxu1 %v8493_v0  ;;  %v5452_v0 = vld [vmem:[#allocation9 + $0xd8] sm:$0xff] }
  0x88   :  { %819 = vmatprep.subr.mxu0 %v5342_v11  ;;  %890 = vmatprep.subr.mxu1 %v5344_v12  ;;  %9053 = vst [vmem:[#allocation38_spill] sm:$0xff] %v5452_v0 }
  0x89   :  { %820 = vmatpush1.msra.mxu0 %v5346_v13  ;;  %891 = vmatpush1.msra.mxu1 %v5350_v14 }
  0x8a   :  { %821 = vmatprep.subr.mxu0 %v5354_v15  ;;  %892 = vmatprep.subr.mxu1 %v5356_v16 }
  0x8b   :  { %822 = vmatpush1.msra.mxu0 %v5358_v17  ;;  %893 = vmatpush1.msra.mxu1 %v5362_v18 }
  0x8c   :  { %823 = vmatprep.subr.mxu0 %v5366_v19  ;;  %894 = vmatprep.subr.mxu1 %v5368_v20 }
  0x8d   :  { %824 = vmatpush1.msra.mxu0 %v5370_v21  ;;  %895 = vmatpush1.msra.mxu1 %v5374_v22 }
  0x8e   :  { %825 = vmatprep.subr.mxu0 %v5378_v23  ;;  %896 = vmatprep.subr.mxu1 %v5380_v24 }
  0x8f   :  { %826 = vmatpush1.msra.mxu0 %v5382_v25  ;;  %897 = vmatpush1.msra.mxu1 %v5386_v26 }
  0x90   :  { %827 = vmatprep.subr.mxu0 %v5390_v27  ;;  %898 = vmatprep.subr.mxu1 %v5392_v28 }
  0x91   :  { %828 = vmatpush1.msra.mxu0 %v5396_v29  ;;  %899 = vmatpush1.msra.mxu1 %v5398_v30 }
  0x92   :  { %829 = vmatprep.subr.mxu0 %v5402_v31  ;;  %900 = vmatprep.subr.mxu1 %v5404_v32 }
  0x93   :  { %830 = vmatpush1.msra.mxu0 %v5408_v33  ;;  %901 = vmatpush1.msra.mxu1 %v5410_v34 }
  0x94   :  { %831 = vmatprep.subr.mxu0 %v5414_v35  ;;  %902 = vmatprep.subr.mxu1 %v5416_v36 }
  0x95   :  { %832 = vmatpush1.msra.mxu0 %v5420_v37  ;;  %903 = vmatpush1.msra.mxu1 %v5422_v38  ;;  %v5680_v38 = vld [vmem:[#allocation9 + $0x260] sm:$0xff] }
  0x96   :  { %833 = vmatprep.subr.mxu0 %v5426_v39  ;;  %904 = vmatprep.subr.mxu1 %v5428_v40  ;;  %v5656_v40 = vld [vmem:[#allocation9 + $0x2a0] sm:$0xff]  ;;  %v5664_v39 = vld [vmem:[#allocation9 + $0x298] sm:$0xff]  ;;  %9130 = vst [vmem:[#allocation115_spill] sm:$0xff] %v5680_v38 }
  0x97   :  { %834 = vmatpush1.msra.mxu0 %v5432_v41  ;;  %905 = vmatpush1.msra.mxu1 %v5434_v42  ;;  %v5456_v42 = vld [vmem:[#allocation9 + $0xc0] sm:$0xff]  ;;  %v5648_v41 = vld [vmem:[#allocation9 + $0x2d0] sm:$0xff]  ;;  %9122 = vst [vmem:[#allocation107_spill] sm:$0xff] %v5656_v40  ;;  %9125 = vst [vmem:[#allocation110_spill] sm:$0xff] %v5664_v39 }
  0x98   :  { %835 = vmatprep.subr.mxu0 %v5438_v43  ;;  %906 = vmatprep.subr.mxu1 %v5440_v44  ;;  %9054 = vst [vmem:[#allocation39_spill] sm:$0xff] %v5456_v42  ;;  %v5458_v43 = vld [vmem:[#allocation9 + $0xd0] sm:$0xff]  ;;  %v5462_v44 = vld [vmem:[#allocation9 + $0xa8] sm:$0xff]  ;;  %9119 = vst [vmem:[#allocation104_spill] sm:$0xff] %v5648_v41 }
  0x99   :  { %836 = vmatpush1.msra.mxu0 %v5444_v47  ;;  %907 = vmatpush1.msra.mxu1 %v5446_v56  ;;  %9055 = vst [vmem:[#allocation40_spill] sm:$0xff] %v5458_v43  ;;  %9056 = vst [vmem:[#allocation41_spill] sm:$0xff] %v5462_v44  ;;  %v5464_v47 = vld [vmem:[#allocation9 + $0xb8] sm:$0xff]  ;;  %v5468_v56 = vld [vmem:[#allocation9 + $0xa0] sm:$0xff] }
  0x9a   :  { %837 = vmatprep.subr.mxu0 %v5450_v2  ;;  %908 = vmatprep.subr.mxu1 %v5452_v0  ;;  %9057 = vst [vmem:[#allocation42_spill] sm:$0xff] %v5464_v47  ;;  %9058 = vst [vmem:[#allocation43_spill] sm:$0xff] %v5468_v56  ;;  %v5470_v2 = vld [vmem:[#allocation9 + $0xb0] sm:$0xff]  ;;  %v5474_v0 = vld [vmem:[#allocation9 + $0x88] sm:$0xff] }
  0x9b   :  { %838 = vmatpush1.msra.mxu0 %v5456_v42  ;;  %909 = vmatpush1.msra.mxu1 %v5458_v43  ;;  %9059 = vst [vmem:[#allocation44_spill] sm:$0xff] %v5470_v2  ;;  %9060 = vst [vmem:[#allocation45_spill] sm:$0xff] %v5474_v0  ;;  %v5476_v42 = vld [vmem:[#allocation9 + $0x98] sm:$0xff]  ;;  %v5480_v43 = vld [vmem:[#allocation9 + $0x80] sm:$0xff] }
  0x9c   :  { %839 = vmatprep.subr.mxu0 %v5462_v44  ;;  %910 = vmatprep.subr.mxu1 %v5464_v47  ;;  %9061 = vst [vmem:[#allocation46_spill] sm:$0xff] %v5476_v42  ;;  %9062 = vst [vmem:[#allocation47_spill] sm:$0xff] %v5480_v43  ;;  %v5482_v44 = vld [vmem:[#allocation9 + $0x90] sm:$0xff]  ;;  %v5486_v47 = vld [vmem:[#allocation9 + $0x68] sm:$0xff] }
  0x9d   :  { %840 = vmatpush1.msra.mxu0 %v5468_v56  ;;  %911 = vmatpush1.msra.mxu1 %v5470_v2  ;;  %9063 = vst [vmem:[#allocation48_spill] sm:$0xff] %v5482_v44  ;;  %9064 = vst [vmem:[#allocation49_spill] sm:$0xff] %v5486_v47  ;;  %v5488_v56 = vld [vmem:[#allocation9 + $0x78] sm:$0xff]  ;;  %v5492_v2 = vld [vmem:[#allocation9 + $0x60] sm:$0xff] }
  0x9e   :  { %841 = vmatprep.subr.mxu0 %v5474_v0  ;;  %912 = vmatprep.subr.mxu1 %v5476_v42  ;;  %9065 = vst [vmem:[#allocation50_spill] sm:$0xff] %v5488_v56  ;;  %9066 = vst [vmem:[#allocation51_spill] sm:$0xff] %v5492_v2  ;;  %v5494_v0 = vld [vmem:[#allocation9 + $0x70] sm:$0xff]  ;;  %v5498_v42 = vld [vmem:[#allocation9 + $0x48] sm:$0xff] }
  0x9f   :  { %842 = vmatpush1.msra.mxu0 %v5480_v43  ;;  %913 = vmatpush1.msra.mxu1 %v5482_v44  ;;  %9067 = vst [vmem:[#allocation52_spill] sm:$0xff] %v5494_v0  ;;  %9068 = vst [vmem:[#allocation53_spill] sm:$0xff] %v5498_v42  ;;  %v5500_v43 = vld [vmem:[#allocation9 + $0x58] sm:$0xff]  ;;  %v5504_v44 = vld [vmem:[#allocation9 + $0x40] sm:$0xff] }
  0xa0   :  { %843 = vmatprep.subr.mxu0 %v5486_v47  ;;  %914 = vmatprep.subr.mxu1 %v5488_v56  ;;  %9069 = vst [vmem:[#allocation54_spill] sm:$0xff] %v5500_v43  ;;  %9070 = vst [vmem:[#allocation55_spill] sm:$0xff] %v5504_v44  ;;  %v5506_v47 = vld [vmem:[#allocation9 + $0x50] sm:$0xff]  ;;  %v5510_v56 = vld [vmem:[#allocation9 + $0x28] sm:$0xff] }
  0xa1   :  { %844 = vmatpush1.msra.mxu0 %v5492_v2  ;;  %915 = vmatpush1.msra.mxu1 %v5494_v0  ;;  %9071 = vst [vmem:[#allocation56_spill] sm:$0xff] %v5506_v47  ;;  %9072 = vst [vmem:[#allocation57_spill] sm:$0xff] %v5510_v56  ;;  %v5512_v2 = vld [vmem:[#allocation9 + $0x38] sm:$0xff]  ;;  %v5516_v0 = vld [vmem:[#allocation9 + $0x20] sm:$0xff] }
  0xa2   :  { %845 = vmatprep.subr.mxu0 %v5498_v42  ;;  %916 = vmatprep.subr.mxu1 %v5500_v43  ;;  %9073 = vst [vmem:[#allocation58_spill] sm:$0xff] %v5512_v2  ;;  %9074 = vst [vmem:[#allocation59_spill] sm:$0xff] %v5516_v0  ;;  %v5518_v42 = vld [vmem:[#allocation9 + $0x30] sm:$0xff]  ;;  %v5522_v43 = vld [vmem:[#allocation9 + $0x8] sm:$0xff] }
  0xa3   :  { %846 = vmatpush1.msra.mxu0 %v5504_v44  ;;  %917 = vmatpush1.msra.mxu1 %v5506_v47  ;;  %9075 = vst [vmem:[#allocation60_spill] sm:$0xff] %v5518_v42  ;;  %9076 = vst [vmem:[#allocation61_spill] sm:$0xff] %v5522_v43  ;;  %v5524_v44 = vld [vmem:[#allocation9 + $0x18] sm:$0xff]  ;;  %v5528_v47 = vld [vmem:[#allocation9] sm:$0xff] }
  0xa4   :  { %847 = vmatprep.subr.mxu0 %v5510_v56  ;;  %918 = vmatprep.subr.mxu1 %v5512_v2  ;;  %9077 = vst [vmem:[#allocation62_spill] sm:$0xff] %v5524_v44  ;;  %9078 = vst [vmem:[#allocation63_spill] sm:$0xff] %v5528_v47  ;;  %v5530_v56 = vld [vmem:[#allocation9 + $0x10] sm:$0xff]  ;;  %v5534_v2 = vld [vmem:[#allocation9 + $0x3e8] sm:$0xff] }
  0xa5   :  { %848 = vmatpush1.msra.mxu0 %v5516_v0  ;;  %919 = vmatpush1.msra.mxu1 %v5518_v42  ;;  %9079 = vst [vmem:[#allocation64_spill] sm:$0xff] %v5530_v56  ;;  %9080 = vst [vmem:[#allocation65_spill] sm:$0xff] %v5534_v2  ;;  %v5536_v0 = vld [vmem:[#allocation9 + $0x3f8] sm:$0xff]  ;;  %v5540_v42 = vld [vmem:[#allocation9 + $0x3e0] sm:$0xff] }
  0xa6   :  { %849 = vmatprep.subr.mxu0 %v5522_v43  ;;  %920 = vmatprep.subr.mxu1 %v5524_v44  ;;  %9081 = vst [vmem:[#allocation66_spill] sm:$0xff] %v5536_v0  ;;  %9082 = vst [vmem:[#allocation67_spill] sm:$0xff] %v5540_v42  ;;  %v5542_v43 = vld [vmem:[#allocation9 + $0x3f0] sm:$0xff]  ;;  %v5546_v44 = vld [vmem:[#allocation9 + $0x3c8] sm:$0xff] }
  0xa7   :  { %850 = vmatpush1.msra.mxu0 %v5528_v47  ;;  %921 = vmatpush1.msra.mxu1 %v5530_v56  ;;  %9083 = vst [vmem:[#allocation68_spill] sm:$0xff] %v5542_v43  ;;  %9084 = vst [vmem:[#allocation69_spill] sm:$0xff] %v5546_v44  ;;  %v5548_v47 = vld [vmem:[#allocation9 + $0x3d8] sm:$0xff]  ;;  %v5552_v56 = vld [vmem:[#allocation9 + $0x3c0] sm:$0xff] }
  0xa8   :  { %851 = vmatprep.subr.mxu0 %v5534_v2  ;;  %922 = vmatprep.subr.mxu1 %v5536_v0  ;;  %9085 = vst [vmem:[#allocation70_spill] sm:$0xff] %v5548_v47  ;;  %9086 = vst [vmem:[#allocation71_spill] sm:$0xff] %v5552_v56  ;;  %v5554_v2 = vld [vmem:[#allocation9 + $0x3d0] sm:$0xff]  ;;  %v5558_v0 = vld [vmem:[#allocation9 + $0x3a8] sm:$0xff] }
  0xa9   :  { %852 = vmatpush2.msra.mxu0 %v5540_v42  ;;  %923 = vmatpush2.msra.mxu1 %v5542_v43  ;;  %9087 = vst [vmem:[#allocation72_spill] sm:$0xff] %v5554_v2  ;;  %9088 = vst [vmem:[#allocation73_spill] sm:$0xff] %v5558_v0  ;;  %v5560_v42 = vld [vmem:[#allocation9 + $0x3b8] sm:$0xff]  ;;  %v5564_v43 = vld [vmem:[#allocation9 + $0x3a0] sm:$0xff] }
  0xaa   :  { %853 = vmatprep.subr.mxu0 %v5546_v44  ;;  %924 = vmatprep.subr.mxu1 %v5548_v47  ;;  %9089 = vst [vmem:[#allocation74_spill] sm:$0xff] %v5560_v42  ;;  %9090 = vst [vmem:[#allocation75_spill] sm:$0xff] %v5564_v43  ;;  %v5566_v44 = vld [vmem:[#allocation9 + $0x3b0] sm:$0xff]  ;;  %v5570_v47 = vld [vmem:[#allocation9 + $0x388] sm:$0xff] }
  0xab   :  { %854 = vmatpush2.msra.mxu0 %v5552_v56  ;;  %925 = vmatpush2.msra.mxu1 %v5554_v2  ;;  %9091 = vst [vmem:[#allocation76_spill] sm:$0xff] %v5566_v44  ;;  %9092 = vst [vmem:[#allocation77_spill] sm:$0xff] %v5570_v47  ;;  %v5572_v56 = vld [vmem:[#allocation9 + $0x398] sm:$0xff]  ;;  %v5576_v2 = vld [vmem:[#allocation9 + $0x380] sm:$0xff] }
  0xac   :  { %855 = vmatprep.subr.mxu0 %v5558_v0  ;;  %926 = vmatprep.subr.mxu1 %v5560_v42  ;;  %9093 = vst [vmem:[#allocation78_spill] sm:$0xff] %v5572_v56  ;;  %9094 = vst [vmem:[#allocation79_spill] sm:$0xff] %v5576_v2  ;;  %v5578_v0 = vld [vmem:[#allocation9 + $0x390] sm:$0xff]  ;;  %v5582_v42 = vld [vmem:[#allocation9 + $0x368] sm:$0xff] }
  0xad   :  { %856 = vmatpush2.msra.mxu0 %v5564_v43  ;;  %927 = vmatpush2.msra.mxu1 %v5566_v44  ;;  %9095 = vst [vmem:[#allocation80_spill] sm:$0xff] %v5578_v0  ;;  %9096 = vst [vmem:[#allocation81_spill] sm:$0xff] %v5582_v42  ;;  %v5584_v43 = vld [vmem:[#allocation9 + $0x378] sm:$0xff]  ;;  %v5588_v44 = vld [vmem:[#allocation9 + $0x360] sm:$0xff] }
  0xae   :  { %857 = vmatprep.subr.mxu0 %v5570_v47  ;;  %928 = vmatprep.subr.mxu1 %v5572_v56  ;;  %9097 = vst [vmem:[#allocation82_spill] sm:$0xff] %v5584_v43  ;;  %9098 = vst [vmem:[#allocation83_spill] sm:$0xff] %v5588_v44  ;;  %v5590_v47 = vld [vmem:[#allocation9 + $0x370] sm:$0xff]  ;;  %v5594_v56 = vld [vmem:[#allocation9 + $0x348] sm:$0xff] }
  0xaf   :  { %858 = vmatpush2.msra.mxu0 %v5576_v2  ;;  %929 = vmatpush2.msra.mxu1 %v5578_v0  ;;  %9099 = vst [vmem:[#allocation84_spill] sm:$0xff] %v5590_v47  ;;  %9100 = vst [vmem:[#allocation85_spill] sm:$0xff] %v5594_v56  ;;  %v5596_v2 = vld [vmem:[#allocation9 + $0x358] sm:$0xff]  ;;  %v5600_v0 = vld [vmem:[#allocation9 + $0x340] sm:$0xff] }
  0xb0   :  { %859 = vmatprep.subr.mxu0 %v5582_v42  ;;  %930 = vmatprep.subr.mxu1 %v5584_v43  ;;  %9101 = vst [vmem:[#allocation86_spill] sm:$0xff] %v5596_v2  ;;  %9102 = vst [vmem:[#allocation87_spill] sm:$0xff] %v5600_v0  ;;  %v5602_v42 = vld [vmem:[#allocation9 + $0x350] sm:$0xff]  ;;  %v5606_v43 = vld [vmem:[#allocation9 + $0x328] sm:$0xff] }
  0xb1   :  { %860 = vmatpush2.msra.mxu0 %v5588_v44  ;;  %931 = vmatpush2.msra.mxu1 %v5590_v47  ;;  %9103 = vst [vmem:[#allocation88_spill] sm:$0xff] %v5602_v42  ;;  %9104 = vst [vmem:[#allocation89_spill] sm:$0xff] %v5606_v43  ;;  %v5608_v44 = vld [vmem:[#allocation9 + $0x338] sm:$0xff]  ;;  %v5612_v47 = vld [vmem:[#allocation9 + $0x320] sm:$0xff] }
  0xb2   :  { %861 = vmatprep.subr.mxu0 %v5594_v56  ;;  %932 = vmatprep.subr.mxu1 %v5596_v2  ;;  %9105 = vst [vmem:[#allocation90_spill] sm:$0xff] %v5608_v44  ;;  %9106 = vst [vmem:[#allocation91_spill] sm:$0xff] %v5612_v47  ;;  %v5614_v56 = vld [vmem:[#allocation9 + $0x330] sm:$0xff]  ;;  %v5618_v2 = vld [vmem:[#allocation9 + $0x308] sm:$0xff] }
  0xb3   :  { %862 = vmatpush2.msra.mxu0 %v5600_v0  ;;  %933 = vmatpush2.msra.mxu1 %v5602_v42  ;;  %9107 = vst [vmem:[#allocation92_spill] sm:$0xff] %v5614_v56  ;;  %9108 = vst [vmem:[#allocation93_spill] sm:$0xff] %v5618_v2  ;;  %v5620_v0 = vld [vmem:[#allocation9 + $0x318] sm:$0xff]  ;;  %v5624_v42 = vld [vmem:[#allocation9 + $0x300] sm:$0xff] }
  0xb4   :  { %863 = vmatprep.subr.mxu0 %v5606_v43  ;;  %934 = vmatprep.subr.mxu1 %v5608_v44  ;;  %9109 = vst [vmem:[#allocation94_spill] sm:$0xff] %v5620_v0  ;;  %9110 = vst [vmem:[#allocation95_spill] sm:$0xff] %v5624_v42  ;;  %v5626_v43 = vld [vmem:[#allocation9 + $0x310] sm:$0xff]  ;;  %v5630_v44 = vld [vmem:[#allocation9 + $0x2e8] sm:$0xff] }
  0xb5   :  { %864 = vmatpush2.msra.mxu0 %v5612_v47  ;;  %935 = vmatpush2.msra.mxu1 %v5614_v56  ;;  %9111 = vst [vmem:[#allocation96_spill] sm:$0xff] %v5626_v43  ;;  %9112 = vst [vmem:[#allocation97_spill] sm:$0xff] %v5630_v44  ;;  %v5632_v47 = vld [vmem:[#allocation9 + $0x2f8] sm:$0xff]  ;;  %v5636_v56 = vld [vmem:[#allocation9 + $0x2e0] sm:$0xff] }
  0xb6   :  { %865 = vmatprep.subr.mxu0 %v5618_v2  ;;  %936 = vmatprep.subr.mxu1 %v5620_v0  ;;  %9113 = vst [vmem:[#allocation98_spill] sm:$0xff] %v5632_v47  ;;  %9114 = vst [vmem:[#allocation99_spill] sm:$0xff] %v5636_v56  ;;  %v5638_v2 = vld [vmem:[#allocation9 + $0x2f0] sm:$0xff]  ;;  %v5640_v0 = vld [vmem:[#allocation9 + $0x2c8] sm:$0xff] }
  0xb7   :  { %866 = vmatpush2.msra.mxu0 %v5624_v42  ;;  %937 = vmatpush2.msra.mxu1 %v5626_v43  ;;  %9115 = vst [vmem:[#allocation100_spill] sm:$0xff] %v5638_v2  ;;  %9116 = vst [vmem:[#allocation101_spill] sm:$0xff] %v5640_v0  ;;  %v5644_v42 = vld [vmem:[#allocation9 + $0x2d8] sm:$0xff]  ;;  %v5646_v43 = vld [vmem:[#allocation9 + $0x2c0] sm:$0xff] }
  0xb8   :  { %867 = vmatprep.subr.mxu0 %v5630_v44  ;;  %938 = vmatprep.subr.mxu1 %v5632_v47  ;;  %9117 = vst [vmem:[#allocation102_spill] sm:$0xff] %v5644_v42  ;;  %9118 = vst [vmem:[#allocation103_spill] sm:$0xff] %v5646_v43  ;;  %v5652_v47 = vld [vmem:[#allocation9 + $0x2a8] sm:$0xff]  ;;  %v5654_v44 = vld [vmem:[#allocation9 + $0x2b8] sm:$0xff] }
  0xb9   :  { %868 = vmatpush2.msra.mxu0 %v5636_v56  ;;  %939 = vmatpush2.msra.mxu1 %v5638_v2  ;;  %9120 = vst [vmem:[#allocation105_spill] sm:$0xff] %v5652_v47  ;;  %9121 = vst [vmem:[#allocation106_spill] sm:$0xff] %v5654_v44  ;;  %v5660_v2 = vld [vmem:[#allocation9 + $0x2b0] sm:$0xff]  ;;  %v5662_v56 = vld [vmem:[#allocation9 + $0x288] sm:$0xff] }
  0xba   :  { %869 = vmatprep.subr.mxu0 %v5640_v0  ;;  %940 = vmatprep.subr.mxu1 %v5644_v42  ;;  %9123 = vst [vmem:[#allocation108_spill] sm:$0xff] %v5660_v2  ;;  %9124 = vst [vmem:[#allocation109_spill] sm:$0xff] %v5662_v56  ;;  %v5668_v42 = vld [vmem:[#allocation9 + $0x280] sm:$0xff]  ;;  %v5670_v0 = vld [vmem:[#allocation9 + $0x290] sm:$0xff] }
  0xbb   :  { %870 = vmatpush2.msra.mxu0 %v5646_v43  ;;  %941 = vmatpush2.msra.mxu1 %v5648_v41  ;;  %9126 = vst [vmem:[#allocation111_spill] sm:$0xff] %v5668_v42  ;;  %9127 = vst [vmem:[#allocation112_spill] sm:$0xff] %v5670_v0  ;;  %v5674_v43 = vld [vmem:[#allocation9 + $0x268] sm:$0xff]  ;;  %v5676_v41 = vld [vmem:[#allocation9 + $0x278] sm:$0xff] }
  0xbc   :  { %871 = vmatprep.subr.mxu0 %v5652_v47  ;;  %942 = vmatprep.subr.mxu1 %v5654_v44  ;;  %9128 = vst [vmem:[#allocation113_spill] sm:$0xff] %v5674_v43  ;;  %9129 = vst [vmem:[#allocation114_spill] sm:$0xff] %v5676_v41  ;;  %v5682_v47 = vld [vmem:[#allocation9 + $0x270] sm:$0xff]  ;;  %v5686_v44 = vld [vmem:[#allocation9 + $0x248] sm:$0xff] }
  0xbd   :  { %872 = vmatpush2.msra.mxu0 %v5656_v40  ;;  %943 = vmatpush2.msra.mxu1 %v5660_v2  ;;  %9131 = vst [vmem:[#allocation116_spill] sm:$0xff] %v5682_v47  ;;  %9132 = vst [vmem:[#allocation117_spill] sm:$0xff] %v5686_v44  ;;  %v5688_v40 = vld [vmem:[#allocation9 + $0x258] sm:$0xff]  ;;  %v5692_v2 = vld [vmem:[#allocation9 + $0x240] sm:$0xff] }
  0xbe   :  { %873 = vmatprep.subr.mxu0 %v5662_v56  ;;  %944 = vmatprep.subr.mxu1 %v5664_v39  ;;  %9133 = vst [vmem:[#allocation118_spill] sm:$0xff] %v5688_v40  ;;  %9134 = vst [vmem:[#allocation119_spill] sm:$0xff] %v5692_v2  ;;  %v5694_v56 = vld [vmem:[#allocation9 + $0x250] sm:$0xff]  ;;  %v5698_v39 = vld [vmem:[#allocation9 + $0x228] sm:$0xff] }
  0xbf   :  { %874 = vmatpush2.msra.mxu0 %v5668_v42  ;;  %945 = vmatpush2.msra.mxu1 %v5670_v0  ;;  %9135 = vst [vmem:[#allocation120_spill] sm:$0xff] %v5694_v56  ;;  %9136 = vst [vmem:[#allocation121_spill] sm:$0xff] %v5698_v39  ;;  %v5700_v42 = vld [vmem:[#allocation9 + $0x238] sm:$0xff]  ;;  %v5704_v0 = vld [vmem:[#allocation9 + $0x220] sm:$0xff] }
  0xc0   :  { %875 = vmatprep.subr.mxu0 %v5674_v43  ;;  %946 = vmatprep.subr.mxu1 %v5676_v41  ;;  %9137 = vst [vmem:[#allocation122_spill] sm:$0xff] %v5700_v42  ;;  %9138 = vst [vmem:[#allocation123_spill] sm:$0xff] %v5704_v0  ;;  %v5706_v43 = vld [vmem:[#allocation9 + $0x230] sm:$0xff]  ;;  %v5710_v41 = vld [vmem:[#allocation9 + $0x208] sm:$0xff] }
  0xc1   :  { %876 = vmatpush2.msra.mxu0 %v5680_v38  ;;  %947 = vmatpush2.msra.mxu1 %v5682_v47  ;;  %9139 = vst [vmem:[#allocation124_spill] sm:$0xff] %v5706_v43  ;;  %9140 = vst [vmem:[#allocation125_spill] sm:$0xff] %v5710_v41  ;;  %v5712_v38 = vld [vmem:[#allocation9 + $0x218] sm:$0xff]  ;;  %v5716_v47 = vld [vmem:[#allocation9 + $0x200] sm:$0xff] }
  0xc2   :  { %877 = vmatprep.subr.mxu0 %v5686_v44  ;;  %948 = vmatprep.subr.mxu1 %v5688_v40  ;;  %9141 = vst [vmem:[#allocation126_spill] sm:$0xff] %v5712_v38  ;;  %9142 = vst [vmem:[#allocation127_spill] sm:$0xff] %v5716_v47  ;;  %v5718_v44 = vld [vmem:[#allocation9 + $0x210] sm:$0xff]  ;;  %v5722_v40 = vld [vmem:[#allocation8 + $0x1e8] sm:$0xff] }
  0xc3   :  { %878 = vmatpush2.msra.mxu0 %v5692_v2  ;;  %949 = vmatpush2.msra.mxu1 %v5694_v56  ;;  %9143 = vst [vmem:[#allocation128_spill] sm:$0xff] %v5718_v44  ;;  %9144 = vst [vmem:[#allocation129_spill] sm:$0xff] %v5722_v40  ;;  %v5724_v2 = vld [vmem:[#allocation8 + $0x1f8] sm:$0xff] }
  0xc4   :  { %879 = vmatprep.subr.mxu0 %v5698_v39  ;;  %950 = vmatprep.subr.mxu1 %v5700_v42  ;;  %9145 = vst [vmem:[#allocation130_spill] sm:$0xff] %v5724_v2  ;;  %v153_v42 = vlaneseq }
  0xc5   :  { %880 = vmatpush2.msra.mxu0 %v5704_v0  ;;  %951 = vmatpush2.msra.mxu1 %v5706_v43 }
  0xc6   :  { %881 = vmatprep.subr.mxu0 %v5710_v41  ;;  %952 = vmatprep.subr.mxu1 %v5712_v38  ;;  %v5732_v0 = vshrl.u32 %v153_v42, 7 }
  0xc7   :  { %882 = vmatpush2.msra.mxu0 %v5716_v47  ;;  %953 = vmatpush2.msra.mxu1 %v5718_v44  ;;  %v151_v47 = vld [vmem:[%s8489_s3] sm:$0xf] }
  0xc8   :  { %1054 = vmatprep.subr.mxu0 %v5722_v40  ;;  %1125 = vmatprep.subr.mxu1 %v5724_v2  ;;  %v8606_v56 = vsub.s32 0, %v5732_v0  ;;  %v8608_v41 = vsub.s32 2, %v5732_v0  ;;  %v8612_v2 = vsub.s32 1, %v5732_v0  ;;  %v8613_v42 = vsub.s32 3, %v5732_v0 }
  0xca   :  { %v156_v38 = vrot.slane %v151_v47, %v8606_v56  ;;  %v5753_v37 = vrot.slane %v151_v47, %v8608_v41  ;;  %v160_v34 = vrot.slane %v151_v47, %v8612_v2  ;;  %v5759_v33 = vrot.slane %v151_v47, %v8613_v42 }
 0x116   :  { %v5734_v43 = vpop.f32.mrf.mxu0  ;;  %v5736_v39 = vpop.f32.mrf.mxu1 }
 0x118   :  { %v5743_v44 = vpop.f32.mrf.mxu0  ;;  %v5745_v40 = vpop.f32.mrf.mxu1 }
 0x11c   :  { %v245_v36 = vpop.f32.mrf.mxu0  ;;  %v358_v35 = vpop.f32.mrf.mxu1 }
 0x11d   :  { %v5761_v32 = vadd.f32 %v245_v36, %v156_v38  ;;  %v5764_v31 = vadd.f32 %v358_v35, %v5753_v37 }
 0x11e   :  { %v247_v30 = vpop.f32.mrf.mxu0  ;;  %v360_v56 = vpop.f32.mrf.mxu1 }
 0x11f   :  { %9146 = vst [vmem:[#allocation131_spill] sm:$0xff] %v5761_v32  ;;  %9147 = vst [vmem:[#allocation132_spill] sm:$0xff] %v5764_v31  ;;  %v5766_v29 = vadd.f32 %v247_v30, %v160_v34  ;;  %v5769_v41 = vadd.f32 %v360_v56, %v5759_v33 }
 0x121   :  { %9148 = vst [vmem:[#allocation133_spill] sm:$0xff] %v5766_v29  ;;  %9149 = vst [vmem:[#allocation134_spill] sm:$0xff] %v5769_v41 }
 0x122   :  { %v251_v28 = vpop.f32.mrf.mxu0  ;;  %v364_v27 = vpop.f32.mrf.mxu1 }
 0x123   :  { %v5771_v26 = vadd.f32 %v251_v28, %v156_v38  ;;  %v5774_v2 = vadd.f32 %v364_v27, %v5753_v37 }
 0x124   :  { %v253_v47 = vpop.f32.mrf.mxu0  ;;  %v366_v36 = vpop.f32.mrf.mxu1 }
 0x125   :  { %9150 = vst [vmem:[#allocation135_spill] sm:$0xff] %v5771_v26  ;;  %9151 = vst [vmem:[#allocation136_spill] sm:$0xff] %v5774_v2  ;;  %v5776_v42 = vadd.f32 %v253_v47, %v160_v34  ;;  %v5779_v35 = vadd.f32 %v366_v36, %v5759_v33 }
 0x127   :  { %9152 = vst [vmem:[#allocation137_spill] sm:$0xff] %v5776_v42  ;;  %9153 = vst [vmem:[#allocation138_spill] sm:$0xff] %v5779_v35 }
 0x128   :  { %v257_v31 = vpop.f32.mrf.mxu0  ;;  %v370_v30 = vpop.f32.mrf.mxu1 }
 0x129   :  { %v5781_v29 = vadd.f32 %v257_v31, %v156_v38  ;;  %v5784_v56 = vadd.f32 %v370_v30, %v5753_v37 }
 0x12a   :  { %v259_v41 = vpop.f32.mrf.mxu0  ;;  %v372_v28 = vpop.f32.mrf.mxu1 }
 0x12b   :  { %9154 = vst [vmem:[#allocation139_spill] sm:$0xff] %v5781_v29  ;;  %9155 = vst [vmem:[#allocation140_spill] sm:$0xff] %v5784_v56  ;;  %v5786_v26 = vadd.f32 %v259_v41, %v160_v34  ;;  %v5789_v27 = vadd.f32 %v372_v28, %v5759_v33 }
 0x12d   :  { %9156 = vst [vmem:[#allocation141_spill] sm:$0xff] %v5786_v26  ;;  %9157 = vst [vmem:[#allocation142_spill] sm:$0xff] %v5789_v27 }
 0x12e   :  { %v263_v2 = vpop.f32.mrf.mxu0  ;;  %v376_v47 = vpop.f32.mrf.mxu1 }
 0x12f   :  { %v5791_v42 = vadd.f32 %v263_v2, %v156_v38  ;;  %v5794_v36 = vadd.f32 %v376_v47, %v5753_v37 }
 0x130   :  { %v265_v35 = vpop.f32.mrf.mxu0  ;;  %v378_v31 = vpop.f32.mrf.mxu1 }
 0x131   :  { %9158 = vst [vmem:[#allocation143_spill] sm:$0xff] %v5791_v42  ;;  %9159 = vst [vmem:[#allocation144_spill] sm:$0xff] %v5794_v36  ;;  %v5796_v29 = vadd.f32 %v265_v35, %v160_v34  ;;  %v5799_v30 = vadd.f32 %v378_v31, %v5759_v33 }
 0x133   :  { %9160 = vst [vmem:[#allocation145_spill] sm:$0xff] %v5796_v29  ;;  %9161 = vst [vmem:[#allocation146_spill] sm:$0xff] %v5799_v30 }
 0x134   :  { %v269_v56 = vpop.f32.mrf.mxu0  ;;  %v382_v41 = vpop.f32.mrf.mxu1 }
 0x135   :  { %v5801_v26 = vadd.f32 %v269_v56, %v156_v38  ;;  %v5804_v28 = vadd.f32 %v382_v41, %v5753_v37 }
 0x136   :  { %v271_v27 = vpop.f32.mrf.mxu0  ;;  %v384_v2 = vpop.f32.mrf.mxu1 }
 0x137   :  { %9162 = vst [vmem:[#allocation147_spill] sm:$0xff] %v5801_v26  ;;  %9163 = vst [vmem:[#allocation148_spill] sm:$0xff] %v5804_v28  ;;  %v5806_v42 = vadd.f32 %v271_v27, %v160_v34  ;;  %v5809_v47 = vadd.f32 %v384_v2, %v5759_v33 }
 0x139   :  { %9164 = vst [vmem:[#allocation149_spill] sm:$0xff] %v5806_v42  ;;  %9165 = vst [vmem:[#allocation150_spill] sm:$0xff] %v5809_v47 }
 0x13a   :  { %v275_v36 = vpop.f32.mrf.mxu0  ;;  %v388_v35 = vpop.f32.mrf.mxu1 }
 0x13b   :  { %v5811_v29 = vadd.f32 %v275_v36, %v156_v38  ;;  %v5814_v31 = vadd.f32 %v388_v35, %v5753_v37 }
 0x13c   :  { %v277_v30 = vpop.f32.mrf.mxu0  ;;  %v390_v56 = vpop.f32.mrf.mxu1 }
 0x13d   :  { %9166 = vst [vmem:[#allocation151_spill] sm:$0xff] %v5811_v29  ;;  %9167 = vst [vmem:[#allocation152_spill] sm:$0xff] %v5814_v31  ;;  %v5816_v26 = vadd.f32 %v277_v30, %v160_v34  ;;  %v5819_v41 = vadd.f32 %v390_v56, %v5759_v33  ;;  %v240_v30 = vadd.f32 %v5734_v43, %v156_v38 }
 0x13e   :  { %v242_v56 = vadd.f32 %v5743_v44, %v160_v34 }
 0x13f   :  { %9168 = vst [vmem:[#allocation153_spill] sm:$0xff] %v5816_v26  ;;  %9169 = vst [vmem:[#allocation154_spill] sm:$0xff] %v5819_v41 }
 0x140   :  { %v281_v28 = vpop.f32.mrf.mxu0  ;;  %v394_v27 = vpop.f32.mrf.mxu1 }
 0x141   :  { %v5821_v42 = vadd.f32 %v281_v28, %v156_v38  ;;  %v5824_v2 = vadd.f32 %v394_v27, %v5753_v37 }
 0x142   :  { %v283_v47 = vpop.f32.mrf.mxu0  ;;  %v396_v36 = vpop.f32.mrf.mxu1 }
 0x143   :  { %9170 = vst [vmem:[#allocation155_spill] sm:$0xff] %v5821_v42  ;;  %9171 = vst [vmem:[#allocation156_spill] sm:$0xff] %v5824_v2  ;;  %v5826_v29 = vadd.f32 %v283_v47, %v160_v34  ;;  %v5829_v35 = vadd.f32 %v396_v36, %v5759_v33  ;;  %v355_v47 = vadd.f32 %v5745_v40, %v5759_v33 }
 0x144   :  { %v353_v36 = vadd.f32 %v5736_v39, %v5753_v37 }
 0x145   :  { %9172 = vst [vmem:[#allocation157_spill] sm:$0xff] %v5826_v29  ;;  %9173 = vst [vmem:[#allocation158_spill] sm:$0xff] %v5829_v35 }
 0x146   :  { %v587_v31 = vpop.f32.mrf.mxu0  ;;  %v658_v42 = vpop.f32.mrf.mxu1 }
 0x147   :  { %v663_v41 = vadd.f32 %v587_v31, %v240_v30  ;;  %v665_v35 = vadd.f32 %v658_v42, %v353_v36  ;;  %v5842_v42 = vld [vmem:[#allocation8 + $0x1e0] sm:$0xff]  ;;  %v5854_v36 = vld [vmem:[#allocation8 + $0x1d0] sm:$0xff] }
 0x148   :  { %v589_v26 = vpop.f32.mrf.mxu0  ;;  %v660_v2 = vpop.f32.mrf.mxu1 }
 0x149   :  { %v4743_v32 = vmul.f32 -1.442695, %v663_v41  ;;  %v664_v28 = vadd.f32 %v589_v26, %v242_v56  ;;  %v666_v29 = vadd.f32 %v660_v2, %v355_v47  ;;  %v5852_v47 = vld [vmem:[#allocation8 + $0x1c0] sm:$0xff] }
 0x14b   :  { %4801 = vpow2.f32 %v4743_v32  ;;  %v4744_v27 = vmul.f32 -1.442695, %v664_v28  ;;  %v4745_v38 = vmul.f32 -1.442695, %v666_v29  ;;  %v5846_v28 = vld [vmem:[#allocation8 + $0x1c8] sm:$0xff] }
 0x14d   :  { %4803 = vpow2.f32 %v4744_v27  ;;  %v5848_v27 = vld [vmem:[#allocation8 + $0x1d8] sm:$0xff] }
 0x14e   :  { %4805 = vpow2.f32 %v4745_v38  ;;  %v5858_v38 = vld [vmem:[#allocation8 + $0x1a8] sm:$0xff] }
 0x158   :  { %v4802_v43 = vpop.eup %4801 }
 0x159   :  { %v670_v34 = vadd.f32 1.0, %v4802_v43  ;;  %v5860_v43 = vld [vmem:[#allocation8 + $0x1b8] sm:$0xff] }
 0x15a   :  { %v4804_v44 = vpop.eup %4803 }
 0x15b   :  { %4807 = vrcp.f32 %v670_v34  ;;  %v676_v26 = vadd.f32 1.0, %v4804_v44  ;;  %v4806_v32 = vpop.eup %4805  ;;  %v5864_v34 = vld [vmem:[#allocation8 + $0x1a0] sm:$0xff]  ;;  %v5866_v44 = vld [vmem:[#allocation8 + $0x1b0] sm:$0xff] }
 0x15c   :  { %4809 = vtanh.f32 %v665_v35  ;;  %v683_v56 = vadd.f32 1.0, %v4806_v32  ;;  %v5844_v35 = vld [vmem:[#allocation8 + $0x1f0] sm:$0xff]  ;;  %9174 = vst [vmem:[#allocation159_spill] sm:$0xff] %v5866_v44  ;;  %v5872_v32 = vld [vmem:[#allocation8 + $0x198] sm:$0xff] }
 0x15d   :  { %4811 = vrcp.f32 %v676_v26  ;;  %v5870_v26 = vld [vmem:[#allocation8 + $0x188] sm:$0xff]  ;;  %9176 = vst [vmem:[#allocation161_spill] sm:$0xff] %v5872_v32 }
 0x15e   :  { %4813 = vrcp.f32 %v683_v56  ;;  %9175 = vst [vmem:[#allocation160_spill] sm:$0xff] %v5870_v26  ;;  %v5884_v56 = vld [vmem:[#allocation8 + $0x178] sm:$0xff] }
 0x15f   :  { %9180 = vst [vmem:[#allocation165_spill] sm:$0xff] %v5884_v56 }
 0x168   :  { %v4808_v31 = vpop.eup %4807 }
 0x169   :  { %v4810_v41 = vpop.eup %4809 }
 0x16a   :  { %v4812_v30 = vpop.eup %4811  ;;  %v687_v40 = vmul.f32 %v4810_v41, %v4808_v31  ;;  %v5876_v31 = vld [vmem:[#allocation8 + $0x180] sm:$0xff]  ;;  %v5878_v41 = vld [vmem:[#allocation8 + $0x190] sm:$0xff] }
 0x16b   :  { %v686_v33 = vmul.f32 0.0, %v4812_v30  ;;  %v4814_v29 = vpop.eup %4813  ;;  %9177 = vst [vmem:[#allocation162_spill] sm:$0xff] %v5876_v31  ;;  %9178 = vst [vmem:[#allocation163_spill] sm:$0xff] %v5878_v41  ;;  %v5882_v30 = vld [vmem:[#allocation8 + $0x168] sm:$0xff] }
 0x16c   :  { %9179 = vst [vmem:[#allocation164_spill] sm:$0xff] %v5882_v30 }
 0x16d   :  { %v5837_v2 = vadd.f32 %v687_v40, %v686_v33  ;;  %v5888_v33 = vld [vmem:[#allocation8 + $0x160] sm:$0xff]  ;;  %v5890_v40 = vld [vmem:[#allocation8 + $0x170] sm:$0xff] }
 0x16e   :  { %9181 = vst [vmem:[#allocation166_spill] sm:$0xff] %v5888_v33  ;;  %9182 = vst [vmem:[#allocation167_spill] sm:$0xff] %v5890_v40 }
 0x16f   :  { %4815 = vtanh.f32 %v5837_v2 }
 0x17c   :  { %v4816_v37 = vpop.eup %4815 }
 0x17d   :  { %v5840_v39 = vmul.f32 %v4816_v37, %v4814_v29  ;;  %v5894_v29 = vld [vmem:[#allocation8 + $0x148] sm:$0xff]  ;;  %v5896_v37 = vld [vmem:[#allocation8 + $0x158] sm:$0xff] }
 0x17e   :  { %9183 = vst [vmem:[#allocation168_spill] sm:$0xff] %v5894_v29  ;;  %9184 = vst [vmem:[#allocation169_spill] sm:$0xff] %v5896_v37 }
 0x17f   :  { %884 = vmatmul.mubr.f32.vlgmr.msra.gmra.mxu0 %v5840_v39  ;;  %955 = vmatmul.mubr.f32.vlgmr.msra.gmra.mxu1 %v5840_v39 }
 0x180   :  { %1055 = vmatpush1.msra.mxu0 %v5842_v42  ;;  %1126 = vmatpush1.msra.mxu1 %v5844_v35 }
 0x181   :  { %1056 = vmatprep.subr.mxu0 %v5846_v28  ;;  %1127 = vmatprep.subr.mxu1 %v5848_v27 }
 0x182   :  { %1057 = vmatpush1.msra.mxu0 %v5852_v47  ;;  %1128 = vmatpush1.msra.mxu1 %v5854_v36 }
 0x183   :  { %1058 = vmatprep.subr.mxu0 %v5858_v38  ;;  %1129 = vmatprep.subr.mxu1 %v5860_v43 }
 0x184   :  { %1059 = vmatpush1.msra.mxu0 %v5864_v34  ;;  %1130 = vmatpush1.msra.mxu1 %v5866_v44  ;;  %v5900_v44 = vld [vmem:[#allocation8 + $0x140] sm:$0xff] }
 0x185   :  { %1060 = vmatprep.subr.mxu0 %v5870_v26  ;;  %1131 = vmatprep.subr.mxu1 %v5872_v32  ;;  %9185 = vst [vmem:[#allocation170_spill] sm:$0xff] %v5900_v44  ;;  %v5902_v26 = vld [vmem:[#allocation8 + $0x150] sm:$0xff]  ;;  %v5906_v32 = vld [vmem:[#allocation8 + $0x128] sm:$0xff] }
 0x186   :  { %1061 = vmatpush1.msra.mxu0 %v5876_v31  ;;  %1132 = vmatpush1.msra.mxu1 %v5878_v41  ;;  %9186 = vst [vmem:[#allocation171_spill] sm:$0xff] %v5902_v26  ;;  %9187 = vst [vmem:[#allocation172_spill] sm:$0xff] %v5906_v32  ;;  %v5908_v31 = vld [vmem:[#allocation8 + $0x138] sm:$0xff]  ;;  %v5912_v41 = vld [vmem:[#allocation8 + $0x120] sm:$0xff] }
 0x187   :  { %1062 = vmatprep.subr.mxu0 %v5882_v30  ;;  %1133 = vmatprep.subr.mxu1 %v5884_v56  ;;  %9188 = vst [vmem:[#allocation173_spill] sm:$0xff] %v5908_v31  ;;  %9189 = vst [vmem:[#allocation174_spill] sm:$0xff] %v5912_v41  ;;  %v5914_v30 = vld [vmem:[#allocation8 + $0x130] sm:$0xff]  ;;  %v5918_v56 = vld [vmem:[#allocation8 + $0x108] sm:$0xff] }
 0x188   :  { %1063 = vmatpush1.msra.mxu0 %v5888_v33  ;;  %1134 = vmatpush1.msra.mxu1 %v5890_v40  ;;  %v5920_v33 = vld [vmem:[#allocation8 + $0x118] sm:$0xff]  ;;  %v5061_v40 = vld [vmem:[#allocation8 + $0xe0] sm:$0xff] }
 0x189   :  { %1064 = vmatprep.subr.mxu0 %v5894_v29  ;;  %1135 = vmatprep.subr.mxu1 %v5896_v37  ;;  %v5057_v37 = vld [vmem:[#allocation8 + $0x100] sm:$0xff]  ;;  %v5060_v29 = vld [vmem:[#allocation8 + $0xf8] sm:$0xff] }
 0x18a   :  { %1065 = vmatpush1.msra.mxu0 %v5900_v44  ;;  %1136 = vmatpush1.msra.mxu1 %v5902_v26  ;;  %v5058_v44 = vld [vmem:[#allocation8 + $0x110] sm:$0xff]  ;;  %v5059_v26 = vld [vmem:[#allocation8 + $0xe8] sm:$0xff] }
 0x18b   :  { %1066 = vmatprep.subr.mxu0 %v5906_v32  ;;  %1137 = vmatprep.subr.mxu1 %v5908_v31  ;;  %v5062_v32 = vld [vmem:[#allocation8 + $0xf0] sm:$0xff]  ;;  %v5063_v31 = vld [vmem:[#allocation8 + $0xc8] sm:$0xff] }
 0x18c   :  { %1067 = vmatpush1.msra.mxu0 %v5912_v41  ;;  %1138 = vmatpush1.msra.mxu1 %v5914_v30  ;;  %v5064_v41 = vld [vmem:[#allocation8 + $0xd8] sm:$0xff] }
 0x18d   :  { %1068 = vmatprep.subr.mxu0 %v5918_v56  ;;  %1139 = vmatprep.subr.mxu1 %v5920_v33 }
 0x18e   :  { %1069 = vmatpush1.msra.mxu0 %v5057_v37  ;;  %1140 = vmatpush1.msra.mxu1 %v5058_v44  ;;  %v9232_v44 = vld [vmem:[#allocation57_spill] sm:$0xff]  ;;  %v9239_v37 = vld [vmem:[#allocation64_spill] sm:$0xff] }
 0x18f   :  { %1070 = vmatprep.subr.mxu0 %v5059_v26  ;;  %1141 = vmatprep.subr.mxu1 %v5060_v29  ;;  %v9233_v26 = vld [vmem:[#allocation58_spill] sm:$0xff]  ;;  %v9238_v29 = vld [vmem:[#allocation63_spill] sm:$0xff] }
 0x190   :  { %1071 = vmatpush1.msra.mxu0 %v5061_v40  ;;  %1142 = vmatpush1.msra.mxu1 %v5062_v32  ;;  %v9234_v32 = vld [vmem:[#allocation59_spill] sm:$0xff]  ;;  %v9237_v40 = vld [vmem:[#allocation62_spill] sm:$0xff] }
 0x191   :  { %1072 = vmatprep.subr.mxu0 %v5063_v31  ;;  %1143 = vmatprep.subr.mxu1 %v5064_v41  ;;  %v9235_v31 = vld [vmem:[#allocation60_spill] sm:$0xff]  ;;  %v9236_v41 = vld [vmem:[#allocation61_spill] sm:$0xff] }
 0x192   :  { %1073 = vmatpush1.msra.mxu0 %v5252_v45  ;;  %1144 = vmatpush1.msra.mxu1 %v5254_v46  ;;  %v9190_v45 = vmov 0.0   ;;  %v9191_v46 = vld [vmem:[#allocation16_spill] sm:$0xff] }
 0x193   :  { %1074 = vmatprep.subr.mxu0 %v5258_v48  ;;  %1145 = vmatprep.subr.mxu1 %v5260_v49  ;;  %v9192_v48 = vld [vmem:[#allocation17_spill] sm:$0xff]  ;;  %v9193_v49 = vld [vmem:[#allocation18_spill] sm:$0xff] }
 0x194   :  { %1075 = vmatpush1.msra.mxu0 %v5264_v50  ;;  %1146 = vmatpush1.msra.mxu1 %v5266_v51  ;;  %v9194_v50 = vld [vmem:[#allocation19_spill] sm:$0xff]  ;;  %v9195_v51 = vld [vmem:[#allocation20_spill] sm:$0xff] }
 0x195   :  { %1076 = vmatprep.subr.mxu0 %v5268_v52  ;;  %1147 = vmatprep.subr.mxu1 %v5270_v53  ;;  %v9196_v52 = vld [vmem:[#allocation21_spill] sm:$0xff]  ;;  %v9197_v53 = vld [vmem:[#allocation22_spill] sm:$0xff] }
 0x196   :  { %1077 = vmatpush1.msra.mxu0 %v5276_v54  ;;  %1148 = vmatpush1.msra.mxu1 %v5278_v55  ;;  %v9198_v54 = vld [vmem:[#allocation23_spill] sm:$0xff]  ;;  %v9199_v55 = vld [vmem:[#allocation24_spill] sm:$0xff] }
 0x197   :  { %1078 = vmatprep.subr.mxu0 %v5284_v57  ;;  %1149 = vmatprep.subr.mxu1 %v5286_v58  ;;  %v9200_v57 = vld [vmem:[#allocation25_spill] sm:$0xff]  ;;  %v9201_v58 = vld [vmem:[#allocation26_spill] sm:$0xff] }
 0x198   :  { %1079 = vmatpush1.msra.mxu0 %v5290_v59  ;;  %1150 = vmatpush1.msra.mxu1 %v5292_v60  ;;  %v9202_v59 = vld [vmem:[#allocation27_spill] sm:$0xff]  ;;  %v9203_v60 = vld [vmem:[#allocation28_spill] sm:$0xff] }
 0x199   :  { %1080 = vmatprep.subr.mxu0 %v5294_v61  ;;  %1151 = vmatprep.subr.mxu1 %v5296_v62  ;;  %v9204_v61 = vld [vmem:[#allocation29_spill] sm:$0xff]  ;;  %v9205_v62 = vld [vmem:[#allocation30_spill] sm:$0xff] }
 0x19a   :  { %1081 = vmatpush1.msra.mxu0 %v5302_v63  ;;  %1152 = vmatpush1.msra.mxu1 %v5304_v1  ;;  %v9206_v63 = vld [vmem:[#allocation31_spill] sm:$0xff]  ;;  %v9207_v1 = vld [vmem:[#allocation32_spill] sm:$0xff] }
 0x19b   :  { %1082 = vmatprep.subr.mxu0 %v5310_v3  ;;  %1153 = vmatprep.subr.mxu1 %v5312_v4  ;;  %v9208_v3 = vld [vmem:[#allocation33_spill] sm:$0xff]  ;;  %v9209_v4 = vld [vmem:[#allocation34_spill] sm:$0xff] }
 0x19c   :  { %1083 = vmatpush1.msra.mxu0 %v5316_v5  ;;  %1154 = vmatpush1.msra.mxu1 %v5318_v6  ;;  %v9210_v5 = vld [vmem:[#allocation35_spill] sm:$0xff]  ;;  %v9211_v6 = vld [vmem:[#allocation36_spill] sm:$0xff] }
 0x19d   :  { %1084 = vmatprep.subr.mxu0 %v5320_v7  ;;  %1155 = vmatprep.subr.mxu1 %v5322_v8  ;;  %v9212_v7 = vld [vmem:[#allocation37_spill] sm:$0xff]  ;;  %v9213_v8 = vld [vmem:[#allocation38_spill] sm:$0xff] }
 0x19e   :  { %1085 = vmatpush1.msra.mxu0 %v5326_v9  ;;  %1118 = vmatprep.mubr.f32.mxu0 %v9190_v45  ;;  %v9214_v9 = vld [vmem:[#allocation39_spill] sm:$0xff] }
 0x19f   :  { %1156 = vmatpush1.msra.mxu1 %v5330_v10  ;;  %1189 = vmatprep.mubr.f32.mxu1 %v9190_v45  ;;  %v9215_v10 = vld [vmem:[#allocation40_spill] sm:$0xff] }
 0x1a0   :  { %1119 = vmatmul.mubr.f32.vlgmr.msra.gmra.mxu0 %v5840_v39  ;;  %1190 = vmatmul.mubr.f32.vlgmr.msra.gmra.mxu1 %v5840_v39  ;;  %v9231_v39 = vld [vmem:[#allocation56_spill] sm:$0xff] }
 0x1a1   :  { %1352 = vmatprep.subr.mxu0 %v5342_v11  ;;  %1423 = vmatprep.subr.mxu1 %v5344_v12  ;;  %v9216_v11 = vld [vmem:[#allocation41_spill] sm:$0xff]  ;;  %v9217_v12 = vld [vmem:[#allocation42_spill] sm:$0xff] }
 0x1a2   :  { %1353 = vmatpush1.msra.mxu0 %v5346_v13  ;;  %1424 = vmatpush1.msra.mxu1 %v5350_v14  ;;  %v9218_v13 = vld [vmem:[#allocation43_spill] sm:$0xff]  ;;  %v9219_v14 = vld [vmem:[#allocation44_spill] sm:$0xff] }
 0x1a3   :  { %1354 = vmatprep.subr.mxu0 %v5354_v15  ;;  %1425 = vmatprep.subr.mxu1 %v5356_v16  ;;  %v9220_v15 = vld [vmem:[#allocation45_spill] sm:$0xff]  ;;  %v9221_v16 = vld [vmem:[#allocation46_spill] sm:$0xff] }
 0x1a4   :  { %1355 = vmatpush1.msra.mxu0 %v5358_v17  ;;  %1426 = vmatpush1.msra.mxu1 %v5362_v18  ;;  %v9222_v17 = vld [vmem:[#allocation47_spill] sm:$0xff]  ;;  %v9223_v18 = vld [vmem:[#allocation48_spill] sm:$0xff] }
 0x1a5   :  { %1356 = vmatprep.subr.mxu0 %v5366_v19  ;;  %1427 = vmatprep.subr.mxu1 %v5368_v20  ;;  %v9224_v19 = vld [vmem:[#allocation49_spill] sm:$0xff]  ;;  %v9225_v20 = vld [vmem:[#allocation50_spill] sm:$0xff] }
 0x1a6   :  { %1357 = vmatpush1.msra.mxu0 %v5370_v21  ;;  %1428 = vmatpush1.msra.mxu1 %v5374_v22  ;;  %v9226_v21 = vld [vmem:[#allocation51_spill] sm:$0xff]  ;;  %v9227_v22 = vld [vmem:[#allocation52_spill] sm:$0xff] }
 0x1a7   :  { %1358 = vmatprep.subr.mxu0 %v5378_v23  ;;  %1429 = vmatprep.subr.mxu1 %v5380_v24  ;;  %v9228_v23 = vld [vmem:[#allocation53_spill] sm:$0xff]  ;;  %v9229_v24 = vld [vmem:[#allocation54_spill] sm:$0xff] }
 0x1a8   :  { %1359 = vmatpush1.msra.mxu0 %v5382_v25  ;;  %1430 = vmatpush1.msra.mxu1 %v9191_v46  ;;  %v9230_v25 = vld [vmem:[#allocation55_spill] sm:$0xff]  ;;  %v9240_v46 = vld [vmem:[#allocation65_spill] sm:$0xff] }
 0x1a9   :  { %1360 = vmatprep.subr.mxu0 %v9192_v48  ;;  %1431 = vmatprep.subr.mxu1 %v9193_v49  ;;  %v9241_v48 = vld [vmem:[#allocation66_spill] sm:$0xff]  ;;  %v9242_v49 = vld [vmem:[#allocation67_spill] sm:$0xff] }
 0x1aa   :  { %1361 = vmatpush1.msra.mxu0 %v9194_v50  ;;  %1432 = vmatpush1.msra.mxu1 %v9195_v51  ;;  %v9243_v50 = vld [vmem:[#allocation68_spill] sm:$0xff]  ;;  %v9244_v51 = vld [vmem:[#allocation69_spill] sm:$0xff] }
 0x1ab   :  { %1362 = vmatprep.subr.mxu0 %v9196_v52  ;;  %1433 = vmatprep.subr.mxu1 %v9197_v53  ;;  %v9245_v52 = vld [vmem:[#allocation70_spill] sm:$0xff]  ;;  %v9246_v53 = vld [vmem:[#allocation71_spill] sm:$0xff] }
 0x1ac   :  { %1363 = vmatpush1.msra.mxu0 %v9198_v54  ;;  %1434 = vmatpush1.msra.mxu1 %v9199_v55  ;;  %v9247_v54 = vld [vmem:[#allocation72_spill] sm:$0xff]  ;;  %v9248_v55 = vld [vmem:[#allocation73_spill] sm:$0xff] }
 0x1ad   :  { %1364 = vmatprep.subr.mxu0 %v9200_v57  ;;  %1435 = vmatprep.subr.mxu1 %v9201_v58  ;;  %v9249_v57 = vld [vmem:[#allocation74_spill] sm:$0xff]  ;;  %v9250_v58 = vld [vmem:[#allocation75_spill] sm:$0xff] }
 0x1ae   :  { %1365 = vmatpush1.msra.mxu0 %v9202_v59  ;;  %1436 = vmatpush1.msra.mxu1 %v9203_v60  ;;  %v9251_v59 = vld [vmem:[#allocation76_spill] sm:$0xff]  ;;  %v9252_v60 = vld [vmem:[#allocation77_spill] sm:$0xff] }
 0x1af   :  { %1366 = vmatprep.subr.mxu0 %v9204_v61  ;;  %1437 = vmatprep.subr.mxu1 %v9205_v62  ;;  %v9253_v61 = vld [vmem:[#allocation78_spill] sm:$0xff]  ;;  %v9254_v62 = vld [vmem:[#allocation79_spill] sm:$0xff] }
 0x1b0   :  { %1367 = vmatpush1.msra.mxu0 %v9206_v63  ;;  %1438 = vmatpush1.msra.mxu1 %v9207_v1  ;;  %v9255_v63 = vld [vmem:[#allocation80_spill] sm:$0xff]  ;;  %v9256_v1 = vld [vmem:[#allocation81_spill] sm:$0xff] }
 0x1b1   :  { %1368 = vmatprep.subr.mxu0 %v9208_v3  ;;  %1439 = vmatprep.subr.mxu1 %v9209_v4  ;;  %v9257_v3 = vld [vmem:[#allocation82_spill] sm:$0xff]  ;;  %v9258_v4 = vld [vmem:[#allocation83_spill] sm:$0xff] }
 0x1b2   :  { %1369 = vmatpush1.msra.mxu0 %v9210_v5  ;;  %1440 = vmatpush1.msra.mxu1 %v9211_v6  ;;  %v9259_v5 = vld [vmem:[#allocation84_spill] sm:$0xff]  ;;  %v9260_v6 = vld [vmem:[#allocation85_spill] sm:$0xff] }
 0x1b3   :  { %1370 = vmatprep.subr.mxu0 %v9212_v7  ;;  %1441 = vmatprep.subr.mxu1 %v9213_v8  ;;  %v9261_v7 = vld [vmem:[#allocation86_spill] sm:$0xff]  ;;  %v9262_v8 = vld [vmem:[#allocation87_spill] sm:$0xff] }
 0x1b4   :  { %1371 = vmatpush1.msra.mxu0 %v9214_v9  ;;  %1442 = vmatpush1.msra.mxu1 %v9215_v10  ;;  %v9263_v9 = vld [vmem:[#allocation88_spill] sm:$0xff]  ;;  %v9264_v10 = vld [vmem:[#allocation89_spill] sm:$0xff] }
 0x1b5   :  { %1372 = vmatprep.subr.mxu0 %v9216_v11  ;;  %1443 = vmatprep.subr.mxu1 %v9217_v12  ;;  %v9265_v11 = vld [vmem:[#allocation90_spill] sm:$0xff]  ;;  %v9266_v12 = vld [vmem:[#allocation91_spill] sm:$0xff] }
 0x1b6   :  { %1373 = vmatpush1.msra.mxu0 %v9218_v13  ;;  %1444 = vmatpush1.msra.mxu1 %v9219_v14  ;;  %v9267_v13 = vld [vmem:[#allocation92_spill] sm:$0xff]  ;;  %v9268_v14 = vld [vmem:[#allocation93_spill] sm:$0xff] }
 0x1b7   :  { %1374 = vmatprep.subr.mxu0 %v9220_v15  ;;  %1445 = vmatprep.subr.mxu1 %v9221_v16  ;;  %v9269_v15 = vld [vmem:[#allocation94_spill] sm:$0xff]  ;;  %v9270_v16 = vld [vmem:[#allocation95_spill] sm:$0xff] }
 0x1b8   :  { %1375 = vmatpush1.msra.mxu0 %v9222_v17  ;;  %1446 = vmatpush1.msra.mxu1 %v9223_v18  ;;  %v9271_v17 = vld [vmem:[#allocation96_spill] sm:$0xff]  ;;  %v9272_v18 = vld [vmem:[#allocation97_spill] sm:$0xff] }
 0x1b9   :  { %1376 = vmatprep.subr.mxu0 %v9224_v19  ;;  %1447 = vmatprep.subr.mxu1 %v9225_v20  ;;  %v9273_v19 = vld [vmem:[#allocation98_spill] sm:$0xff]  ;;  %v9274_v20 = vld [vmem:[#allocation99_spill] sm:$0xff] }
 0x1ba   :  { %1377 = vmatpush1.msra.mxu0 %v9226_v21  ;;  %1448 = vmatpush1.msra.mxu1 %v9227_v22  ;;  %v9275_v21 = vld [vmem:[#allocation100_spill] sm:$0xff]  ;;  %v9276_v22 = vld [vmem:[#allocation101_spill] sm:$0xff] }
 0x1bb   :  { %1378 = vmatprep.subr.mxu0 %v9228_v23  ;;  %1449 = vmatprep.subr.mxu1 %v9229_v24  ;;  %v9277_v23 = vld [vmem:[#allocation102_spill] sm:$0xff]  ;;  %v9278_v24 = vld [vmem:[#allocation103_spill] sm:$0xff] }
 0x1bc   :  { %1379 = vmatpush1.msra.mxu0 %v9230_v25  ;;  %1450 = vmatpush1.msra.mxu1 %v9231_v39  ;;  %v9279_v25 = vld [vmem:[#allocation104_spill] sm:$0xff]  ;;  %v9280_v39 = vld [vmem:[#allocation105_spill] sm:$0xff] }
 0x1bd   :  { %1380 = vmatprep.subr.mxu0 %v9232_v44  ;;  %1451 = vmatprep.subr.mxu1 %v9233_v26  ;;  %v9281_v44 = vld [vmem:[#allocation106_spill] sm:$0xff]  ;;  %v9282_v26 = vld [vmem:[#allocation107_spill] sm:$0xff] }
 0x1be   :  { %1381 = vmatpush1.msra.mxu0 %v9234_v32  ;;  %1452 = vmatpush1.msra.mxu1 %v9235_v31  ;;  %v9283_v32 = vld [vmem:[#allocation108_spill] sm:$0xff]  ;;  %v9284_v31 = vld [vmem:[#allocation109_spill] sm:$0xff] }
 0x1bf   :  { %1382 = vmatprep.subr.mxu0 %v9236_v41  ;;  %1453 = vmatprep.subr.mxu1 %v9237_v40  ;;  %v9285_v41 = vld [vmem:[#allocation110_spill] sm:$0xff]  ;;  %v9286_v40 = vld [vmem:[#allocation111_spill] sm:$0xff] }
 0x1c0   :  { %1383 = vmatpush1.msra.mxu0 %v9238_v29  ;;  %1454 = vmatpush1.msra.mxu1 %v9239_v37  ;;  %v9287_v29 = vld [vmem:[#allocation112_spill] sm:$0xff]  ;;  %v9288_v37 = vld [vmem:[#allocation113_spill] sm:$0xff] }
 0x1c1   :  { %1384 = vmatprep.subr.mxu0 %v9240_v46  ;;  %1455 = vmatprep.subr.mxu1 %v9241_v48  ;;  %v9289_v46 = vld [vmem:[#allocation114_spill] sm:$0xff]  ;;  %v9290_v48 = vld [vmem:[#allocation115_spill] sm:$0xff] }
 0x1c2   :  { %1385 = vmatpush2.msra.mxu0 %v9242_v49  ;;  %1456 = vmatpush2.msra.mxu1 %v9243_v50  ;;  %v9291_v49 = vld [vmem:[#allocation116_spill] sm:$0xff]  ;;  %v9292_v50 = vld [vmem:[#allocation117_spill] sm:$0xff] }
 0x1c3   :  { %1386 = vmatprep.subr.mxu0 %v9244_v51  ;;  %1457 = vmatprep.subr.mxu1 %v9245_v52  ;;  %v9293_v51 = vld [vmem:[#allocation118_spill] sm:$0xff]  ;;  %v9294_v52 = vld [vmem:[#allocation119_spill] sm:$0xff] }
 0x1c4   :  { %1387 = vmatpush2.msra.mxu0 %v9246_v53  ;;  %1458 = vmatpush2.msra.mxu1 %v9247_v54  ;;  %v9295_v53 = vld [vmem:[#allocation120_spill] sm:$0xff]  ;;  %v9296_v54 = vld [vmem:[#allocation121_spill] sm:$0xff] }
 0x1c5   :  { %1388 = vmatprep.subr.mxu0 %v9248_v55  ;;  %1459 = vmatprep.subr.mxu1 %v9249_v57  ;;  %v9297_v55 = vld [vmem:[#allocation122_spill] sm:$0xff]  ;;  %v9298_v57 = vld [vmem:[#allocation123_spill] sm:$0xff] }
 0x1c6   :  { %1389 = vmatpush2.msra.mxu0 %v9250_v58  ;;  %1460 = vmatpush2.msra.mxu1 %v9251_v59  ;;  %v9299_v58 = vld [vmem:[#allocation124_spill] sm:$0xff]  ;;  %v9300_v59 = vld [vmem:[#allocation125_spill] sm:$0xff] }
 0x1c7   :  { %1390 = vmatprep.subr.mxu0 %v9252_v60  ;;  %1461 = vmatprep.subr.mxu1 %v9253_v61  ;;  %v9301_v60 = vld [vmem:[#allocation126_spill] sm:$0xff]  ;;  %v9302_v61 = vld [vmem:[#allocation127_spill] sm:$0xff] }
 0x1c8   :  { %1391 = vmatpush2.msra.mxu0 %v9254_v62  ;;  %1462 = vmatpush2.msra.mxu1 %v9255_v63  ;;  %v9303_v62 = vld [vmem:[#allocation128_spill] sm:$0xff]  ;;  %v9304_v63 = vld [vmem:[#allocation129_spill] sm:$0xff] }
 0x1c9   :  { %1392 = vmatprep.subr.mxu0 %v9256_v1  ;;  %1463 = vmatprep.subr.mxu1 %v9257_v3  ;;  %v9305_v1 = vld [vmem:[#allocation130_spill] sm:$0xff]  ;;  %v431_v3 = vld [vmem:[%s8491_s5] sm:$0xf]  ;;  %s5182_s5 = smov [#allocation11]  }
 0x1ca   :  { %1393 = vmatpush2.msra.mxu0 %v9258_v4  ;;  %1464 = vmatpush2.msra.mxu1 %v9259_v5  ;;  %v9306_v4 = vsub.s32 0, %v5732_v0  ;;  %s4729_s20 = sshll.u32 %s5182_s5, 4  ;;  %s4730_s20 = int_to_ptr.vmem [resolvable:$true] %s4729_s20 }
 0x1cb   :  { %1394 = vmatprep.subr.mxu0 %v9260_v6  ;;  %1465 = vmatprep.subr.mxu1 %v9261_v7  ;;  %v9308_v6 = vsub.s32 1, %v5732_v0  ;;  %s5145_s21 = scalar_lea.vmem %s4730_s20, 1024  ;;  %p5150_p7 = scmp.lt.s32.totalorder %s4730_s20, %s4730_s20 }
 0x1cc   :  { %1395 = vmatpush2.msra.mxu0 %v9262_v8  ;;  %1466 = vmatpush2.msra.mxu1 %v9263_v9  ;;  %v6093_v5 = vrot.slane %v431_v3, %v9306_v4  ;;  %p5146_p6 = scmp.ne.s32.totalorder %s4730_s20, %s5145_s21  ;;  %p5151_p8 = scmp.lt.s32.totalorder %s5145_s21, %s5145_s21 }
 0x1cd   :  { %1396 = vmatprep.subr.mxu0 %v9264_v10  ;;  %1467 = vmatprep.subr.mxu1 %v9265_v11  ;;  %v6097_v7 = vrot.slane %v431_v3, %v9308_v6 }
 0x1ce   :  { %1397 = vmatpush2.msra.mxu0 %v9266_v12  ;;  %1468 = vmatpush2.msra.mxu1 %v9267_v13  ;;  %9307 = vst [vmem:[#allocation16_spill] sm:$0xff] %v6093_v5  ;;  %p5152_p9 = por %p5151_p8, %p5150_p7 }
 0x1cf   :  { %1398 = vmatprep.subr.mxu0 %v9268_v14  ;;  %1469 = vmatprep.subr.mxu1 %v9269_v15  ;;  %9309 = vst [vmem:[#allocation17_spill] sm:$0xff] %v6097_v7  ;;  %v9310_v15 = vsub.s32 3, %v5732_v0 }
 0x1d0   :  { %1399 = vmatpush2.msra.mxu0 %v9270_v16  ;;  %1470 = vmatpush2.msra.mxu1 %v9271_v17  ;;  %p5153_p10 = pnand %p5152_p9, %p5146_p6 }
 0x1d1   :  { %1400 = vmatprep.subr.mxu0 %v9272_v18  ;;  %1471 = vmatprep.subr.mxu1 %v9273_v19  ;;  %v6103_v16 = vrot.slane %v431_v3, %v9310_v15  ;;  %v9312_v19 = vsub.s32 2, %v5732_v0 }
 0x1d2   :  { %1401 = vmatpush2.msra.mxu0 %v9274_v20  ;;  %1472 = vmatpush2.msra.mxu1 %v9275_v21 }
 0x1d3   :  { %1402 = vmatprep.subr.mxu0 %v9276_v22  ;;  %1473 = vmatprep.subr.mxu1 %v9277_v23  ;;  %9311 = vst [vmem:[#allocation18_spill] sm:$0xff] %v6103_v16  ;;  %v6108_v20 = vrot.slane %v431_v3, %v9312_v19 }
 0x1d4   :  { %1403 = vmatpush2.msra.mxu0 %v9278_v24  ;;  %1474 = vmatpush2.msra.mxu1 %v9279_v25 }
 0x1d5   :  { %1404 = vmatprep.subr.mxu0 %v9280_v39  ;;  %1475 = vmatprep.subr.mxu1 %v9281_v44  ;;  %9313 = vst [vmem:[#allocation19_spill] sm:$0xff] %v6108_v20 }
 0x1d6   :  { %1405 = vmatpush2.msra.mxu0 %v9282_v26  ;;  %1476 = vmatpush2.msra.mxu1 %v9283_v32 }
 0x1d7   :  { %1406 = vmatprep.subr.mxu0 %v9284_v31  ;;  %1477 = vmatprep.subr.mxu1 %v9285_v41  ;;  %v9314_v31 = vld [vmem:[#allocation131_spill] sm:$0xff] }
 0x1d8   :  { %1407 = vmatpush2.msra.mxu0 %v9286_v40  ;;  %1478 = vmatpush2.msra.mxu1 %v9287_v29 }
 0x1d9   :  { %1408 = vmatprep.subr.mxu0 %v9288_v37  ;;  %1479 = vmatprep.subr.mxu1 %v9289_v46 }
 0x1da   :  { %1409 = vmatpush2.msra.mxu0 %v9290_v48  ;;  %1480 = vmatpush2.msra.mxu1 %v9291_v49  ;;  %v9315_v48 = vld [vmem:[#allocation133_spill] sm:$0xff] }
 0x1db   :  { %1410 = vmatprep.subr.mxu0 %v9292_v50  ;;  %1481 = vmatprep.subr.mxu1 %v9293_v51 }
 0x1dc   :  { %1411 = vmatpush2.msra.mxu0 %v9294_v52  ;;  %1482 = vmatpush2.msra.mxu1 %v9295_v53 }
 0x1dd   :  { %1412 = vmatprep.subr.mxu0 %v9296_v54  ;;  %1483 = vmatprep.subr.mxu1 %v9297_v55 }
 0x1de   :  { %1413 = vmatpush2.msra.mxu0 %v9298_v57  ;;  %1484 = vmatpush2.msra.mxu1 %v9299_v58  ;;  %v9316_v57 = vld [vmem:[#allocation134_spill] sm:$0xff] }
 0x1df   :  { %1414 = vmatprep.subr.mxu0 %v9300_v59  ;;  %1485 = vmatprep.subr.mxu1 %v9301_v60  ;;  %v9317_v59 = vld [vmem:[#allocation132_spill] sm:$0xff] }
 0x1e0   :  { %1415 = vmatpush2.msra.mxu0 %v9302_v61  ;;  %1486 = vmatpush2.msra.mxu1 %v9303_v62 }
 0x1e1   :  { %1588 = vmatprep.subr.mxu0 %v9304_v63  ;;  %1659 = vmatprep.subr.mxu1 %v9305_v1 }
 0x23f   :  { %v885_v8 = vpop.f32.mrf.mxu0  ;;  %v956_v13 = vpop.f32.mrf.mxu1 }
 0x240   :  { %v886_v9 = vadd.f32 %v885_v8, %v6093_v5  ;;  %v957_v23 = vadd.f32 %v956_v13, %v6108_v20 }
 0x241   :  { %v887_v10 = vpop.f32.mrf.mxu0  ;;  %v958_v17 = vpop.f32.mrf.mxu1 }
 0x242   :  { %v4746_v11 = vmul.f32 -1.442695, %v886_v9  ;;  %v888_v12 = vadd.f32 %v887_v10, %v6097_v7  ;;  %v959_v18 = vadd.f32 %v958_v17, %v6103_v16 }
 0x244   :  { %4817 = vpow2.f32 %v4746_v11  ;;  %v4747_v14 = vmul.f32 -1.442695, %v888_v12  ;;  %v4748_v21 = vmul.f32 -1.442695, %v959_v18 }
 0x246   :  { %4819 = vpow2.f32 %v4747_v14 }
 0x247   :  { %4821 = vpow2.f32 %v4748_v21 }
 0x251   :  { %v4818_v22 = vpop.eup %4817 }
 0x252   :  { %v964_v24 = vadd.f32 1.0, %v4818_v22  ;;  %v9319_v22 = vld [vmem:[#allocation160_spill] sm:$0xff] }
 0x253   :  { %v4820_v25 = vpop.eup %4819 }
 0x254   :  { %4823 = vrcp.f32 %v964_v24  ;;  %v970_v39 = vadd.f32 1.0, %v4820_v25  ;;  %v4822_v44 = vpop.eup %4821  ;;  %v9330_v24 = vld [vmem:[#allocation171_spill] sm:$0xff]  ;;  %v9331_v25 = vld [vmem:[#allocation172_spill] sm:$0xff] }
 0x255   :  { %4825 = vtanh.f32 %v957_v23  ;;  %v977_v0 = vadd.f32 1.0, %v4822_v44  ;;  %v9329_v23 = vld [vmem:[#allocation170_spill] sm:$0xff]  ;;  %v6150_v44 = vld [vmem:[#allocation8 + $0x100] sm:$0xff] }
 0x256   :  { %4827 = vrcp.f32 %v970_v39  ;;  %v9332_v39 = vld [vmem:[#allocation173_spill] sm:$0xff] }
 0x260   :  { %v1120_v26 = vpop.f32.mrf.mxu0  ;;  %v1191_v52 = vpop.f32.mrf.mxu1 }
 0x261   :  { %v4824_v32 = vpop.eup %4823  ;;  %v1196_v41 = vadd.f32 %v1120_v26, %v9314_v31  ;;  %v1198_v60 = vadd.f32 %v1191_v52, %v9317_v59  ;;  %v6152_v26 = vld [vmem:[#allocation8 + $0x110] sm:$0xff]  ;;  %v6156_v31 = vld [vmem:[#allocation8 + $0xe8] sm:$0xff]  ;;  %v6198_v52 = vld [vmem:[#allocation8 + $0x80] sm:$0xff] }
 0x262   :  { %v4826_v40 = vpop.eup %4825  ;;  %v1122_v29 = vpop.f32.mrf.mxu0  ;;  %v6212_v59 = vld [vmem:[#allocation8 + $0x70] sm:$0xff] }
 0x263   :  { %v4828_v37 = vpop.eup %4827  ;;  %v4749_v46 = vmul.f32 -1.442695, %v1196_v41  ;;  %v1197_v49 = vadd.f32 %v1122_v29, %v9315_v48  ;;  %v981_v51 = vmul.f32 %v4826_v40, %v4824_v32  ;;  %v1193_v55 = vpop.f32.mrf.mxu1  ;;  %v9333_v32 = vld [vmem:[#allocation174_spill] sm:$0xff]  ;;  %v6158_v41 = vld [vmem:[#allocation8 + $0xf8] sm:$0xff]  ;;  %v6162_v40 = vld [vmem:[#allocation8 + $0xe0] sm:$0xff] }
 0x264   :  { %v980_v50 = vmul.f32 0.0, %v4828_v37  ;;  %v1199_v58 = vadd.f32 %v1193_v55, %v9316_v57  ;;  %v6168_v29 = vld [vmem:[#allocation8 + $0xc8] sm:$0xff]  ;;  %v6170_v37 = vld [vmem:[#allocation8 + $0xd8] sm:$0xff]  ;;  %v6186_v48 = vld [vmem:[#allocation8 + $0xa0] sm:$0xff] }
 0x265   :  { %4829 = vpow2.f32 %v4749_v46  ;;  %v4750_v53 = vmul.f32 -1.442695, %v1197_v49  ;;  %v6182_v46 = vld [vmem:[#allocation8 + $0xb8] sm:$0xff]  ;;  %v6188_v49 = vld [vmem:[#allocation8 + $0xb0] sm:$0xff]  ;;  %v6204_v55 = vld [vmem:[#allocation8 + $0x68] sm:$0xff] }
 0x266   :  { %v6113_v54 = vadd.f32 %v981_v51, %v980_v50  ;;  %4831 = vrcp.f32 %v977_v0  ;;  %v4751_v61 = vmul.f32 -1.442695, %v1199_v58  ;;  %v6164_v0 = vld [vmem:[#allocation8 + $0xf0] sm:$0xff]  ;;  %v6192_v50 = vld [vmem:[#allocation8 + $0x88] sm:$0xff]  ;;  %v6194_v51 = vld [vmem:[#allocation8 + $0x98] sm:$0xff] }
 0x267   :  { %4833 = vpow2.f32 %v4750_v53  ;;  %v6200_v53 = vld [vmem:[#allocation8 + $0x90] sm:$0xff]  ;;  %v6206_v57 = vld [vmem:[#allocation8 + $0x78] sm:$0xff]  ;;  %v6210_v58 = vld [vmem:[#allocation8 + $0x60] sm:$0xff] }
 0x268   :  { %4835 = vtanh.f32 %v6113_v54 }
 0x269   :  { %4837 = vtanh.f32 %v1198_v60  ;;  %v6216_v60 = vld [vmem:[#allocation8 + $0x48] sm:$0xff] }
 0x26a   :  { %4839 = vpow2.f32 %v4751_v61  ;;  %v6218_v61 = vld [vmem:[#allocation8 + $0x58] sm:$0xff] }
 0x272   :  { %v4830_v62 = vpop.eup %4829 }
 0x273   :  { %v4832_v63 = vpop.eup %4831  ;;  %v1203_v1 = vadd.f32 1.0, %v4830_v62  ;;  %v6222_v62 = vld [vmem:[#allocation8 + $0x40] sm:$0xff] }
 0x274   :  { %v4834_v3 = vpop.eup %4833 }
 0x275   :  { %v4836_v4 = vpop.eup %4835  ;;  %4841 = vrcp.f32 %v1203_v1  ;;  %v1209_v6 = vadd.f32 1.0, %v4834_v3  ;;  %v6228_v1 = vld [vmem:[#allocation8 + $0x28] sm:$0xff]  ;;  %v6230_v3 = vld [vmem:[#allocation8 + $0x38] sm:$0xff] }
 0x276   :  { %v984_v8 = vmul.f32 %v4836_v4, %v4832_v63  ;;  %v4838_v9 = vpop.eup %4837  ;;  %v6224_v63 = vld [vmem:[#allocation8 + $0x50] sm:$0xff]  ;;  %v6234_v4 = vld [vmem:[#allocation8 + $0x20] sm:$0xff] }
 0x277   :  { %4843 = vrcp.f32 %v1209_v6  ;;  %v4840_v10 = vpop.eup %4839  ;;  %v6236_v6 = vld [vmem:[#allocation8 + $0x30] sm:$0xff] }
 0x278   :  { %985 = vst [vmem:[#allocation11] sm:$0xff] %v984_v8  ;;  %1416 = vmatprep.mubr.f32.mxu0 %v984_v8  ;;  %1487 = vmatprep.mubr.f32.mxu1 %v984_v8  ;;  %v1216_v14 = vadd.f32 1.0, %v4840_v10  ;;  %v6240_v8 = vld [vmem:[#allocation8 + $0x8] sm:$0xff]  ;;  %v6246_v10 = vld [vmem:[#allocation8] sm:$0xff] }
 0x27a   :  { %4845 = vrcp.f32 %v1216_v14  ;;  %v6266_v14 = vld [vmem:[#allocation9 + $0x1e0] sm:$0xff] }
 0x282   :  { %v4842_v11 = vpop.eup %4841 }
 0x283   :  { %v1220_v12 = vmul.f32 %v4842_v11, %v4838_v9  ;;  %v6242_v9 = vld [vmem:[#allocation8 + $0x18] sm:$0xff]  ;;  %v6250_v11 = vld [vmem:[#allocation8 + $0x10] sm:$0xff] }
 0x284   :  { %v4844_v13 = vpop.eup %4843 }
 0x285   :  { %v1219_v15 = vmul.f32 %v4844_v13, %v5837_v2  ;;  %v9318_v2 = vld [vmem:[#allocation159_spill] sm:$0xff] }
 0x286   :  { %v6262_v13 = vld [vmem:[#allocation9 + $0x1f8] sm:$0xff] }
 0x287   :  { %v6119_v17 = vadd.f32 %v1220_v12, %v1219_v15  ;;  %v4846_v18 = vpop.eup %4845  ;;  %v6260_v12 = vld [vmem:[#allocation9 + $0x1e8] sm:$0xff]  ;;  %v6268_v15 = vld [vmem:[#allocation9 + $0x1f0] sm:$0xff] }
 0x289   :  { %4847 = vtanh.f32 %v6119_v17 }
 0x296   :  { %v4848_v19 = vpop.eup %4847 }
 0x297   :  { %v6122_v21 = vmul.f32 %v4848_v19, %v4846_v18  ;;  %v6272_v18 = vld [vmem:[#allocation9 + $0x1c8] sm:$0xff]  ;;  %v6274_v19 = vld [vmem:[#allocation9 + $0x1d8] sm:$0xff] }
 0x299   :  { %1417 = vmatmul.mubr.f32.vlgmr.msra.gmra.mxu0 %v6122_v21  ;;  %1488 = vmatmul.mubr.f32.vlgmr.msra.gmra.mxu1 %v6122_v21 }
 0x29a   :  { %1589 = vmatpush1.msra.mxu0 %v5842_v42  ;;  %1660 = vmatpush1.msra.mxu1 %v5844_v35  ;;  %v9320_v42 = vld [vmem:[#allocation161_spill] sm:$0xff]  ;;  %v9321_v35 = vld [vmem:[#allocation162_spill] sm:$0xff] }
 0x29b   :  { %1590 = vmatprep.subr.mxu0 %v5846_v28  ;;  %1661 = vmatprep.subr.mxu1 %v5848_v27  ;;  %v9322_v28 = vld [vmem:[#allocation163_spill] sm:$0xff]  ;;  %v9323_v27 = vld [vmem:[#allocation164_spill] sm:$0xff] }
 0x29c   :  { %1591 = vmatpush1.msra.mxu0 %v5852_v47  ;;  %1662 = vmatpush1.msra.mxu1 %v5854_v36  ;;  %v9324_v47 = vld [vmem:[#allocation165_spill] sm:$0xff]  ;;  %v9325_v36 = vld [vmem:[#allocation166_spill] sm:$0xff] }
 0x29d   :  { %1592 = vmatprep.subr.mxu0 %v5858_v38  ;;  %1663 = vmatprep.subr.mxu1 %v5860_v43  ;;  %v9326_v38 = vld [vmem:[#allocation167_spill] sm:$0xff]  ;;  %v9327_v43 = vld [vmem:[#allocation168_spill] sm:$0xff] }
 0x29e   :  { %1593 = vmatpush1.msra.mxu0 %v5864_v34  ;;  %1664 = vmatpush1.msra.mxu1 %v9318_v2  ;;  %v9328_v34 = vld [vmem:[#allocation169_spill] sm:$0xff]  ;;  %v6280_v2 = vld [vmem:[#allocation9 + $0x1d0] sm:$0xff] }
 0x29f   :  { %1594 = vmatprep.subr.mxu0 %v9319_v22  ;;  %1665 = vmatprep.subr.mxu1 %v9320_v42  ;;  %9334 = vst [vmem:[#allocation20_spill] sm:$0xff] %v6280_v2  ;;  %v6284_v22 = vld [vmem:[#allocation9 + $0x1a8] sm:$0xff]  ;;  %v6286_v42 = vld [vmem:[#allocation9 + $0x1b8] sm:$0xff] }
 0x2a0   :  { %1595 = vmatpush1.msra.mxu0 %v9321_v35  ;;  %1666 = vmatpush1.msra.mxu1 %v9322_v28  ;;  %9335 = vst [vmem:[#allocation21_spill] sm:$0xff] %v6284_v22  ;;  %9336 = vst [vmem:[#allocation22_spill] sm:$0xff] %v6286_v42  ;;  %v6290_v35 = vld [vmem:[#allocation9 + $0x1a0] sm:$0xff]  ;;  %v6292_v28 = vld [vmem:[#allocation9 + $0x1b0] sm:$0xff] }
 0x2a1   :  { %1596 = vmatprep.subr.mxu0 %v9323_v27  ;;  %1667 = vmatprep.subr.mxu1 %v9324_v47  ;;  %9337 = vst [vmem:[#allocation23_spill] sm:$0xff] %v6290_v35  ;;  %9338 = vst [vmem:[#allocation24_spill] sm:$0xff] %v6292_v28  ;;  %v6296_v27 = vld [vmem:[#allocation9 + $0x188] sm:$0xff]  ;;  %v6298_v47 = vld [vmem:[#allocation9 + $0x198] sm:$0xff] }
 0x2a2   :  { %1597 = vmatpush1.msra.mxu0 %v9325_v36  ;;  %1668 = vmatpush1.msra.mxu1 %v9326_v38  ;;  %9339 = vst [vmem:[#allocation25_spill] sm:$0xff] %v6296_v27  ;;  %9340 = vst [vmem:[#allocation26_spill] sm:$0xff] %v6298_v47  ;;  %v6302_v36 = vld [vmem:[#allocation9 + $0x180] sm:$0xff]  ;;  %v6304_v38 = vld [vmem:[#allocation9 + $0x190] sm:$0xff] }
 0x2a3   :  { %1598 = vmatprep.subr.mxu0 %v9327_v43  ;;  %1669 = vmatprep.subr.mxu1 %v9328_v34  ;;  %9341 = vst [vmem:[#allocation27_spill] sm:$0xff] %v6302_v36  ;;  %9342 = vst [vmem:[#allocation28_spill] sm:$0xff] %v6304_v38  ;;  %v6308_v43 = vld [vmem:[#allocation9 + $0x168] sm:$0xff]  ;;  %v6310_v34 = vld [vmem:[#allocation9 + $0x178] sm:$0xff] }
 0x2a4   :  { %1599 = vmatpush1.msra.mxu0 %v9329_v23  ;;  %1670 = vmatpush1.msra.mxu1 %v9330_v24  ;;  %9343 = vst [vmem:[#allocation29_spill] sm:$0xff] %v6308_v43  ;;  %9344 = vst [vmem:[#allocation30_spill] sm:$0xff] %v6310_v34  ;;  %v6314_v23 = vld [vmem:[#allocation9 + $0x160] sm:$0xff]  ;;  %v6316_v24 = vld [vmem:[#allocation9 + $0x170] sm:$0xff] }
 0x2a5   :  { %1600 = vmatprep.subr.mxu0 %v9331_v25  ;;  %1671 = vmatprep.subr.mxu1 %v9332_v39  ;;  %9345 = vst [vmem:[#allocation31_spill] sm:$0xff] %v6314_v23  ;;  %9346 = vst [vmem:[#allocation32_spill] sm:$0xff] %v6316_v24  ;;  %v6320_v25 = vld [vmem:[#allocation9 + $0x148] sm:$0xff]  ;;  %v6322_v39 = vld [vmem:[#allocation9 + $0x158] sm:$0xff] }
 0x2a6   :  { %1601 = vmatpush1.msra.mxu0 %v9333_v32  ;;  %1672 = vmatpush1.msra.mxu1 %v5914_v30  ;;  %v6174_v30 = vld [vmem:[#allocation8 + $0xc0] sm:$0xff]  ;;  %9347 = vst [vmem:[#allocation33_spill] sm:$0xff] %v6320_v25  ;;  %9348 = vst [vmem:[#allocation34_spill] sm:$0xff] %v6322_v39 }
 0x2a7   :  { %1602 = vmatprep.subr.mxu0 %v5918_v56  ;;  %1673 = vmatprep.subr.mxu1 %v5920_v33  ;;  %v6176_v56 = vld [vmem:[#allocation8 + $0xd0] sm:$0xff]  ;;  %v6180_v33 = vld [vmem:[#allocation8 + $0xa8] sm:$0xff]  ;;  %v6326_v32 = vld [vmem:[#allocation9 + $0x140] sm:$0xff] }
 0x2a8   :  { %1603 = vmatpush1.msra.mxu0 %v6150_v44  ;;  %1674 = vmatpush1.msra.mxu1 %v6152_v26  ;;  %9349 = vst [vmem:[#allocation35_spill] sm:$0xff] %v6326_v32 }
 0x2a9   :  { %1604 = vmatprep.subr.mxu0 %v6156_v31  ;;  %1675 = vmatprep.subr.mxu1 %v6158_v41 }
 0x2aa   :  { %1605 = vmatpush1.msra.mxu0 %v6162_v40  ;;  %1676 = vmatpush1.msra.mxu1 %v6164_v0 }
 0x2ab   :  { %1606 = vmatprep.subr.mxu0 %v6168_v29  ;;  %1677 = vmatprep.subr.mxu1 %v6170_v37 }
 0x2ac   :  { %1607 = vmatpush1.msra.mxu0 %v6174_v30  ;;  %1678 = vmatpush1.msra.mxu1 %v6176_v56 }
 0x2ad   :  { %1608 = vmatprep.subr.mxu0 %v6180_v33  ;;  %1679 = vmatprep.subr.mxu1 %v6182_v46 }
 0x2ae   :  { %1609 = vmatpush1.msra.mxu0 %v6186_v48  ;;  %1680 = vmatpush1.msra.mxu1 %v6188_v49 }
 0x2af   :  { %1610 = vmatprep.subr.mxu0 %v6192_v50  ;;  %1681 = vmatprep.subr.mxu1 %v6194_v51 }
 0x2b0   :  { %1611 = vmatpush1.msra.mxu0 %v6198_v52  ;;  %1682 = vmatpush1.msra.mxu1 %v6200_v53 }
 0x2b1   :  { %1612 = vmatprep.subr.mxu0 %v6204_v55  ;;  %1683 = vmatprep.subr.mxu1 %v6206_v57 }
 0x2b2   :  { %1613 = vmatpush1.msra.mxu0 %v6210_v58  ;;  %1684 = vmatpush1.msra.mxu1 %v6212_v59 }
 0x2b3   :  { %1614 = vmatprep.subr.mxu0 %v6216_v60  ;;  %1685 = vmatprep.subr.mxu1 %v6218_v61 }
 0x2b4   :  { %1615 = vmatpush1.msra.mxu0 %v6222_v62  ;;  %1686 = vmatpush1.msra.mxu1 %v6224_v63 }
 0x2b5   :  { %1616 = vmatprep.subr.mxu0 %v6228_v1  ;;  %1687 = vmatprep.subr.mxu1 %v6230_v3 }
 0x2b6   :  { %1617 = vmatpush1.msra.mxu0 %v6234_v4  ;;  %1688 = vmatpush1.msra.mxu1 %v6236_v6 }
 0x2b7   :  { %1618 = vmatprep.subr.mxu0 %v6240_v8  ;;  %1689 = vmatprep.subr.mxu1 %v6242_v9 }
 0x2b8   :  { %1619 = vmatpush1.msra.mxu0 %v6246_v10  ;;  %1652 = vmatprep.mubr.f32.mxu0 %v9190_v45 }
 0x2b9   :  { %1690 = vmatpush1.msra.mxu1 %v6250_v11  ;;  %1723 = vmatprep.mubr.f32.mxu1 %v9190_v45 }
 0x2ba   :  { %1653 = vmatmul.mubr.f32.vlgmr.msra.gmra.mxu0 %v6122_v21  ;;  %1724 = vmatmul.mubr.f32.vlgmr.msra.gmra.mxu1 %v6122_v21  ;;  %v6278_v21 = vld [vmem:[#allocation9 + $0x1c0] sm:$0xff] }
 0x2bb   :  { %1886 = vmatprep.subr.mxu0 %v6260_v12  ;;  %1957 = vmatprep.subr.mxu1 %v6262_v13 }
 0x2bc   :  { %1887 = vmatpush1.msra.mxu0 %v6266_v14  ;;  %1958 = vmatpush1.msra.mxu1 %v6268_v15 }
 0x2bd   :  { %1888 = vmatprep.subr.mxu0 %v6272_v18  ;;  %1959 = vmatprep.subr.mxu1 %v6274_v19 }
 0x2be   :  { %1889 = vmatpush1.msra.mxu0 %v6278_v21  ;;  %1960 = vmatpush1.msra.mxu1 %v6280_v2 }
 0x2bf   :  { %1890 = vmatprep.subr.mxu0 %v6284_v22  ;;  %1961 = vmatprep.subr.mxu1 %v6286_v42 }
 0x2c0   :  { %1891 = vmatpush1.msra.mxu0 %v6290_v35  ;;  %1962 = vmatpush1.msra.mxu1 %v6292_v28 }
 0x2c1   :  { %1892 = vmatprep.subr.mxu0 %v6296_v27  ;;  %1963 = vmatprep.subr.mxu1 %v6298_v47  ;;  %v6570_v47 = vld [vmem:[#allocation9 + $0x2b8] sm:$0xff]  ;;  %v6586_v27 = vld [vmem:[#allocation9 + $0x280] sm:$0xff] }
 0x2c2   :  { %1893 = vmatpush1.msra.mxu0 %v6302_v36  ;;  %1964 = vmatpush1.msra.mxu1 %v6304_v38  ;;  %v6554_v38 = vld [vmem:[#allocation9 + $0x2f0] sm:$0xff]  ;;  %v6562_v36 = vld [vmem:[#allocation9 + $0x2c0] sm:$0xff]  ;;  %9432 = vst [vmem:[#allocation118_spill] sm:$0xff] %v6570_v47  ;;  %9437 = vst [vmem:[#allocation123_spill] sm:$0xff] %v6586_v27 }
 0x2c3   :  { %1894 = vmatprep.subr.mxu0 %v6308_v43  ;;  %1965 = vmatprep.subr.mxu1 %v6310_v34  ;;  %v6328_v43 = vld [vmem:[#allocation9 + $0x150] sm:$0xff]  ;;  %v6332_v34 = vld [vmem:[#allocation9 + $0x128] sm:$0xff]  ;;  %9426 = vst [vmem:[#allocation112_spill] sm:$0xff] %v6554_v38  ;;  %9429 = vst [vmem:[#allocation115_spill] sm:$0xff] %v6562_v36 }
 0x2c4   :  { %1895 = vmatpush1.msra.mxu0 %v6314_v23  ;;  %1966 = vmatpush1.msra.mxu1 %v6316_v24  ;;  %9350 = vst [vmem:[#allocation36_spill] sm:$0xff] %v6328_v43  ;;  %9351 = vst [vmem:[#allocation37_spill] sm:$0xff] %v6332_v34  ;;  %v6334_v23 = vld [vmem:[#allocation9 + $0x138] sm:$0xff]  ;;  %v6338_v24 = vld [vmem:[#allocation9 + $0x120] sm:$0xff] }
 0x2c5   :  { %1896 = vmatprep.subr.mxu0 %v6320_v25  ;;  %1967 = vmatprep.subr.mxu1 %v6322_v39  ;;  %9352 = vst [vmem:[#allocation38_spill] sm:$0xff] %v6334_v23  ;;  %9353 = vst [vmem:[#allocation39_spill] sm:$0xff] %v6338_v24  ;;  %v6340_v25 = vld [vmem:[#allocation9 + $0x130] sm:$0xff]  ;;  %v6344_v39 = vld [vmem:[#allocation9 + $0x108] sm:$0xff] }
 0x2c6   :  { %1897 = vmatpush1.msra.mxu0 %v6326_v32  ;;  %1968 = vmatpush1.msra.mxu1 %v6328_v43  ;;  %9354 = vst [vmem:[#allocation40_spill] sm:$0xff] %v6340_v25  ;;  %9355 = vst [vmem:[#allocation41_spill] sm:$0xff] %v6344_v39  ;;  %v6346_v32 = vld [vmem:[#allocation9 + $0x118] sm:$0xff]  ;;  %v6350_v43 = vld [vmem:[#allocation9 + $0x100] sm:$0xff] }
 0x2c7   :  { %1898 = vmatprep.subr.mxu0 %v6332_v34  ;;  %1969 = vmatprep.subr.mxu1 %v6334_v23  ;;  %9356 = vst [vmem:[#allocation42_spill] sm:$0xff] %v6346_v32  ;;  %9357 = vst [vmem:[#allocation43_spill] sm:$0xff] %v6350_v43  ;;  %v6352_v34 = vld [vmem:[#allocation9 + $0x110] sm:$0xff]  ;;  %v6356_v23 = vld [vmem:[#allocation9 + $0xe8] sm:$0xff] }
 0x2c8   :  { %1899 = vmatpush1.msra.mxu0 %v6338_v24  ;;  %1970 = vmatpush1.msra.mxu1 %v6340_v25  ;;  %9358 = vst [vmem:[#allocation44_spill] sm:$0xff] %v6352_v34  ;;  %9359 = vst [vmem:[#allocation45_spill] sm:$0xff] %v6356_v23  ;;  %v6358_v24 = vld [vmem:[#allocation9 + $0xf8] sm:$0xff]  ;;  %v6362_v25 = vld [vmem:[#allocation9 + $0xe0] sm:$0xff] }
 0x2c9   :  { %1900 = vmatprep.subr.mxu0 %v6344_v39  ;;  %1971 = vmatprep.subr.mxu1 %v6346_v32  ;;  %9360 = vst [vmem:[#allocation46_spill] sm:$0xff] %v6358_v24  ;;  %9361 = vst [vmem:[#allocation47_spill] sm:$0xff] %v6362_v25  ;;  %v6364_v39 = vld [vmem:[#allocation9 + $0xf0] sm:$0xff]  ;;  %v6368_v32 = vld [vmem:[#allocation9 + $0xc8] sm:$0xff] }
 0x2ca   :  { %1901 = vmatpush1.msra.mxu0 %v6350_v43  ;;  %1972 = vmatpush1.msra.mxu1 %v6352_v34  ;;  %9362 = vst [vmem:[#allocation48_spill] sm:$0xff] %v6364_v39  ;;  %9363 = vst [vmem:[#allocation49_spill] sm:$0xff] %v6368_v32  ;;  %v6370_v43 = vld [vmem:[#allocation9 + $0xd8] sm:$0xff]  ;;  %v6374_v34 = vld [vmem:[#allocation9 + $0xc0] sm:$0xff] }
 0x2cb   :  { %1902 = vmatprep.subr.mxu0 %v6356_v23  ;;  %1973 = vmatprep.subr.mxu1 %v6358_v24  ;;  %9364 = vst [vmem:[#allocation50_spill] sm:$0xff] %v6370_v43  ;;  %9365 = vst [vmem:[#allocation51_spill] sm:$0xff] %v6374_v34  ;;  %v6376_v23 = vld [vmem:[#allocation9 + $0xd0] sm:$0xff]  ;;  %v6380_v24 = vld [vmem:[#allocation9 + $0xa8] sm:$0xff] }
 0x2cc   :  { %1903 = vmatpush1.msra.mxu0 %v6362_v25  ;;  %1974 = vmatpush1.msra.mxu1 %v6364_v39  ;;  %9366 = vst [vmem:[#allocation52_spill] sm:$0xff] %v6376_v23  ;;  %9367 = vst [vmem:[#allocation53_spill] sm:$0xff] %v6380_v24  ;;  %v6382_v25 = vld [vmem:[#allocation9 + $0xb8] sm:$0xff]  ;;  %v6386_v39 = vld [vmem:[#allocation9 + $0xa0] sm:$0xff] }
 0x2cd   :  { %1904 = vmatprep.subr.mxu0 %v6368_v32  ;;  %1975 = vmatprep.subr.mxu1 %v6370_v43  ;;  %9368 = vst [vmem:[#allocation54_spill] sm:$0xff] %v6382_v25  ;;  %9369 = vst [vmem:[#allocation55_spill] sm:$0xff] %v6386_v39  ;;  %v6388_v32 = vld [vmem:[#allocation9 + $0xb0] sm:$0xff]  ;;  %v6392_v43 = vld [vmem:[#allocation9 + $0x88] sm:$0xff] }
 0x2ce   :  { %1905 = vmatpush1.msra.mxu0 %v6374_v34  ;;  %1976 = vmatpush1.msra.mxu1 %v6376_v23  ;;  %9370 = vst [vmem:[#allocation56_spill] sm:$0xff] %v6388_v32  ;;  %9371 = vst [vmem:[#allocation57_spill] sm:$0xff] %v6392_v43  ;;  %v6394_v34 = vld [vmem:[#allocation9 + $0x98] sm:$0xff]  ;;  %v6398_v23 = vld [vmem:[#allocation9 + $0x80] sm:$0xff] }
 0x2cf   :  { %1906 = vmatprep.subr.mxu0 %v6380_v24  ;;  %1977 = vmatprep.subr.mxu1 %v6382_v25  ;;  %9372 = vst [vmem:[#allocation58_spill] sm:$0xff] %v6394_v34  ;;  %9373 = vst [vmem:[#allocation59_spill] sm:$0xff] %v6398_v23  ;;  %v6400_v24 = vld [vmem:[#allocation9 + $0x90] sm:$0xff]  ;;  %v6404_v25 = vld [vmem:[#allocation9 + $0x68] sm:$0xff] }
 0x2d0   :  { %1907 = vmatpush1.msra.mxu0 %v6386_v39  ;;  %1978 = vmatpush1.msra.mxu1 %v6388_v32  ;;  %9374 = vst [vmem:[#allocation60_spill] sm:$0xff] %v6400_v24  ;;  %9375 = vst [vmem:[#allocation61_spill] sm:$0xff] %v6404_v25  ;;  %v6406_v39 = vld [vmem:[#allocation9 + $0x78] sm:$0xff]  ;;  %v6410_v32 = vld [vmem:[#allocation9 + $0x60] sm:$0xff] }
 0x2d1   :  { %1908 = vmatprep.subr.mxu0 %v6392_v43  ;;  %1979 = vmatprep.subr.mxu1 %v6394_v34  ;;  %9376 = vst [vmem:[#allocation62_spill] sm:$0xff] %v6406_v39  ;;  %9377 = vst [vmem:[#allocation63_spill] sm:$0xff] %v6410_v32  ;;  %v6412_v43 = vld [vmem:[#allocation9 + $0x70] sm:$0xff]  ;;  %v6416_v34 = vld [vmem:[#allocation9 + $0x48] sm:$0xff] }
 0x2d2   :  { %1909 = vmatpush1.msra.mxu0 %v6398_v23  ;;  %1980 = vmatpush1.msra.mxu1 %v6400_v24  ;;  %9378 = vst [vmem:[#allocation64_spill] sm:$0xff] %v6412_v43  ;;  %9379 = vst [vmem:[#allocation65_spill] sm:$0xff] %v6416_v34  ;;  %v6418_v23 = vld [vmem:[#allocation9 + $0x58] sm:$0xff]  ;;  %v6422_v24 = vld [vmem:[#allocation9 + $0x40] sm:$0xff] }
 0x2d3   :  { %1910 = vmatprep.subr.mxu0 %v6404_v25  ;;  %1981 = vmatprep.subr.mxu1 %v6406_v39  ;;  %9380 = vst [vmem:[#allocation66_spill] sm:$0xff] %v6418_v23  ;;  %9381 = vst [vmem:[#allocation67_spill] sm:$0xff] %v6422_v24  ;;  %v6424_v25 = vld [vmem:[#allocation9 + $0x50] sm:$0xff]  ;;  %v6428_v39 = vld [vmem:[#allocation9 + $0x28] sm:$0xff] }
 0x2d4   :  { %1911 = vmatpush1.msra.mxu0 %v6410_v32  ;;  %1982 = vmatpush1.msra.mxu1 %v6412_v43  ;;  %9382 = vst [vmem:[#allocation68_spill] sm:$0xff] %v6424_v25  ;;  %9383 = vst [vmem:[#allocation69_spill] sm:$0xff] %v6428_v39  ;;  %v6430_v32 = vld [vmem:[#allocation9 + $0x38] sm:$0xff]  ;;  %v6434_v43 = vld [vmem:[#allocation9 + $0x20] sm:$0xff] }
 0x2d5   :  { %1912 = vmatprep.subr.mxu0 %v6416_v34  ;;  %1983 = vmatprep.subr.mxu1 %v6418_v23  ;;  %9384 = vst [vmem:[#allocation70_spill] sm:$0xff] %v6430_v32  ;;  %9385 = vst [vmem:[#allocation71_spill] sm:$0xff] %v6434_v43  ;;  %v6436_v34 = vld [vmem:[#allocation9 + $0x30] sm:$0xff]  ;;  %v6440_v23 = vld [vmem:[#allocation9 + $0x8] sm:$0xff] }
 0x2d6   :  { %1913 = vmatpush1.msra.mxu0 %v6422_v24  ;;  %1984 = vmatpush1.msra.mxu1 %v6424_v25  ;;  %9386 = vst [vmem:[#allocation72_spill] sm:$0xff] %v6436_v34  ;;  %9387 = vst [vmem:[#allocation73_spill] sm:$0xff] %v6440_v23  ;;  %v6442_v24 = vld [vmem:[#allocation9 + $0x18] sm:$0xff]  ;;  %v6446_v25 = vld [vmem:[#allocation9] sm:$0xff] }
 0x2d7   :  { %1914 = vmatprep.subr.mxu0 %v6428_v39  ;;  %1985 = vmatprep.subr.mxu1 %v6430_v32  ;;  %9388 = vst [vmem:[#allocation74_spill] sm:$0xff] %v6442_v24  ;;  %9389 = vst [vmem:[#allocation75_spill] sm:$0xff] %v6446_v25  ;;  %v6448_v39 = vld [vmem:[#allocation9 + $0x10] sm:$0xff]  ;;  %v6452_v32 = vld [vmem:[#allocation9 + $0x3e8] sm:$0xff] }
 0x2d8   :  { %1915 = vmatpush1.msra.mxu0 %v6434_v43  ;;  %1986 = vmatpush1.msra.mxu1 %v6436_v34  ;;  %9390 = vst [vmem:[#allocation76_spill] sm:$0xff] %v6448_v39  ;;  %9391 = vst [vmem:[#allocation77_spill] sm:$0xff] %v6452_v32  ;;  %v6454_v43 = vld [vmem:[#allocation9 + $0x3f8] sm:$0xff]  ;;  %v6458_v34 = vld [vmem:[#allocation9 + $0x3e0] sm:$0xff] }
 0x2d9   :  { %1916 = vmatprep.subr.mxu0 %v6440_v23  ;;  %1987 = vmatprep.subr.mxu1 %v6442_v24  ;;  %9392 = vst [vmem:[#allocation78_spill] sm:$0xff] %v6454_v43  ;;  %9393 = vst [vmem:[#allocation79_spill] sm:$0xff] %v6458_v34  ;;  %v6460_v23 = vld [vmem:[#allocation9 + $0x3f0] sm:$0xff]  ;;  %v6464_v24 = vld [vmem:[#allocation9 + $0x3c8] sm:$0xff] }
 0x2da   :  { %1917 = vmatpush1.msra.mxu0 %v6446_v25  ;;  %1988 = vmatpush1.msra.mxu1 %v6448_v39  ;;  %9394 = vst [vmem:[#allocation80_spill] sm:$0xff] %v6460_v23  ;;  %9395 = vst [vmem:[#allocation81_spill] sm:$0xff] %v6464_v24  ;;  %v6466_v25 = vld [vmem:[#allocation9 + $0x3d8] sm:$0xff]  ;;  %v6470_v39 = vld [vmem:[#allocation9 + $0x3c0] sm:$0xff] }
 0x2db   :  { %1918 = vmatprep.subr.mxu0 %v6452_v32  ;;  %1989 = vmatprep.subr.mxu1 %v6454_v43  ;;  %9396 = vst [vmem:[#allocation82_spill] sm:$0xff] %v6466_v25  ;;  %9397 = vst [vmem:[#allocation83_spill] sm:$0xff] %v6470_v39  ;;  %v6472_v32 = vld [vmem:[#allocation9 + $0x3d0] sm:$0xff]  ;;  %v6476_v43 = vld [vmem:[#allocation9 + $0x3a8] sm:$0xff] }
 0x2dc   :  { %1919 = vmatpush2.msra.mxu0 %v6458_v34  ;;  %1990 = vmatpush2.msra.mxu1 %v6460_v23  ;;  %9398 = vst [vmem:[#allocation84_spill] sm:$0xff] %v6472_v32  ;;  %9399 = vst [vmem:[#allocation85_spill] sm:$0xff] %v6476_v43  ;;  %v6478_v34 = vld [vmem:[#allocation9 + $0x3b8] sm:$0xff]  ;;  %v6482_v23 = vld [vmem:[#allocation9 + $0x3a0] sm:$0xff] }
 0x2dd   :  { %1920 = vmatprep.subr.mxu0 %v6464_v24  ;;  %1991 = vmatprep.subr.mxu1 %v6466_v25  ;;  %9400 = vst [vmem:[#allocation86_spill] sm:$0xff] %v6478_v34  ;;  %9401 = vst [vmem:[#allocation87_spill] sm:$0xff] %v6482_v23  ;;  %v6484_v24 = vld [vmem:[#allocation9 + $0x3b0] sm:$0xff]  ;;  %v6488_v25 = vld [vmem:[#allocation9 + $0x388] sm:$0xff] }
 0x2de   :  { %1921 = vmatpush2.msra.mxu0 %v6470_v39  ;;  %1992 = vmatpush2.msra.mxu1 %v6472_v32  ;;  %9402 = vst [vmem:[#allocation88_spill] sm:$0xff] %v6484_v24  ;;  %9403 = vst [vmem:[#allocation89_spill] sm:$0xff] %v6488_v25  ;;  %v6490_v39 = vld [vmem:[#allocation9 + $0x398] sm:$0xff]  ;;  %v6494_v32 = vld [vmem:[#allocation9 + $0x380] sm:$0xff] }
 0x2df   :  { %1922 = vmatprep.subr.mxu0 %v6476_v43  ;;  %1993 = vmatprep.subr.mxu1 %v6478_v34  ;;  %9404 = vst [vmem:[#allocation90_spill] sm:$0xff] %v6490_v39  ;;  %9405 = vst [vmem:[#allocation91_spill] sm:$0xff] %v6494_v32  ;;  %v6496_v43 = vld [vmem:[#allocation9 + $0x390] sm:$0xff]  ;;  %v6500_v34 = vld [vmem:[#allocation9 + $0x368] sm:$0xff] }
 0x2e0   :  { %1923 = vmatpush2.msra.mxu0 %v6482_v23  ;;  %1994 = vmatpush2.msra.mxu1 %v6484_v24  ;;  %9406 = vst [vmem:[#allocation92_spill] sm:$0xff] %v6496_v43  ;;  %9407 = vst [vmem:[#allocation93_spill] sm:$0xff] %v6500_v34  ;;  %v6502_v23 = vld [vmem:[#allocation9 + $0x378] sm:$0xff]  ;;  %v6506_v24 = vld [vmem:[#allocation9 + $0x360] sm:$0xff] }
 0x2e1   :  { %1924 = vmatprep.subr.mxu0 %v6488_v25  ;;  %1995 = vmatprep.subr.mxu1 %v6490_v39  ;;  %9408 = vst [vmem:[#allocation94_spill] sm:$0xff] %v6502_v23  ;;  %9409 = vst [vmem:[#allocation95_spill] sm:$0xff] %v6506_v24  ;;  %v6508_v25 = vld [vmem:[#allocation9 + $0x370] sm:$0xff]  ;;  %v6512_v39 = vld [vmem:[#allocation9 + $0x348] sm:$0xff] }
 0x2e2   :  { %1925 = vmatpush2.msra.mxu0 %v6494_v32  ;;  %1996 = vmatpush2.msra.mxu1 %v6496_v43  ;;  %9410 = vst [vmem:[#allocation96_spill] sm:$0xff] %v6508_v25  ;;  %9411 = vst [vmem:[#allocation97_spill] sm:$0xff] %v6512_v39  ;;  %v6514_v32 = vld [vmem:[#allocation9 + $0x358] sm:$0xff]  ;;  %v6518_v43 = vld [vmem:[#allocation9 + $0x340] sm:$0xff] }
 0x2e3   :  { %1926 = vmatprep.subr.mxu0 %v6500_v34  ;;  %1997 = vmatprep.subr.mxu1 %v6502_v23  ;;  %9412 = vst [vmem:[#allocation98_spill] sm:$0xff] %v6514_v32  ;;  %9413 = vst [vmem:[#allocation99_spill] sm:$0xff] %v6518_v43  ;;  %v6520_v34 = vld [vmem:[#allocation9 + $0x350] sm:$0xff]  ;;  %v6524_v23 = vld [vmem:[#allocation9 + $0x328] sm:$0xff] }
 0x2e4   :  { %1927 = vmatpush2.msra.mxu0 %v6506_v24  ;;  %1998 = vmatpush2.msra.mxu1 %v6508_v25  ;;  %9414 = vst [vmem:[#allocation100_spill] sm:$0xff] %v6520_v34  ;;  %9415 = vst [vmem:[#allocation101_spill] sm:$0xff] %v6524_v23  ;;  %v6526_v24 = vld [vmem:[#allocation9 + $0x338] sm:$0xff]  ;;  %v6530_v25 = vld [vmem:[#allocation9 + $0x320] sm:$0xff] }
 0x2e5   :  { %1928 = vmatprep.subr.mxu0 %v6512_v39  ;;  %1999 = vmatprep.subr.mxu1 %v6514_v32  ;;  %9416 = vst [vmem:[#allocation102_spill] sm:$0xff] %v6526_v24  ;;  %9417 = vst [vmem:[#allocation103_spill] sm:$0xff] %v6530_v25  ;;  %v6532_v39 = vld [vmem:[#allocation9 + $0x330] sm:$0xff]  ;;  %v6536_v32 = vld [vmem:[#allocation9 + $0x308] sm:$0xff] }
 0x2e6   :  { %1929 = vmatpush2.msra.mxu0 %v6518_v43  ;;  %2000 = vmatpush2.msra.mxu1 %v6520_v34  ;;  %9418 = vst [vmem:[#allocation104_spill] sm:$0xff] %v6532_v39  ;;  %9419 = vst [vmem:[#allocation105_spill] sm:$0xff] %v6536_v32  ;;  %v6538_v43 = vld [vmem:[#allocation9 + $0x318] sm:$0xff]  ;;  %v6542_v34 = vld [vmem:[#allocation9 + $0x300] sm:$0xff] }
 0x2e7   :  { %1930 = vmatprep.subr.mxu0 %v6524_v23  ;;  %2001 = vmatprep.subr.mxu1 %v6526_v24  ;;  %9420 = vst [vmem:[#allocation106_spill] sm:$0xff] %v6538_v43  ;;  %9421 = vst [vmem:[#allocation107_spill] sm:$0xff] %v6542_v34  ;;  %v6544_v23 = vld [vmem:[#allocation9 + $0x310] sm:$0xff]  ;;  %v6546_v24 = vld [vmem:[#allocation9 + $0x2e8] sm:$0xff] }
 0x2e8   :  { %1931 = vmatpush2.msra.mxu0 %v6530_v25  ;;  %2002 = vmatpush2.msra.mxu1 %v6532_v39  ;;  %9422 = vst [vmem:[#allocation108_spill] sm:$0xff] %v6544_v23  ;;  %9423 = vst [vmem:[#allocation109_spill] sm:$0xff] %v6546_v24  ;;  %v6550_v25 = vld [vmem:[#allocation9 + $0x2f8] sm:$0xff]  ;;  %v6552_v39 = vld [vmem:[#allocation9 + $0x2e0] sm:$0xff] }
 0x2e9   :  { %1932 = vmatprep.subr.mxu0 %v6536_v32  ;;  %2003 = vmatprep.subr.mxu1 %v6538_v43  ;;  %9424 = vst [vmem:[#allocation110_spill] sm:$0xff] %v6550_v25  ;;  %9425 = vst [vmem:[#allocation111_spill] sm:$0xff] %v6552_v39  ;;  %v6558_v43 = vld [vmem:[#allocation9 + $0x2c8] sm:$0xff]  ;;  %v6560_v32 = vld [vmem:[#allocation9 + $0x2d8] sm:$0xff] }
 0x2ea   :  { %1933 = vmatpush2.msra.mxu0 %v6542_v34  ;;  %2004 = vmatpush2.msra.mxu1 %v6544_v23  ;;  %9427 = vst [vmem:[#allocation113_spill] sm:$0xff] %v6558_v43  ;;  %9428 = vst [vmem:[#allocation114_spill] sm:$0xff] %v6560_v32  ;;  %v6566_v23 = vld [vmem:[#allocation9 + $0x2d0] sm:$0xff]  ;;  %v6568_v34 = vld [vmem:[#allocation9 + $0x2a8] sm:$0xff] }
 0x2eb   :  { %1934 = vmatprep.subr.mxu0 %v6546_v24  ;;  %2005 = vmatprep.subr.mxu1 %v6550_v25  ;;  %9430 = vst [vmem:[#allocation116_spill] sm:$0xff] %v6566_v23  ;;  %9431 = vst [vmem:[#allocation117_spill] sm:$0xff] %v6568_v34  ;;  %v6574_v25 = vld [vmem:[#allocation9 + $0x2a0] sm:$0xff]  ;;  %v6576_v24 = vld [vmem:[#allocation9 + $0x2b0] sm:$0xff] }
 0x2ec   :  { %1935 = vmatpush2.msra.mxu0 %v6552_v39  ;;  %2006 = vmatpush2.msra.mxu1 %v6554_v38  ;;  %9433 = vst [vmem:[#allocation119_spill] sm:$0xff] %v6574_v25  ;;  %9434 = vst [vmem:[#allocation120_spill] sm:$0xff] %v6576_v24  ;;  %v6580_v39 = vld [vmem:[#allocation9 + $0x288] sm:$0xff]  ;;  %v6582_v38 = vld [vmem:[#allocation9 + $0x298] sm:$0xff] }
 0x2ed   :  { %1936 = vmatprep.subr.mxu0 %v6558_v43  ;;  %2007 = vmatprep.subr.mxu1 %v6560_v32  ;;  %9435 = vst [vmem:[#allocation121_spill] sm:$0xff] %v6580_v39  ;;  %9436 = vst [vmem:[#allocation122_spill] sm:$0xff] %v6582_v38  ;;  %v6588_v43 = vld [vmem:[#allocation9 + $0x290] sm:$0xff]  ;;  %v6592_v32 = vld [vmem:[#allocation9 + $0x268] sm:$0xff] }
 0x2ee   :  { %1937 = vmatpush2.msra.mxu0 %v6562_v36  ;;  %2008 = vmatpush2.msra.mxu1 %v6566_v23  ;;  %9438 = vst [vmem:[#allocation124_spill] sm:$0xff] %v6588_v43  ;;  %9439 = vst [vmem:[#allocation125_spill] sm:$0xff] %v6592_v32  ;;  %v6594_v36 = vld [vmem:[#allocation9 + $0x278] sm:$0xff]  ;;  %v6598_v23 = vld [vmem:[#allocation9 + $0x260] sm:$0xff] }
 0x2ef   :  { %1938 = vmatprep.subr.mxu0 %v6568_v34  ;;  %2009 = vmatprep.subr.mxu1 %v6570_v47  ;;  %9440 = vst [vmem:[#allocation126_spill] sm:$0xff] %v6594_v36  ;;  %9441 = vst [vmem:[#allocation127_spill] sm:$0xff] %v6598_v23  ;;  %v6600_v34 = vld [vmem:[#allocation9 + $0x270] sm:$0xff]  ;;  %v6604_v47 = vld [vmem:[#allocation9 + $0x248] sm:$0xff] }
 0x2f0   :  { %1939 = vmatpush2.msra.mxu0 %v6574_v25  ;;  %2010 = vmatpush2.msra.mxu1 %v6576_v24  ;;  %9442 = vst [vmem:[#allocation128_spill] sm:$0xff] %v6600_v34  ;;  %9443 = vst [vmem:[#allocation129_spill] sm:$0xff] %v6604_v47  ;;  %v6606_v25 = vld [vmem:[#allocation9 + $0x258] sm:$0xff]  ;;  %v6610_v24 = vld [vmem:[#allocation9 + $0x240] sm:$0xff] }
 0x2f1   :  { %1940 = vmatprep.subr.mxu0 %v6580_v39  ;;  %2011 = vmatprep.subr.mxu1 %v6582_v38  ;;  %9444 = vst [vmem:[#allocation130_spill] sm:$0xff] %v6606_v25  ;;  %9445 = vst [vmem:[#allocation131_spill] sm:$0xff] %v6610_v24  ;;  %v6612_v39 = vld [vmem:[#allocation9 + $0x250] sm:$0xff]  ;;  %v6616_v38 = vld [vmem:[#allocation9 + $0x228] sm:$0xff] }
 0x2f2   :  { %1941 = vmatpush2.msra.mxu0 %v6586_v27  ;;  %2012 = vmatpush2.msra.mxu1 %v6588_v43  ;;  %9446 = vst [vmem:[#allocation133_spill] sm:$0xff] %v6612_v39  ;;  %9447 = vst [vmem:[#allocation134_spill] sm:$0xff] %v6616_v38  ;;  %v6618_v27 = vld [vmem:[#allocation9 + $0x238] sm:$0xff]  ;;  %v6622_v43 = vld [vmem:[#allocation9 + $0x220] sm:$0xff] }
 0x2f3   :  { %1942 = vmatprep.subr.mxu0 %v6592_v32  ;;  %2013 = vmatprep.subr.mxu1 %v6594_v36  ;;  %9448 = vst [vmem:[#allocation132_spill] sm:$0xff] %v6618_v27  ;;  %9449 = vst [vmem:[#allocation159_spill] sm:$0xff] %v6622_v43  ;;  %v6624_v32 = vld [vmem:[#allocation9 + $0x230] sm:$0xff]  ;;  %v6628_v36 = vld [vmem:[#allocation9 + $0x208] sm:$0xff] }
 0x2f4   :  { %1943 = vmatpush2.msra.mxu0 %v6598_v23  ;;  %2014 = vmatpush2.msra.mxu1 %v6600_v34  ;;  %9450 = vst [vmem:[#allocation160_spill] sm:$0xff] %v6624_v32  ;;  %9451 = vst [vmem:[#allocation161_spill] sm:$0xff] %v6628_v36  ;;  %v6630_v23 = vld [vmem:[#allocation9 + $0x218] sm:$0xff]  ;;  %v6634_v34 = vld [vmem:[#allocation9 + $0x200] sm:$0xff] }
 0x2f5   :  { %1944 = vmatprep.subr.mxu0 %v6604_v47  ;;  %2015 = vmatprep.subr.mxu1 %v6606_v25  ;;  %9452 = vst [vmem:[#allocation162_spill] sm:$0xff] %v6630_v23  ;;  %9453 = vst [vmem:[#allocation163_spill] sm:$0xff] %v6634_v34  ;;  %v6636_v47 = vld [vmem:[#allocation9 + $0x210] sm:$0xff]  ;;  %v6640_v25 = vld [vmem:[#allocation8 + $0x1e8] sm:$0xff] }
 0x2f6   :  { %1945 = vmatpush2.msra.mxu0 %v6610_v24  ;;  %2016 = vmatpush2.msra.mxu1 %v6612_v39  ;;  %9454 = vst [vmem:[#allocation164_spill] sm:$0xff] %v6636_v47  ;;  %9455 = vst [vmem:[#allocation165_spill] sm:$0xff] %v6640_v25  ;;  %v6642_v24 = vld [vmem:[#allocation8 + $0x1f8] sm:$0xff] }
 0x2f7   :  { %1946 = vmatprep.subr.mxu0 %v6616_v38  ;;  %2017 = vmatprep.subr.mxu1 %v6618_v27  ;;  %9456 = vst [vmem:[#allocation166_spill] sm:$0xff] %v6642_v24 }
 0x2f8   :  { %1947 = vmatpush2.msra.mxu0 %v6622_v43  ;;  %2018 = vmatpush2.msra.mxu1 %v6624_v32 }
 0x2f9   :  { %1948 = vmatprep.subr.mxu0 %v6628_v36  ;;  %2019 = vmatprep.subr.mxu1 %v6630_v23 }
 0x2fa   :  { %1949 = vmatpush2.msra.mxu0 %v6634_v34  ;;  %2020 = vmatpush2.msra.mxu1 %v6636_v47 }
 0x2fb   :  { %2122 = vmatprep.subr.mxu0 %v6640_v25  ;;  %2193 = vmatprep.subr.mxu1 %v6642_v24 }
 0x359   :  { %v1418_v27 = vpop.f32.mrf.mxu0  ;;  %v1489_v28 = vpop.f32.mrf.mxu1 }
 0x35a   :  { %v1419_v43 = vadd.f32 %v1418_v27, %v6093_v5  ;;  %v1490_v25 = vadd.f32 %v1489_v28, %v6108_v20 }
 0x35b   :  { %v1420_v32 = vpop.f32.mrf.mxu0  ;;  %v1491_v23 = vpop.f32.mrf.mxu1 }
 0x35c   :  { %v4752_v38 = vmul.f32 -1.442695, %v1419_v43  ;;  %v1421_v39 = vadd.f32 %v1420_v32, %v6097_v7  ;;  %v1492_v34 = vadd.f32 %v1491_v23, %v6103_v16  ;;  %v9457_v7 = vld [vmem:[#allocation135_spill] sm:$0xff] }
 0x35e   :  { %4849 = vpow2.f32 %v4752_v38  ;;  %v4753_v36 = vmul.f32 -1.442695, %v1421_v39  ;;  %v4754_v35 = vmul.f32 -1.442695, %v1492_v34  ;;  %v9458_v34 = vld [vmem:[#allocation137_spill] sm:$0xff] }
 0x360   :  { %4851 = vpow2.f32 %v4753_v36 }
 0x361   :  { %4853 = vpow2.f32 %v4754_v35 }
 0x36b   :  { %v4850_v47 = vpop.eup %4849 }
 0x36c   :  { %v1497_v42 = vadd.f32 1.0, %v4850_v47 }
 0x36d   :  { %v4852_v24 = vpop.eup %4851 }
 0x36e   :  { %4855 = vrcp.f32 %v1497_v42  ;;  %v1503_v27 = vadd.f32 1.0, %v4852_v24  ;;  %v4854_v43 = vpop.eup %4853 }
 0x36f   :  { %4857 = vtanh.f32 %v1490_v25  ;;  %v1510_v47 = vadd.f32 1.0, %v4854_v43 }
 0x370   :  { %4859 = vrcp.f32 %v1503_v27 }
 0x37a   :  { %v1654_v32 = vpop.f32.mrf.mxu0  ;;  %v1725_v42 = vpop.f32.mrf.mxu1 }
 0x37b   :  { %v4856_v38 = vpop.eup %4855  ;;  %v1730_v39 = vadd.f32 %v1654_v32, %v9457_v7  ;;  %v9459_v7 = vld [vmem:[#allocation138_spill] sm:$0xff]  ;;  %v9460_v32 = vld [vmem:[#allocation136_spill] sm:$0xff] }
 0x37c   :  { %v4858_v36 = vpop.eup %4857  ;;  %v1656_v5 = vpop.f32.mrf.mxu0 }
 0x37d   :  { %v4860_v22 = vpop.eup %4859  ;;  %v4755_v23 = vmul.f32 -1.442695, %v1730_v39  ;;  %v1731_v16 = vadd.f32 %v1656_v5, %v9458_v34  ;;  %v1514_v2 = vmul.f32 %v4858_v36, %v4856_v38  ;;  %v1727_v25 = vpop.f32.mrf.mxu1  ;;  %v1732_v39 = vadd.f32 %v1725_v42, %v9460_v32  ;;  %v6668_v32 = vld [vmem:[#allocation8 + $0x1e0] sm:$0xff] }
 0x37e   :  { %v1513_v28 = vmul.f32 %v4860_v22, %v6113_v54  ;;  %v1733_v27 = vadd.f32 %v1727_v25, %v9459_v7 }
 0x37f   :  { %4861 = vpow2.f32 %v4755_v23  ;;  %v4756_v35 = vmul.f32 -1.442695, %v1731_v16 }
 0x380   :  { %v6657_v24 = vadd.f32 %v1514_v2, %v1513_v28  ;;  %v4757_v20 = vmul.f32 -1.442695, %v1733_v27 }
 0x381   :  { %4863 = vpow2.f32 %v4756_v35 }
 0x382   :  { %4865 = vrcp.f32 %v1510_v47 }
 0x383   :  { %4867 = vtanh.f32 %v6657_v24 }
 0x384   :  { %4869 = vtanh.f32 %v1732_v39  ;;  %v6670_v39 = vld [vmem:[#allocation8 + $0x1f0] sm:$0xff] }
 0x385   :  { %4871 = vpow2.f32 %v4757_v20 }
 0x38c   :  { %v4862_v5 = vpop.eup %4861 }
 0x38d   :  { %v1737_v38 = vadd.f32 1.0, %v4862_v5  ;;  %v6672_v5 = vld [vmem:[#allocation8 + $0x1c8] sm:$0xff] }
 0x38e   :  { %v4864_v54 = vpop.eup %4863 }
 0x38f   :  { %v4866_v22 = vpop.eup %4865  ;;  %4873 = vrcp.f32 %v1737_v38  ;;  %v1743_v16 = vadd.f32 1.0, %v4864_v54  ;;  %v6674_v38 = vld [vmem:[#allocation8 + $0x1d8] sm:$0xff]  ;;  %v6680_v54 = vld [vmem:[#allocation8 + $0x1d0] sm:$0xff] }
 0x390   :  { %v4868_v2 = vpop.eup %4867 }
 0x391   :  { %4875 = vrcp.f32 %v1743_v16  ;;  %v1517_v43 = vmul.f32 %v4868_v2, %v4866_v22  ;;  %v4870_v36 = vpop.eup %4869  ;;  %v6684_v22 = vld [vmem:[#allocation8 + $0x1a8] sm:$0xff]  ;;  %v6686_v16 = vld [vmem:[#allocation8 + $0x1b8] sm:$0xff]  ;;  %v6690_v2 = vld [vmem:[#allocation8 + $0x1a0] sm:$0xff] }
 0x392   :  { %v4872_v23 = vpop.eup %4871  ;;  %9461 = vst [vmem:[#allocation167_spill] sm:$0xff] %v6690_v2 }
 0x393   :  { %1519 = vst [vmem:[#allocation11 + $0x8] sm:$0xff] %v1517_v43  ;;  %1950 = vmatprep.mubr.f32.mxu0 %v1517_v43  ;;  %2021 = vmatprep.mubr.f32.mxu1 %v1517_v43  ;;  %v1750_v42 = vadd.f32 1.0, %v4872_v23  ;;  %v6692_v43 = vld [vmem:[#allocation8 + $0x1b0] sm:$0xff]  ;;  %v6698_v23 = vld [vmem:[#allocation8 + $0x198] sm:$0xff] }
 0x394   :  { %9462 = vst [vmem:[#allocation168_spill] sm:$0xff] %v6692_v43  ;;  %9464 = vst [vmem:[#allocation170_spill] sm:$0xff] %v6698_v23 }
 0x395   :  { %4877 = vrcp.f32 %v1750_v42  ;;  %v6710_v42 = vld [vmem:[#allocation8 + $0x178] sm:$0xff] }
 0x396   :  { %9468 = vst [vmem:[#allocation174_spill] sm:$0xff] %v6710_v42 }
 0x39c   :  { %v4874_v34 = vpop.eup %4873 }
 0x39d   :  { %v1754_v28 = vmul.f32 %v4874_v34, %v4870_v36  ;;  %v6696_v36 = vld [vmem:[#allocation8 + $0x188] sm:$0xff]  ;;  %v6702_v34 = vld [vmem:[#allocation8 + $0x180] sm:$0xff] }
 0x39e   :  { %v4876_v47 = vpop.eup %4875  ;;  %9463 = vst [vmem:[#allocation169_spill] sm:$0xff] %v6696_v36  ;;  %9465 = vst [vmem:[#allocation171_spill] sm:$0xff] %v6702_v34 }
 0x39f   :  { %v1753_v35 = vmul.f32 %v4876_v47, %v6119_v17  ;;  %v6678_v17 = vld [vmem:[#allocation8 + $0x1c0] sm:$0xff]  ;;  %v6708_v47 = vld [vmem:[#allocation8 + $0x168] sm:$0xff] }
 0x3a0   :  { %9467 = vst [vmem:[#allocation173_spill] sm:$0xff] %v6708_v47 }
 0x3a1   :  { %v6663_v25 = vadd.f32 %v1754_v28, %v1753_v35  ;;  %v6704_v28 = vld [vmem:[#allocation8 + $0x190] sm:$0xff]  ;;  %v6714_v35 = vld [vmem:[#allocation8 + $0x160] sm:$0xff] }
 0x3a2   :  { %v4878_v20 = vpop.eup %4877  ;;  %9466 = vst [vmem:[#allocation172_spill] sm:$0xff] %v6704_v28  ;;  %9469 = vst [vmem:[#allocation135_spill] sm:$0xff] %v6714_v35 }
 0x3a3   :  { %4879 = vtanh.f32 %v6663_v25 }
 0x3b0   :  { %v4880_v7 = vpop.eup %4879 }
 0x3b1   :  { %v6666_v27 = vmul.f32 %v4880_v7, %v4878_v20  ;;  %v6716_v20 = vld [vmem:[#allocation8 + $0x170] sm:$0xff]  ;;  %v6720_v7 = vld [vmem:[#allocation8 + $0x148] sm:$0xff] }
 0x3b3   :  { %1951 = vmatmul.mubr.f32.vlgmr.msra.gmra.mxu0 %v6666_v27  ;;  %2022 = vmatmul.mubr.f32.vlgmr.msra.gmra.mxu1 %v6666_v27 }
 0x3b4   :  { %2123 = vmatpush1.msra.mxu0 %v6668_v32  ;;  %2194 = vmatpush1.msra.mxu1 %v6670_v39 }
 0x3b5   :  { %2124 = vmatprep.subr.mxu0 %v6672_v5  ;;  %2195 = vmatprep.subr.mxu1 %v6674_v38 }
 0x3b6   :  { %2125 = vmatpush1.msra.mxu0 %v6678_v17  ;;  %2196 = vmatpush1.msra.mxu1 %v6680_v54 }
 0x3b7   :  { %2126 = vmatprep.subr.mxu0 %v6684_v22  ;;  %2197 = vmatprep.subr.mxu1 %v6686_v16 }
 0x3b8   :  { %2127 = vmatpush1.msra.mxu0 %v6690_v2  ;;  %2198 = vmatpush1.msra.mxu1 %v6692_v43  ;;  %v6722_v2 = vld [vmem:[#allocation8 + $0x158] sm:$0xff]  ;;  %v6726_v43 = vld [vmem:[#allocation8 + $0x140] sm:$0xff] }
 0x3b9   :  { %2128 = vmatprep.subr.mxu0 %v6696_v36  ;;  %2199 = vmatprep.subr.mxu1 %v6698_v23  ;;  %v6728_v36 = vld [vmem:[#allocation8 + $0x150] sm:$0xff]  ;;  %v6732_v23 = vld [vmem:[#allocation8 + $0x128] sm:$0xff] }
 0x3ba   :  { %2129 = vmatpush1.msra.mxu0 %v6702_v34  ;;  %2200 = vmatpush1.msra.mxu1 %v6704_v28  ;;  %v6734_v34 = vld [vmem:[#allocation8 + $0x138] sm:$0xff]  ;;  %v6738_v28 = vld [vmem:[#allocation8 + $0x120] sm:$0xff] }
 0x3bb   :  { %2130 = vmatprep.subr.mxu0 %v6708_v47  ;;  %2201 = vmatprep.subr.mxu1 %v6710_v42  ;;  %v6740_v47 = vld [vmem:[#allocation8 + $0x130] sm:$0xff]  ;;  %v6744_v42 = vld [vmem:[#allocation8 + $0x108] sm:$0xff] }
 0x3bc   :  { %2131 = vmatpush1.msra.mxu0 %v6714_v35  ;;  %2202 = vmatpush1.msra.mxu1 %v6716_v20  ;;  %v6746_v35 = vld [vmem:[#allocation8 + $0x118] sm:$0xff] }
 0x3bd   :  { %2132 = vmatprep.subr.mxu0 %v6720_v7  ;;  %2203 = vmatprep.subr.mxu1 %v6722_v2 }
 0x3be   :  { %2133 = vmatpush1.msra.mxu0 %v6726_v43  ;;  %2204 = vmatpush1.msra.mxu1 %v6728_v36 }
 0x3bf   :  { %2134 = vmatprep.subr.mxu0 %v6732_v23  ;;  %2205 = vmatprep.subr.mxu1 %v6734_v34 }
 0x3c0   :  { %2135 = vmatpush1.msra.mxu0 %v6738_v28  ;;  %2206 = vmatpush1.msra.mxu1 %v6740_v47 }
 0x3c1   :  { %2136 = vmatprep.subr.mxu0 %v6744_v42  ;;  %2207 = vmatprep.subr.mxu1 %v6746_v35 }
 0x3c2   :  { %2137 = vmatpush1.msra.mxu0 %v6150_v44  ;;  %2208 = vmatpush1.msra.mxu1 %v6152_v26  ;;  %v9470_v44 = vld [vmem:[#allocation20_spill] sm:$0xff]  ;;  %v9471_v26 = vld [vmem:[#allocation21_spill] sm:$0xff] }
 0x3c3   :  { %2138 = vmatprep.subr.mxu0 %v6156_v31  ;;  %2209 = vmatprep.subr.mxu1 %v6158_v41  ;;  %v9472_v31 = vld [vmem:[#allocation22_spill] sm:$0xff]  ;;  %v9473_v41 = vld [vmem:[#allocation23_spill] sm:$0xff] }
 0x3c4   :  { %2139 = vmatpush1.msra.mxu0 %v6162_v40  ;;  %2210 = vmatpush1.msra.mxu1 %v6164_v0  ;;  %v9474_v40 = vld [vmem:[#allocation24_spill] sm:$0xff]  ;;  %v9475_v0 = vld [vmem:[#allocation25_spill] sm:$0xff] }
 0x3c5   :  { %2140 = vmatprep.subr.mxu0 %v6168_v29  ;;  %2211 = vmatprep.subr.mxu1 %v6170_v37  ;;  %v9476_v29 = vld [vmem:[#allocation26_spill] sm:$0xff]  ;;  %v9477_v37 = vld [vmem:[#allocation27_spill] sm:$0xff] }
 0x3c6   :  { %2141 = vmatpush1.msra.mxu0 %v6174_v30  ;;  %2212 = vmatpush1.msra.mxu1 %v6176_v56  ;;  %v9478_v30 = vld [vmem:[#allocation28_spill] sm:$0xff]  ;;  %v9479_v56 = vld [vmem:[#allocation29_spill] sm:$0xff] }
 0x3c7   :  { %2142 = vmatprep.subr.mxu0 %v6180_v33  ;;  %2213 = vmatprep.subr.mxu1 %v6182_v46  ;;  %v9480_v33 = vld [vmem:[#allocation30_spill] sm:$0xff]  ;;  %v9481_v46 = vld [vmem:[#allocation31_spill] sm:$0xff] }
 0x3c8   :  { %2143 = vmatpush1.msra.mxu0 %v6186_v48  ;;  %2214 = vmatpush1.msra.mxu1 %v6188_v49  ;;  %v9482_v48 = vld [vmem:[#allocation32_spill] sm:$0xff]  ;;  %v9483_v49 = vld [vmem:[#allocation33_spill] sm:$0xff] }
 0x3c9   :  { %2144 = vmatprep.subr.mxu0 %v6192_v50  ;;  %2215 = vmatprep.subr.mxu1 %v6194_v51  ;;  %v9484_v50 = vld [vmem:[#allocation34_spill] sm:$0xff]  ;;  %v9485_v51 = vld [vmem:[#allocation35_spill] sm:$0xff] }
 0x3ca   :  { %2145 = vmatpush1.msra.mxu0 %v6198_v52  ;;  %2216 = vmatpush1.msra.mxu1 %v6200_v53  ;;  %v9486_v52 = vld [vmem:[#allocation36_spill] sm:$0xff]  ;;  %v9487_v53 = vld [vmem:[#allocation37_spill] sm:$0xff] }
 0x3cb   :  { %2146 = vmatprep.subr.mxu0 %v6204_v55  ;;  %2217 = vmatprep.subr.mxu1 %v6206_v57  ;;  %v9488_v55 = vld [vmem:[#allocation38_spill] sm:$0xff]  ;;  %v9489_v57 = vld [vmem:[#allocation39_spill] sm:$0xff] }
 0x3cc   :  { %2147 = vmatpush1.msra.mxu0 %v6210_v58  ;;  %2218 = vmatpush1.msra.mxu1 %v6212_v59  ;;  %v9490_v58 = vld [vmem:[#allocation40_spill] sm:$0xff]  ;;  %v9491_v59 = vld [vmem:[#allocation41_spill] sm:$0xff] }
 0x3cd   :  { %2148 = vmatprep.subr.mxu0 %v6216_v60  ;;  %2219 = vmatprep.subr.mxu1 %v6218_v61  ;;  %v9492_v60 = vld [vmem:[#allocation42_spill] sm:$0xff]  ;;  %v9493_v61 = vld [vmem:[#allocation43_spill] sm:$0xff] }
 0x3ce   :  { %2149 = vmatpush1.msra.mxu0 %v6222_v62  ;;  %2220 = vmatpush1.msra.mxu1 %v6224_v63  ;;  %v9494_v62 = vld [vmem:[#allocation44_spill] sm:$0xff]  ;;  %v9495_v63 = vld [vmem:[#allocation45_spill] sm:$0xff] }
 0x3cf   :  { %2150 = vmatprep.subr.mxu0 %v6228_v1  ;;  %2221 = vmatprep.subr.mxu1 %v6230_v3  ;;  %v9496_v1 = vld [vmem:[#allocation46_spill] sm:$0xff]  ;;  %v9497_v3 = vld [vmem:[#allocation47_spill] sm:$0xff] }
 0x3d0   :  { %2151 = vmatpush1.msra.mxu0 %v6234_v4  ;;  %2222 = vmatpush1.msra.mxu1 %v6236_v6  ;;  %v9498_v4 = vld [vmem:[#allocation48_spill] sm:$0xff]  ;;  %v9499_v6 = vld [vmem:[#allocation49_spill] sm:$0xff] }
 0x3d1   :  { %2152 = vmatprep.subr.mxu0 %v6240_v8  ;;  %2223 = vmatprep.subr.mxu1 %v6242_v9  ;;  %v9500_v8 = vld [vmem:[#allocation50_spill] sm:$0xff]  ;;  %v9501_v9 = vld [vmem:[#allocation51_spill] sm:$0xff] }
 0x3d2   :  { %2153 = vmatpush1.msra.mxu0 %v6246_v10  ;;  %2186 = vmatprep.mubr.f32.mxu0 %v9190_v45  ;;  %v9502_v10 = vld [vmem:[#allocation52_spill] sm:$0xff] }
 0x3d3   :  { %2224 = vmatpush1.msra.mxu1 %v6250_v11  ;;  %2257 = vmatprep.mubr.f32.mxu1 %v9190_v45  ;;  %v9503_v11 = vld [vmem:[#allocation53_spill] sm:$0xff] }
 0x3d4   :  { %2187 = vmatmul.mubr.f32.vlgmr.msra.gmra.mxu0 %v6666_v27  ;;  %2258 = vmatmul.mubr.f32.vlgmr.msra.gmra.mxu1 %v6666_v27  ;;  %v9511_v27 = vld [vmem:[#allocation61_spill] sm:$0xff] }
 0x3d5   :  { %2420 = vmatprep.subr.mxu0 %v6260_v12  ;;  %2491 = vmatprep.subr.mxu1 %v6262_v13  ;;  %v9504_v12 = vld [vmem:[#allocation54_spill] sm:$0xff]  ;;  %v9505_v13 = vld [vmem:[#allocation55_spill] sm:$0xff] }
 0x3d6   :  { %2421 = vmatpush1.msra.mxu0 %v6266_v14  ;;  %2492 = vmatpush1.msra.mxu1 %v6268_v15  ;;  %v9506_v14 = vld [vmem:[#allocation56_spill] sm:$0xff]  ;;  %v9507_v15 = vld [vmem:[#allocation57_spill] sm:$0xff] }
 0x3d7   :  { %2422 = vmatprep.subr.mxu0 %v6272_v18  ;;  %2493 = vmatprep.subr.mxu1 %v6274_v19  ;;  %v9508_v18 = vld [vmem:[#allocation58_spill] sm:$0xff]  ;;  %v9509_v19 = vld [vmem:[#allocation59_spill] sm:$0xff] }
 0x3d8   :  { %2423 = vmatpush1.msra.mxu0 %v6278_v21  ;;  %2494 = vmatpush1.msra.mxu1 %v9470_v44  ;;  %v9510_v21 = vld [vmem:[#allocation60_spill] sm:$0xff]  ;;  %v9512_v44 = vld [vmem:[#allocation62_spill] sm:$0xff] }
 0x3d9   :  { %2424 = vmatprep.subr.mxu0 %v9471_v26  ;;  %2495 = vmatprep.subr.mxu1 %v9472_v31  ;;  %v9513_v26 = vld [vmem:[#allocation63_spill] sm:$0xff]  ;;  %v9514_v31 = vld [vmem:[#allocation64_spill] sm:$0xff] }
 0x3da   :  { %2425 = vmatpush1.msra.mxu0 %v9473_v41  ;;  %2496 = vmatpush1.msra.mxu1 %v9474_v40  ;;  %v9515_v41 = vld [vmem:[#allocation65_spill] sm:$0xff]  ;;  %v9516_v40 = vld [vmem:[#allocation66_spill] sm:$0xff] }
 0x3db   :  { %2426 = vmatprep.subr.mxu0 %v9475_v0  ;;  %2497 = vmatprep.subr.mxu1 %v9476_v29  ;;  %v9517_v0 = vld [vmem:[#allocation67_spill] sm:$0xff]  ;;  %v9518_v29 = vld [vmem:[#allocation68_spill] sm:$0xff] }
 0x3dc   :  { %2427 = vmatpush1.msra.mxu0 %v9477_v37  ;;  %2498 = vmatpush1.msra.mxu1 %v9478_v30  ;;  %v9519_v37 = vld [vmem:[#allocation69_spill] sm:$0xff]  ;;  %v9520_v30 = vld [vmem:[#allocation70_spill] sm:$0xff] }
 0x3dd   :  { %2428 = vmatprep.subr.mxu0 %v9479_v56  ;;  %2499 = vmatprep.subr.mxu1 %v9480_v33  ;;  %v9521_v56 = vld [vmem:[#allocation71_spill] sm:$0xff]  ;;  %v9522_v33 = vld [vmem:[#allocation72_spill] sm:$0xff] }
 0x3de   :  { %2429 = vmatpush1.msra.mxu0 %v9481_v46  ;;  %2500 = vmatpush1.msra.mxu1 %v9482_v48  ;;  %v9523_v46 = vld [vmem:[#allocation73_spill] sm:$0xff]  ;;  %v9524_v48 = vld [vmem:[#allocation74_spill] sm:$0xff] }
 0x3df   :  { %2430 = vmatprep.subr.mxu0 %v9483_v49  ;;  %2501 = vmatprep.subr.mxu1 %v9484_v50  ;;  %v9525_v49 = vld [vmem:[#allocation75_spill] sm:$0xff]  ;;  %v9526_v50 = vld [vmem:[#allocation76_spill] sm:$0xff] }
 0x3e0   :  { %2431 = vmatpush1.msra.mxu0 %v9485_v51  ;;  %2502 = vmatpush1.msra.mxu1 %v9486_v52  ;;  %v9527_v51 = vld [vmem:[#allocation77_spill] sm:$0xff]  ;;  %v9528_v52 = vld [vmem:[#allocation78_spill] sm:$0xff] }
 0x3e1   :  { %2432 = vmatprep.subr.mxu0 %v9487_v53  ;;  %2503 = vmatprep.subr.mxu1 %v9488_v55  ;;  %v9529_v53 = vld [vmem:[#allocation79_spill] sm:$0xff]  ;;  %v9530_v55 = vld [vmem:[#allocation80_spill] sm:$0xff] }
 0x3e2   :  { %2433 = vmatpush1.msra.mxu0 %v9489_v57  ;;  %2504 = vmatpush1.msra.mxu1 %v9490_v58  ;;  %v9531_v57 = vld [vmem:[#allocation81_spill] sm:$0xff]  ;;  %v9532_v58 = vld [vmem:[#allocation82_spill] sm:$0xff] }
 0x3e3   :  { %2434 = vmatprep.subr.mxu0 %v9491_v59  ;;  %2505 = vmatprep.subr.mxu1 %v9492_v60  ;;  %v9533_v59 = vld [vmem:[#allocation83_spill] sm:$0xff]  ;;  %v9534_v60 = vld [vmem:[#allocation84_spill] sm:$0xff] }
 0x3e4   :  { %2435 = vmatpush1.msra.mxu0 %v9493_v61  ;;  %2506 = vmatpush1.msra.mxu1 %v9494_v62  ;;  %v9535_v61 = vld [vmem:[#allocation85_spill] sm:$0xff]  ;;  %v9536_v62 = vld [vmem:[#allocation86_spill] sm:$0xff] }
 0x3e5   :  { %2436 = vmatprep.subr.mxu0 %v9495_v63  ;;  %2507 = vmatprep.subr.mxu1 %v9496_v1  ;;  %v9537_v63 = vld [vmem:[#allocation87_spill] sm:$0xff]  ;;  %v9538_v1 = vld [vmem:[#allocation88_spill] sm:$0xff] }
 0x3e6   :  { %2437 = vmatpush1.msra.mxu0 %v9497_v3  ;;  %2508 = vmatpush1.msra.mxu1 %v9498_v4  ;;  %v9539_v3 = vld [vmem:[#allocation89_spill] sm:$0xff]  ;;  %v9540_v4 = vld [vmem:[#allocation90_spill] sm:$0xff] }
 0x3e7   :  { %2438 = vmatprep.subr.mxu0 %v9499_v6  ;;  %2509 = vmatprep.subr.mxu1 %v9500_v8  ;;  %v9541_v6 = vld [vmem:[#allocation91_spill] sm:$0xff]  ;;  %v9542_v8 = vld [vmem:[#allocation92_spill] sm:$0xff] }
 0x3e8   :  { %2439 = vmatpush1.msra.mxu0 %v9501_v9  ;;  %2510 = vmatpush1.msra.mxu1 %v9502_v10  ;;  %v9543_v9 = vld [vmem:[#allocation93_spill] sm:$0xff]  ;;  %v9544_v10 = vld [vmem:[#allocation94_spill] sm:$0xff] }
 0x3e9   :  { %2440 = vmatprep.subr.mxu0 %v9503_v11  ;;  %2511 = vmatprep.subr.mxu1 %v9504_v12  ;;  %v9545_v11 = vld [vmem:[#allocation95_spill] sm:$0xff]  ;;  %v9546_v12 = vld [vmem:[#allocation96_spill] sm:$0xff] }
 0x3ea   :  { %2441 = vmatpush1.msra.mxu0 %v9505_v13  ;;  %2512 = vmatpush1.msra.mxu1 %v9506_v14  ;;  %v9547_v13 = vld [vmem:[#allocation97_spill] sm:$0xff]  ;;  %v9548_v14 = vld [vmem:[#allocation98_spill] sm:$0xff] }
 0x3eb   :  { %2442 = vmatprep.subr.mxu0 %v9507_v15  ;;  %2513 = vmatprep.subr.mxu1 %v9508_v18  ;;  %v9549_v15 = vld [vmem:[#allocation99_spill] sm:$0xff]  ;;  %v9550_v18 = vld [vmem:[#allocation100_spill] sm:$0xff] }
 0x3ec   :  { %2443 = vmatpush1.msra.mxu0 %v9509_v19  ;;  %2514 = vmatpush1.msra.mxu1 %v9510_v21  ;;  %v9551_v19 = vld [vmem:[#allocation101_spill] sm:$0xff]  ;;  %v9552_v21 = vld [vmem:[#allocation102_spill] sm:$0xff] }
 0x3ed   :  { %2444 = vmatprep.subr.mxu0 %v9511_v27  ;;  %2515 = vmatprep.subr.mxu1 %v9512_v44  ;;  %v9553_v27 = vld [vmem:[#allocation103_spill] sm:$0xff]  ;;  %v9554_v44 = vld [vmem:[#allocation104_spill] sm:$0xff] }
 0x3ee   :  { %2445 = vmatpush1.msra.mxu0 %v9513_v26  ;;  %2516 = vmatpush1.msra.mxu1 %v9514_v31  ;;  %v9555_v26 = vld [vmem:[#allocation105_spill] sm:$0xff]  ;;  %v9556_v31 = vld [vmem:[#allocation106_spill] sm:$0xff] }
 0x3ef   :  { %2446 = vmatprep.subr.mxu0 %v9515_v41  ;;  %2517 = vmatprep.subr.mxu1 %v9516_v40  ;;  %v9557_v41 = vld [vmem:[#allocation107_spill] sm:$0xff]  ;;  %v9558_v40 = vld [vmem:[#allocation108_spill] sm:$0xff] }
 0x3f0   :  { %2447 = vmatpush1.msra.mxu0 %v9517_v0  ;;  %2518 = vmatpush1.msra.mxu1 %v9518_v29  ;;  %v9559_v0 = vld [vmem:[#allocation109_spill] sm:$0xff]  ;;  %v9560_v29 = vld [vmem:[#allocation110_spill] sm:$0xff] }
 0x3f1   :  { %2448 = vmatprep.subr.mxu0 %v9519_v37  ;;  %2519 = vmatprep.subr.mxu1 %v9520_v30  ;;  %v9561_v37 = vld [vmem:[#allocation111_spill] sm:$0xff]  ;;  %v9562_v30 = vld [vmem:[#allocation112_spill] sm:$0xff] }
 0x3f2   :  { %2449 = vmatpush1.msra.mxu0 %v9521_v56  ;;  %2520 = vmatpush1.msra.mxu1 %v9522_v33  ;;  %v9563_v56 = vld [vmem:[#allocation113_spill] sm:$0xff]  ;;  %v9564_v33 = vld [vmem:[#allocation114_spill] sm:$0xff] }
 0x3f3   :  { %2450 = vmatprep.subr.mxu0 %v9523_v46  ;;  %2521 = vmatprep.subr.mxu1 %v9524_v48  ;;  %v9565_v46 = vld [vmem:[#allocation115_spill] sm:$0xff]  ;;  %v9566_v48 = vld [vmem:[#allocation116_spill] sm:$0xff] }
 0x3f4   :  { %2451 = vmatpush1.msra.mxu0 %v9525_v49  ;;  %2522 = vmatpush1.msra.mxu1 %v9526_v50  ;;  %v9567_v49 = vld [vmem:[#allocation117_spill] sm:$0xff]  ;;  %v9568_v50 = vld [vmem:[#allocation118_spill] sm:$0xff] }
 0x3f5   :  { %2452 = vmatprep.subr.mxu0 %v9527_v51  ;;  %2523 = vmatprep.subr.mxu1 %v9528_v52  ;;  %v9569_v51 = vld [vmem:[#allocation119_spill] sm:$0xff]  ;;  %v9570_v52 = vld [vmem:[#allocation120_spill] sm:$0xff] }
 0x3f6   :  { %2453 = vmatpush2.msra.mxu0 %v9529_v53  ;;  %2524 = vmatpush2.msra.mxu1 %v9530_v55  ;;  %v9571_v53 = vld [vmem:[#allocation121_spill] sm:$0xff]  ;;  %v9572_v55 = vld [vmem:[#allocation122_spill] sm:$0xff] }
 0x3f7   :  { %2454 = vmatprep.subr.mxu0 %v9531_v57  ;;  %2525 = vmatprep.subr.mxu1 %v9532_v58  ;;  %v9573_v57 = vld [vmem:[#allocation123_spill] sm:$0xff]  ;;  %v9574_v58 = vld [vmem:[#allocation124_spill] sm:$0xff] }
 0x3f8   :  { %2455 = vmatpush2.msra.mxu0 %v9533_v59  ;;  %2526 = vmatpush2.msra.mxu1 %v9534_v60  ;;  %v9575_v59 = vld [vmem:[#allocation125_spill] sm:$0xff]  ;;  %v9576_v60 = vld [vmem:[#allocation126_spill] sm:$0xff] }
 0x3f9   :  { %2456 = vmatprep.subr.mxu0 %v9535_v61  ;;  %2527 = vmatprep.subr.mxu1 %v9536_v62  ;;  %v9577_v61 = vld [vmem:[#allocation127_spill] sm:$0xff]  ;;  %v9578_v62 = vld [vmem:[#allocation128_spill] sm:$0xff] }
 0x3fa   :  { %2457 = vmatpush2.msra.mxu0 %v9537_v63  ;;  %2528 = vmatpush2.msra.mxu1 %v9538_v1  ;;  %v9579_v63 = vld [vmem:[#allocation129_spill] sm:$0xff]  ;;  %v9580_v1 = vld [vmem:[#allocation130_spill] sm:$0xff] }
 0x3fb   :  { %2458 = vmatprep.subr.mxu0 %v9539_v3  ;;  %2529 = vmatprep.subr.mxu1 %v9540_v4  ;;  %v9581_v3 = vld [vmem:[#allocation131_spill] sm:$0xff]  ;;  %v9582_v4 = vld [vmem:[#allocation133_spill] sm:$0xff] }
 0x3fc   :  { %2459 = vmatpush2.msra.mxu0 %v9541_v6  ;;  %2530 = vmatpush2.msra.mxu1 %v9542_v8  ;;  %v9583_v6 = vld [vmem:[#allocation134_spill] sm:$0xff]  ;;  %v9584_v8 = vld [vmem:[#allocation132_spill] sm:$0xff] }
 0x3fd   :  { %2460 = vmatprep.subr.mxu0 %v9543_v9  ;;  %2531 = vmatprep.subr.mxu1 %v9544_v10  ;;  %v9585_v9 = vld [vmem:[#allocation159_spill] sm:$0xff]  ;;  %v9586_v10 = vld [vmem:[#allocation160_spill] sm:$0xff] }
 0x3fe   :  { %2461 = vmatpush2.msra.mxu0 %v9545_v11  ;;  %2532 = vmatpush2.msra.mxu1 %v9546_v12  ;;  %v9587_v11 = vld [vmem:[#allocation161_spill] sm:$0xff]  ;;  %v9588_v12 = vld [vmem:[#allocation162_spill] sm:$0xff] }
 0x3ff   :  { %2462 = vmatprep.subr.mxu0 %v9547_v13  ;;  %2533 = vmatprep.subr.mxu1 %v9548_v14  ;;  %v9589_v13 = vld [vmem:[#allocation163_spill] sm:$0xff]  ;;  %v9590_v14 = vld [vmem:[#allocation164_spill] sm:$0xff] }
 0x400   :  { %2463 = vmatpush2.msra.mxu0 %v9549_v15  ;;  %2534 = vmatpush2.msra.mxu1 %v9550_v18  ;;  %v9591_v15 = vld [vmem:[#allocation165_spill] sm:$0xff]  ;;  %v9592_v18 = vld [vmem:[#allocation166_spill] sm:$0xff] }
 0x401   :  { %2464 = vmatprep.subr.mxu0 %v9551_v19  ;;  %2535 = vmatprep.subr.mxu1 %v9552_v21  ;;  %v9593_v21 = vld [vmem:[#allocation16_spill] sm:$0xff] }
 0x402   :  { %2465 = vmatpush2.msra.mxu0 %v9553_v27  ;;  %2536 = vmatpush2.msra.mxu1 %v9554_v44 }
 0x403   :  { %2466 = vmatprep.subr.mxu0 %v9555_v26  ;;  %2537 = vmatprep.subr.mxu1 %v9556_v31  ;;  %v9594_v31 = vld [vmem:[#allocation17_spill] sm:$0xff] }
 0x404   :  { %2467 = vmatpush2.msra.mxu0 %v9557_v41  ;;  %2538 = vmatpush2.msra.mxu1 %v9558_v40 }
 0x405   :  { %2468 = vmatprep.subr.mxu0 %v9559_v0  ;;  %2539 = vmatprep.subr.mxu1 %v9560_v29 }
 0x406   :  { %2469 = vmatpush2.msra.mxu0 %v9561_v37  ;;  %2540 = vmatpush2.msra.mxu1 %v9562_v30  ;;  %v9595_v37 = vld [vmem:[#allocation18_spill] sm:$0xff] }
 0x407   :  { %2470 = vmatprep.subr.mxu0 %v9563_v56  ;;  %2541 = vmatprep.subr.mxu1 %v9564_v33 }
 0x408   :  { %2471 = vmatpush2.msra.mxu0 %v9565_v46  ;;  %2542 = vmatpush2.msra.mxu1 %v9566_v48  ;;  %v9596_v46 = vld [vmem:[#allocation19_spill] sm:$0xff] }
 0x409   :  { %2472 = vmatprep.subr.mxu0 %v9567_v49  ;;  %2543 = vmatprep.subr.mxu1 %v9568_v50 }
 0x40a   :  { %2473 = vmatpush2.msra.mxu0 %v9569_v51  ;;  %2544 = vmatpush2.msra.mxu1 %v9570_v52 }
 0x40b   :  { %2474 = vmatprep.subr.mxu0 %v9571_v53  ;;  %2545 = vmatprep.subr.mxu1 %v9572_v55 }
 0x40c   :  { %2475 = vmatpush2.msra.mxu0 %v9573_v57  ;;  %2546 = vmatpush2.msra.mxu1 %v9574_v58  ;;  %v9597_v57 = vld [vmem:[#allocation139_spill] sm:$0xff] }
 0x40d   :  { %2476 = vmatprep.subr.mxu0 %v9575_v59  ;;  %2547 = vmatprep.subr.mxu1 %v9576_v60 }
 0x40e   :  { %2477 = vmatpush2.msra.mxu0 %v9577_v61  ;;  %2548 = vmatpush2.msra.mxu1 %v9578_v62 }
 0x40f   :  { %2478 = vmatprep.subr.mxu0 %v9579_v63  ;;  %2549 = vmatprep.subr.mxu1 %v9580_v1  ;;  %v9598_v63 = vld [vmem:[#allocation141_spill] sm:$0xff] }
 0x410   :  { %2479 = vmatpush2.msra.mxu0 %v9581_v3  ;;  %2550 = vmatpush2.msra.mxu1 %v9582_v4 }
 0x411   :  { %2480 = vmatprep.subr.mxu0 %v9583_v6  ;;  %2551 = vmatprep.subr.mxu1 %v9584_v8 }
 0x412   :  { %2481 = vmatpush2.msra.mxu0 %v9585_v9  ;;  %2552 = vmatpush2.msra.mxu1 %v9586_v10 }
 0x413   :  { %2482 = vmatprep.subr.mxu0 %v9587_v11  ;;  %2553 = vmatprep.subr.mxu1 %v9588_v12  ;;  %v9599_v12 = vld [vmem:[#allocation142_spill] sm:$0xff] }
 0x414   :  { %2483 = vmatpush2.msra.mxu0 %v9589_v13  ;;  %2554 = vmatpush2.msra.mxu1 %v9590_v14  ;;  %v9600_v14 = vld [vmem:[#allocation140_spill] sm:$0xff] }
 0x415   :  { %2656 = vmatprep.subr.mxu0 %v9591_v15  ;;  %2727 = vmatprep.subr.mxu1 %v9592_v18 }
 0x473   :  { %v1952_v19 = vpop.f32.mrf.mxu0  ;;  %v2023_v40 = vpop.f32.mrf.mxu1 }
 0x474   :  { %v1953_v27 = vadd.f32 %v1952_v19, %v9593_v21  ;;  %v2024_v48 = vadd.f32 %v2023_v40, %v9596_v46 }
 0x475   :  { %v1954_v44 = vpop.f32.mrf.mxu0  ;;  %v2025_v29 = vpop.f32.mrf.mxu1 }
 0x476   :  { %v4758_v26 = vmul.f32 -1.442695, %v1953_v27  ;;  %v1955_v41 = vadd.f32 %v1954_v44, %v9594_v31  ;;  %v2026_v30 = vadd.f32 %v2025_v29, %v9595_v37 }
 0x478   :  { %4881 = vpow2.f32 %v4758_v26  ;;  %v4759_v0 = vmul.f32 -1.442695, %v1955_v41  ;;  %v4760_v56 = vmul.f32 -1.442695, %v2026_v30 }
 0x47a   :  { %4883 = vpow2.f32 %v4759_v0 }
 0x47b   :  { %4885 = vpow2.f32 %v4760_v56 }
 0x485   :  { %v4882_v33 = vpop.eup %4881 }
 0x486   :  { %v2031_v49 = vadd.f32 1.0, %v4882_v33 }
 0x487   :  { %v4884_v50 = vpop.eup %4883 }
 0x488   :  { %4887 = vrcp.f32 %v2031_v49  ;;  %v2037_v51 = vadd.f32 1.0, %v4884_v50  ;;  %v4886_v52 = vpop.eup %4885 }
 0x489   :  { %4889 = vtanh.f32 %v2024_v48  ;;  %v2044_v6 = vadd.f32 1.0, %v4886_v52 }
 0x48a   :  { %4891 = vrcp.f32 %v2037_v51 }
 0x494   :  { %v2188_v53 = vpop.f32.mrf.mxu0  ;;  %v2259_v8 = vpop.f32.mrf.mxu1 }
 0x495   :  { %v4888_v55 = vpop.eup %4887  ;;  %v2264_v58 = vadd.f32 %v2188_v53, %v9597_v57  ;;  %v2266_v15 = vadd.f32 %v2259_v8, %v9600_v14  ;;  %v9603_v57 = vld [vmem:[#allocation169_spill] sm:$0xff]  ;;  %v7034_v8 = vld [vmem:[#allocation8 + $0x58] sm:$0xff]  ;;  %v7050_v14 = vld [vmem:[#allocation8 + $0x20] sm:$0xff] }
 0x496   :  { %v4890_v59 = vpop.eup %4889  ;;  %v2190_v60 = vpop.f32.mrf.mxu0 }
 0x497   :  { %v4892_v61 = vpop.eup %4891  ;;  %v4761_v62 = vmul.f32 -1.442695, %v2264_v58  ;;  %v2265_v1 = vadd.f32 %v2190_v60, %v9598_v63  ;;  %v2048_v3 = vmul.f32 %v4890_v59, %v4888_v55  ;;  %v2261_v11 = vpop.f32.mrf.mxu1  ;;  %v9602_v55 = vld [vmem:[#allocation168_spill] sm:$0xff]  ;;  %v7004_v58 = vld [vmem:[#allocation8 + $0xb0] sm:$0xff]  ;;  %v7008_v59 = vld [vmem:[#allocation8 + $0x88] sm:$0xff] }
 0x498   :  { %v2047_v4 = vmul.f32 %v4892_v61, %v6657_v24  ;;  %v2267_v13 = vadd.f32 %v2261_v11, %v9599_v12  ;;  %v7010_v60 = vld [vmem:[#allocation8 + $0x98] sm:$0xff]  ;;  %v7014_v61 = vld [vmem:[#allocation8 + $0x80] sm:$0xff]  ;;  %v7020_v63 = vld [vmem:[#allocation8 + $0x68] sm:$0xff] }
 0x499   :  { %4893 = vpow2.f32 %v4761_v62  ;;  %v4762_v9 = vmul.f32 -1.442695, %v2265_v1  ;;  %v7016_v62 = vld [vmem:[#allocation8 + $0x90] sm:$0xff]  ;;  %v7022_v1 = vld [vmem:[#allocation8 + $0x78] sm:$0xff]  ;;  %v7044_v12 = vld [vmem:[#allocation8 + $0x28] sm:$0xff] }
 0x49a   :  { %v6929_v10 = vadd.f32 %v2048_v3, %v2047_v4  ;;  %v4763_v18 = vmul.f32 -1.442695, %v2267_v13  ;;  %v7026_v3 = vld [vmem:[#allocation8 + $0x60] sm:$0xff]  ;;  %v7028_v4 = vld [vmem:[#allocation8 + $0x70] sm:$0xff]  ;;  %v7046_v13 = vld [vmem:[#allocation8 + $0x38] sm:$0xff] }
 0x49b   :  { %4895 = vpow2.f32 %v4762_v9  ;;  %v7038_v9 = vld [vmem:[#allocation8 + $0x40] sm:$0xff]  ;;  %v7040_v11 = vld [vmem:[#allocation8 + $0x50] sm:$0xff] }
 0x49c   :  { %4897 = vrcp.f32 %v2044_v6  ;;  %v7032_v6 = vld [vmem:[#allocation8 + $0x48] sm:$0xff] }
 0x49d   :  { %4899 = vtanh.f32 %v6929_v10 }
 0x49e   :  { %4901 = vtanh.f32 %v2266_v15  ;;  %v7052_v15 = vld [vmem:[#allocation8 + $0x30] sm:$0xff] }
 0x49f   :  { %4903 = vpow2.f32 %v4763_v18  ;;  %v7056_v18 = vld [vmem:[#allocation8 + $0x8] sm:$0xff] }
 0x4a6   :  { %v4894_v19 = vpop.eup %4893 }
 0x4a7   :  { %v2271_v27 = vadd.f32 1.0, %v4894_v19  ;;  %v7058_v19 = vld [vmem:[#allocation8 + $0x18] sm:$0xff] }
 0x4a8   :  { %v4896_v24 = vpop.eup %4895 }
 0x4a9   :  { %v4898_v44 = vpop.eup %4897  ;;  %4905 = vrcp.f32 %v2271_v27  ;;  %v2277_v26 = vadd.f32 1.0, %v4896_v24  ;;  %v7062_v27 = vld [vmem:[#allocation8] sm:$0xff]  ;;  %v7066_v24 = vld [vmem:[#allocation8 + $0x10] sm:$0xff] }
 0x4aa   :  { %v4900_v41 = vpop.eup %4899 }
 0x4ab   :  { %4907 = vrcp.f32 %v2277_v26  ;;  %v2051_v40 = vmul.f32 %v4900_v41, %v4898_v44  ;;  %v4902_v0 = vpop.eup %4901  ;;  %v7076_v44 = vld [vmem:[#allocation9 + $0x1e8] sm:$0xff]  ;;  %v7078_v26 = vld [vmem:[#allocation9 + $0x1f8] sm:$0xff]  ;;  %v7082_v41 = vld [vmem:[#allocation9 + $0x1e0] sm:$0xff] }
 0x4ac   :  { %v4904_v29 = vpop.eup %4903 }
 0x4ad   :  { %2053 = vst [vmem:[#allocation11 + $0x10] sm:$0xff] %v2051_v40  ;;  %2484 = vmatprep.mubr.f32.mxu0 %v2051_v40  ;;  %2555 = vmatprep.mubr.f32.mxu1 %v2051_v40  ;;  %v2284_v48 = vadd.f32 1.0, %v4904_v29  ;;  %v7084_v40 = vld [vmem:[#allocation9 + $0x1f0] sm:$0xff]  ;;  %v7090_v29 = vld [vmem:[#allocation9 + $0x1d8] sm:$0xff] }
 0x4af   :  { %4909 = vrcp.f32 %v2284_v48  ;;  %v7102_v48 = vld [vmem:[#allocation9 + $0x1b8] sm:$0xff] }
 0x4b0   :  { %9612 = vst [vmem:[#allocation136_spill] sm:$0xff] %v7102_v48 }
 0x4b6   :  { %v4906_v30 = vpop.eup %4905 }
 0x4b7   :  { %v2288_v56 = vmul.f32 %v4906_v30, %v4902_v0  ;;  %v7088_v0 = vld [vmem:[#allocation9 + $0x1c8] sm:$0xff]  ;;  %v7094_v30 = vld [vmem:[#allocation9 + $0x1c0] sm:$0xff] }
 0x4b8   :  { %v4908_v33 = vpop.eup %4907 }
 0x4b9   :  { %v2287_v49 = vmul.f32 %v4908_v33, %v6663_v25  ;;  %v9601_v25 = vld [vmem:[#allocation167_spill] sm:$0xff]  ;;  %v7100_v33 = vld [vmem:[#allocation9 + $0x1a8] sm:$0xff] }
 0x4ba   :  { %9611 = vst [vmem:[#allocation138_spill] sm:$0xff] %v7100_v33 }
 0x4bb   :  { %v6935_v50 = vadd.f32 %v2288_v56, %v2287_v49  ;;  %v7096_v56 = vld [vmem:[#allocation9 + $0x1d0] sm:$0xff]  ;;  %v7106_v49 = vld [vmem:[#allocation9 + $0x1a0] sm:$0xff] }
 0x4bc   :  { %v4910_v51 = vpop.eup %4909  ;;  %9610 = vst [vmem:[#allocation137_spill] sm:$0xff] %v7096_v56  ;;  %9613 = vst [vmem:[#allocation20_spill] sm:$0xff] %v7106_v49 }
 0x4bd   :  { %4911 = vtanh.f32 %v6935_v50 }
 0x4ca   :  { %v4912_v52 = vpop.eup %4911 }
 0x4cb   :  { %v6938_v53 = vmul.f32 %v4912_v52, %v4910_v51  ;;  %v7108_v51 = vld [vmem:[#allocation9 + $0x1b0] sm:$0xff]  ;;  %v7112_v52 = vld [vmem:[#allocation9 + $0x188] sm:$0xff] }
 0x4cc   :  { %9614 = vst [vmem:[#allocation21_spill] sm:$0xff] %v7108_v51  ;;  %9615 = vst [vmem:[#allocation22_spill] sm:$0xff] %v7112_v52 }
 0x4cd   :  { %2485 = vmatmul.mubr.f32.vlgmr.msra.gmra.mxu0 %v6938_v53  ;;  %2556 = vmatmul.mubr.f32.vlgmr.msra.gmra.mxu1 %v6938_v53 }
 0x4ce   :  { %2657 = vmatpush1.msra.mxu0 %v6668_v32  ;;  %2728 = vmatpush1.msra.mxu1 %v6670_v39  ;;  %v9604_v32 = vld [vmem:[#allocation170_spill] sm:$0xff]  ;;  %v9605_v39 = vld [vmem:[#allocation171_spill] sm:$0xff] }
 0x4cf   :  { %2658 = vmatprep.subr.mxu0 %v6672_v5  ;;  %2729 = vmatprep.subr.mxu1 %v6674_v38  ;;  %v9606_v5 = vld [vmem:[#allocation172_spill] sm:$0xff]  ;;  %v9607_v38 = vld [vmem:[#allocation173_spill] sm:$0xff] }
 0x4d0   :  { %2659 = vmatpush1.msra.mxu0 %v6678_v17  ;;  %2730 = vmatpush1.msra.mxu1 %v6680_v54  ;;  %v9608_v17 = vld [vmem:[#allocation174_spill] sm:$0xff]  ;;  %v9609_v54 = vld [vmem:[#allocation135_spill] sm:$0xff] }
 0x4d1   :  { %2660 = vmatprep.subr.mxu0 %v6684_v22  ;;  %2731 = vmatprep.subr.mxu1 %v6686_v16  ;;  %v6966_v22 = vld [vmem:[#allocation8 + $0x100] sm:$0xff]  ;;  %v6968_v16 = vld [vmem:[#allocation8 + $0x110] sm:$0xff] }
 0x4d2   :  { %2661 = vmatpush1.msra.mxu0 %v9601_v25  ;;  %2732 = vmatpush1.msra.mxu1 %v9602_v55  ;;  %v7118_v25 = vld [vmem:[#allocation9 + $0x180] sm:$0xff]  ;;  %v7120_v55 = vld [vmem:[#allocation9 + $0x190] sm:$0xff] }
 0x4d3   :  { %2662 = vmatprep.subr.mxu0 %v9603_v57  ;;  %2733 = vmatprep.subr.mxu1 %v9604_v32  ;;  %9617 = vst [vmem:[#allocation24_spill] sm:$0xff] %v7118_v25  ;;  %9618 = vst [vmem:[#allocation25_spill] sm:$0xff] %v7120_v55  ;;  %v7124_v57 = vld [vmem:[#allocation9 + $0x168] sm:$0xff]  ;;  %v7126_v32 = vld [vmem:[#allocation9 + $0x178] sm:$0xff] }
 0x4d4   :  { %2663 = vmatpush1.msra.mxu0 %v9605_v39  ;;  %2734 = vmatpush1.msra.mxu1 %v9606_v5  ;;  %9619 = vst [vmem:[#allocation26_spill] sm:$0xff] %v7124_v57  ;;  %9620 = vst [vmem:[#allocation27_spill] sm:$0xff] %v7126_v32  ;;  %v7130_v39 = vld [vmem:[#allocation9 + $0x160] sm:$0xff]  ;;  %v7132_v5 = vld [vmem:[#allocation9 + $0x170] sm:$0xff] }
 0x4d5   :  { %2664 = vmatprep.subr.mxu0 %v9607_v38  ;;  %2735 = vmatprep.subr.mxu1 %v9608_v17  ;;  %9621 = vst [vmem:[#allocation28_spill] sm:$0xff] %v7130_v39  ;;  %9622 = vst [vmem:[#allocation29_spill] sm:$0xff] %v7132_v5  ;;  %v7136_v38 = vld [vmem:[#allocation9 + $0x148] sm:$0xff]  ;;  %v7138_v17 = vld [vmem:[#allocation9 + $0x158] sm:$0xff] }
 0x4d6   :  { %2665 = vmatpush1.msra.mxu0 %v9609_v54  ;;  %2736 = vmatpush1.msra.mxu1 %v6716_v20  ;;  %v6972_v20 = vld [vmem:[#allocation8 + $0xe8] sm:$0xff]  ;;  %9623 = vst [vmem:[#allocation30_spill] sm:$0xff] %v7136_v38  ;;  %9624 = vst [vmem:[#allocation31_spill] sm:$0xff] %v7138_v17  ;;  %v7142_v54 = vld [vmem:[#allocation9 + $0x140] sm:$0xff] }
 0x4d7   :  { %2666 = vmatprep.subr.mxu0 %v6720_v7  ;;  %2737 = vmatprep.subr.mxu1 %v6722_v2  ;;  %v6974_v7 = vld [vmem:[#allocation8 + $0xf8] sm:$0xff]  ;;  %v6978_v2 = vld [vmem:[#allocation8 + $0xe0] sm:$0xff]  ;;  %9625 = vst [vmem:[#allocation32_spill] sm:$0xff] %v7142_v54 }
 0x4d8   :  { %2667 = vmatpush1.msra.mxu0 %v6726_v43  ;;  %2738 = vmatpush1.msra.mxu1 %v6728_v36  ;;  %v6980_v43 = vld [vmem:[#allocation8 + $0xf0] sm:$0xff]  ;;  %v6984_v36 = vld [vmem:[#allocation8 + $0xc8] sm:$0xff] }
 0x4d9   :  { %2668 = vmatprep.subr.mxu0 %v6732_v23  ;;  %2739 = vmatprep.subr.mxu1 %v6734_v34  ;;  %v6986_v23 = vld [vmem:[#allocation8 + $0xd8] sm:$0xff]  ;;  %v6990_v34 = vld [vmem:[#allocation8 + $0xc0] sm:$0xff] }
 0x4da   :  { %2669 = vmatpush1.msra.mxu0 %v6738_v28  ;;  %2740 = vmatpush1.msra.mxu1 %v6740_v47  ;;  %v6992_v28 = vld [vmem:[#allocation8 + $0xd0] sm:$0xff]  ;;  %v6996_v47 = vld [vmem:[#allocation8 + $0xa8] sm:$0xff] }
 0x4db   :  { %2670 = vmatprep.subr.mxu0 %v6744_v42  ;;  %2741 = vmatprep.subr.mxu1 %v6746_v35  ;;  %v6998_v42 = vld [vmem:[#allocation8 + $0xb8] sm:$0xff]  ;;  %v7002_v35 = vld [vmem:[#allocation8 + $0xa0] sm:$0xff] }
 0x4dc   :  { %2671 = vmatpush1.msra.mxu0 %v6966_v22  ;;  %2742 = vmatpush1.msra.mxu1 %v6968_v16 }
 0x4dd   :  { %2672 = vmatprep.subr.mxu0 %v6972_v20  ;;  %2743 = vmatprep.subr.mxu1 %v6974_v7 }
 0x4de   :  { %2673 = vmatpush1.msra.mxu0 %v6978_v2  ;;  %2744 = vmatpush1.msra.mxu1 %v6980_v43 }
 0x4df   :  { %2674 = vmatprep.subr.mxu0 %v6984_v36  ;;  %2745 = vmatprep.subr.mxu1 %v6986_v23 }
 0x4e0   :  { %2675 = vmatpush1.msra.mxu0 %v6990_v34  ;;  %2746 = vmatpush1.msra.mxu1 %v6992_v28 }
 0x4e1   :  { %2676 = vmatprep.subr.mxu0 %v6996_v47  ;;  %2747 = vmatprep.subr.mxu1 %v6998_v42 }
 0x4e2   :  { %2677 = vmatpush1.msra.mxu0 %v7002_v35  ;;  %2748 = vmatpush1.msra.mxu1 %v7004_v58 }
 0x4e3   :  { %2678 = vmatprep.subr.mxu0 %v7008_v59  ;;  %2749 = vmatprep.subr.mxu1 %v7010_v60 }
 0x4e4   :  { %2679 = vmatpush1.msra.mxu0 %v7014_v61  ;;  %2750 = vmatpush1.msra.mxu1 %v7016_v62 }
 0x4e5   :  { %2680 = vmatprep.subr.mxu0 %v7020_v63  ;;  %2751 = vmatprep.subr.mxu1 %v7022_v1 }
 0x4e6   :  { %2681 = vmatpush1.msra.mxu0 %v7026_v3  ;;  %2752 = vmatpush1.msra.mxu1 %v7028_v4 }
 0x4e7   :  { %2682 = vmatprep.subr.mxu0 %v7032_v6  ;;  %2753 = vmatprep.subr.mxu1 %v7034_v8 }
 0x4e8   :  { %2683 = vmatpush1.msra.mxu0 %v7038_v9  ;;  %2754 = vmatpush1.msra.mxu1 %v7040_v11 }
 0x4e9   :  { %2684 = vmatprep.subr.mxu0 %v7044_v12  ;;  %2755 = vmatprep.subr.mxu1 %v7046_v13 }
 0x4ea   :  { %2685 = vmatpush1.msra.mxu0 %v7050_v14  ;;  %2756 = vmatpush1.msra.mxu1 %v7052_v15 }
 0x4eb   :  { %2686 = vmatprep.subr.mxu0 %v7056_v18  ;;  %2757 = vmatprep.subr.mxu1 %v7058_v19 }
 0x4ec   :  { %2687 = vmatpush1.msra.mxu0 %v7062_v27  ;;  %2720 = vmatprep.mubr.f32.mxu0 %v9190_v45 }
 0x4ed   :  { %2758 = vmatpush1.msra.mxu1 %v7066_v24  ;;  %2791 = vmatprep.mubr.f32.mxu1 %v9190_v45 }
 0x4ee   :  { %2721 = vmatmul.mubr.f32.vlgmr.msra.gmra.mxu0 %v6938_v53  ;;  %2792 = vmatmul.mubr.f32.vlgmr.msra.gmra.mxu1 %v6938_v53  ;;  %v7114_v53 = vld [vmem:[#allocation9 + $0x198] sm:$0xff] }
 0x4ef   :  { %2954 = vmatprep.subr.mxu0 %v7076_v44  ;;  %3025 = vmatprep.subr.mxu1 %v7078_v26  ;;  %9616 = vst [vmem:[#allocation23_spill] sm:$0xff] %v7114_v53 }
 0x4f0   :  { %2955 = vmatpush1.msra.mxu0 %v7082_v41  ;;  %3026 = vmatpush1.msra.mxu1 %v7084_v40 }
 0x4f1   :  { %2956 = vmatprep.subr.mxu0 %v7088_v0  ;;  %3027 = vmatprep.subr.mxu1 %v7090_v29 }
 0x4f2   :  { %2957 = vmatpush1.msra.mxu0 %v7094_v30  ;;  %3028 = vmatpush1.msra.mxu1 %v7096_v56 }
 0x4f3   :  { %2958 = vmatprep.subr.mxu0 %v7100_v33  ;;  %3029 = vmatprep.subr.mxu1 %v7102_v48 }
 0x4f4   :  { %2959 = vmatpush1.msra.mxu0 %v7106_v49  ;;  %3030 = vmatpush1.msra.mxu1 %v7108_v51 }
 0x4f5   :  { %2960 = vmatprep.subr.mxu0 %v7112_v52  ;;  %3031 = vmatprep.subr.mxu1 %v7114_v53  ;;  %v7386_v53 = vld [vmem:[#allocation9 + $0x2b8] sm:$0xff]  ;;  %v7402_v52 = vld [vmem:[#allocation9 + $0x280] sm:$0xff] }
 0x4f6   :  { %2961 = vmatpush1.msra.mxu0 %v7118_v25  ;;  %3032 = vmatpush1.msra.mxu1 %v7120_v55  ;;  %v7370_v55 = vld [vmem:[#allocation9 + $0x2f0] sm:$0xff]  ;;  %v7378_v25 = vld [vmem:[#allocation9 + $0x2c0] sm:$0xff]  ;;  %9708 = vst [vmem:[#allocation115_spill] sm:$0xff] %v7386_v53  ;;  %9713 = vst [vmem:[#allocation120_spill] sm:$0xff] %v7402_v52 }
 0x4f7   :  { %2962 = vmatprep.subr.mxu0 %v7124_v57  ;;  %3033 = vmatprep.subr.mxu1 %v7126_v32  ;;  %v7144_v57 = vld [vmem:[#allocation9 + $0x150] sm:$0xff]  ;;  %v7148_v32 = vld [vmem:[#allocation9 + $0x128] sm:$0xff]  ;;  %9702 = vst [vmem:[#allocation109_spill] sm:$0xff] %v7370_v55  ;;  %9705 = vst [vmem:[#allocation112_spill] sm:$0xff] %v7378_v25 }
 0x4f8   :  { %2963 = vmatpush1.msra.mxu0 %v7130_v39  ;;  %3034 = vmatpush1.msra.mxu1 %v7132_v5  ;;  %9626 = vst [vmem:[#allocation33_spill] sm:$0xff] %v7144_v57  ;;  %9627 = vst [vmem:[#allocation34_spill] sm:$0xff] %v7148_v32  ;;  %v7150_v39 = vld [vmem:[#allocation9 + $0x138] sm:$0xff]  ;;  %v7154_v5 = vld [vmem:[#allocation9 + $0x120] sm:$0xff] }
 0x4f9   :  { %2964 = vmatprep.subr.mxu0 %v7136_v38  ;;  %3035 = vmatprep.subr.mxu1 %v7138_v17  ;;  %9628 = vst [vmem:[#allocation35_spill] sm:$0xff] %v7150_v39  ;;  %9629 = vst [vmem:[#allocation36_spill] sm:$0xff] %v7154_v5  ;;  %v7156_v38 = vld [vmem:[#allocation9 + $0x130] sm:$0xff]  ;;  %v7160_v17 = vld [vmem:[#allocation9 + $0x108] sm:$0xff] }
 0x4fa   :  { %2965 = vmatpush1.msra.mxu0 %v7142_v54  ;;  %3036 = vmatpush1.msra.mxu1 %v7144_v57  ;;  %9630 = vst [vmem:[#allocation37_spill] sm:$0xff] %v7156_v38  ;;  %9631 = vst [vmem:[#allocation38_spill] sm:$0xff] %v7160_v17  ;;  %v7162_v54 = vld [vmem:[#allocation9 + $0x118] sm:$0xff]  ;;  %v7166_v57 = vld [vmem:[#allocation9 + $0x100] sm:$0xff] }
 0x4fb   :  { %2966 = vmatprep.subr.mxu0 %v7148_v32  ;;  %3037 = vmatprep.subr.mxu1 %v7150_v39  ;;  %9632 = vst [vmem:[#allocation39_spill] sm:$0xff] %v7162_v54  ;;  %9633 = vst [vmem:[#allocation40_spill] sm:$0xff] %v7166_v57  ;;  %v7168_v32 = vld [vmem:[#allocation9 + $0x110] sm:$0xff]  ;;  %v7172_v39 = vld [vmem:[#allocation9 + $0xe8] sm:$0xff] }
 0x4fc   :  { %2967 = vmatpush1.msra.mxu0 %v7154_v5  ;;  %3038 = vmatpush1.msra.mxu1 %v7156_v38  ;;  %9634 = vst [vmem:[#allocation41_spill] sm:$0xff] %v7168_v32  ;;  %9635 = vst [vmem:[#allocation42_spill] sm:$0xff] %v7172_v39  ;;  %v7174_v5 = vld [vmem:[#allocation9 + $0xf8] sm:$0xff]  ;;  %v7178_v38 = vld [vmem:[#allocation9 + $0xe0] sm:$0xff] }
 0x4fd   :  { %2968 = vmatprep.subr.mxu0 %v7160_v17  ;;  %3039 = vmatprep.subr.mxu1 %v7162_v54  ;;  %9636 = vst [vmem:[#allocation43_spill] sm:$0xff] %v7174_v5  ;;  %9637 = vst [vmem:[#allocation44_spill] sm:$0xff] %v7178_v38  ;;  %v7180_v17 = vld [vmem:[#allocation9 + $0xf0] sm:$0xff]  ;;  %v7184_v54 = vld [vmem:[#allocation9 + $0xc8] sm:$0xff] }
 0x4fe   :  { %2969 = vmatpush1.msra.mxu0 %v7166_v57  ;;  %3040 = vmatpush1.msra.mxu1 %v7168_v32  ;;  %9638 = vst [vmem:[#allocation45_spill] sm:$0xff] %v7180_v17  ;;  %9639 = vst [vmem:[#allocation46_spill] sm:$0xff] %v7184_v54  ;;  %v7186_v57 = vld [vmem:[#allocation9 + $0xd8] sm:$0xff]  ;;  %v7190_v32 = vld [vmem:[#allocation9 + $0xc0] sm:$0xff] }
 0x4ff   :  { %2970 = vmatprep.subr.mxu0 %v7172_v39  ;;  %3041 = vmatprep.subr.mxu1 %v7174_v5  ;;  %9640 = vst [vmem:[#allocation47_spill] sm:$0xff] %v7186_v57  ;;  %9641 = vst [vmem:[#allocation48_spill] sm:$0xff] %v7190_v32  ;;  %v7192_v39 = vld [vmem:[#allocation9 + $0xd0] sm:$0xff]  ;;  %v7196_v5 = vld [vmem:[#allocation9 + $0xa8] sm:$0xff] }
 0x500   :  { %2971 = vmatpush1.msra.mxu0 %v7178_v38  ;;  %3042 = vmatpush1.msra.mxu1 %v7180_v17  ;;  %9642 = vst [vmem:[#allocation49_spill] sm:$0xff] %v7192_v39  ;;  %9643 = vst [vmem:[#allocation50_spill] sm:$0xff] %v7196_v5  ;;  %v7198_v38 = vld [vmem:[#allocation9 + $0xb8] sm:$0xff]  ;;  %v7202_v17 = vld [vmem:[#allocation9 + $0xa0] sm:$0xff] }
 0x501   :  { %2972 = vmatprep.subr.mxu0 %v7184_v54  ;;  %3043 = vmatprep.subr.mxu1 %v7186_v57  ;;  %9644 = vst [vmem:[#allocation51_spill] sm:$0xff] %v7198_v38  ;;  %9645 = vst [vmem:[#allocation52_spill] sm:$0xff] %v7202_v17  ;;  %v7204_v54 = vld [vmem:[#allocation9 + $0xb0] sm:$0xff]  ;;  %v7208_v57 = vld [vmem:[#allocation9 + $0x88] sm:$0xff] }
 0x502   :  { %2973 = vmatpush1.msra.mxu0 %v7190_v32  ;;  %3044 = vmatpush1.msra.mxu1 %v7192_v39  ;;  %9646 = vst [vmem:[#allocation53_spill] sm:$0xff] %v7204_v54  ;;  %9647 = vst [vmem:[#allocation54_spill] sm:$0xff] %v7208_v57  ;;  %v7210_v32 = vld [vmem:[#allocation9 + $0x98] sm:$0xff]  ;;  %v7214_v39 = vld [vmem:[#allocation9 + $0x80] sm:$0xff] }
 0x503   :  { %2974 = vmatprep.subr.mxu0 %v7196_v5  ;;  %3045 = vmatprep.subr.mxu1 %v7198_v38  ;;  %9648 = vst [vmem:[#allocation55_spill] sm:$0xff] %v7210_v32  ;;  %9649 = vst [vmem:[#allocation56_spill] sm:$0xff] %v7214_v39  ;;  %v7216_v5 = vld [vmem:[#allocation9 + $0x90] sm:$0xff]  ;;  %v7220_v38 = vld [vmem:[#allocation9 + $0x68] sm:$0xff] }
 0x504   :  { %2975 = vmatpush1.msra.mxu0 %v7202_v17  ;;  %3046 = vmatpush1.msra.mxu1 %v7204_v54  ;;  %9650 = vst [vmem:[#allocation57_spill] sm:$0xff] %v7216_v5  ;;  %9651 = vst [vmem:[#allocation58_spill] sm:$0xff] %v7220_v38  ;;  %v7222_v17 = vld [vmem:[#allocation9 + $0x78] sm:$0xff]  ;;  %v7226_v54 = vld [vmem:[#allocation9 + $0x60] sm:$0xff] }
 0x505   :  { %2976 = vmatprep.subr.mxu0 %v7208_v57  ;;  %3047 = vmatprep.subr.mxu1 %v7210_v32  ;;  %9652 = vst [vmem:[#allocation59_spill] sm:$0xff] %v7222_v17  ;;  %9653 = vst [vmem:[#allocation60_spill] sm:$0xff] %v7226_v54  ;;  %v7228_v57 = vld [vmem:[#allocation9 + $0x70] sm:$0xff]  ;;  %v7232_v32 = vld [vmem:[#allocation9 + $0x48] sm:$0xff] }
 0x506   :  { %2977 = vmatpush1.msra.mxu0 %v7214_v39  ;;  %3048 = vmatpush1.msra.mxu1 %v7216_v5  ;;  %9654 = vst [vmem:[#allocation61_spill] sm:$0xff] %v7228_v57  ;;  %9655 = vst [vmem:[#allocation62_spill] sm:$0xff] %v7232_v32  ;;  %v7234_v39 = vld [vmem:[#allocation9 + $0x58] sm:$0xff]  ;;  %v7238_v5 = vld [vmem:[#allocation9 + $0x40] sm:$0xff] }
 0x507   :  { %2978 = vmatprep.subr.mxu0 %v7220_v38  ;;  %3049 = vmatprep.subr.mxu1 %v7222_v17  ;;  %9656 = vst [vmem:[#allocation63_spill] sm:$0xff] %v7234_v39  ;;  %9657 = vst [vmem:[#allocation64_spill] sm:$0xff] %v7238_v5  ;;  %v7240_v38 = vld [vmem:[#allocation9 + $0x50] sm:$0xff]  ;;  %v7244_v17 = vld [vmem:[#allocation9 + $0x28] sm:$0xff] }
 0x508   :  { %2979 = vmatpush1.msra.mxu0 %v7226_v54  ;;  %3050 = vmatpush1.msra.mxu1 %v7228_v57  ;;  %9658 = vst [vmem:[#allocation65_spill] sm:$0xff] %v7240_v38  ;;  %9659 = vst [vmem:[#allocation66_spill] sm:$0xff] %v7244_v17  ;;  %v7246_v54 = vld [vmem:[#allocation9 + $0x38] sm:$0xff]  ;;  %v7250_v57 = vld [vmem:[#allocation9 + $0x20] sm:$0xff] }
 0x509   :  { %2980 = vmatprep.subr.mxu0 %v7232_v32  ;;  %3051 = vmatprep.subr.mxu1 %v7234_v39  ;;  %9660 = vst [vmem:[#allocation67_spill] sm:$0xff] %v7246_v54  ;;  %9661 = vst [vmem:[#allocation68_spill] sm:$0xff] %v7250_v57  ;;  %v7252_v32 = vld [vmem:[#allocation9 + $0x30] sm:$0xff]  ;;  %v7256_v39 = vld [vmem:[#allocation9 + $0x8] sm:$0xff] }
 0x50a   :  { %2981 = vmatpush1.msra.mxu0 %v7238_v5  ;;  %3052 = vmatpush1.msra.mxu1 %v7240_v38  ;;  %9662 = vst [vmem:[#allocation69_spill] sm:$0xff] %v7252_v32  ;;  %9663 = vst [vmem:[#allocation70_spill] sm:$0xff] %v7256_v39  ;;  %v7258_v5 = vld [vmem:[#allocation9 + $0x18] sm:$0xff]  ;;  %v7262_v38 = vld [vmem:[#allocation9] sm:$0xff] }
 0x50b   :  { %2982 = vmatprep.subr.mxu0 %v7244_v17  ;;  %3053 = vmatprep.subr.mxu1 %v7246_v54  ;;  %9664 = vst [vmem:[#allocation71_spill] sm:$0xff] %v7258_v5  ;;  %9665 = vst [vmem:[#allocation72_spill] sm:$0xff] %v7262_v38  ;;  %v7264_v17 = vld [vmem:[#allocation9 + $0x10] sm:$0xff]  ;;  %v7268_v54 = vld [vmem:[#allocation9 + $0x3e8] sm:$0xff] }
 0x50c   :  { %2983 = vmatpush1.msra.mxu0 %v7250_v57  ;;  %3054 = vmatpush1.msra.mxu1 %v7252_v32  ;;  %9666 = vst [vmem:[#allocation73_spill] sm:$0xff] %v7264_v17  ;;  %9667 = vst [vmem:[#allocation74_spill] sm:$0xff] %v7268_v54  ;;  %v7270_v57 = vld [vmem:[#allocation9 + $0x3f8] sm:$0xff]  ;;  %v7274_v32 = vld [vmem:[#allocation9 + $0x3e0] sm:$0xff] }
 0x50d   :  { %2984 = vmatprep.subr.mxu0 %v7256_v39  ;;  %3055 = vmatprep.subr.mxu1 %v7258_v5  ;;  %9668 = vst [vmem:[#allocation75_spill] sm:$0xff] %v7270_v57  ;;  %9669 = vst [vmem:[#allocation76_spill] sm:$0xff] %v7274_v32  ;;  %v7276_v39 = vld [vmem:[#allocation9 + $0x3f0] sm:$0xff]  ;;  %v7280_v5 = vld [vmem:[#allocation9 + $0x3c8] sm:$0xff] }
 0x50e   :  { %2985 = vmatpush1.msra.mxu0 %v7262_v38  ;;  %3056 = vmatpush1.msra.mxu1 %v7264_v17  ;;  %9670 = vst [vmem:[#allocation77_spill] sm:$0xff] %v7276_v39  ;;  %9671 = vst [vmem:[#allocation78_spill] sm:$0xff] %v7280_v5  ;;  %v7282_v38 = vld [vmem:[#allocation9 + $0x3d8] sm:$0xff]  ;;  %v7286_v17 = vld [vmem:[#allocation9 + $0x3c0] sm:$0xff] }
 0x50f   :  { %2986 = vmatprep.subr.mxu0 %v7268_v54  ;;  %3057 = vmatprep.subr.mxu1 %v7270_v57  ;;  %9672 = vst [vmem:[#allocation79_spill] sm:$0xff] %v7282_v38  ;;  %9673 = vst [vmem:[#allocation80_spill] sm:$0xff] %v7286_v17  ;;  %v7288_v54 = vld [vmem:[#allocation9 + $0x3d0] sm:$0xff]  ;;  %v7292_v57 = vld [vmem:[#allocation9 + $0x3a8] sm:$0xff] }
 0x510   :  { %2987 = vmatpush2.msra.mxu0 %v7274_v32  ;;  %3058 = vmatpush2.msra.mxu1 %v7276_v39  ;;  %9674 = vst [vmem:[#allocation81_spill] sm:$0xff] %v7288_v54  ;;  %9675 = vst [vmem:[#allocation82_spill] sm:$0xff] %v7292_v57  ;;  %v7294_v32 = vld [vmem:[#allocation9 + $0x3b8] sm:$0xff]  ;;  %v7298_v39 = vld [vmem:[#allocation9 + $0x3a0] sm:$0xff] }
 0x511   :  { %2988 = vmatprep.subr.mxu0 %v7280_v5  ;;  %3059 = vmatprep.subr.mxu1 %v7282_v38  ;;  %9676 = vst [vmem:[#allocation83_spill] sm:$0xff] %v7294_v32  ;;  %9677 = vst [vmem:[#allocation84_spill] sm:$0xff] %v7298_v39  ;;  %v7300_v5 = vld [vmem:[#allocation9 + $0x3b0] sm:$0xff]  ;;  %v7304_v38 = vld [vmem:[#allocation9 + $0x388] sm:$0xff] }
 0x512   :  { %2989 = vmatpush2.msra.mxu0 %v7286_v17  ;;  %3060 = vmatpush2.msra.mxu1 %v7288_v54  ;;  %9678 = vst [vmem:[#allocation85_spill] sm:$0xff] %v7300_v5  ;;  %9679 = vst [vmem:[#allocation86_spill] sm:$0xff] %v7304_v38  ;;  %v7306_v17 = vld [vmem:[#allocation9 + $0x398] sm:$0xff]  ;;  %v7310_v54 = vld [vmem:[#allocation9 + $0x380] sm:$0xff] }
 0x513   :  { %2990 = vmatprep.subr.mxu0 %v7292_v57  ;;  %3061 = vmatprep.subr.mxu1 %v7294_v32  ;;  %9680 = vst [vmem:[#allocation87_spill] sm:$0xff] %v7306_v17  ;;  %9681 = vst [vmem:[#allocation88_spill] sm:$0xff] %v7310_v54  ;;  %v7312_v57 = vld [vmem:[#allocation9 + $0x390] sm:$0xff]  ;;  %v7316_v32 = vld [vmem:[#allocation9 + $0x368] sm:$0xff] }
 0x514   :  { %2991 = vmatpush2.msra.mxu0 %v7298_v39  ;;  %3062 = vmatpush2.msra.mxu1 %v7300_v5  ;;  %9682 = vst [vmem:[#allocation89_spill] sm:$0xff] %v7312_v57  ;;  %9683 = vst [vmem:[#allocation90_spill] sm:$0xff] %v7316_v32  ;;  %v7318_v39 = vld [vmem:[#allocation9 + $0x378] sm:$0xff]  ;;  %v7322_v5 = vld [vmem:[#allocation9 + $0x360] sm:$0xff] }
 0x515   :  { %2992 = vmatprep.subr.mxu0 %v7304_v38  ;;  %3063 = vmatprep.subr.mxu1 %v7306_v17  ;;  %9684 = vst [vmem:[#allocation91_spill] sm:$0xff] %v7318_v39  ;;  %9685 = vst [vmem:[#allocation92_spill] sm:$0xff] %v7322_v5  ;;  %v7324_v38 = vld [vmem:[#allocation9 + $0x370] sm:$0xff]  ;;  %v7328_v17 = vld [vmem:[#allocation9 + $0x348] sm:$0xff] }
 0x516   :  { %2993 = vmatpush2.msra.mxu0 %v7310_v54  ;;  %3064 = vmatpush2.msra.mxu1 %v7312_v57  ;;  %9686 = vst [vmem:[#allocation93_spill] sm:$0xff] %v7324_v38  ;;  %9687 = vst [vmem:[#allocation94_spill] sm:$0xff] %v7328_v17  ;;  %v7330_v54 = vld [vmem:[#allocation9 + $0x358] sm:$0xff]  ;;  %v7334_v57 = vld [vmem:[#allocation9 + $0x340] sm:$0xff] }
 0x517   :  { %2994 = vmatprep.subr.mxu0 %v7316_v32  ;;  %3065 = vmatprep.subr.mxu1 %v7318_v39  ;;  %9688 = vst [vmem:[#allocation95_spill] sm:$0xff] %v7330_v54  ;;  %9689 = vst [vmem:[#allocation96_spill] sm:$0xff] %v7334_v57  ;;  %v7336_v32 = vld [vmem:[#allocation9 + $0x350] sm:$0xff]  ;;  %v7340_v39 = vld [vmem:[#allocation9 + $0x328] sm:$0xff] }
 0x518   :  { %2995 = vmatpush2.msra.mxu0 %v7322_v5  ;;  %3066 = vmatpush2.msra.mxu1 %v7324_v38  ;;  %9690 = vst [vmem:[#allocation97_spill] sm:$0xff] %v7336_v32  ;;  %9691 = vst [vmem:[#allocation98_spill] sm:$0xff] %v7340_v39  ;;  %v7342_v5 = vld [vmem:[#allocation9 + $0x338] sm:$0xff]  ;;  %v7346_v38 = vld [vmem:[#allocation9 + $0x320] sm:$0xff] }
 0x519   :  { %2996 = vmatprep.subr.mxu0 %v7328_v17  ;;  %3067 = vmatprep.subr.mxu1 %v7330_v54  ;;  %9692 = vst [vmem:[#allocation99_spill] sm:$0xff] %v7342_v5  ;;  %9693 = vst [vmem:[#allocation100_spill] sm:$0xff] %v7346_v38  ;;  %v7348_v17 = vld [vmem:[#allocation9 + $0x330] sm:$0xff]  ;;  %v7352_v54 = vld [vmem:[#allocation9 + $0x308] sm:$0xff] }
 0x51a   :  { %2997 = vmatpush2.msra.mxu0 %v7334_v57  ;;  %3068 = vmatpush2.msra.mxu1 %v7336_v32  ;;  %9694 = vst [vmem:[#allocation101_spill] sm:$0xff] %v7348_v17  ;;  %9695 = vst [vmem:[#allocation102_spill] sm:$0xff] %v7352_v54  ;;  %v7354_v57 = vld [vmem:[#allocation9 + $0x318] sm:$0xff]  ;;  %v7358_v32 = vld [vmem:[#allocation9 + $0x300] sm:$0xff] }
 0x51b   :  { %2998 = vmatprep.subr.mxu0 %v7340_v39  ;;  %3069 = vmatprep.subr.mxu1 %v7342_v5  ;;  %9696 = vst [vmem:[#allocation103_spill] sm:$0xff] %v7354_v57  ;;  %9697 = vst [vmem:[#allocation104_spill] sm:$0xff] %v7358_v32  ;;  %v7360_v39 = vld [vmem:[#allocation9 + $0x310] sm:$0xff]  ;;  %v7362_v5 = vld [vmem:[#allocation9 + $0x2e8] sm:$0xff] }
 0x51c   :  { %2999 = vmatpush2.msra.mxu0 %v7346_v38  ;;  %3070 = vmatpush2.msra.mxu1 %v7348_v17  ;;  %9698 = vst [vmem:[#allocation105_spill] sm:$0xff] %v7360_v39  ;;  %9699 = vst [vmem:[#allocation106_spill] sm:$0xff] %v7362_v5  ;;  %v7366_v38 = vld [vmem:[#allocation9 + $0x2f8] sm:$0xff]  ;;  %v7368_v17 = vld [vmem:[#allocation9 + $0x2e0] sm:$0xff] }
 0x51d   :  { %3000 = vmatprep.subr.mxu0 %v7352_v54  ;;  %3071 = vmatprep.subr.mxu1 %v7354_v57  ;;  %9700 = vst [vmem:[#allocation107_spill] sm:$0xff] %v7366_v38  ;;  %9701 = vst [vmem:[#allocation108_spill] sm:$0xff] %v7368_v17  ;;  %v7374_v57 = vld [vmem:[#allocation9 + $0x2c8] sm:$0xff]  ;;  %v7376_v54 = vld [vmem:[#allocation9 + $0x2d8] sm:$0xff] }
 0x51e   :  { %3001 = vmatpush2.msra.mxu0 %v7358_v32  ;;  %3072 = vmatpush2.msra.mxu1 %v7360_v39  ;;  %9703 = vst [vmem:[#allocation110_spill] sm:$0xff] %v7374_v57  ;;  %9704 = vst [vmem:[#allocation111_spill] sm:$0xff] %v7376_v54  ;;  %v7382_v39 = vld [vmem:[#allocation9 + $0x2d0] sm:$0xff]  ;;  %v7384_v32 = vld [vmem:[#allocation9 + $0x2a8] sm:$0xff] }
 0x51f   :  { %3002 = vmatprep.subr.mxu0 %v7362_v5  ;;  %3073 = vmatprep.subr.mxu1 %v7366_v38  ;;  %9706 = vst [vmem:[#allocation113_spill] sm:$0xff] %v7382_v39  ;;  %9707 = vst [vmem:[#allocation114_spill] sm:$0xff] %v7384_v32  ;;  %v7390_v38 = vld [vmem:[#allocation9 + $0x2a0] sm:$0xff]  ;;  %v7392_v5 = vld [vmem:[#allocation9 + $0x2b0] sm:$0xff] }
 0x520   :  { %3003 = vmatpush2.msra.mxu0 %v7368_v17  ;;  %3074 = vmatpush2.msra.mxu1 %v7370_v55  ;;  %9709 = vst [vmem:[#allocation116_spill] sm:$0xff] %v7390_v38  ;;  %9710 = vst [vmem:[#allocation117_spill] sm:$0xff] %v7392_v5  ;;  %v7396_v17 = vld [vmem:[#allocation9 + $0x288] sm:$0xff]  ;;  %v7398_v55 = vld [vmem:[#allocation9 + $0x298] sm:$0xff] }
 0x521   :  { %3004 = vmatprep.subr.mxu0 %v7374_v57  ;;  %3075 = vmatprep.subr.mxu1 %v7376_v54  ;;  %9711 = vst [vmem:[#allocation118_spill] sm:$0xff] %v7396_v17  ;;  %9712 = vst [vmem:[#allocation119_spill] sm:$0xff] %v7398_v55  ;;  %v7404_v57 = vld [vmem:[#allocation9 + $0x290] sm:$0xff]  ;;  %v7408_v54 = vld [vmem:[#allocation9 + $0x268] sm:$0xff] }
 0x522   :  { %3005 = vmatpush2.msra.mxu0 %v7378_v25  ;;  %3076 = vmatpush2.msra.mxu1 %v7382_v39  ;;  %9714 = vst [vmem:[#allocation121_spill] sm:$0xff] %v7404_v57  ;;  %9715 = vst [vmem:[#allocation122_spill] sm:$0xff] %v7408_v54  ;;  %v7410_v25 = vld [vmem:[#allocation9 + $0x278] sm:$0xff]  ;;  %v7414_v39 = vld [vmem:[#allocation9 + $0x260] sm:$0xff] }
 0x523   :  { %3006 = vmatprep.subr.mxu0 %v7384_v32  ;;  %3077 = vmatprep.subr.mxu1 %v7386_v53  ;;  %9716 = vst [vmem:[#allocation123_spill] sm:$0xff] %v7410_v25  ;;  %9717 = vst [vmem:[#allocation124_spill] sm:$0xff] %v7414_v39  ;;  %v7416_v32 = vld [vmem:[#allocation9 + $0x270] sm:$0xff]  ;;  %v7420_v53 = vld [vmem:[#allocation9 + $0x248] sm:$0xff] }
 0x524   :  { %3007 = vmatpush2.msra.mxu0 %v7390_v38  ;;  %3078 = vmatpush2.msra.mxu1 %v7392_v5  ;;  %9718 = vst [vmem:[#allocation125_spill] sm:$0xff] %v7416_v32  ;;  %9719 = vst [vmem:[#allocation126_spill] sm:$0xff] %v7420_v53  ;;  %v7422_v38 = vld [vmem:[#allocation9 + $0x258] sm:$0xff]  ;;  %v7426_v5 = vld [vmem:[#allocation9 + $0x240] sm:$0xff] }
 0x525   :  { %3008 = vmatprep.subr.mxu0 %v7396_v17  ;;  %3079 = vmatprep.subr.mxu1 %v7398_v55  ;;  %9720 = vst [vmem:[#allocation127_spill] sm:$0xff] %v7422_v38  ;;  %9721 = vst [vmem:[#allocation128_spill] sm:$0xff] %v7426_v5  ;;  %v7428_v17 = vld [vmem:[#allocation9 + $0x250] sm:$0xff]  ;;  %v7432_v55 = vld [vmem:[#allocation9 + $0x228] sm:$0xff] }
 0x526   :  { %3009 = vmatpush2.msra.mxu0 %v7402_v52  ;;  %3080 = vmatpush2.msra.mxu1 %v7404_v57  ;;  %9722 = vst [vmem:[#allocation129_spill] sm:$0xff] %v7428_v17  ;;  %9723 = vst [vmem:[#allocation130_spill] sm:$0xff] %v7432_v55  ;;  %v7434_v52 = vld [vmem:[#allocation9 + $0x238] sm:$0xff]  ;;  %v7438_v57 = vld [vmem:[#allocation9 + $0x220] sm:$0xff] }
 0x527   :  { %3010 = vmatprep.subr.mxu0 %v7408_v54  ;;  %3081 = vmatprep.subr.mxu1 %v7410_v25  ;;  %9724 = vst [vmem:[#allocation131_spill] sm:$0xff] %v7434_v52  ;;  %9725 = vst [vmem:[#allocation133_spill] sm:$0xff] %v7438_v57  ;;  %v7440_v54 = vld [vmem:[#allocation9 + $0x230] sm:$0xff]  ;;  %v7444_v25 = vld [vmem:[#allocation9 + $0x208] sm:$0xff] }
 0x528   :  { %3011 = vmatpush2.msra.mxu0 %v7414_v39  ;;  %3082 = vmatpush2.msra.mxu1 %v7416_v32  ;;  %9726 = vst [vmem:[#allocation134_spill] sm:$0xff] %v7440_v54  ;;  %9727 = vst [vmem:[#allocation132_spill] sm:$0xff] %v7444_v25  ;;  %v7446_v39 = vld [vmem:[#allocation9 + $0x218] sm:$0xff]  ;;  %v7450_v32 = vld [vmem:[#allocation9 + $0x200] sm:$0xff] }
 0x529   :  { %3012 = vmatprep.subr.mxu0 %v7420_v53  ;;  %3083 = vmatprep.subr.mxu1 %v7422_v38  ;;  %9728 = vst [vmem:[#allocation159_spill] sm:$0xff] %v7446_v39  ;;  %9729 = vst [vmem:[#allocation160_spill] sm:$0xff] %v7450_v32  ;;  %v7452_v53 = vld [vmem:[#allocation9 + $0x210] sm:$0xff]  ;;  %v7456_v38 = vld [vmem:[#allocation8 + $0x1e8] sm:$0xff] }
 0x52a   :  { %3013 = vmatpush2.msra.mxu0 %v7426_v5  ;;  %3084 = vmatpush2.msra.mxu1 %v7428_v17  ;;  %9730 = vst [vmem:[#allocation161_spill] sm:$0xff] %v7452_v53  ;;  %9731 = vst [vmem:[#allocation162_spill] sm:$0xff] %v7456_v38  ;;  %v7458_v5 = vld [vmem:[#allocation8 + $0x1f8] sm:$0xff] }
 0x52b   :  { %3014 = vmatprep.subr.mxu0 %v7432_v55  ;;  %3085 = vmatprep.subr.mxu1 %v7434_v52  ;;  %9732 = vst [vmem:[#allocation163_spill] sm:$0xff] %v7458_v5 }
 0x52c   :  { %3015 = vmatpush2.msra.mxu0 %v7438_v57  ;;  %3086 = vmatpush2.msra.mxu1 %v7440_v54 }
 0x52d   :  { %3016 = vmatprep.subr.mxu0 %v7444_v25  ;;  %3087 = vmatprep.subr.mxu1 %v7446_v39 }
 0x52e   :  { %3017 = vmatpush2.msra.mxu0 %v7450_v32  ;;  %3088 = vmatpush2.msra.mxu1 %v7452_v53 }
 0x52f   :  { %3190 = vmatprep.subr.mxu0 %v7456_v38  ;;  %3261 = vmatprep.subr.mxu1 %v7458_v5 }
 0x58d   :  { %v2486_v52 = vpop.f32.mrf.mxu0  ;;  %v2557_v51 = vpop.f32.mrf.mxu1 }
 0x58e   :  { %v2487_v57 = vadd.f32 %v2486_v52, %v9593_v21  ;;  %v2558_v38 = vadd.f32 %v2557_v51, %v9596_v46 }
 0x58f   :  { %v2488_v54 = vpop.f32.mrf.mxu0  ;;  %v2559_v39 = vpop.f32.mrf.mxu1 }
 0x590   :  { %v4764_v55 = vmul.f32 -1.442695, %v2487_v57  ;;  %v2489_v17 = vadd.f32 %v2488_v54, %v9594_v31  ;;  %v2560_v32 = vadd.f32 %v2559_v39, %v9595_v37  ;;  %v9733_v31 = vld [vmem:[#allocation143_spill] sm:$0xff] }
 0x592   :  { %4913 = vpow2.f32 %v4764_v55  ;;  %v4765_v25 = vmul.f32 -1.442695, %v2489_v17  ;;  %v4766_v49 = vmul.f32 -1.442695, %v2560_v32  ;;  %v9734_v32 = vld [vmem:[#allocation145_spill] sm:$0xff] }
 0x594   :  { %4915 = vpow2.f32 %v4765_v25 }
 0x595   :  { %4917 = vpow2.f32 %v4766_v49 }
 0x59f   :  { %v4914_v53 = vpop.eup %4913 }
 0x5a0   :  { %v2565_v48 = vadd.f32 1.0, %v4914_v53 }
 0x5a1   :  { %v4916_v5 = vpop.eup %4915 }
 0x5a2   :  { %4919 = vrcp.f32 %v2565_v48  ;;  %v2571_v52 = vadd.f32 1.0, %v4916_v5  ;;  %v4918_v57 = vpop.eup %4917 }
 0x5a3   :  { %4921 = vtanh.f32 %v2558_v38  ;;  %v2578_v53 = vadd.f32 1.0, %v4918_v57 }
 0x5a4   :  { %4923 = vrcp.f32 %v2571_v52 }
 0x5ae   :  { %v2722_v54 = vpop.f32.mrf.mxu0  ;;  %v2793_v48 = vpop.f32.mrf.mxu1 }
 0x5af   :  { %v4920_v55 = vpop.eup %4919  ;;  %v2798_v17 = vadd.f32 %v2722_v54, %v9733_v31  ;;  %v9735_v31 = vld [vmem:[#allocation146_spill] sm:$0xff]  ;;  %v9736_v54 = vld [vmem:[#allocation144_spill] sm:$0xff] }
 0x5b0   :  { %v4922_v25 = vpop.eup %4921  ;;  %v2724_v21 = vpop.f32.mrf.mxu0 }
 0x5b1   :  { %v4924_v33 = vpop.eup %4923  ;;  %v4767_v39 = vmul.f32 -1.442695, %v2798_v17  ;;  %v2799_v37 = vadd.f32 %v2724_v21, %v9734_v32  ;;  %v2582_v56 = vmul.f32 %v4922_v25, %v4920_v55  ;;  %v2795_v38 = vpop.f32.mrf.mxu1  ;;  %v2800_v17 = vadd.f32 %v2793_v48, %v9736_v54  ;;  %v7484_v54 = vld [vmem:[#allocation8 + $0x1e0] sm:$0xff] }
 0x5b2   :  { %v2581_v51 = vmul.f32 %v4924_v33, %v6929_v10  ;;  %v2801_v52 = vadd.f32 %v2795_v38, %v9735_v31 }
 0x5b3   :  { %4925 = vpow2.f32 %v4767_v39  ;;  %v4768_v49 = vmul.f32 -1.442695, %v2799_v37 }
 0x5b4   :  { %v7473_v5 = vadd.f32 %v2582_v56, %v2581_v51  ;;  %v4769_v46 = vmul.f32 -1.442695, %v2801_v52 }
 0x5b5   :  { %4927 = vpow2.f32 %v4768_v49 }
 0x5b6   :  { %4929 = vrcp.f32 %v2578_v53 }
 0x5b7   :  { %4931 = vtanh.f32 %v7473_v5 }
 0x5b8   :  { %4933 = vtanh.f32 %v2800_v17  ;;  %v7486_v17 = vld [vmem:[#allocation8 + $0x1f0] sm:$0xff] }
 0x5b9   :  { %4935 = vpow2.f32 %v4769_v46 }
 0x5c0   :  { %v4926_v21 = vpop.eup %4925 }
 0x5c1   :  { %v2805_v55 = vadd.f32 1.0, %v4926_v21  ;;  %v7488_v21 = vld [vmem:[#allocation8 + $0x1c8] sm:$0xff] }
 0x5c2   :  { %v4928_v10 = vpop.eup %4927 }
 0x5c3   :  { %v4930_v33 = vpop.eup %4929  ;;  %4937 = vrcp.f32 %v2805_v55  ;;  %v2811_v37 = vadd.f32 1.0, %v4928_v10  ;;  %v7490_v55 = vld [vmem:[#allocation8 + $0x1d8] sm:$0xff]  ;;  %v7496_v10 = vld [vmem:[#allocation8 + $0x1d0] sm:$0xff] }
 0x5c4   :  { %v4932_v56 = vpop.eup %4931 }
 0x5c5   :  { %4939 = vrcp.f32 %v2811_v37  ;;  %v2585_v57 = vmul.f32 %v4932_v56, %v4930_v33  ;;  %v4934_v25 = vpop.eup %4933  ;;  %v7500_v33 = vld [vmem:[#allocation8 + $0x1a8] sm:$0xff]  ;;  %v7502_v37 = vld [vmem:[#allocation8 + $0x1b8] sm:$0xff]  ;;  %v7506_v56 = vld [vmem:[#allocation8 + $0x1a0] sm:$0xff] }
 0x5c6   :  { %v4936_v39 = vpop.eup %4935  ;;  %9737 = vst [vmem:[#allocation164_spill] sm:$0xff] %v7506_v56 }
 0x5c7   :  { %2587 = vst [vmem:[#allocation11 + $0x18] sm:$0xff] %v2585_v57  ;;  %3018 = vmatprep.mubr.f32.mxu0 %v2585_v57  ;;  %3089 = vmatprep.mubr.f32.mxu1 %v2585_v57  ;;  %v2818_v48 = vadd.f32 1.0, %v4936_v39  ;;  %v7508_v57 = vld [vmem:[#allocation8 + $0x1b0] sm:$0xff]  ;;  %v7514_v39 = vld [vmem:[#allocation8 + $0x198] sm:$0xff] }
 0x5c8   :  { %9738 = vst [vmem:[#allocation165_spill] sm:$0xff] %v7508_v57  ;;  %9740 = vst [vmem:[#allocation139_spill] sm:$0xff] %v7514_v39 }
 0x5c9   :  { %4941 = vrcp.f32 %v2818_v48  ;;  %v7526_v48 = vld [vmem:[#allocation8 + $0x178] sm:$0xff] }
 0x5ca   :  { %9744 = vst [vmem:[#allocation167_spill] sm:$0xff] %v7526_v48 }
 0x5d0   :  { %v4938_v32 = vpop.eup %4937 }
 0x5d1   :  { %v2822_v51 = vmul.f32 %v4938_v32, %v4934_v25  ;;  %v7512_v25 = vld [vmem:[#allocation8 + $0x188] sm:$0xff]  ;;  %v7518_v32 = vld [vmem:[#allocation8 + $0x180] sm:$0xff] }
 0x5d2   :  { %v4940_v53 = vpop.eup %4939  ;;  %9739 = vst [vmem:[#allocation166_spill] sm:$0xff] %v7512_v25  ;;  %9741 = vst [vmem:[#allocation141_spill] sm:$0xff] %v7518_v32 }
 0x5d3   :  { %v2821_v49 = vmul.f32 %v4940_v53, %v6935_v50  ;;  %v7494_v50 = vld [vmem:[#allocation8 + $0x1c0] sm:$0xff]  ;;  %v7524_v53 = vld [vmem:[#allocation8 + $0x168] sm:$0xff] }
 0x5d4   :  { %9743 = vst [vmem:[#allocation140_spill] sm:$0xff] %v7524_v53 }
 0x5d5   :  { %v7479_v38 = vadd.f32 %v2822_v51, %v2821_v49  ;;  %v7520_v51 = vld [vmem:[#allocation8 + $0x190] sm:$0xff]  ;;  %v7530_v49 = vld [vmem:[#allocation8 + $0x160] sm:$0xff] }
 0x5d6   :  { %v4942_v46 = vpop.eup %4941  ;;  %9742 = vst [vmem:[#allocation142_spill] sm:$0xff] %v7520_v51  ;;  %9745 = vst [vmem:[#allocation168_spill] sm:$0xff] %v7530_v49 }
 0x5d7   :  { %4943 = vtanh.f32 %v7479_v38 }
 0x5e4   :  { %v4944_v31 = vpop.eup %4943 }
 0x5e5   :  { %v7482_v52 = vmul.f32 %v4944_v31, %v4942_v46  ;;  %v7532_v46 = vld [vmem:[#allocation8 + $0x170] sm:$0xff]  ;;  %v7536_v31 = vld [vmem:[#allocation8 + $0x148] sm:$0xff] }
 0x5e7   :  { %3019 = vmatmul.mubr.f32.vlgmr.msra.gmra.mxu0 %v7482_v52  ;;  %3090 = vmatmul.mubr.f32.vlgmr.msra.gmra.mxu1 %v7482_v52 }
 0x5e8   :  { %3191 = vmatpush1.msra.mxu0 %v7484_v54  ;;  %3262 = vmatpush1.msra.mxu1 %v7486_v17 }
 0x5e9   :  { %3192 = vmatprep.subr.mxu0 %v7488_v21  ;;  %3263 = vmatprep.subr.mxu1 %v7490_v55 }
 0x5ea   :  { %3193 = vmatpush1.msra.mxu0 %v7494_v50  ;;  %3264 = vmatpush1.msra.mxu1 %v7496_v10 }
 0x5eb   :  { %3194 = vmatprep.subr.mxu0 %v7500_v33  ;;  %3265 = vmatprep.subr.mxu1 %v7502_v37 }
 0x5ec   :  { %3195 = vmatpush1.msra.mxu0 %v7506_v56  ;;  %3266 = vmatpush1.msra.mxu1 %v7508_v57  ;;  %v7538_v56 = vld [vmem:[#allocation8 + $0x158] sm:$0xff]  ;;  %v7542_v57 = vld [vmem:[#allocation8 + $0x140] sm:$0xff] }
 0x5ed   :  { %3196 = vmatprep.subr.mxu0 %v7512_v25  ;;  %3267 = vmatprep.subr.mxu1 %v7514_v39  ;;  %v7544_v25 = vld [vmem:[#allocation8 + $0x150] sm:$0xff]  ;;  %v7548_v39 = vld [vmem:[#allocation8 + $0x128] sm:$0xff] }
 0x5ee   :  { %3197 = vmatpush1.msra.mxu0 %v7518_v32  ;;  %3268 = vmatpush1.msra.mxu1 %v7520_v51  ;;  %v7550_v32 = vld [vmem:[#allocation8 + $0x138] sm:$0xff]  ;;  %v7554_v51 = vld [vmem:[#allocation8 + $0x120] sm:$0xff] }
 0x5ef   :  { %3198 = vmatprep.subr.mxu0 %v7524_v53  ;;  %3269 = vmatprep.subr.mxu1 %v7526_v48  ;;  %v7556_v53 = vld [vmem:[#allocation8 + $0x130] sm:$0xff]  ;;  %v7560_v48 = vld [vmem:[#allocation8 + $0x108] sm:$0xff] }
 0x5f0   :  { %3199 = vmatpush1.msra.mxu0 %v7530_v49  ;;  %3270 = vmatpush1.msra.mxu1 %v7532_v46  ;;  %v7562_v49 = vld [vmem:[#allocation8 + $0x118] sm:$0xff] }
 0x5f1   :  { %3200 = vmatprep.subr.mxu0 %v7536_v31  ;;  %3271 = vmatprep.subr.mxu1 %v7538_v56 }
 0x5f2   :  { %3201 = vmatpush1.msra.mxu0 %v7542_v57  ;;  %3272 = vmatpush1.msra.mxu1 %v7544_v25 }
 0x5f3   :  { %3202 = vmatprep.subr.mxu0 %v7548_v39  ;;  %3273 = vmatprep.subr.mxu1 %v7550_v32 }
 0x5f4   :  { %3203 = vmatpush1.msra.mxu0 %v7554_v51  ;;  %3274 = vmatpush1.msra.mxu1 %v7556_v53 }
 0x5f5   :  { %3204 = vmatprep.subr.mxu0 %v7560_v48  ;;  %3275 = vmatprep.subr.mxu1 %v7562_v49 }
 0x5f6   :  { %3205 = vmatpush1.msra.mxu0 %v6966_v22  ;;  %3276 = vmatpush1.msra.mxu1 %v6968_v16  ;;  %v9746_v22 = vld [vmem:[#allocation137_spill] sm:$0xff]  ;;  %v9747_v16 = vld [vmem:[#allocation138_spill] sm:$0xff] }
 0x5f7   :  { %3206 = vmatprep.subr.mxu0 %v6972_v20  ;;  %3277 = vmatprep.subr.mxu1 %v6974_v7  ;;  %v9748_v20 = vld [vmem:[#allocation136_spill] sm:$0xff] }
 0x5f8   :  { %3207 = vmatpush1.msra.mxu0 %v6978_v2  ;;  %3278 = vmatpush1.msra.mxu1 %v6980_v43  ;;  %v9749_v7 = vld [vmem:[#allocation20_spill] sm:$0xff]  ;;  %v9750_v2 = vld [vmem:[#allocation21_spill] sm:$0xff]  ;;  %v9751_v43 = vld [vmem:[#allocation22_spill] sm:$0xff] }
 0x5f9   :  { %3208 = vmatprep.subr.mxu0 %v6984_v36  ;;  %3279 = vmatprep.subr.mxu1 %v6986_v23  ;;  %v9752_v36 = vld [vmem:[#allocation23_spill] sm:$0xff]  ;;  %v9753_v23 = vld [vmem:[#allocation24_spill] sm:$0xff] }
 0x5fa   :  { %3209 = vmatpush1.msra.mxu0 %v6990_v34  ;;  %3280 = vmatpush1.msra.mxu1 %v6992_v28  ;;  %v9754_v34 = vld [vmem:[#allocation25_spill] sm:$0xff]  ;;  %v9755_v28 = vld [vmem:[#allocation26_spill] sm:$0xff] }
 0x5fb   :  { %3210 = vmatprep.subr.mxu0 %v6996_v47  ;;  %3281 = vmatprep.subr.mxu1 %v6998_v42  ;;  %v9756_v47 = vld [vmem:[#allocation27_spill] sm:$0xff]  ;;  %v9757_v42 = vld [vmem:[#allocation28_spill] sm:$0xff] }
 0x5fc   :  { %3211 = vmatpush1.msra.mxu0 %v7002_v35  ;;  %3282 = vmatpush1.msra.mxu1 %v7004_v58  ;;  %v9758_v35 = vld [vmem:[#allocation29_spill] sm:$0xff]  ;;  %v9759_v58 = vld [vmem:[#allocation30_spill] sm:$0xff] }
 0x5fd   :  { %3212 = vmatprep.subr.mxu0 %v7008_v59  ;;  %3283 = vmatprep.subr.mxu1 %v7010_v60  ;;  %v9760_v59 = vld [vmem:[#allocation31_spill] sm:$0xff]  ;;  %v9761_v60 = vld [vmem:[#allocation32_spill] sm:$0xff] }
 0x5fe   :  { %3213 = vmatpush1.msra.mxu0 %v7014_v61  ;;  %3284 = vmatpush1.msra.mxu1 %v7016_v62  ;;  %v9762_v61 = vld [vmem:[#allocation33_spill] sm:$0xff]  ;;  %v9763_v62 = vld [vmem:[#allocation34_spill] sm:$0xff] }
 0x5ff   :  { %3214 = vmatprep.subr.mxu0 %v7020_v63  ;;  %3285 = vmatprep.subr.mxu1 %v7022_v1  ;;  %v9764_v63 = vld [vmem:[#allocation35_spill] sm:$0xff]  ;;  %v9765_v1 = vld [vmem:[#allocation36_spill] sm:$0xff] }
 0x600   :  { %3215 = vmatpush1.msra.mxu0 %v7026_v3  ;;  %3286 = vmatpush1.msra.mxu1 %v7028_v4  ;;  %v9766_v3 = vld [vmem:[#allocation37_spill] sm:$0xff]  ;;  %v9767_v4 = vld [vmem:[#allocation38_spill] sm:$0xff] }
 0x601   :  { %3216 = vmatprep.subr.mxu0 %v7032_v6  ;;  %3287 = vmatprep.subr.mxu1 %v7034_v8  ;;  %v9768_v6 = vld [vmem:[#allocation39_spill] sm:$0xff]  ;;  %v9769_v8 = vld [vmem:[#allocation40_spill] sm:$0xff] }
 0x602   :  { %3217 = vmatpush1.msra.mxu0 %v7038_v9  ;;  %3288 = vmatpush1.msra.mxu1 %v7040_v11  ;;  %v9770_v9 = vld [vmem:[#allocation41_spill] sm:$0xff]  ;;  %v9771_v11 = vld [vmem:[#allocation42_spill] sm:$0xff] }
 0x603   :  { %3218 = vmatprep.subr.mxu0 %v7044_v12  ;;  %3289 = vmatprep.subr.mxu1 %v7046_v13  ;;  %v9772_v12 = vld [vmem:[#allocation43_spill] sm:$0xff]  ;;  %v9773_v13 = vld [vmem:[#allocation44_spill] sm:$0xff] }
 0x604   :  { %3219 = vmatpush1.msra.mxu0 %v7050_v14  ;;  %3290 = vmatpush1.msra.mxu1 %v7052_v15  ;;  %v9774_v14 = vld [vmem:[#allocation45_spill] sm:$0xff]  ;;  %v9775_v15 = vld [vmem:[#allocation46_spill] sm:$0xff] }
 0x605   :  { %3220 = vmatprep.subr.mxu0 %v7056_v18  ;;  %3291 = vmatprep.subr.mxu1 %v7058_v19  ;;  %v9776_v18 = vld [vmem:[#allocation47_spill] sm:$0xff]  ;;  %v9777_v19 = vld [vmem:[#allocation48_spill] sm:$0xff] }
 0x606   :  { %3221 = vmatpush1.msra.mxu0 %v7062_v27  ;;  %3254 = vmatprep.mubr.f32.mxu0 %v9190_v45  ;;  %v9778_v27 = vld [vmem:[#allocation49_spill] sm:$0xff] }
 0x607   :  { %3292 = vmatpush1.msra.mxu1 %v7066_v24  ;;  %3325 = vmatprep.mubr.f32.mxu1 %v9190_v45  ;;  %v9779_v24 = vld [vmem:[#allocation50_spill] sm:$0xff] }
 0x608   :  { %3255 = vmatmul.mubr.f32.vlgmr.msra.gmra.mxu0 %v7482_v52  ;;  %3326 = vmatmul.mubr.f32.vlgmr.msra.gmra.mxu1 %v7482_v52  ;;  %v9787_v52 = vld [vmem:[#allocation58_spill] sm:$0xff] }
 0x609   :  { %3488 = vmatprep.subr.mxu0 %v7076_v44  ;;  %3559 = vmatprep.subr.mxu1 %v7078_v26  ;;  %v9780_v44 = vld [vmem:[#allocation51_spill] sm:$0xff]  ;;  %v9781_v26 = vld [vmem:[#allocation52_spill] sm:$0xff] }
 0x60a   :  { %3489 = vmatpush1.msra.mxu0 %v7082_v41  ;;  %3560 = vmatpush1.msra.mxu1 %v7084_v40  ;;  %v9782_v41 = vld [vmem:[#allocation53_spill] sm:$0xff]  ;;  %v9783_v40 = vld [vmem:[#allocation54_spill] sm:$0xff] }
 0x60b   :  { %3490 = vmatprep.subr.mxu0 %v7088_v0  ;;  %3561 = vmatprep.subr.mxu1 %v7090_v29  ;;  %v9784_v0 = vld [vmem:[#allocation55_spill] sm:$0xff]  ;;  %v9785_v29 = vld [vmem:[#allocation56_spill] sm:$0xff] }
 0x60c   :  { %3491 = vmatpush1.msra.mxu0 %v7094_v30  ;;  %3562 = vmatpush1.msra.mxu1 %v9746_v22  ;;  %v9786_v30 = vld [vmem:[#allocation57_spill] sm:$0xff]  ;;  %v9788_v22 = vld [vmem:[#allocation59_spill] sm:$0xff] }
 0x60d   :  { %3492 = vmatprep.subr.mxu0 %v9747_v16  ;;  %3563 = vmatprep.subr.mxu1 %v9748_v20  ;;  %v9789_v16 = vld [vmem:[#allocation60_spill] sm:$0xff]  ;;  %v9790_v20 = vld [vmem:[#allocation61_spill] sm:$0xff] }
 0x60e   :  { %3493 = vmatpush1.msra.mxu0 %v9749_v7  ;;  %3564 = vmatpush1.msra.mxu1 %v9750_v2  ;;  %v9791_v7 = vld [vmem:[#allocation62_spill] sm:$0xff]  ;;  %v9792_v2 = vld [vmem:[#allocation63_spill] sm:$0xff] }
 0x60f   :  { %3494 = vmatprep.subr.mxu0 %v9751_v43  ;;  %3565 = vmatprep.subr.mxu1 %v9752_v36  ;;  %v9793_v43 = vld [vmem:[#allocation64_spill] sm:$0xff]  ;;  %v9794_v36 = vld [vmem:[#allocation65_spill] sm:$0xff] }
 0x610   :  { %3495 = vmatpush1.msra.mxu0 %v9753_v23  ;;  %3566 = vmatpush1.msra.mxu1 %v9754_v34  ;;  %v9795_v23 = vld [vmem:[#allocation66_spill] sm:$0xff]  ;;  %v9796_v34 = vld [vmem:[#allocation67_spill] sm:$0xff] }
 0x611   :  { %3496 = vmatprep.subr.mxu0 %v9755_v28  ;;  %3567 = vmatprep.subr.mxu1 %v9756_v47  ;;  %v9797_v28 = vld [vmem:[#allocation68_spill] sm:$0xff]  ;;  %v9798_v47 = vld [vmem:[#allocation69_spill] sm:$0xff] }
 0x612   :  { %3497 = vmatpush1.msra.mxu0 %v9757_v42  ;;  %3568 = vmatpush1.msra.mxu1 %v9758_v35  ;;  %v9799_v42 = vld [vmem:[#allocation70_spill] sm:$0xff]  ;;  %v9800_v35 = vld [vmem:[#allocation71_spill] sm:$0xff] }
 0x613   :  { %3498 = vmatprep.subr.mxu0 %v9759_v58  ;;  %3569 = vmatprep.subr.mxu1 %v9760_v59  ;;  %v9801_v58 = vld [vmem:[#allocation72_spill] sm:$0xff]  ;;  %v9802_v59 = vld [vmem:[#allocation73_spill] sm:$0xff] }
 0x614   :  { %3499 = vmatpush1.msra.mxu0 %v9761_v60  ;;  %3570 = vmatpush1.msra.mxu1 %v9762_v61  ;;  %v9803_v60 = vld [vmem:[#allocation74_spill] sm:$0xff]  ;;  %v9804_v61 = vld [vmem:[#allocation75_spill] sm:$0xff] }
 0x615   :  { %3500 = vmatprep.subr.mxu0 %v9763_v62  ;;  %3571 = vmatprep.subr.mxu1 %v9764_v63  ;;  %v9805_v62 = vld [vmem:[#allocation76_spill] sm:$0xff]  ;;  %v9806_v63 = vld [vmem:[#allocation77_spill] sm:$0xff] }
 0x616   :  { %3501 = vmatpush1.msra.mxu0 %v9765_v1  ;;  %3572 = vmatpush1.msra.mxu1 %v9766_v3  ;;  %v9807_v1 = vld [vmem:[#allocation78_spill] sm:$0xff]  ;;  %v9808_v3 = vld [vmem:[#allocation79_spill] sm:$0xff] }
 0x617   :  { %3502 = vmatprep.subr.mxu0 %v9767_v4  ;;  %3573 = vmatprep.subr.mxu1 %v9768_v6  ;;  %v9809_v4 = vld [vmem:[#allocation80_spill] sm:$0xff]  ;;  %v9810_v6 = vld [vmem:[#allocation81_spill] sm:$0xff] }
 0x618   :  { %3503 = vmatpush1.msra.mxu0 %v9769_v8  ;;  %3574 = vmatpush1.msra.mxu1 %v9770_v9  ;;  %v9811_v8 = vld [vmem:[#allocation82_spill] sm:$0xff]  ;;  %v9812_v9 = vld [vmem:[#allocation83_spill] sm:$0xff] }
 0x619   :  { %3504 = vmatprep.subr.mxu0 %v9771_v11  ;;  %3575 = vmatprep.subr.mxu1 %v9772_v12  ;;  %v9813_v11 = vld [vmem:[#allocation84_spill] sm:$0xff]  ;;  %v9814_v12 = vld [vmem:[#allocation85_spill] sm:$0xff] }
 0x61a   :  { %3505 = vmatpush1.msra.mxu0 %v9773_v13  ;;  %3576 = vmatpush1.msra.mxu1 %v9774_v14  ;;  %v9815_v13 = vld [vmem:[#allocation86_spill] sm:$0xff]  ;;  %v9816_v14 = vld [vmem:[#allocation87_spill] sm:$0xff] }
 0x61b   :  { %3506 = vmatprep.subr.mxu0 %v9775_v15  ;;  %3577 = vmatprep.subr.mxu1 %v9776_v18  ;;  %v9817_v15 = vld [vmem:[#allocation88_spill] sm:$0xff]  ;;  %v9818_v18 = vld [vmem:[#allocation89_spill] sm:$0xff] }
 0x61c   :  { %3507 = vmatpush1.msra.mxu0 %v9777_v19  ;;  %3578 = vmatpush1.msra.mxu1 %v9778_v27  ;;  %v9819_v19 = vld [vmem:[#allocation90_spill] sm:$0xff]  ;;  %v9820_v27 = vld [vmem:[#allocation91_spill] sm:$0xff] }
 0x61d   :  { %3508 = vmatprep.subr.mxu0 %v9779_v24  ;;  %3579 = vmatprep.subr.mxu1 %v9780_v44  ;;  %v9821_v24 = vld [vmem:[#allocation92_spill] sm:$0xff]  ;;  %v9822_v44 = vld [vmem:[#allocation93_spill] sm:$0xff] }
 0x61e   :  { %3509 = vmatpush1.msra.mxu0 %v9781_v26  ;;  %3580 = vmatpush1.msra.mxu1 %v9782_v41  ;;  %v9823_v26 = vld [vmem:[#allocation94_spill] sm:$0xff]  ;;  %v9824_v41 = vld [vmem:[#allocation95_spill] sm:$0xff] }
 0x61f   :  { %3510 = vmatprep.subr.mxu0 %v9783_v40  ;;  %3581 = vmatprep.subr.mxu1 %v9784_v0  ;;  %v9825_v40 = vld [vmem:[#allocation96_spill] sm:$0xff]  ;;  %v9826_v0 = vld [vmem:[#allocation97_spill] sm:$0xff] }
 0x620   :  { %3511 = vmatpush1.msra.mxu0 %v9785_v29  ;;  %3582 = vmatpush1.msra.mxu1 %v9786_v30  ;;  %v9827_v29 = vld [vmem:[#allocation98_spill] sm:$0xff]  ;;  %v9828_v30 = vld [vmem:[#allocation99_spill] sm:$0xff] }
 0x621   :  { %3512 = vmatprep.subr.mxu0 %v9787_v52  ;;  %3583 = vmatprep.subr.mxu1 %v9788_v22  ;;  %v9829_v52 = vld [vmem:[#allocation100_spill] sm:$0xff]  ;;  %v9830_v22 = vld [vmem:[#allocation101_spill] sm:$0xff] }
 0x622   :  { %3513 = vmatpush1.msra.mxu0 %v9789_v16  ;;  %3584 = vmatpush1.msra.mxu1 %v9790_v20  ;;  %v9831_v16 = vld [vmem:[#allocation102_spill] sm:$0xff]  ;;  %v9832_v20 = vld [vmem:[#allocation103_spill] sm:$0xff] }
 0x623   :  { %3514 = vmatprep.subr.mxu0 %v9791_v7  ;;  %3585 = vmatprep.subr.mxu1 %v9792_v2  ;;  %v9833_v7 = vld [vmem:[#allocation104_spill] sm:$0xff]  ;;  %v9834_v2 = vld [vmem:[#allocation105_spill] sm:$0xff] }
 0x624   :  { %3515 = vmatpush1.msra.mxu0 %v9793_v43  ;;  %3586 = vmatpush1.msra.mxu1 %v9794_v36  ;;  %v9835_v43 = vld [vmem:[#allocation106_spill] sm:$0xff]  ;;  %v9836_v36 = vld [vmem:[#allocation107_spill] sm:$0xff] }
 0x625   :  { %3516 = vmatprep.subr.mxu0 %v9795_v23  ;;  %3587 = vmatprep.subr.mxu1 %v9796_v34  ;;  %v9837_v23 = vld [vmem:[#allocation108_spill] sm:$0xff]  ;;  %v9838_v34 = vld [vmem:[#allocation109_spill] sm:$0xff] }
 0x626   :  { %3517 = vmatpush1.msra.mxu0 %v9797_v28  ;;  %3588 = vmatpush1.msra.mxu1 %v9798_v47  ;;  %v9839_v28 = vld [vmem:[#allocation110_spill] sm:$0xff]  ;;  %v9840_v47 = vld [vmem:[#allocation111_spill] sm:$0xff] }
 0x627   :  { %3518 = vmatprep.subr.mxu0 %v9799_v42  ;;  %3589 = vmatprep.subr.mxu1 %v9800_v35  ;;  %v9841_v42 = vld [vmem:[#allocation112_spill] sm:$0xff]  ;;  %v9842_v35 = vld [vmem:[#allocation113_spill] sm:$0xff] }
 0x628   :  { %3519 = vmatpush1.msra.mxu0 %v9801_v58  ;;  %3590 = vmatpush1.msra.mxu1 %v9802_v59  ;;  %v9843_v58 = vld [vmem:[#allocation114_spill] sm:$0xff]  ;;  %v9844_v59 = vld [vmem:[#allocation115_spill] sm:$0xff] }
 0x629   :  { %3520 = vmatprep.subr.mxu0 %v9803_v60  ;;  %3591 = vmatprep.subr.mxu1 %v9804_v61  ;;  %v9845_v60 = vld [vmem:[#allocation116_spill] sm:$0xff]  ;;  %v9846_v61 = vld [vmem:[#allocation117_spill] sm:$0xff] }
 0x62a   :  { %3521 = vmatpush2.msra.mxu0 %v9805_v62  ;;  %3592 = vmatpush2.msra.mxu1 %v9806_v63  ;;  %v9847_v62 = vld [vmem:[#allocation118_spill] sm:$0xff]  ;;  %v9848_v63 = vld [vmem:[#allocation119_spill] sm:$0xff] }
 0x62b   :  { %3522 = vmatprep.subr.mxu0 %v9807_v1  ;;  %3593 = vmatprep.subr.mxu1 %v9808_v3  ;;  %v9849_v1 = vld [vmem:[#allocation120_spill] sm:$0xff]  ;;  %v9850_v3 = vld [vmem:[#allocation121_spill] sm:$0xff] }
 0x62c   :  { %3523 = vmatpush2.msra.mxu0 %v9809_v4  ;;  %3594 = vmatpush2.msra.mxu1 %v9810_v6  ;;  %v9851_v4 = vld [vmem:[#allocation122_spill] sm:$0xff]  ;;  %v9852_v6 = vld [vmem:[#allocation123_spill] sm:$0xff] }
 0x62d   :  { %3524 = vmatprep.subr.mxu0 %v9811_v8  ;;  %3595 = vmatprep.subr.mxu1 %v9812_v9  ;;  %v9853_v8 = vld [vmem:[#allocation124_spill] sm:$0xff]  ;;  %v9854_v9 = vld [vmem:[#allocation125_spill] sm:$0xff] }
 0x62e   :  { %3525 = vmatpush2.msra.mxu0 %v9813_v11  ;;  %3596 = vmatpush2.msra.mxu1 %v9814_v12  ;;  %v9855_v11 = vld [vmem:[#allocation126_spill] sm:$0xff]  ;;  %v9856_v12 = vld [vmem:[#allocation127_spill] sm:$0xff] }
 0x62f   :  { %3526 = vmatprep.subr.mxu0 %v9815_v13  ;;  %3597 = vmatprep.subr.mxu1 %v9816_v14  ;;  %v9857_v13 = vld [vmem:[#allocation128_spill] sm:$0xff]  ;;  %v9858_v14 = vld [vmem:[#allocation129_spill] sm:$0xff] }
 0x630   :  { %3527 = vmatpush2.msra.mxu0 %v9817_v15  ;;  %3598 = vmatpush2.msra.mxu1 %v9818_v18  ;;  %v9859_v15 = vld [vmem:[#allocation130_spill] sm:$0xff]  ;;  %v9860_v18 = vld [vmem:[#allocation131_spill] sm:$0xff] }
 0x631   :  { %3528 = vmatprep.subr.mxu0 %v9819_v19  ;;  %3599 = vmatprep.subr.mxu1 %v9820_v27  ;;  %v9861_v19 = vld [vmem:[#allocation133_spill] sm:$0xff]  ;;  %v9862_v27 = vld [vmem:[#allocation134_spill] sm:$0xff] }
 0x632   :  { %3529 = vmatpush2.msra.mxu0 %v9821_v24  ;;  %3600 = vmatpush2.msra.mxu1 %v9822_v44  ;;  %v9863_v24 = vld [vmem:[#allocation132_spill] sm:$0xff]  ;;  %v9864_v44 = vld [vmem:[#allocation159_spill] sm:$0xff] }
 0x633   :  { %3530 = vmatprep.subr.mxu0 %v9823_v26  ;;  %3601 = vmatprep.subr.mxu1 %v9824_v41  ;;  %v9865_v26 = vld [vmem:[#allocation160_spill] sm:$0xff]  ;;  %v9866_v41 = vld [vmem:[#allocation161_spill] sm:$0xff] }
 0x634   :  { %3531 = vmatpush2.msra.mxu0 %v9825_v40  ;;  %3602 = vmatpush2.msra.mxu1 %v9826_v0  ;;  %v9867_v40 = vld [vmem:[#allocation162_spill] sm:$0xff]  ;;  %v9868_v0 = vld [vmem:[#allocation163_spill] sm:$0xff] }
 0x635   :  { %3532 = vmatprep.subr.mxu0 %v9827_v29  ;;  %3603 = vmatprep.subr.mxu1 %v9828_v30  ;;  %v9869_v30 = vld [vmem:[#allocation16_spill] sm:$0xff] }
 0x636   :  { %3533 = vmatpush2.msra.mxu0 %v9829_v52  ;;  %3604 = vmatpush2.msra.mxu1 %v9830_v22 }
 0x637   :  { %3534 = vmatprep.subr.mxu0 %v9831_v16  ;;  %3605 = vmatprep.subr.mxu1 %v9832_v20  ;;  %v9870_v20 = vld [vmem:[#allocation17_spill] sm:$0xff] }
 0x638   :  { %3535 = vmatpush2.msra.mxu0 %v9833_v7  ;;  %3606 = vmatpush2.msra.mxu1 %v9834_v2 }
 0x639   :  { %3536 = vmatprep.subr.mxu0 %v9835_v43  ;;  %3607 = vmatprep.subr.mxu1 %v9836_v36 }
 0x63a   :  { %3537 = vmatpush2.msra.mxu0 %v9837_v23  ;;  %3608 = vmatpush2.msra.mxu1 %v9838_v34  ;;  %v9871_v23 = vld [vmem:[#allocation18_spill] sm:$0xff] }
 0x63b   :  { %3538 = vmatprep.subr.mxu0 %v9839_v28  ;;  %3609 = vmatprep.subr.mxu1 %v9840_v47 }
 0x63c   :  { %3539 = vmatpush2.msra.mxu0 %v9841_v42  ;;  %3610 = vmatpush2.msra.mxu1 %v9842_v35  ;;  %v9872_v42 = vld [vmem:[#allocation19_spill] sm:$0xff] }
 0x63d   :  { %3540 = vmatprep.subr.mxu0 %v9843_v58  ;;  %3611 = vmatprep.subr.mxu1 %v9844_v59 }
 0x63e   :  { %3541 = vmatpush2.msra.mxu0 %v9845_v60  ;;  %3612 = vmatpush2.msra.mxu1 %v9846_v61 }
 0x63f   :  { %3542 = vmatprep.subr.mxu0 %v9847_v62  ;;  %3613 = vmatprep.subr.mxu1 %v9848_v63 }
 0x640   :  { %3543 = vmatpush2.msra.mxu0 %v9849_v1  ;;  %3614 = vmatpush2.msra.mxu1 %v9850_v3  ;;  %v9873_v1 = vld [vmem:[#allocation147_spill] sm:$0xff] }
 0x641   :  { %3544 = vmatprep.subr.mxu0 %v9851_v4  ;;  %3615 = vmatprep.subr.mxu1 %v9852_v6 }
 0x642   :  { %3545 = vmatpush2.msra.mxu0 %v9853_v8  ;;  %3616 = vmatpush2.msra.mxu1 %v9854_v9 }
 0x643   :  { %3546 = vmatprep.subr.mxu0 %v9855_v11  ;;  %3617 = vmatprep.subr.mxu1 %v9856_v12  ;;  %v9874_v11 = vld [vmem:[#allocation149_spill] sm:$0xff] }
 0x644   :  { %3547 = vmatpush2.msra.mxu0 %v9857_v13  ;;  %3618 = vmatpush2.msra.mxu1 %v9858_v14 }
 0x645   :  { %3548 = vmatprep.subr.mxu0 %v9859_v15  ;;  %3619 = vmatprep.subr.mxu1 %v9860_v18 }
 0x646   :  { %3549 = vmatpush2.msra.mxu0 %v9861_v19  ;;  %3620 = vmatpush2.msra.mxu1 %v9862_v27 }
 0x647   :  { %3550 = vmatprep.subr.mxu0 %v9863_v24  ;;  %3621 = vmatprep.subr.mxu1 %v9864_v44  ;;  %v9875_v44 = vld [vmem:[#allocation150_spill] sm:$0xff] }
 0x648   :  { %3551 = vmatpush2.msra.mxu0 %v9865_v26  ;;  %3622 = vmatpush2.msra.mxu1 %v9866_v41  ;;  %v9876_v41 = vld [vmem:[#allocation148_spill] sm:$0xff] }
 0x649   :  { %3724 = vmatprep.subr.mxu0 %v9867_v40  ;;  %3795 = vmatprep.subr.mxu1 %v9868_v0 }
 0x6a7   :  { %v3020_v29 = vpop.f32.mrf.mxu0  ;;  %v3091_v2 = vpop.f32.mrf.mxu1 }
 0x6a8   :  { %v3021_v52 = vadd.f32 %v3020_v29, %v9869_v30  ;;  %v3092_v35 = vadd.f32 %v3091_v2, %v9872_v42 }
 0x6a9   :  { %v3022_v22 = vpop.f32.mrf.mxu0  ;;  %v3093_v36 = vpop.f32.mrf.mxu1 }
 0x6aa   :  { %v4770_v16 = vmul.f32 -1.442695, %v3021_v52  ;;  %v3023_v7 = vadd.f32 %v3022_v22, %v9870_v20  ;;  %v3094_v34 = vadd.f32 %v3093_v36, %v9871_v23 }
 0x6ac   :  { %4945 = vpow2.f32 %v4770_v16  ;;  %v4771_v43 = vmul.f32 -1.442695, %v3023_v7  ;;  %v4772_v28 = vmul.f32 -1.442695, %v3094_v34 }
 0x6ae   :  { %4947 = vpow2.f32 %v4771_v43 }
 0x6af   :  { %4949 = vpow2.f32 %v4772_v28 }
 0x6b9   :  { %v4946_v47 = vpop.eup %4945 }
 0x6ba   :  { %v3099_v58 = vadd.f32 1.0, %v4946_v47 }
 0x6bb   :  { %v4948_v59 = vpop.eup %4947 }
 0x6bc   :  { %4951 = vrcp.f32 %v3099_v58  ;;  %v3105_v60 = vadd.f32 1.0, %v4948_v59  ;;  %v4950_v61 = vpop.eup %4949 }
 0x6bd   :  { %4953 = vtanh.f32 %v3092_v35  ;;  %v3112_v15 = vadd.f32 1.0, %v4950_v61 }
 0x6be   :  { %4955 = vrcp.f32 %v3105_v60 }
 0x6c8   :  { %v3256_v62 = vpop.f32.mrf.mxu0  ;;  %v3327_v18 = vpop.f32.mrf.mxu1 }
 0x6c9   :  { %v4952_v63 = vpop.eup %4951  ;;  %v3332_v3 = vadd.f32 %v3256_v62, %v9873_v1  ;;  %v3334_v40 = vadd.f32 %v3327_v18, %v9876_v41  ;;  %v9879_v1 = vld [vmem:[#allocation166_spill] sm:$0xff]  ;;  %v7850_v18 = vld [vmem:[#allocation8 + $0x58] sm:$0xff]  ;;  %v7866_v41 = vld [vmem:[#allocation8 + $0x20] sm:$0xff] }
 0x6ca   :  { %v4954_v4 = vpop.eup %4953  ;;  %v3258_v6 = vpop.f32.mrf.mxu0 }
 0x6cb   :  { %v4956_v8 = vpop.eup %4955  ;;  %v4773_v9 = vmul.f32 -1.442695, %v3332_v3  ;;  %v3333_v12 = vadd.f32 %v3258_v6, %v9874_v11  ;;  %v3116_v13 = vmul.f32 %v4954_v4, %v4952_v63  ;;  %v3329_v24 = vpop.f32.mrf.mxu1  ;;  %v9878_v63 = vld [vmem:[#allocation165_spill] sm:$0xff]  ;;  %v7820_v3 = vld [vmem:[#allocation8 + $0xb0] sm:$0xff]  ;;  %v7826_v6 = vld [vmem:[#allocation8 + $0x98] sm:$0xff] }
 0x6cc   :  { %v3115_v14 = vmul.f32 %v4956_v8, %v7473_v5  ;;  %v3335_v26 = vadd.f32 %v3329_v24, %v9875_v44  ;;  %v7824_v4 = vld [vmem:[#allocation8 + $0x88] sm:$0xff]  ;;  %v7830_v8 = vld [vmem:[#allocation8 + $0x80] sm:$0xff]  ;;  %v7856_v24 = vld [vmem:[#allocation8 + $0x50] sm:$0xff] }
 0x6cd   :  { %4957 = vpow2.f32 %v4773_v9  ;;  %v4774_v19 = vmul.f32 -1.442695, %v3333_v12  ;;  %v7832_v9 = vld [vmem:[#allocation8 + $0x90] sm:$0xff]  ;;  %v7836_v11 = vld [vmem:[#allocation8 + $0x68] sm:$0xff]  ;;  %v7838_v12 = vld [vmem:[#allocation8 + $0x78] sm:$0xff] }
 0x6ce   :  { %v7745_v27 = vadd.f32 %v3116_v13, %v3115_v14  ;;  %v4775_v0 = vmul.f32 -1.442695, %v3335_v26  ;;  %v7842_v13 = vld [vmem:[#allocation8 + $0x60] sm:$0xff]  ;;  %v7844_v14 = vld [vmem:[#allocation8 + $0x70] sm:$0xff]  ;;  %v7860_v44 = vld [vmem:[#allocation8 + $0x28] sm:$0xff] }
 0x6cf   :  { %4959 = vpow2.f32 %v4774_v19  ;;  %v7854_v19 = vld [vmem:[#allocation8 + $0x40] sm:$0xff]  ;;  %v7862_v26 = vld [vmem:[#allocation8 + $0x38] sm:$0xff] }
 0x6d0   :  { %4961 = vrcp.f32 %v3112_v15  ;;  %v7848_v15 = vld [vmem:[#allocation8 + $0x48] sm:$0xff] }
 0x6d1   :  { %4963 = vtanh.f32 %v7745_v27 }
 0x6d2   :  { %4965 = vtanh.f32 %v3334_v40  ;;  %v7868_v40 = vld [vmem:[#allocation8 + $0x30] sm:$0xff] }
 0x6d3   :  { %4967 = vpow2.f32 %v4775_v0  ;;  %v7872_v0 = vld [vmem:[#allocation8 + $0x8] sm:$0xff] }
 0x6da   :  { %v4958_v29 = vpop.eup %4957 }
 0x6db   :  { %v3339_v52 = vadd.f32 1.0, %v4958_v29  ;;  %v7874_v29 = vld [vmem:[#allocation8 + $0x18] sm:$0xff] }
 0x6dc   :  { %v4960_v5 = vpop.eup %4959 }
 0x6dd   :  { %v4962_v22 = vpop.eup %4961  ;;  %4969 = vrcp.f32 %v3339_v52  ;;  %v3345_v16 = vadd.f32 1.0, %v4960_v5  ;;  %v7878_v52 = vld [vmem:[#allocation8] sm:$0xff]  ;;  %v7882_v5 = vld [vmem:[#allocation8 + $0x10] sm:$0xff] }
 0x6de   :  { %v4964_v7 = vpop.eup %4963 }
 0x6df   :  { %4971 = vrcp.f32 %v3345_v16  ;;  %v3119_v2 = vmul.f32 %v4964_v7, %v4962_v22  ;;  %v4966_v43 = vpop.eup %4965  ;;  %v7892_v22 = vld [vmem:[#allocation9 + $0x1e8] sm:$0xff]  ;;  %v7894_v16 = vld [vmem:[#allocation9 + $0x1f8] sm:$0xff]  ;;  %v7898_v7 = vld [vmem:[#allocation9 + $0x1e0] sm:$0xff] }
 0x6e0   :  { %v4968_v36 = vpop.eup %4967 }
 0x6e1   :  { %3121 = vst [vmem:[#allocation11 + $0x20] sm:$0xff] %v3119_v2  ;;  %3552 = vmatprep.mubr.f32.mxu0 %v3119_v2  ;;  %3623 = vmatprep.mubr.f32.mxu1 %v3119_v2  ;;  %v3352_v35 = vadd.f32 1.0, %v4968_v36  ;;  %v7900_v2 = vld [vmem:[#allocation9 + $0x1f0] sm:$0xff]  ;;  %v7906_v36 = vld [vmem:[#allocation9 + $0x1d8] sm:$0xff] }
 0x6e3   :  { %4973 = vrcp.f32 %v3352_v35  ;;  %v7918_v35 = vld [vmem:[#allocation9 + $0x1b8] sm:$0xff] }
 0x6e4   :  { %9888 = vst [vmem:[#allocation171_spill] sm:$0xff] %v7918_v35 }
 0x6ea   :  { %v4970_v34 = vpop.eup %4969 }
 0x6eb   :  { %v3356_v28 = vmul.f32 %v4970_v34, %v4966_v43  ;;  %v7904_v43 = vld [vmem:[#allocation9 + $0x1c8] sm:$0xff]  ;;  %v7910_v34 = vld [vmem:[#allocation9 + $0x1c0] sm:$0xff] }
 0x6ec   :  { %v4972_v47 = vpop.eup %4971 }
 0x6ed   :  { %v3355_v58 = vmul.f32 %v4972_v47, %v7479_v38  ;;  %v9877_v38 = vld [vmem:[#allocation164_spill] sm:$0xff]  ;;  %v7916_v47 = vld [vmem:[#allocation9 + $0x1a8] sm:$0xff] }
 0x6ee   :  { %9887 = vst [vmem:[#allocation170_spill] sm:$0xff] %v7916_v47 }
 0x6ef   :  { %v7751_v59 = vadd.f32 %v3356_v28, %v3355_v58  ;;  %v7912_v28 = vld [vmem:[#allocation9 + $0x1d0] sm:$0xff]  ;;  %v7922_v58 = vld [vmem:[#allocation9 + $0x1a0] sm:$0xff] }
 0x6f0   :  { %v4974_v60 = vpop.eup %4973  ;;  %9886 = vst [vmem:[#allocation169_spill] sm:$0xff] %v7912_v28  ;;  %9889 = vst [vmem:[#allocation172_spill] sm:$0xff] %v7922_v58 }
 0x6f1   :  { %4975 = vtanh.f32 %v7751_v59 }
 0x6fe   :  { %v4976_v61 = vpop.eup %4975 }
 0x6ff   :  { %v7754_v62 = vmul.f32 %v4976_v61, %v4974_v60  ;;  %v7924_v60 = vld [vmem:[#allocation9 + $0x1b0] sm:$0xff]  ;;  %v7928_v61 = vld [vmem:[#allocation9 + $0x188] sm:$0xff] }
 0x700   :  { %9890 = vst [vmem:[#allocation173_spill] sm:$0xff] %v7924_v60  ;;  %9891 = vst [vmem:[#allocation174_spill] sm:$0xff] %v7928_v61 }
 0x701   :  { %3553 = vmatmul.mubr.f32.vlgmr.msra.gmra.mxu0 %v7754_v62  ;;  %3624 = vmatmul.mubr.f32.vlgmr.msra.gmra.mxu1 %v7754_v62 }
 0x702   :  { %3725 = vmatpush1.msra.mxu0 %v7484_v54  ;;  %3796 = vmatpush1.msra.mxu1 %v7486_v17  ;;  %v9880_v54 = vld [vmem:[#allocation139_spill] sm:$0xff]  ;;  %v9881_v17 = vld [vmem:[#allocation141_spill] sm:$0xff] }
 0x703   :  { %3726 = vmatprep.subr.mxu0 %v7488_v21  ;;  %3797 = vmatprep.subr.mxu1 %v7490_v55  ;;  %v9882_v21 = vld [vmem:[#allocation142_spill] sm:$0xff]  ;;  %v9883_v55 = vld [vmem:[#allocation140_spill] sm:$0xff] }
 0x704   :  { %3727 = vmatpush1.msra.mxu0 %v7494_v50  ;;  %3798 = vmatpush1.msra.mxu1 %v7496_v10  ;;  %v9884_v50 = vld [vmem:[#allocation167_spill] sm:$0xff]  ;;  %v9885_v10 = vld [vmem:[#allocation168_spill] sm:$0xff] }
 0x705   :  { %3728 = vmatprep.subr.mxu0 %v7500_v33  ;;  %3799 = vmatprep.subr.mxu1 %v7502_v37  ;;  %v7782_v33 = vld [vmem:[#allocation8 + $0x100] sm:$0xff]  ;;  %v7784_v37 = vld [vmem:[#allocation8 + $0x110] sm:$0xff] }
 0x706   :  { %3729 = vmatpush1.msra.mxu0 %v9877_v38  ;;  %3800 = vmatpush1.msra.mxu1 %v9878_v63  ;;  %v7934_v38 = vld [vmem:[#allocation9 + $0x180] sm:$0xff]  ;;  %v7936_v63 = vld [vmem:[#allocation9 + $0x190] sm:$0xff] }
 0x707   :  { %3730 = vmatprep.subr.mxu0 %v9879_v1  ;;  %3801 = vmatprep.subr.mxu1 %v9880_v54  ;;  %9893 = vst [vmem:[#allocation143_spill] sm:$0xff] %v7934_v38  ;;  %9894 = vst [vmem:[#allocation145_spill] sm:$0xff] %v7936_v63  ;;  %v7940_v1 = vld [vmem:[#allocation9 + $0x168] sm:$0xff]  ;;  %v7942_v54 = vld [vmem:[#allocation9 + $0x178] sm:$0xff] }
 0x708   :  { %3731 = vmatpush1.msra.mxu0 %v9881_v17  ;;  %3802 = vmatpush1.msra.mxu1 %v9882_v21  ;;  %9895 = vst [vmem:[#allocation146_spill] sm:$0xff] %v7940_v1  ;;  %9896 = vst [vmem:[#allocation144_spill] sm:$0xff] %v7942_v54  ;;  %v7946_v17 = vld [vmem:[#allocation9 + $0x160] sm:$0xff]  ;;  %v7948_v21 = vld [vmem:[#allocation9 + $0x170] sm:$0xff] }
 0x709   :  { %3732 = vmatprep.subr.mxu0 %v9883_v55  ;;  %3803 = vmatprep.subr.mxu1 %v9884_v50  ;;  %9897 = vst [vmem:[#allocation137_spill] sm:$0xff] %v7946_v17  ;;  %9898 = vst [vmem:[#allocation138_spill] sm:$0xff] %v7948_v21  ;;  %v7952_v55 = vld [vmem:[#allocation9 + $0x148] sm:$0xff]  ;;  %v7954_v50 = vld [vmem:[#allocation9 + $0x158] sm:$0xff] }
 0x70a   :  { %3733 = vmatpush1.msra.mxu0 %v9885_v10  ;;  %3804 = vmatpush1.msra.mxu1 %v7532_v46  ;;  %v7788_v46 = vld [vmem:[#allocation8 + $0xe8] sm:$0xff]  ;;  %9899 = vst [vmem:[#allocation136_spill] sm:$0xff] %v7952_v55  ;;  %9900 = vst [vmem:[#allocation20_spill] sm:$0xff] %v7954_v50  ;;  %v7958_v10 = vld [vmem:[#allocation9 + $0x140] sm:$0xff] }
 0x70b   :  { %3734 = vmatprep.subr.mxu0 %v7536_v31  ;;  %3805 = vmatprep.subr.mxu1 %v7538_v56  ;;  %v7790_v31 = vld [vmem:[#allocation8 + $0xf8] sm:$0xff]  ;;  %v7794_v56 = vld [vmem:[#allocation8 + $0xe0] sm:$0xff]  ;;  %9901 = vst [vmem:[#allocation21_spill] sm:$0xff] %v7958_v10 }
 0x70c   :  { %3735 = vmatpush1.msra.mxu0 %v7542_v57  ;;  %3806 = vmatpush1.msra.mxu1 %v7544_v25  ;;  %v7796_v57 = vld [vmem:[#allocation8 + $0xf0] sm:$0xff]  ;;  %v7800_v25 = vld [vmem:[#allocation8 + $0xc8] sm:$0xff] }
 0x70d   :  { %3736 = vmatprep.subr.mxu0 %v7548_v39  ;;  %3807 = vmatprep.subr.mxu1 %v7550_v32  ;;  %v7802_v39 = vld [vmem:[#allocation8 + $0xd8] sm:$0xff]  ;;  %v7806_v32 = vld [vmem:[#allocation8 + $0xc0] sm:$0xff] }
 0x70e   :  { %3737 = vmatpush1.msra.mxu0 %v7554_v51  ;;  %3808 = vmatpush1.msra.mxu1 %v7556_v53  ;;  %v7808_v51 = vld [vmem:[#allocation8 + $0xd0] sm:$0xff]  ;;  %v7812_v53 = vld [vmem:[#allocation8 + $0xa8] sm:$0xff] }
 0x70f   :  { %3738 = vmatprep.subr.mxu0 %v7560_v48  ;;  %3809 = vmatprep.subr.mxu1 %v7562_v49  ;;  %v7814_v48 = vld [vmem:[#allocation8 + $0xb8] sm:$0xff]  ;;  %v7818_v49 = vld [vmem:[#allocation8 + $0xa0] sm:$0xff] }
 0x710   :  { %3739 = vmatpush1.msra.mxu0 %v7782_v33  ;;  %3810 = vmatpush1.msra.mxu1 %v7784_v37 }
 0x711   :  { %3740 = vmatprep.subr.mxu0 %v7788_v46  ;;  %3811 = vmatprep.subr.mxu1 %v7790_v31 }
 0x712   :  { %3741 = vmatpush1.msra.mxu0 %v7794_v56  ;;  %3812 = vmatpush1.msra.mxu1 %v7796_v57 }
 0x713   :  { %3742 = vmatprep.subr.mxu0 %v7800_v25  ;;  %3813 = vmatprep.subr.mxu1 %v7802_v39 }
 0x714   :  { %3743 = vmatpush1.msra.mxu0 %v7806_v32  ;;  %3814 = vmatpush1.msra.mxu1 %v7808_v51 }
 0x715   :  { %3744 = vmatprep.subr.mxu0 %v7812_v53  ;;  %3815 = vmatprep.subr.mxu1 %v7814_v48 }
 0x716   :  { %3745 = vmatpush1.msra.mxu0 %v7818_v49  ;;  %3816 = vmatpush1.msra.mxu1 %v7820_v3 }
 0x717   :  { %3746 = vmatprep.subr.mxu0 %v7824_v4  ;;  %3817 = vmatprep.subr.mxu1 %v7826_v6 }
 0x718   :  { %3747 = vmatpush1.msra.mxu0 %v7830_v8  ;;  %3818 = vmatpush1.msra.mxu1 %v7832_v9 }
 0x719   :  { %3748 = vmatprep.subr.mxu0 %v7836_v11  ;;  %3819 = vmatprep.subr.mxu1 %v7838_v12 }
 0x71a   :  { %3749 = vmatpush1.msra.mxu0 %v7842_v13  ;;  %3820 = vmatpush1.msra.mxu1 %v7844_v14 }
 0x71b   :  { %3750 = vmatprep.subr.mxu0 %v7848_v15  ;;  %3821 = vmatprep.subr.mxu1 %v7850_v18 }
 0x71c   :  { %3751 = vmatpush1.msra.mxu0 %v7854_v19  ;;  %3822 = vmatpush1.msra.mxu1 %v7856_v24 }
 0x71d   :  { %3752 = vmatprep.subr.mxu0 %v7860_v44  ;;  %3823 = vmatprep.subr.mxu1 %v7862_v26 }
 0x71e   :  { %3753 = vmatpush1.msra.mxu0 %v7866_v41  ;;  %3824 = vmatpush1.msra.mxu1 %v7868_v40 }
 0x71f   :  { %3754 = vmatprep.subr.mxu0 %v7872_v0  ;;  %3825 = vmatprep.subr.mxu1 %v7874_v29 }
 0x720   :  { %3755 = vmatpush1.msra.mxu0 %v7878_v52  ;;  %3788 = vmatprep.mubr.f32.mxu0 %v9190_v45 }
 0x721   :  { %3826 = vmatpush1.msra.mxu1 %v7882_v5  ;;  %3859 = vmatprep.mubr.f32.mxu1 %v9190_v45 }
 0x722   :  { %3789 = vmatmul.mubr.f32.vlgmr.msra.gmra.mxu0 %v7754_v62  ;;  %3860 = vmatmul.mubr.f32.vlgmr.msra.gmra.mxu1 %v7754_v62  ;;  %v7930_v62 = vld [vmem:[#allocation9 + $0x198] sm:$0xff] }
 0x723   :  { %4022 = vmatprep.subr.mxu0 %v7892_v22  ;;  %4093 = vmatprep.subr.mxu1 %v7894_v16  ;;  %9892 = vst [vmem:[#allocation135_spill] sm:$0xff] %v7930_v62 }
 0x724   :  { %4023 = vmatpush1.msra.mxu0 %v7898_v7  ;;  %4094 = vmatpush1.msra.mxu1 %v7900_v2 }
 0x725   :  { %4024 = vmatprep.subr.mxu0 %v7904_v43  ;;  %4095 = vmatprep.subr.mxu1 %v7906_v36 }
 0x726   :  { %4025 = vmatpush1.msra.mxu0 %v7910_v34  ;;  %4096 = vmatpush1.msra.mxu1 %v7912_v28 }
 0x727   :  { %4026 = vmatprep.subr.mxu0 %v7916_v47  ;;  %4097 = vmatprep.subr.mxu1 %v7918_v35 }
 0x728   :  { %4027 = vmatpush1.msra.mxu0 %v7922_v58  ;;  %4098 = vmatpush1.msra.mxu1 %v7924_v60 }
 0x729   :  { %4028 = vmatprep.subr.mxu0 %v7928_v61  ;;  %4099 = vmatprep.subr.mxu1 %v7930_v62  ;;  %v8202_v62 = vld [vmem:[#allocation9 + $0x2b8] sm:$0xff]  ;;  %v8218_v61 = vld [vmem:[#allocation9 + $0x280] sm:$0xff] }
 0x72a   :  { %4029 = vmatpush1.msra.mxu0 %v7934_v38  ;;  %4100 = vmatpush1.msra.mxu1 %v7936_v63  ;;  %v8186_v63 = vld [vmem:[#allocation9 + $0x2f0] sm:$0xff]  ;;  %v8194_v38 = vld [vmem:[#allocation9 + $0x2c0] sm:$0xff]  ;;  %9984 = vst [vmem:[#allocation104_spill] sm:$0xff] %v8202_v62  ;;  %9989 = vst [vmem:[#allocation109_spill] sm:$0xff] %v8218_v61 }
 0x72b   :  { %4030 = vmatprep.subr.mxu0 %v7940_v1  ;;  %4101 = vmatprep.subr.mxu1 %v7942_v54  ;;  %v7960_v1 = vld [vmem:[#allocation9 + $0x150] sm:$0xff]  ;;  %v7964_v54 = vld [vmem:[#allocation9 + $0x128] sm:$0xff]  ;;  %9978 = vst [vmem:[#allocation98_spill] sm:$0xff] %v8186_v63  ;;  %9981 = vst [vmem:[#allocation101_spill] sm:$0xff] %v8194_v38 }
 0x72c   :  { %4031 = vmatpush1.msra.mxu0 %v7946_v17  ;;  %4102 = vmatpush1.msra.mxu1 %v7948_v21  ;;  %9902 = vst [vmem:[#allocation22_spill] sm:$0xff] %v7960_v1  ;;  %9903 = vst [vmem:[#allocation23_spill] sm:$0xff] %v7964_v54  ;;  %v7966_v17 = vld [vmem:[#allocation9 + $0x138] sm:$0xff]  ;;  %v7970_v21 = vld [vmem:[#allocation9 + $0x120] sm:$0xff] }
 0x72d   :  { %4032 = vmatprep.subr.mxu0 %v7952_v55  ;;  %4103 = vmatprep.subr.mxu1 %v7954_v50  ;;  %9904 = vst [vmem:[#allocation24_spill] sm:$0xff] %v7966_v17  ;;  %9905 = vst [vmem:[#allocation25_spill] sm:$0xff] %v7970_v21  ;;  %v7972_v55 = vld [vmem:[#allocation9 + $0x130] sm:$0xff]  ;;  %v7976_v50 = vld [vmem:[#allocation9 + $0x108] sm:$0xff] }
 0x72e   :  { %4033 = vmatpush1.msra.mxu0 %v7958_v10  ;;  %4104 = vmatpush1.msra.mxu1 %v7960_v1  ;;  %9906 = vst [vmem:[#allocation26_spill] sm:$0xff] %v7972_v55  ;;  %9907 = vst [vmem:[#allocation27_spill] sm:$0xff] %v7976_v50  ;;  %v7978_v10 = vld [vmem:[#allocation9 + $0x118] sm:$0xff]  ;;  %v7982_v1 = vld [vmem:[#allocation9 + $0x100] sm:$0xff] }
 0x72f   :  { %4034 = vmatprep.subr.mxu0 %v7964_v54  ;;  %4105 = vmatprep.subr.mxu1 %v7966_v17  ;;  %9908 = vst [vmem:[#allocation28_spill] sm:$0xff] %v7978_v10  ;;  %9909 = vst [vmem:[#allocation29_spill] sm:$0xff] %v7982_v1  ;;  %v7984_v54 = vld [vmem:[#allocation9 + $0x110] sm:$0xff]  ;;  %v7988_v17 = vld [vmem:[#allocation9 + $0xe8] sm:$0xff] }
 0x730   :  { %4035 = vmatpush1.msra.mxu0 %v7970_v21  ;;  %4106 = vmatpush1.msra.mxu1 %v7972_v55  ;;  %9910 = vst [vmem:[#allocation30_spill] sm:$0xff] %v7984_v54  ;;  %9911 = vst [vmem:[#allocation31_spill] sm:$0xff] %v7988_v17  ;;  %v7990_v21 = vld [vmem:[#allocation9 + $0xf8] sm:$0xff]  ;;  %v7994_v55 = vld [vmem:[#allocation9 + $0xe0] sm:$0xff] }
 0x731   :  { %4036 = vmatprep.subr.mxu0 %v7976_v50  ;;  %4107 = vmatprep.subr.mxu1 %v7978_v10  ;;  %9912 = vst [vmem:[#allocation32_spill] sm:$0xff] %v7990_v21  ;;  %9913 = vst [vmem:[#allocation33_spill] sm:$0xff] %v7994_v55  ;;  %v7996_v50 = vld [vmem:[#allocation9 + $0xf0] sm:$0xff]  ;;  %v8000_v10 = vld [vmem:[#allocation9 + $0xc8] sm:$0xff] }
 0x732   :  { %4037 = vmatpush1.msra.mxu0 %v7982_v1  ;;  %4108 = vmatpush1.msra.mxu1 %v7984_v54  ;;  %9914 = vst [vmem:[#allocation34_spill] sm:$0xff] %v7996_v50  ;;  %9915 = vst [vmem:[#allocation35_spill] sm:$0xff] %v8000_v10  ;;  %v8002_v1 = vld [vmem:[#allocation9 + $0xd8] sm:$0xff]  ;;  %v8006_v54 = vld [vmem:[#allocation9 + $0xc0] sm:$0xff] }
 0x733   :  { %4038 = vmatprep.subr.mxu0 %v7988_v17  ;;  %4109 = vmatprep.subr.mxu1 %v7990_v21  ;;  %9916 = vst [vmem:[#allocation36_spill] sm:$0xff] %v8002_v1  ;;  %9917 = vst [vmem:[#allocation37_spill] sm:$0xff] %v8006_v54  ;;  %v8008_v17 = vld [vmem:[#allocation9 + $0xd0] sm:$0xff]  ;;  %v8012_v21 = vld [vmem:[#allocation9 + $0xa8] sm:$0xff] }
 0x734   :  { %4039 = vmatpush1.msra.mxu0 %v7994_v55  ;;  %4110 = vmatpush1.msra.mxu1 %v7996_v50  ;;  %9918 = vst [vmem:[#allocation38_spill] sm:$0xff] %v8008_v17  ;;  %9919 = vst [vmem:[#allocation39_spill] sm:$0xff] %v8012_v21  ;;  %v8014_v55 = vld [vmem:[#allocation9 + $0xb8] sm:$0xff]  ;;  %v8018_v50 = vld [vmem:[#allocation9 + $0xa0] sm:$0xff] }
 0x735   :  { %4040 = vmatprep.subr.mxu0 %v8000_v10  ;;  %4111 = vmatprep.subr.mxu1 %v8002_v1  ;;  %9920 = vst [vmem:[#allocation40_spill] sm:$0xff] %v8014_v55  ;;  %9921 = vst [vmem:[#allocation41_spill] sm:$0xff] %v8018_v50  ;;  %v8020_v10 = vld [vmem:[#allocation9 + $0xb0] sm:$0xff]  ;;  %v8024_v1 = vld [vmem:[#allocation9 + $0x88] sm:$0xff] }
 0x736   :  { %4041 = vmatpush1.msra.mxu0 %v8006_v54  ;;  %4112 = vmatpush1.msra.mxu1 %v8008_v17  ;;  %9922 = vst [vmem:[#allocation42_spill] sm:$0xff] %v8020_v10  ;;  %9923 = vst [vmem:[#allocation43_spill] sm:$0xff] %v8024_v1  ;;  %v8026_v54 = vld [vmem:[#allocation9 + $0x98] sm:$0xff]  ;;  %v8030_v17 = vld [vmem:[#allocation9 + $0x80] sm:$0xff] }
 0x737   :  { %4042 = vmatprep.subr.mxu0 %v8012_v21  ;;  %4113 = vmatprep.subr.mxu1 %v8014_v55  ;;  %9924 = vst [vmem:[#allocation44_spill] sm:$0xff] %v8026_v54  ;;  %9925 = vst [vmem:[#allocation45_spill] sm:$0xff] %v8030_v17  ;;  %v8032_v21 = vld [vmem:[#allocation9 + $0x90] sm:$0xff]  ;;  %v8036_v55 = vld [vmem:[#allocation9 + $0x68] sm:$0xff] }
 0x738   :  { %4043 = vmatpush1.msra.mxu0 %v8018_v50  ;;  %4114 = vmatpush1.msra.mxu1 %v8020_v10  ;;  %9926 = vst [vmem:[#allocation46_spill] sm:$0xff] %v8032_v21  ;;  %9927 = vst [vmem:[#allocation47_spill] sm:$0xff] %v8036_v55  ;;  %v8038_v50 = vld [vmem:[#allocation9 + $0x78] sm:$0xff]  ;;  %v8042_v10 = vld [vmem:[#allocation9 + $0x60] sm:$0xff] }
 0x739   :  { %4044 = vmatprep.subr.mxu0 %v8024_v1  ;;  %4115 = vmatprep.subr.mxu1 %v8026_v54  ;;  %9928 = vst [vmem:[#allocation48_spill] sm:$0xff] %v8038_v50  ;;  %9929 = vst [vmem:[#allocation49_spill] sm:$0xff] %v8042_v10  ;;  %v8044_v1 = vld [vmem:[#allocation9 + $0x70] sm:$0xff]  ;;  %v8048_v54 = vld [vmem:[#allocation9 + $0x48] sm:$0xff] }
 0x73a   :  { %4045 = vmatpush1.msra.mxu0 %v8030_v17  ;;  %4116 = vmatpush1.msra.mxu1 %v8032_v21  ;;  %9930 = vst [vmem:[#allocation50_spill] sm:$0xff] %v8044_v1  ;;  %9931 = vst [vmem:[#allocation51_spill] sm:$0xff] %v8048_v54  ;;  %v8050_v17 = vld [vmem:[#allocation9 + $0x58] sm:$0xff]  ;;  %v8054_v21 = vld [vmem:[#allocation9 + $0x40] sm:$0xff] }
 0x73b   :  { %4046 = vmatprep.subr.mxu0 %v8036_v55  ;;  %4117 = vmatprep.subr.mxu1 %v8038_v50  ;;  %9932 = vst [vmem:[#allocation52_spill] sm:$0xff] %v8050_v17  ;;  %9933 = vst [vmem:[#allocation53_spill] sm:$0xff] %v8054_v21  ;;  %v8056_v55 = vld [vmem:[#allocation9 + $0x50] sm:$0xff]  ;;  %v8060_v50 = vld [vmem:[#allocation9 + $0x28] sm:$0xff] }
 0x73c   :  { %4047 = vmatpush1.msra.mxu0 %v8042_v10  ;;  %4118 = vmatpush1.msra.mxu1 %v8044_v1  ;;  %9934 = vst [vmem:[#allocation54_spill] sm:$0xff] %v8056_v55  ;;  %9935 = vst [vmem:[#allocation55_spill] sm:$0xff] %v8060_v50  ;;  %v8062_v10 = vld [vmem:[#allocation9 + $0x38] sm:$0xff]  ;;  %v8066_v1 = vld [vmem:[#allocation9 + $0x20] sm:$0xff] }
 0x73d   :  { %4048 = vmatprep.subr.mxu0 %v8048_v54  ;;  %4119 = vmatprep.subr.mxu1 %v8050_v17  ;;  %9936 = vst [vmem:[#allocation56_spill] sm:$0xff] %v8062_v10  ;;  %9937 = vst [vmem:[#allocation57_spill] sm:$0xff] %v8066_v1  ;;  %v8068_v54 = vld [vmem:[#allocation9 + $0x30] sm:$0xff]  ;;  %v8072_v17 = vld [vmem:[#allocation9 + $0x8] sm:$0xff] }
 0x73e   :  { %4049 = vmatpush1.msra.mxu0 %v8054_v21  ;;  %4120 = vmatpush1.msra.mxu1 %v8056_v55  ;;  %9938 = vst [vmem:[#allocation58_spill] sm:$0xff] %v8068_v54  ;;  %9939 = vst [vmem:[#allocation59_spill] sm:$0xff] %v8072_v17  ;;  %v8074_v21 = vld [vmem:[#allocation9 + $0x18] sm:$0xff]  ;;  %v8078_v55 = vld [vmem:[#allocation9] sm:$0xff] }
 0x73f   :  { %4050 = vmatprep.subr.mxu0 %v8060_v50  ;;  %4121 = vmatprep.subr.mxu1 %v8062_v10  ;;  %9940 = vst [vmem:[#allocation60_spill] sm:$0xff] %v8074_v21  ;;  %9941 = vst [vmem:[#allocation61_spill] sm:$0xff] %v8078_v55  ;;  %v8080_v50 = vld [vmem:[#allocation9 + $0x10] sm:$0xff]  ;;  %v8084_v10 = vld [vmem:[#allocation9 + $0x3e8] sm:$0xff] }
 0x740   :  { %4051 = vmatpush1.msra.mxu0 %v8066_v1  ;;  %4122 = vmatpush1.msra.mxu1 %v8068_v54  ;;  %9942 = vst [vmem:[#allocation62_spill] sm:$0xff] %v8080_v50  ;;  %9943 = vst [vmem:[#allocation63_spill] sm:$0xff] %v8084_v10  ;;  %v8086_v1 = vld [vmem:[#allocation9 + $0x3f8] sm:$0xff]  ;;  %v8090_v54 = vld [vmem:[#allocation9 + $0x3e0] sm:$0xff] }
 0x741   :  { %4052 = vmatprep.subr.mxu0 %v8072_v17  ;;  %4123 = vmatprep.subr.mxu1 %v8074_v21  ;;  %9944 = vst [vmem:[#allocation64_spill] sm:$0xff] %v8086_v1  ;;  %9945 = vst [vmem:[#allocation65_spill] sm:$0xff] %v8090_v54  ;;  %v8092_v17 = vld [vmem:[#allocation9 + $0x3f0] sm:$0xff]  ;;  %v8096_v21 = vld [vmem:[#allocation9 + $0x3c8] sm:$0xff] }
 0x742   :  { %4053 = vmatpush1.msra.mxu0 %v8078_v55  ;;  %4124 = vmatpush1.msra.mxu1 %v8080_v50  ;;  %9946 = vst [vmem:[#allocation66_spill] sm:$0xff] %v8092_v17  ;;  %9947 = vst [vmem:[#allocation67_spill] sm:$0xff] %v8096_v21  ;;  %v8098_v55 = vld [vmem:[#allocation9 + $0x3d8] sm:$0xff]  ;;  %v8102_v50 = vld [vmem:[#allocation9 + $0x3c0] sm:$0xff] }
 0x743   :  { %4054 = vmatprep.subr.mxu0 %v8084_v10  ;;  %4125 = vmatprep.subr.mxu1 %v8086_v1  ;;  %9948 = vst [vmem:[#allocation68_spill] sm:$0xff] %v8098_v55  ;;  %9949 = vst [vmem:[#allocation69_spill] sm:$0xff] %v8102_v50  ;;  %v8104_v10 = vld [vmem:[#allocation9 + $0x3d0] sm:$0xff]  ;;  %v8108_v1 = vld [vmem:[#allocation9 + $0x3a8] sm:$0xff] }
 0x744   :  { %4055 = vmatpush2.msra.mxu0 %v8090_v54  ;;  %4126 = vmatpush2.msra.mxu1 %v8092_v17  ;;  %9950 = vst [vmem:[#allocation70_spill] sm:$0xff] %v8104_v10  ;;  %9951 = vst [vmem:[#allocation71_spill] sm:$0xff] %v8108_v1  ;;  %v8110_v54 = vld [vmem:[#allocation9 + $0x3b8] sm:$0xff]  ;;  %v8114_v17 = vld [vmem:[#allocation9 + $0x3a0] sm:$0xff] }
 0x745   :  { %4056 = vmatprep.subr.mxu0 %v8096_v21  ;;  %4127 = vmatprep.subr.mxu1 %v8098_v55  ;;  %9952 = vst [vmem:[#allocation72_spill] sm:$0xff] %v8110_v54  ;;  %9953 = vst [vmem:[#allocation73_spill] sm:$0xff] %v8114_v17  ;;  %v8116_v21 = vld [vmem:[#allocation9 + $0x3b0] sm:$0xff]  ;;  %v8120_v55 = vld [vmem:[#allocation9 + $0x388] sm:$0xff] }
 0x746   :  { %4057 = vmatpush2.msra.mxu0 %v8102_v50  ;;  %4128 = vmatpush2.msra.mxu1 %v8104_v10  ;;  %9954 = vst [vmem:[#allocation74_spill] sm:$0xff] %v8116_v21  ;;  %9955 = vst [vmem:[#allocation75_spill] sm:$0xff] %v8120_v55  ;;  %v8122_v50 = vld [vmem:[#allocation9 + $0x398] sm:$0xff]  ;;  %v8126_v10 = vld [vmem:[#allocation9 + $0x380] sm:$0xff] }
 0x747   :  { %4058 = vmatprep.subr.mxu0 %v8108_v1  ;;  %4129 = vmatprep.subr.mxu1 %v8110_v54  ;;  %9956 = vst [vmem:[#allocation76_spill] sm:$0xff] %v8122_v50  ;;  %9957 = vst [vmem:[#allocation77_spill] sm:$0xff] %v8126_v10  ;;  %v8128_v1 = vld [vmem:[#allocation9 + $0x390] sm:$0xff]  ;;  %v8132_v54 = vld [vmem:[#allocation9 + $0x368] sm:$0xff] }
 0x748   :  { %4059 = vmatpush2.msra.mxu0 %v8114_v17  ;;  %4130 = vmatpush2.msra.mxu1 %v8116_v21  ;;  %9958 = vst [vmem:[#allocation78_spill] sm:$0xff] %v8128_v1  ;;  %9959 = vst [vmem:[#allocation79_spill] sm:$0xff] %v8132_v54  ;;  %v8134_v17 = vld [vmem:[#allocation9 + $0x378] sm:$0xff]  ;;  %v8138_v21 = vld [vmem:[#allocation9 + $0x360] sm:$0xff] }
 0x749   :  { %4060 = vmatprep.subr.mxu0 %v8120_v55  ;;  %4131 = vmatprep.subr.mxu1 %v8122_v50  ;;  %9960 = vst [vmem:[#allocation80_spill] sm:$0xff] %v8134_v17  ;;  %9961 = vst [vmem:[#allocation81_spill] sm:$0xff] %v8138_v21  ;;  %v8140_v55 = vld [vmem:[#allocation9 + $0x370] sm:$0xff]  ;;  %v8144_v50 = vld [vmem:[#allocation9 + $0x348] sm:$0xff] }
 0x74a   :  { %4061 = vmatpush2.msra.mxu0 %v8126_v10  ;;  %4132 = vmatpush2.msra.mxu1 %v8128_v1  ;;  %9962 = vst [vmem:[#allocation82_spill] sm:$0xff] %v8140_v55  ;;  %9963 = vst [vmem:[#allocation83_spill] sm:$0xff] %v8144_v50  ;;  %v8146_v10 = vld [vmem:[#allocation9 + $0x358] sm:$0xff]  ;;  %v8150_v1 = vld [vmem:[#allocation9 + $0x340] sm:$0xff] }
 0x74b   :  { %4062 = vmatprep.subr.mxu0 %v8132_v54  ;;  %4133 = vmatprep.subr.mxu1 %v8134_v17  ;;  %9964 = vst [vmem:[#allocation84_spill] sm:$0xff] %v8146_v10  ;;  %9965 = vst [vmem:[#allocation85_spill] sm:$0xff] %v8150_v1  ;;  %v8152_v54 = vld [vmem:[#allocation9 + $0x350] sm:$0xff]  ;;  %v8156_v17 = vld [vmem:[#allocation9 + $0x328] sm:$0xff] }
 0x74c   :  { %4063 = vmatpush2.msra.mxu0 %v8138_v21  ;;  %4134 = vmatpush2.msra.mxu1 %v8140_v55  ;;  %9966 = vst [vmem:[#allocation86_spill] sm:$0xff] %v8152_v54  ;;  %9967 = vst [vmem:[#allocation87_spill] sm:$0xff] %v8156_v17  ;;  %v8158_v21 = vld [vmem:[#allocation9 + $0x338] sm:$0xff]  ;;  %v8162_v55 = vld [vmem:[#allocation9 + $0x320] sm:$0xff] }
 0x74d   :  { %4064 = vmatprep.subr.mxu0 %v8144_v50  ;;  %4135 = vmatprep.subr.mxu1 %v8146_v10  ;;  %9968 = vst [vmem:[#allocation88_spill] sm:$0xff] %v8158_v21  ;;  %9969 = vst [vmem:[#allocation89_spill] sm:$0xff] %v8162_v55  ;;  %v8164_v50 = vld [vmem:[#allocation9 + $0x330] sm:$0xff]  ;;  %v8168_v10 = vld [vmem:[#allocation9 + $0x308] sm:$0xff] }
 0x74e   :  { %4065 = vmatpush2.msra.mxu0 %v8150_v1  ;;  %4136 = vmatpush2.msra.mxu1 %v8152_v54  ;;  %9970 = vst [vmem:[#allocation90_spill] sm:$0xff] %v8164_v50  ;;  %9971 = vst [vmem:[#allocation91_spill] sm:$0xff] %v8168_v10  ;;  %v8170_v1 = vld [vmem:[#allocation9 + $0x318] sm:$0xff]  ;;  %v8174_v54 = vld [vmem:[#allocation9 + $0x300] sm:$0xff] }
 0x74f   :  { %4066 = vmatprep.subr.mxu0 %v8156_v17  ;;  %4137 = vmatprep.subr.mxu1 %v8158_v21  ;;  %9972 = vst [vmem:[#allocation92_spill] sm:$0xff] %v8170_v1  ;;  %9973 = vst [vmem:[#allocation93_spill] sm:$0xff] %v8174_v54  ;;  %v8176_v17 = vld [vmem:[#allocation9 + $0x310] sm:$0xff]  ;;  %v8178_v21 = vld [vmem:[#allocation9 + $0x2e8] sm:$0xff] }
 0x750   :  { %4067 = vmatpush2.msra.mxu0 %v8162_v55  ;;  %4138 = vmatpush2.msra.mxu1 %v8164_v50  ;;  %9974 = vst [vmem:[#allocation94_spill] sm:$0xff] %v8176_v17  ;;  %9975 = vst [vmem:[#allocation95_spill] sm:$0xff] %v8178_v21  ;;  %v8182_v55 = vld [vmem:[#allocation9 + $0x2f8] sm:$0xff]  ;;  %v8184_v50 = vld [vmem:[#allocation9 + $0x2e0] sm:$0xff] }
 0x751   :  { %4068 = vmatprep.subr.mxu0 %v8168_v10  ;;  %4139 = vmatprep.subr.mxu1 %v8170_v1  ;;  %9976 = vst [vmem:[#allocation96_spill] sm:$0xff] %v8182_v55  ;;  %9977 = vst [vmem:[#allocation97_spill] sm:$0xff] %v8184_v50  ;;  %v8190_v1 = vld [vmem:[#allocation9 + $0x2c8] sm:$0xff]  ;;  %v8192_v10 = vld [vmem:[#allocation9 + $0x2d8] sm:$0xff] }
 0x752   :  { %4069 = vmatpush2.msra.mxu0 %v8174_v54  ;;  %4140 = vmatpush2.msra.mxu1 %v8176_v17  ;;  %9979 = vst [vmem:[#allocation99_spill] sm:$0xff] %v8190_v1  ;;  %9980 = vst [vmem:[#allocation100_spill] sm:$0xff] %v8192_v10  ;;  %v8198_v17 = vld [vmem:[#allocation9 + $0x2d0] sm:$0xff]  ;;  %v8200_v54 = vld [vmem:[#allocation9 + $0x2a8] sm:$0xff] }
 0x753   :  { %4070 = vmatprep.subr.mxu0 %v8178_v21  ;;  %4141 = vmatprep.subr.mxu1 %v8182_v55  ;;  %9982 = vst [vmem:[#allocation102_spill] sm:$0xff] %v8198_v17  ;;  %9983 = vst [vmem:[#allocation103_spill] sm:$0xff] %v8200_v54  ;;  %v8206_v55 = vld [vmem:[#allocation9 + $0x2a0] sm:$0xff]  ;;  %v8208_v21 = vld [vmem:[#allocation9 + $0x2b0] sm:$0xff] }
 0x754   :  { %4071 = vmatpush2.msra.mxu0 %v8184_v50  ;;  %4142 = vmatpush2.msra.mxu1 %v8186_v63  ;;  %9985 = vst [vmem:[#allocation105_spill] sm:$0xff] %v8206_v55  ;;  %9986 = vst [vmem:[#allocation106_spill] sm:$0xff] %v8208_v21  ;;  %v8212_v50 = vld [vmem:[#allocation9 + $0x288] sm:$0xff]  ;;  %v8214_v63 = vld [vmem:[#allocation9 + $0x298] sm:$0xff] }
 0x755   :  { %4072 = vmatprep.subr.mxu0 %v8190_v1  ;;  %4143 = vmatprep.subr.mxu1 %v8192_v10  ;;  %9987 = vst [vmem:[#allocation107_spill] sm:$0xff] %v8212_v50  ;;  %9988 = vst [vmem:[#allocation108_spill] sm:$0xff] %v8214_v63  ;;  %v8220_v1 = vld [vmem:[#allocation9 + $0x290] sm:$0xff]  ;;  %v8224_v10 = vld [vmem:[#allocation9 + $0x268] sm:$0xff] }
 0x756   :  { %4073 = vmatpush2.msra.mxu0 %v8194_v38  ;;  %4144 = vmatpush2.msra.mxu1 %v8198_v17  ;;  %9990 = vst [vmem:[#allocation110_spill] sm:$0xff] %v8220_v1  ;;  %9991 = vst [vmem:[#allocation111_spill] sm:$0xff] %v8224_v10  ;;  %v8226_v38 = vld [vmem:[#allocation9 + $0x278] sm:$0xff]  ;;  %v8230_v17 = vld [vmem:[#allocation9 + $0x260] sm:$0xff] }
 0x757   :  { %4074 = vmatprep.subr.mxu0 %v8200_v54  ;;  %4145 = vmatprep.subr.mxu1 %v8202_v62  ;;  %9992 = vst [vmem:[#allocation112_spill] sm:$0xff] %v8226_v38  ;;  %9993 = vst [vmem:[#allocation113_spill] sm:$0xff] %v8230_v17  ;;  %v8232_v54 = vld [vmem:[#allocation9 + $0x270] sm:$0xff]  ;;  %v8236_v62 = vld [vmem:[#allocation9 + $0x248] sm:$0xff] }
 0x758   :  { %4075 = vmatpush2.msra.mxu0 %v8206_v55  ;;  %4146 = vmatpush2.msra.mxu1 %v8208_v21  ;;  %9994 = vst [vmem:[#allocation114_spill] sm:$0xff] %v8232_v54  ;;  %9995 = vst [vmem:[#allocation115_spill] sm:$0xff] %v8236_v62  ;;  %v8238_v55 = vld [vmem:[#allocation9 + $0x258] sm:$0xff]  ;;  %v8242_v21 = vld [vmem:[#allocation9 + $0x240] sm:$0xff] }
 0x759   :  { %4076 = vmatprep.subr.mxu0 %v8212_v50  ;;  %4147 = vmatprep.subr.mxu1 %v8214_v63  ;;  %9996 = vst [vmem:[#allocation116_spill] sm:$0xff] %v8238_v55  ;;  %9997 = vst [vmem:[#allocation117_spill] sm:$0xff] %v8242_v21  ;;  %v8244_v50 = vld [vmem:[#allocation9 + $0x250] sm:$0xff]  ;;  %v8248_v63 = vld [vmem:[#allocation9 + $0x228] sm:$0xff] }
 0x75a   :  { %4077 = vmatpush2.msra.mxu0 %v8218_v61  ;;  %4148 = vmatpush2.msra.mxu1 %v8220_v1  ;;  %9998 = vst [vmem:[#allocation118_spill] sm:$0xff] %v8244_v50  ;;  %9999 = vst [vmem:[#allocation119_spill] sm:$0xff] %v8248_v63  ;;  %v8250_v61 = vld [vmem:[#allocation9 + $0x238] sm:$0xff]  ;;  %v8254_v1 = vld [vmem:[#allocation9 + $0x220] sm:$0xff] }
 0x75b   :  { %4078 = vmatprep.subr.mxu0 %v8224_v10  ;;  %4149 = vmatprep.subr.mxu1 %v8226_v38  ;;  %10000 = vst [vmem:[#allocation120_spill] sm:$0xff] %v8250_v61  ;;  %10001 = vst [vmem:[#allocation121_spill] sm:$0xff] %v8254_v1  ;;  %v8256_v10 = vld [vmem:[#allocation9 + $0x230] sm:$0xff]  ;;  %v8260_v38 = vld [vmem:[#allocation9 + $0x208] sm:$0xff] }
 0x75c   :  { %4079 = vmatpush2.msra.mxu0 %v8230_v17  ;;  %4150 = vmatpush2.msra.mxu1 %v8232_v54  ;;  %10002 = vst [vmem:[#allocation122_spill] sm:$0xff] %v8256_v10  ;;  %10003 = vst [vmem:[#allocation123_spill] sm:$0xff] %v8260_v38  ;;  %v8262_v17 = vld [vmem:[#allocation9 + $0x218] sm:$0xff]  ;;  %v8266_v54 = vld [vmem:[#allocation9 + $0x200] sm:$0xff] }
 0x75d   :  { %4080 = vmatprep.subr.mxu0 %v8236_v62  ;;  %4151 = vmatprep.subr.mxu1 %v8238_v55  ;;  %10004 = vst [vmem:[#allocation124_spill] sm:$0xff] %v8262_v17  ;;  %10005 = vst [vmem:[#allocation125_spill] sm:$0xff] %v8266_v54  ;;  %v8268_v62 = vld [vmem:[#allocation9 + $0x210] sm:$0xff]  ;;  %v4255_v55 = vld [vmem:[#allocation8 + $0x1e8] sm:$0xff] }
 0x75e   :  { %4081 = vmatpush2.msra.mxu0 %v8242_v21  ;;  %4152 = vmatpush2.msra.mxu1 %v8244_v50  ;;  %10006 = vst [vmem:[#allocation126_spill] sm:$0xff] %v8268_v62  ;;  %v4257_v21 = vld [vmem:[#allocation8 + $0x1f8] sm:$0xff] }
 0x75f   :  { %4082 = vmatprep.subr.mxu0 %v8248_v63  ;;  %4153 = vmatprep.subr.mxu1 %v8250_v61 }
 0x760   :  { %4083 = vmatpush2.msra.mxu0 %v8254_v1  ;;  %4154 = vmatpush2.msra.mxu1 %v8256_v10 }
 0x761   :  { %4084 = vmatprep.subr.mxu0 %v8260_v38  ;;  %4155 = vmatprep.subr.mxu1 %v8262_v17 }
 0x762   :  { %4085 = vmatpush2.msra.mxu0 %v8266_v54  ;;  %4156 = vmatpush2.msra.mxu1 %v8268_v62 }
 0x763   :  { %4258 = vmatprep.subr.mxu0 %v4255_v55  ;;  %4329 = vmatprep.subr.mxu1 %v4257_v21 }
 0x7c1   :  { %v3554_v61 = vpop.f32.mrf.mxu0  ;;  %v3625_v10 = vpop.f32.mrf.mxu1 }
 0x7c2   :  { %v3555_v63 = vadd.f32 %v3554_v61, %v9869_v30  ;;  %v3626_v62 = vadd.f32 %v3625_v10, %v9872_v42 }
 0x7c3   :  { %v3556_v50 = vpop.f32.mrf.mxu0  ;;  %v3627_v38 = vpop.f32.mrf.mxu1 }
 0x7c4   :  { %v4776_v60 = vmul.f32 -1.442695, %v3555_v63  ;;  %v3557_v1 = vadd.f32 %v3556_v50, %v9870_v20  ;;  %v3628_v17 = vadd.f32 %v3627_v38, %v9871_v23  ;;  %v10007_v20 = vld [vmem:[#allocation151_spill] sm:$0xff] }
 0x7c6   :  { %4977 = vpow2.f32 %v4776_v60  ;;  %v4777_v58 = vmul.f32 -1.442695, %v3557_v1  ;;  %v4778_v35 = vmul.f32 -1.442695, %v3628_v17  ;;  %v10008_v17 = vld [vmem:[#allocation153_spill] sm:$0xff] }
 0x7c8   :  { %4979 = vpow2.f32 %v4777_v58 }
 0x7c9   :  { %4981 = vpow2.f32 %v4778_v35 }
 0x7d3   :  { %v4978_v54 = vpop.eup %4977 }
 0x7d4   :  { %v3633_v55 = vadd.f32 1.0, %v4978_v54 }
 0x7d5   :  { %v4980_v21 = vpop.eup %4979 }
 0x7d6   :  { %4983 = vrcp.f32 %v3633_v55  ;;  %v3639_v61 = vadd.f32 1.0, %v4980_v21  ;;  %v4982_v63 = vpop.eup %4981 }
 0x7d7   :  { %4985 = vtanh.f32 %v3626_v62  ;;  %v3646_v10 = vadd.f32 1.0, %v4982_v63 }
 0x7d8   :  { %4987 = vrcp.f32 %v3639_v61 }
 0x7e2   :  { %v3790_v50 = vpop.f32.mrf.mxu0  ;;  %v3861_v35 = vpop.f32.mrf.mxu1 }
 0x7e3   :  { %v4984_v60 = vpop.eup %4983  ;;  %v3866_v1 = vadd.f32 %v3790_v50, %v10007_v20  ;;  %v10009_v20 = vld [vmem:[#allocation154_spill] sm:$0xff]  ;;  %v10010_v50 = vld [vmem:[#allocation152_spill] sm:$0xff] }
 0x7e4   :  { %v4986_v58 = vpop.eup %4985  ;;  %v3792_v30 = vpop.f32.mrf.mxu0 }
 0x7e5   :  { %v4988_v47 = vpop.eup %4987  ;;  %v4779_v38 = vmul.f32 -1.442695, %v3866_v1  ;;  %v3867_v23 = vadd.f32 %v3792_v30, %v10008_v17  ;;  %v3650_v28 = vmul.f32 %v4986_v58, %v4984_v60  ;;  %v3863_v21 = vpop.f32.mrf.mxu1  ;;  %v3868_v1 = vadd.f32 %v3861_v35, %v10010_v50  ;;  %v4254_v50 = vld [vmem:[#allocation8 + $0x1e0] sm:$0xff] }
 0x7e6   :  { %v3649_v54 = vmul.f32 %v4988_v47, %v7745_v27  ;;  %v3869_v61 = vadd.f32 %v3863_v21, %v10009_v20 }
 0x7e7   :  { %4989 = vpow2.f32 %v4779_v38  ;;  %v4780_v55 = vmul.f32 -1.442695, %v3867_v23 }
 0x7e8   :  { %v8283_v62 = vadd.f32 %v3650_v28, %v3649_v54  ;;  %v4781_v42 = vmul.f32 -1.442695, %v3869_v61 }
 0x7e9   :  { %4991 = vpow2.f32 %v4780_v55 }
 0x7ea   :  { %4993 = vrcp.f32 %v3646_v10 }
 0x7eb   :  { %4995 = vtanh.f32 %v8283_v62 }
 0x7ec   :  { %4997 = vtanh.f32 %v3868_v1  ;;  %v4256_v1 = vld [vmem:[#allocation8 + $0x1f0] sm:$0xff] }
 0x7ed   :  { %4999 = vpow2.f32 %v4781_v42 }
 0x7f4   :  { %v4990_v30 = vpop.eup %4989 }
 0x7f5   :  { %v3873_v60 = vadd.f32 1.0, %v4990_v30  ;;  %v4251_v30 = vld [vmem:[#allocation8 + $0x1c8] sm:$0xff] }
 0x7f6   :  { %v4992_v27 = vpop.eup %4991 }
 0x7f7   :  { %v4994_v47 = vpop.eup %4993  ;;  %5001 = vrcp.f32 %v3873_v60  ;;  %v3879_v23 = vadd.f32 1.0, %v4992_v27  ;;  %v4253_v60 = vld [vmem:[#allocation8 + $0x1d8] sm:$0xff]  ;;  %v4250_v27 = vld [vmem:[#allocation8 + $0x1c0] sm:$0xff] }
 0x7f8   :  { %v4996_v28 = vpop.eup %4995 }
 0x7f9   :  { %5003 = vrcp.f32 %v3879_v23  ;;  %v3653_v63 = vmul.f32 %v4996_v28, %v4994_v47  ;;  %v4998_v58 = vpop.eup %4997  ;;  %v4252_v47 = vld [vmem:[#allocation8 + $0x1d0] sm:$0xff]  ;;  %v4249_v23 = vld [vmem:[#allocation8 + $0x1b8] sm:$0xff]  ;;  %v4246_v28 = vld [vmem:[#allocation8 + $0x1a0] sm:$0xff] }
 0x7fa   :  { %v5000_v38 = vpop.eup %4999 }
 0x7fb   :  { %3655 = vst [vmem:[#allocation11 + $0x28] sm:$0xff] %v3653_v63  ;;  %4086 = vmatprep.mubr.f32.mxu0 %v3653_v63  ;;  %4157 = vmatprep.mubr.f32.mxu1 %v3653_v63  ;;  %v3886_v35 = vadd.f32 1.0, %v5000_v38  ;;  %v4248_v63 = vld [vmem:[#allocation8 + $0x1b0] sm:$0xff]  ;;  %v4245_v38 = vld [vmem:[#allocation8 + $0x198] sm:$0xff] }
 0x7fd   :  { %5005 = vrcp.f32 %v3886_v35  ;;  %v4241_v35 = vld [vmem:[#allocation8 + $0x178] sm:$0xff] }
 0x804   :  { %v5002_v17 = vpop.eup %5001 }
 0x805   :  { %v3890_v54 = vmul.f32 %v5002_v17, %v4998_v58  ;;  %v4243_v58 = vld [vmem:[#allocation8 + $0x188] sm:$0xff]  ;;  %v4242_v17 = vld [vmem:[#allocation8 + $0x180] sm:$0xff] }
 0x806   :  { %v5004_v10 = vpop.eup %5003 }
 0x807   :  { %v3889_v55 = vmul.f32 %v5004_v10, %v7751_v59  ;;  %v4247_v59 = vld [vmem:[#allocation8 + $0x1a8] sm:$0xff] }
 0x808   :  { %v4239_v10 = vld [vmem:[#allocation8 + $0x168] sm:$0xff] }
 0x809   :  { %v8289_v21 = vadd.f32 %v3890_v54, %v3889_v55  ;;  %v4244_v54 = vld [vmem:[#allocation8 + $0x190] sm:$0xff]  ;;  %v4238_v55 = vld [vmem:[#allocation8 + $0x160] sm:$0xff] }
 0x80a   :  { %v5006_v42 = vpop.eup %5005 }
 0x80b   :  { %5007 = vtanh.f32 %v8289_v21 }
 0x818   :  { %v5008_v20 = vpop.eup %5007 }
 0x819   :  { %v8292_v61 = vmul.f32 %v5008_v20, %v5006_v42  ;;  %v4240_v42 = vld [vmem:[#allocation8 + $0x170] sm:$0xff]  ;;  %v4235_v20 = vld [vmem:[#allocation8 + $0x148] sm:$0xff] }
 0x81b   :  { %4087 = vmatmul.mubr.f32.vlgmr.msra.gmra.mxu0 %v8292_v61  ;;  %4158 = vmatmul.mubr.f32.vlgmr.msra.gmra.mxu1 %v8292_v61 }
 0x81c   :  { %4259 = vmatpush1.msra.mxu0 %v4254_v50  ;;  %4330 = vmatpush1.msra.mxu1 %v4256_v1  ;;  %v4237_v50 = vld [vmem:[#allocation8 + $0x158] sm:$0xff]  ;;  %v4234_v1 = vld [vmem:[#allocation8 + $0x140] sm:$0xff] }
 0x81d   :  { %4260 = vmatprep.subr.mxu0 %v4251_v30  ;;  %4331 = vmatprep.subr.mxu1 %v4253_v60  ;;  %v4236_v30 = vld [vmem:[#allocation8 + $0x150] sm:$0xff]  ;;  %v4231_v60 = vld [vmem:[#allocation8 + $0x128] sm:$0xff] }
 0x81e   :  { %4261 = vmatpush1.msra.mxu0 %v4250_v27  ;;  %4332 = vmatpush1.msra.mxu1 %v4252_v47  ;;  %v4233_v27 = vld [vmem:[#allocation8 + $0x138] sm:$0xff]  ;;  %v4230_v47 = vld [vmem:[#allocation8 + $0x120] sm:$0xff] }
 0x81f   :  { %4262 = vmatprep.subr.mxu0 %v4247_v59  ;;  %4333 = vmatprep.subr.mxu1 %v4249_v23  ;;  %v4232_v59 = vld [vmem:[#allocation8 + $0x130] sm:$0xff]  ;;  %v4227_v23 = vld [vmem:[#allocation8 + $0x108] sm:$0xff] }
 0x820   :  { %4263 = vmatpush1.msra.mxu0 %v4246_v28  ;;  %4334 = vmatpush1.msra.mxu1 %v4248_v63  ;;  %v4229_v28 = vld [vmem:[#allocation8 + $0x118] sm:$0xff]  ;;  %v10054_v63 = vld [vmem:[#allocation49_spill] sm:$0xff] }
 0x821   :  { %4264 = vmatprep.subr.mxu0 %v4243_v58  ;;  %4335 = vmatprep.subr.mxu1 %v4245_v38  ;;  %v10055_v58 = vld [vmem:[#allocation50_spill] sm:$0xff]  ;;  %v10056_v38 = vld [vmem:[#allocation51_spill] sm:$0xff] }
 0x822   :  { %4265 = vmatpush1.msra.mxu0 %v4242_v17  ;;  %4336 = vmatpush1.msra.mxu1 %v4244_v54  ;;  %v10057_v17 = vld [vmem:[#allocation52_spill] sm:$0xff]  ;;  %v10058_v54 = vld [vmem:[#allocation53_spill] sm:$0xff] }
 0x823   :  { %4266 = vmatprep.subr.mxu0 %v4239_v10  ;;  %4337 = vmatprep.subr.mxu1 %v4241_v35  ;;  %v10059_v10 = vld [vmem:[#allocation54_spill] sm:$0xff]  ;;  %v10060_v35 = vld [vmem:[#allocation55_spill] sm:$0xff] }
 0x824   :  { %4267 = vmatpush1.msra.mxu0 %v4238_v55  ;;  %4338 = vmatpush1.msra.mxu1 %v4240_v42  ;;  %v10061_v55 = vld [vmem:[#allocation56_spill] sm:$0xff]  ;;  %v10062_v42 = vld [vmem:[#allocation57_spill] sm:$0xff] }
 0x825   :  { %4268 = vmatprep.subr.mxu0 %v4235_v20  ;;  %4339 = vmatprep.subr.mxu1 %v4237_v50  ;;  %v10063_v20 = vld [vmem:[#allocation58_spill] sm:$0xff]  ;;  %v10064_v50 = vld [vmem:[#allocation59_spill] sm:$0xff] }
 0x826   :  { %4269 = vmatpush1.msra.mxu0 %v4234_v1  ;;  %4340 = vmatpush1.msra.mxu1 %v4236_v30  ;;  %v10065_v1 = vld [vmem:[#allocation60_spill] sm:$0xff]  ;;  %v10066_v30 = vld [vmem:[#allocation61_spill] sm:$0xff] }
 0x827   :  { %4270 = vmatprep.subr.mxu0 %v4231_v60  ;;  %4341 = vmatprep.subr.mxu1 %v4233_v27  ;;  %v10067_v60 = vld [vmem:[#allocation62_spill] sm:$0xff]  ;;  %v10068_v27 = vld [vmem:[#allocation63_spill] sm:$0xff] }
 0x828   :  { %4271 = vmatpush1.msra.mxu0 %v4230_v47  ;;  %4342 = vmatpush1.msra.mxu1 %v4232_v59  ;;  %v10069_v47 = vld [vmem:[#allocation64_spill] sm:$0xff]  ;;  %v10070_v59 = vld [vmem:[#allocation65_spill] sm:$0xff] }
 0x829   :  { %4272 = vmatprep.subr.mxu0 %v4227_v23  ;;  %4343 = vmatprep.subr.mxu1 %v4229_v28  ;;  %v10071_v23 = vld [vmem:[#allocation66_spill] sm:$0xff]  ;;  %v10072_v28 = vld [vmem:[#allocation67_spill] sm:$0xff] }
 0x82a   :  { %4273 = vmatpush1.msra.mxu0 %v7782_v33  ;;  %4344 = vmatpush1.msra.mxu1 %v7784_v37  ;;  %v10011_v33 = vld [vmem:[#allocation169_spill] sm:$0xff]  ;;  %v10013_v37 = vld [vmem:[#allocation171_spill] sm:$0xff] }
 0x82b   :  { %4274 = vmatprep.subr.mxu0 %v7788_v46  ;;  %4345 = vmatprep.subr.mxu1 %v7790_v31  ;;  %v10014_v46 = vld [vmem:[#allocation172_spill] sm:$0xff]  ;;  %v10015_v31 = vld [vmem:[#allocation173_spill] sm:$0xff] }
 0x82c   :  { %4275 = vmatpush1.msra.mxu0 %v7794_v56  ;;  %4346 = vmatpush1.msra.mxu1 %v7796_v57  ;;  %v10016_v56 = vld [vmem:[#allocation174_spill] sm:$0xff]  ;;  %v10017_v57 = vld [vmem:[#allocation135_spill] sm:$0xff] }
 0x82d   :  { %4276 = vmatprep.subr.mxu0 %v7800_v25  ;;  %4347 = vmatprep.subr.mxu1 %v7802_v39  ;;  %v10018_v25 = vld [vmem:[#allocation143_spill] sm:$0xff]  ;;  %v10019_v39 = vld [vmem:[#allocation145_spill] sm:$0xff] }
 0x82e   :  { %4277 = vmatpush1.msra.mxu0 %v7806_v32  ;;  %4348 = vmatpush1.msra.mxu1 %v7808_v51  ;;  %v10020_v32 = vld [vmem:[#allocation146_spill] sm:$0xff]  ;;  %v10021_v51 = vld [vmem:[#allocation144_spill] sm:$0xff] }
 0x82f   :  { %4278 = vmatprep.subr.mxu0 %v7812_v53  ;;  %4349 = vmatprep.subr.mxu1 %v7814_v48  ;;  %v10022_v53 = vld [vmem:[#allocation137_spill] sm:$0xff]  ;;  %v10023_v48 = vld [vmem:[#allocation138_spill] sm:$0xff] }
 0x830   :  { %4279 = vmatpush1.msra.mxu0 %v7818_v49  ;;  %4350 = vmatpush1.msra.mxu1 %v7820_v3  ;;  %v10024_v49 = vld [vmem:[#allocation136_spill] sm:$0xff] }
 0x831   :  { %4280 = vmatprep.subr.mxu0 %v7824_v4  ;;  %4351 = vmatprep.subr.mxu1 %v7826_v6  ;;  %v10025_v3 = vld [vmem:[#allocation20_spill] sm:$0xff]  ;;  %v10026_v4 = vld [vmem:[#allocation21_spill] sm:$0xff]  ;;  %v10027_v6 = vld [vmem:[#allocation22_spill] sm:$0xff] }
 0x832   :  { %4281 = vmatpush1.msra.mxu0 %v7830_v8  ;;  %4352 = vmatpush1.msra.mxu1 %v7832_v9  ;;  %v10028_v8 = vld [vmem:[#allocation23_spill] sm:$0xff]  ;;  %v10029_v9 = vld [vmem:[#allocation24_spill] sm:$0xff] }
 0x833   :  { %4282 = vmatprep.subr.mxu0 %v7836_v11  ;;  %4353 = vmatprep.subr.mxu1 %v7838_v12  ;;  %v10030_v11 = vld [vmem:[#allocation25_spill] sm:$0xff]  ;;  %v10031_v12 = vld [vmem:[#allocation26_spill] sm:$0xff] }
 0x834   :  { %4283 = vmatpush1.msra.mxu0 %v7842_v13  ;;  %4354 = vmatpush1.msra.mxu1 %v7844_v14  ;;  %v10032_v13 = vld [vmem:[#allocation27_spill] sm:$0xff]  ;;  %v10033_v14 = vld [vmem:[#allocation28_spill] sm:$0xff] }
 0x835   :  { %4284 = vmatprep.subr.mxu0 %v7848_v15  ;;  %4355 = vmatprep.subr.mxu1 %v7850_v18  ;;  %v10034_v15 = vld [vmem:[#allocation29_spill] sm:$0xff]  ;;  %v10035_v18 = vld [vmem:[#allocation30_spill] sm:$0xff] }
 0x836   :  { %4285 = vmatpush1.msra.mxu0 %v7854_v19  ;;  %4356 = vmatpush1.msra.mxu1 %v7856_v24  ;;  %v10036_v19 = vld [vmem:[#allocation31_spill] sm:$0xff]  ;;  %v10037_v24 = vld [vmem:[#allocation32_spill] sm:$0xff] }
 0x837   :  { %4286 = vmatprep.subr.mxu0 %v7860_v44  ;;  %4357 = vmatprep.subr.mxu1 %v7862_v26  ;;  %v10038_v44 = vld [vmem:[#allocation33_spill] sm:$0xff]  ;;  %v10039_v26 = vld [vmem:[#allocation34_spill] sm:$0xff] }
 0x838   :  { %4287 = vmatpush1.msra.mxu0 %v7866_v41  ;;  %4358 = vmatpush1.msra.mxu1 %v7868_v40  ;;  %v10040_v41 = vld [vmem:[#allocation35_spill] sm:$0xff]  ;;  %v10041_v40 = vld [vmem:[#allocation36_spill] sm:$0xff] }
 0x839   :  { %4288 = vmatprep.subr.mxu0 %v7872_v0  ;;  %4359 = vmatprep.subr.mxu1 %v7874_v29  ;;  %v10042_v0 = vld [vmem:[#allocation37_spill] sm:$0xff]  ;;  %v10043_v29 = vld [vmem:[#allocation38_spill] sm:$0xff] }
 0x83a   :  { %4289 = vmatpush1.msra.mxu0 %v7878_v52  ;;  %4322 = vmatprep.mubr.f32.mxu0 %v9190_v45  ;;  %v10044_v52 = vld [vmem:[#allocation39_spill] sm:$0xff] }
 0x83b   :  { %4360 = vmatpush1.msra.mxu1 %v7882_v5  ;;  %4393 = vmatprep.mubr.f32.mxu1 %v9190_v45  ;;  %v10012_v45 = vld [vmem:[#allocation170_spill] sm:$0xff]  ;;  %v10045_v5 = vld [vmem:[#allocation40_spill] sm:$0xff] }
 0x83c   :  { %4323 = vmatmul.mubr.f32.vlgmr.msra.gmra.mxu0 %v8292_v61  ;;  %4394 = vmatmul.mubr.f32.vlgmr.msra.gmra.mxu1 %v8292_v61  ;;  %v10053_v61 = vld [vmem:[#allocation48_spill] sm:$0xff] }
 0x83d   :  { %4556 = vmatprep.subr.mxu0 %v7892_v22  ;;  %4627 = vmatprep.subr.mxu1 %v7894_v16  ;;  %v10046_v22 = vld [vmem:[#allocation41_spill] sm:$0xff]  ;;  %v10047_v16 = vld [vmem:[#allocation42_spill] sm:$0xff] }
 0x83e   :  { %4557 = vmatpush1.msra.mxu0 %v7898_v7  ;;  %4628 = vmatpush1.msra.mxu1 %v7900_v2  ;;  %v10048_v7 = vld [vmem:[#allocation43_spill] sm:$0xff]  ;;  %v10049_v2 = vld [vmem:[#allocation44_spill] sm:$0xff] }
 0x83f   :  { %4558 = vmatprep.subr.mxu0 %v7904_v43  ;;  %4629 = vmatprep.subr.mxu1 %v7906_v36  ;;  %v10050_v43 = vld [vmem:[#allocation45_spill] sm:$0xff]  ;;  %v10051_v36 = vld [vmem:[#allocation46_spill] sm:$0xff] }
 0x840   :  { %4559 = vmatpush1.msra.mxu0 %v7910_v34  ;;  %4630 = vmatpush1.msra.mxu1 %v10011_v33  ;;  %v10052_v34 = vld [vmem:[#allocation47_spill] sm:$0xff]  ;;  %v10073_v33 = vld [vmem:[#allocation68_spill] sm:$0xff] }
 0x841   :  { %4560 = vmatprep.subr.mxu0 %v10012_v45  ;;  %4631 = vmatprep.subr.mxu1 %v10013_v37  ;;  %v10074_v45 = vld [vmem:[#allocation69_spill] sm:$0xff]  ;;  %v10075_v37 = vld [vmem:[#allocation70_spill] sm:$0xff] }
 0x842   :  { %4561 = vmatpush1.msra.mxu0 %v10014_v46  ;;  %4632 = vmatpush1.msra.mxu1 %v10015_v31  ;;  %v10076_v46 = vld [vmem:[#allocation71_spill] sm:$0xff]  ;;  %v10077_v31 = vld [vmem:[#allocation72_spill] sm:$0xff] }
 0x843   :  { %4562 = vmatprep.subr.mxu0 %v10016_v56  ;;  %4633 = vmatprep.subr.mxu1 %v10017_v57  ;;  %v10078_v56 = vld [vmem:[#allocation73_spill] sm:$0xff]  ;;  %v10079_v57 = vld [vmem:[#allocation74_spill] sm:$0xff] }
 0x844   :  { %4563 = vmatpush1.msra.mxu0 %v10018_v25  ;;  %4634 = vmatpush1.msra.mxu1 %v10019_v39  ;;  %v10080_v25 = vld [vmem:[#allocation75_spill] sm:$0xff]  ;;  %v10081_v39 = vld [vmem:[#allocation76_spill] sm:$0xff] }
 0x845   :  { %4564 = vmatprep.subr.mxu0 %v10020_v32  ;;  %4635 = vmatprep.subr.mxu1 %v10021_v51  ;;  %v10082_v32 = vld [vmem:[#allocation77_spill] sm:$0xff]  ;;  %v10083_v51 = vld [vmem:[#allocation78_spill] sm:$0xff] }
 0x846   :  { %4565 = vmatpush1.msra.mxu0 %v10022_v53  ;;  %4636 = vmatpush1.msra.mxu1 %v10023_v48  ;;  %v10084_v53 = vld [vmem:[#allocation79_spill] sm:$0xff]  ;;  %v10085_v48 = vld [vmem:[#allocation80_spill] sm:$0xff] }
 0x847   :  { %4566 = vmatprep.subr.mxu0 %v10024_v49  ;;  %4637 = vmatprep.subr.mxu1 %v10025_v3  ;;  %v10086_v49 = vld [vmem:[#allocation81_spill] sm:$0xff]  ;;  %v10087_v3 = vld [vmem:[#allocation82_spill] sm:$0xff] }
 0x848   :  { %4567 = vmatpush1.msra.mxu0 %v10026_v4  ;;  %4638 = vmatpush1.msra.mxu1 %v10027_v6  ;;  %v10088_v4 = vld [vmem:[#allocation83_spill] sm:$0xff]  ;;  %v10089_v6 = vld [vmem:[#allocation84_spill] sm:$0xff] }
 0x849   :  { %4568 = vmatprep.subr.mxu0 %v10028_v8  ;;  %4639 = vmatprep.subr.mxu1 %v10029_v9  ;;  %v10090_v8 = vld [vmem:[#allocation85_spill] sm:$0xff]  ;;  %v10091_v9 = vld [vmem:[#allocation86_spill] sm:$0xff] }
 0x84a   :  { %4569 = vmatpush1.msra.mxu0 %v10030_v11  ;;  %4640 = vmatpush1.msra.mxu1 %v10031_v12  ;;  %v10092_v11 = vld [vmem:[#allocation87_spill] sm:$0xff]  ;;  %v10093_v12 = vld [vmem:[#allocation88_spill] sm:$0xff] }
 0x84b   :  { %4570 = vmatprep.subr.mxu0 %v10032_v13  ;;  %4641 = vmatprep.subr.mxu1 %v10033_v14  ;;  %v10094_v13 = vld [vmem:[#allocation89_spill] sm:$0xff]  ;;  %v10095_v14 = vld [vmem:[#allocation90_spill] sm:$0xff] }
 0x84c   :  { %4571 = vmatpush1.msra.mxu0 %v10034_v15  ;;  %4642 = vmatpush1.msra.mxu1 %v10035_v18  ;;  %v10096_v15 = vld [vmem:[#allocation91_spill] sm:$0xff]  ;;  %v10097_v18 = vld [vmem:[#allocation92_spill] sm:$0xff] }
 0x84d   :  { %4572 = vmatprep.subr.mxu0 %v10036_v19  ;;  %4643 = vmatprep.subr.mxu1 %v10037_v24  ;;  %v10098_v19 = vld [vmem:[#allocation93_spill] sm:$0xff]  ;;  %v10099_v24 = vld [vmem:[#allocation94_spill] sm:$0xff] }
 0x84e   :  { %4573 = vmatpush1.msra.mxu0 %v10038_v44  ;;  %4644 = vmatpush1.msra.mxu1 %v10039_v26  ;;  %v10100_v44 = vld [vmem:[#allocation95_spill] sm:$0xff]  ;;  %v10101_v26 = vld [vmem:[#allocation96_spill] sm:$0xff] }
 0x84f   :  { %4574 = vmatprep.subr.mxu0 %v10040_v41  ;;  %4645 = vmatprep.subr.mxu1 %v10041_v40  ;;  %v10102_v41 = vld [vmem:[#allocation97_spill] sm:$0xff]  ;;  %v10103_v40 = vld [vmem:[#allocation98_spill] sm:$0xff] }
 0x850   :  { %4575 = vmatpush1.msra.mxu0 %v10042_v0  ;;  %4646 = vmatpush1.msra.mxu1 %v10043_v29  ;;  %v10104_v0 = vld [vmem:[#allocation99_spill] sm:$0xff]  ;;  %v10105_v29 = vld [vmem:[#allocation100_spill] sm:$0xff] }
 0x851   :  { %4576 = vmatprep.subr.mxu0 %v10044_v52  ;;  %4647 = vmatprep.subr.mxu1 %v10045_v5  ;;  %v10106_v52 = vld [vmem:[#allocation101_spill] sm:$0xff]  ;;  %v10107_v5 = vld [vmem:[#allocation102_spill] sm:$0xff] }
 0x852   :  { %4577 = vmatpush1.msra.mxu0 %v10046_v22  ;;  %4648 = vmatpush1.msra.mxu1 %v10047_v16  ;;  %v10108_v22 = vld [vmem:[#allocation103_spill] sm:$0xff]  ;;  %v10109_v16 = vld [vmem:[#allocation104_spill] sm:$0xff] }
 0x853   :  { %4578 = vmatprep.subr.mxu0 %v10048_v7  ;;  %4649 = vmatprep.subr.mxu1 %v10049_v2  ;;  %v10110_v7 = vld [vmem:[#allocation105_spill] sm:$0xff]  ;;  %v10111_v2 = vld [vmem:[#allocation106_spill] sm:$0xff] }
 0x854   :  { %4579 = vmatpush1.msra.mxu0 %v10050_v43  ;;  %4650 = vmatpush1.msra.mxu1 %v10051_v36  ;;  %v10112_v43 = vld [vmem:[#allocation107_spill] sm:$0xff]  ;;  %v10113_v36 = vld [vmem:[#allocation108_spill] sm:$0xff] }
 0x855   :  { %4580 = vmatprep.subr.mxu0 %v10052_v34  ;;  %4651 = vmatprep.subr.mxu1 %v10053_v61  ;;  %v10114_v34 = vld [vmem:[#allocation109_spill] sm:$0xff]  ;;  %v10115_v61 = vld [vmem:[#allocation110_spill] sm:$0xff] }
 0x856   :  { %4581 = vmatpush1.msra.mxu0 %v10054_v63  ;;  %4652 = vmatpush1.msra.mxu1 %v10055_v58  ;;  %v10116_v63 = vld [vmem:[#allocation111_spill] sm:$0xff]  ;;  %v10117_v58 = vld [vmem:[#allocation112_spill] sm:$0xff] }
 0x857   :  { %4582 = vmatprep.subr.mxu0 %v10056_v38  ;;  %4653 = vmatprep.subr.mxu1 %v10057_v17  ;;  %v10118_v38 = vld [vmem:[#allocation113_spill] sm:$0xff]  ;;  %v10119_v17 = vld [vmem:[#allocation114_spill] sm:$0xff] }
 0x858   :  { %4583 = vmatpush1.msra.mxu0 %v10058_v54  ;;  %4654 = vmatpush1.msra.mxu1 %v10059_v10  ;;  %v10120_v54 = vld [vmem:[#allocation115_spill] sm:$0xff]  ;;  %v10121_v10 = vld [vmem:[#allocation116_spill] sm:$0xff] }
 0x859   :  { %4584 = vmatprep.subr.mxu0 %v10060_v35  ;;  %4655 = vmatprep.subr.mxu1 %v10061_v55  ;;  %v10122_v35 = vld [vmem:[#allocation117_spill] sm:$0xff]  ;;  %v10123_v55 = vld [vmem:[#allocation118_spill] sm:$0xff] }
 0x85a   :  { %4585 = vmatpush1.msra.mxu0 %v10062_v42  ;;  %4656 = vmatpush1.msra.mxu1 %v10063_v20  ;;  %v10124_v42 = vld [vmem:[#allocation119_spill] sm:$0xff]  ;;  %v10125_v20 = vld [vmem:[#allocation120_spill] sm:$0xff] }
 0x85b   :  { %4586 = vmatprep.subr.mxu0 %v10064_v50  ;;  %4657 = vmatprep.subr.mxu1 %v10065_v1  ;;  %v10126_v50 = vld [vmem:[#allocation121_spill] sm:$0xff]  ;;  %v10127_v1 = vld [vmem:[#allocation122_spill] sm:$0xff] }
 0x85c   :  { %4587 = vmatpush1.msra.mxu0 %v10066_v30  ;;  %4658 = vmatpush1.msra.mxu1 %v10067_v60  ;;  %v10128_v30 = vld [vmem:[#allocation123_spill] sm:$0xff]  ;;  %v10129_v60 = vld [vmem:[#allocation124_spill] sm:$0xff] }
 0x85d   :  { %4588 = vmatprep.subr.mxu0 %v10068_v27  ;;  %4659 = vmatprep.subr.mxu1 %v10069_v47  ;;  %v10130_v27 = vld [vmem:[#allocation125_spill] sm:$0xff]  ;;  %v10131_v47 = vld [vmem:[#allocation126_spill] sm:$0xff] }
 0x85e   :  { %4589 = vmatpush2.msra.mxu0 %v10070_v59  ;;  %4660 = vmatpush2.msra.mxu1 %v10071_v23  ;;  %v10132_v23 = vld [vmem:[#allocation16_spill] sm:$0xff] }
 0x85f   :  { %4590 = vmatprep.subr.mxu0 %v10072_v28  ;;  %4661 = vmatprep.subr.mxu1 %v10073_v33 }
 0x860   :  { %4591 = vmatpush2.msra.mxu0 %v10074_v45  ;;  %4662 = vmatpush2.msra.mxu1 %v10075_v37  ;;  %v10133_v37 = vld [vmem:[#allocation17_spill] sm:$0xff] }
 0x861   :  { %4592 = vmatprep.subr.mxu0 %v10076_v46  ;;  %4663 = vmatprep.subr.mxu1 %v10077_v31 }
 0x862   :  { %4593 = vmatpush2.msra.mxu0 %v10078_v56  ;;  %4664 = vmatpush2.msra.mxu1 %v10079_v57 }
 0x863   :  { %4594 = vmatprep.subr.mxu0 %v10080_v25  ;;  %4665 = vmatprep.subr.mxu1 %v10081_v39  ;;  %v10134_v25 = vld [vmem:[#allocation18_spill] sm:$0xff] }
 0x864   :  { %4595 = vmatpush2.msra.mxu0 %v10082_v32  ;;  %4666 = vmatpush2.msra.mxu1 %v10083_v51 }
 0x865   :  { %4596 = vmatprep.subr.mxu0 %v10084_v53  ;;  %4667 = vmatprep.subr.mxu1 %v10085_v48  ;;  %v10135_v53 = vld [vmem:[#allocation19_spill] sm:$0xff] }
 0x866   :  { %4597 = vmatpush2.msra.mxu0 %v10086_v49  ;;  %4668 = vmatpush2.msra.mxu1 %v10087_v3 }
 0x867   :  { %4598 = vmatprep.subr.mxu0 %v10088_v4  ;;  %4669 = vmatprep.subr.mxu1 %v10089_v6 }
 0x868   :  { %4599 = vmatpush2.msra.mxu0 %v10090_v8  ;;  %4670 = vmatpush2.msra.mxu1 %v10091_v9 }
 0x869   :  { %4600 = vmatprep.subr.mxu0 %v10092_v11  ;;  %4671 = vmatprep.subr.mxu1 %v10093_v12  ;;  %v10136_v11 = vld [vmem:[#allocation155_spill] sm:$0xff] }
 0x86a   :  { %4601 = vmatpush2.msra.mxu0 %v10094_v13  ;;  %4672 = vmatpush2.msra.mxu1 %v10095_v14 }
 0x86b   :  { %4602 = vmatprep.subr.mxu0 %v10096_v15  ;;  %4673 = vmatprep.subr.mxu1 %v10097_v18 }
 0x86c   :  { %4603 = vmatpush2.msra.mxu0 %v10098_v19  ;;  %4674 = vmatpush2.msra.mxu1 %v10099_v24  ;;  %v10137_v19 = vld [vmem:[#allocation157_spill] sm:$0xff] }
 0x86d   :  { %4604 = vmatprep.subr.mxu0 %v10100_v44  ;;  %4675 = vmatprep.subr.mxu1 %v10101_v26 }
 0x86e   :  { %4605 = vmatpush2.msra.mxu0 %v10102_v41  ;;  %4676 = vmatpush2.msra.mxu1 %v10103_v40 }
 0x86f   :  { %4606 = vmatprep.subr.mxu0 %v10104_v0  ;;  %4677 = vmatprep.subr.mxu1 %v10105_v29 }
 0x870   :  { %4607 = vmatpush2.msra.mxu0 %v10106_v52  ;;  %4678 = vmatpush2.msra.mxu1 %v10107_v5  ;;  %v10138_v5 = vld [vmem:[#allocation158_spill] sm:$0xff] }
 0x871   :  { %4608 = vmatprep.subr.mxu0 %v10108_v22  ;;  %4679 = vmatprep.subr.mxu1 %v10109_v16  ;;  %v10139_v16 = vld [vmem:[#allocation156_spill] sm:$0xff] }
 0x872   :  { %4609 = vmatpush2.msra.mxu0 %v10110_v7  ;;  %4680 = vmatpush2.msra.mxu1 %v10111_v2 }
 0x873   :  { %4610 = vmatprep.subr.mxu0 %v10112_v43  ;;  %4681 = vmatprep.subr.mxu1 %v10113_v36 }
 0x874   :  { %4611 = vmatpush2.msra.mxu0 %v10114_v34  ;;  %4682 = vmatpush2.msra.mxu1 %v10115_v61 }
 0x875   :  { %4612 = vmatprep.subr.mxu0 %v10116_v63  ;;  %4683 = vmatprep.subr.mxu1 %v10117_v58 }
 0x876   :  { %4613 = vmatpush2.msra.mxu0 %v10118_v38  ;;  %4684 = vmatpush2.msra.mxu1 %v10119_v17 }
 0x877   :  { %4614 = vmatprep.subr.mxu0 %v10120_v54  ;;  %4685 = vmatprep.subr.mxu1 %v10121_v10 }
 0x878   :  { %4615 = vmatpush2.msra.mxu0 %v10122_v35  ;;  %4686 = vmatpush2.msra.mxu1 %v10123_v55 }
 0x879   :  { %4616 = vmatprep.subr.mxu0 %v10124_v42  ;;  %4687 = vmatprep.subr.mxu1 %v10125_v20 }
 0x87a   :  { %4617 = vmatpush2.msra.mxu0 %v10126_v50  ;;  %4688 = vmatpush2.msra.mxu1 %v10127_v1 }
 0x87b   :  { %4618 = vmatprep.subr.mxu0 %v10128_v30  ;;  %4689 = vmatprep.subr.mxu1 %v10129_v60 }
 0x87c   :  { %4619 = vmatpush2.msra.mxu0 %v10130_v27  ;;  %4690 = vmatpush2.msra.mxu1 %v10131_v47 }
 0x8db   :  { %v4088_v59 = vpop.f32.mrf.mxu0  ;;  %v4159_v31 = vpop.f32.mrf.mxu1 }
 0x8dc   :  { %v4089_v28 = vadd.f32 %v4088_v59, %v10132_v23  ;;  %v4160_v48 = vadd.f32 %v4159_v31, %v10135_v53 }
 0x8dd   :  { %v4090_v33 = vpop.f32.mrf.mxu0  ;;  %v4161_v57 = vpop.f32.mrf.mxu1 }
 0x8de   :  { %v4782_v45 = vmul.f32 -1.442695, %v4089_v28  ;;  %v4091_v46 = vadd.f32 %v4090_v33, %v10133_v37  ;;  %v4162_v39 = vadd.f32 %v4161_v57, %v10134_v25 }
 0x8e0   :  { %5009 = vpow2.f32 %v4782_v45  ;;  %v4783_v56 = vmul.f32 -1.442695, %v4091_v46  ;;  %v4784_v32 = vmul.f32 -1.442695, %v4162_v39 }
 0x8e2   :  { %5011 = vpow2.f32 %v4783_v56 }
 0x8e3   :  { %5013 = vpow2.f32 %v4784_v32 }
 0x8ed   :  { %v5010_v51 = vpop.eup %5009 }
 0x8ee   :  { %v4167_v49 = vadd.f32 1.0, %v5010_v51 }
 0x8ef   :  { %v5012_v3 = vpop.eup %5011 }
 0x8f0   :  { %5015 = vrcp.f32 %v4167_v49  ;;  %v4173_v4 = vadd.f32 1.0, %v5012_v3  ;;  %v5014_v6 = vpop.eup %5013 }
 0x8f1   :  { %5017 = vtanh.f32 %v4160_v48  ;;  %v4180_v41 = vadd.f32 1.0, %v5014_v6 }
 0x8f2   :  { %5019 = vrcp.f32 %v4173_v4 }
 0x8fc   :  { %v4324_v8 = vpop.f32.mrf.mxu0  ;;  %v4395_v40 = vpop.f32.mrf.mxu1 }
 0x8fd   :  { %v5016_v9 = vpop.eup %5015  ;;  %v4400_v12 = vadd.f32 %v4324_v8, %v10136_v11  ;;  %v4402_v7 = vadd.f32 %v4395_v40, %v10139_v16 }
 0x8fe   :  { %v5018_v13 = vpop.eup %5017  ;;  %v4326_v14 = vpop.f32.mrf.mxu0 }
 0x8ff   :  { %v5020_v15 = vpop.eup %5019  ;;  %v4785_v18 = vmul.f32 -1.442695, %v4400_v12  ;;  %v4401_v24 = vadd.f32 %v4326_v14, %v10137_v19  ;;  %v4184_v44 = vmul.f32 %v5018_v13, %v5016_v9  ;;  %v4397_v52 = vpop.f32.mrf.mxu1 }
 0x900   :  { %v4183_v26 = vmul.f32 %v5020_v15, %v8283_v62  ;;  %v4403_v22 = vadd.f32 %v4397_v52, %v10138_v5 }
 0x901   :  { %5021 = vpow2.f32 %v4785_v18  ;;  %v4786_v0 = vmul.f32 -1.442695, %v4401_v24 }
 0x902   :  { %v8469_v29 = vadd.f32 %v4184_v44, %v4183_v26  ;;  %v4787_v2 = vmul.f32 -1.442695, %v4403_v22 }
 0x903   :  { %5023 = vpow2.f32 %v4786_v0 }
 0x904   :  { %5025 = vrcp.f32 %v4180_v41 }
 0x905   :  { %5027 = vtanh.f32 %v8469_v29 }
 0x906   :  { %5029 = vtanh.f32 %v4402_v7 }
 0x907   :  { %5031 = vpow2.f32 %v4787_v2 }
 0x90e   :  { %v5022_v43 = vpop.eup %5021 }
 0x90f   :  { %v4407_v36 = vadd.f32 1.0, %v5022_v43 }
 0x910   :  { %v5024_v62 = vpop.eup %5023 }
 0x911   :  { %v5026_v34 = vpop.eup %5025  ;;  %5033 = vrcp.f32 %v4407_v36  ;;  %v4413_v61 = vadd.f32 1.0, %v5024_v62 }
 0x912   :  { %v5028_v63 = vpop.eup %5027 }
 0x913   :  { %5035 = vrcp.f32 %v4413_v61  ;;  %v4187_v58 = vmul.f32 %v5028_v63, %v5026_v34  ;;  %v5030_v38 = vpop.eup %5029 }
 0x914   :  { %v5032_v17 = vpop.eup %5031 }
 0x915   :  { %4189 = vst [vmem:[#allocation11 + $0x30] sm:$0xff] %v4187_v58  ;;  %4620 = vmatprep.mubr.f32.mxu0 %v4187_v58  ;;  %4691 = vmatprep.mubr.f32.mxu1 %v4187_v58  ;;  %v4420_v55 = vadd.f32 1.0, %v5032_v17 }
 0x917   :  { %5037 = vrcp.f32 %v4420_v55 }
 0x91e   :  { %v5034_v54 = vpop.eup %5033 }
 0x91f   :  { %v4424_v10 = vmul.f32 %v5034_v54, %v5030_v38 }
 0x920   :  { %v5036_v35 = vpop.eup %5035 }
 0x921   :  { %v4423_v42 = vmul.f32 %v5036_v35, %v8289_v21 }
 0x923   :  { %v4425_v20 = vadd.f32 %v4424_v10, %v4423_v42 }
 0x924   :  { %v5038_v50 = vpop.eup %5037 }
 0x925   :  { %5039 = vtanh.f32 %v4425_v20 }
 0x932   :  { %v5040_v1 = vpop.eup %5039 }
 0x933   :  { %v4427_v30 = vmul.f32 %v5040_v1, %v5038_v50 }
 0x935   :  { %4621 = vmatmul.mubr.f32.vlgmr.msra.gmra.mxu0 %v4427_v30  ;;  %4692 = vmatmul.mubr.f32.vlgmr.msra.gmra.mxu1 %v4427_v30 }
 0x9f5   :  { %v4622_v60 = vpop.f32.mrf.mxu0  ;;  %v4693_v33 = vpop.f32.mrf.mxu1 }
 0x9f6   :  { %v4623_v27 = vadd.f32 %v4622_v60, %v10132_v23  ;;  %v4694_v57 = vadd.f32 %v4693_v33, %v10135_v53 }
 0x9f7   :  { %v4624_v47 = vpop.f32.mrf.mxu0  ;;  %v4695_v21 = vpop.f32.mrf.mxu1 }
 0x9f8   :  { %v4788_v59 = vmul.f32 -1.442695, %v4623_v27  ;;  %v4625_v28 = vadd.f32 %v4624_v47, %v10133_v37  ;;  %v4696_v46 = vadd.f32 %v4695_v21, %v10134_v25 }
 0x9fa   :  { %5041 = vpow2.f32 %v4788_v59  ;;  %v4789_v45 = vmul.f32 -1.442695, %v4625_v28  ;;  %v4790_v31 = vmul.f32 -1.442695, %v4696_v46 }
 0x9fc   :  { %5043 = vpow2.f32 %v4789_v45 }
 0x9fd   :  { %5045 = vpow2.f32 %v4790_v31 }
 0xa07   :  { %v5042_v56 = vpop.eup %5041 }
 0xa08   :  { %v4701_v39 = vadd.f32 1.0, %v5042_v56 }
 0xa09   :  { %v5044_v32 = vpop.eup %5043 }
 0xa0a   :  { %5047 = vrcp.f32 %v4701_v39  ;;  %v4707_v23 = vadd.f32 1.0, %v5044_v32  ;;  %v5046_v51 = vpop.eup %5045 }
 0xa0b   :  { %5049 = vtanh.f32 %v4694_v57  ;;  %v4714_v3 = vadd.f32 1.0, %v5046_v51 }
 0xa0c   :  { %5051 = vrcp.f32 %v4707_v23 }
 0xa0d   :  { %5053 = vrcp.f32 %v4714_v3 }
 0xa17   :  { %v5048_v37 = vpop.eup %5047 }
 0xa18   :  { %v5050_v48 = vpop.eup %5049 }
 0xa19   :  { %v5052_v49 = vpop.eup %5051  ;;  %v4718_v4 = vmul.f32 %v5050_v48, %v5048_v37 }
 0xa1a   :  { %v4717_v6 = vmul.f32 %v5052_v49, %v8469_v29  ;;  %v5054_v53 = vpop.eup %5053 }
 0xa1c   :  { %v4719_v25 = vadd.f32 %v4718_v4, %v4717_v6 }
 0xa1e   :  { %5055 = vtanh.f32 %v4719_v25 }
 0xa2b   :  { %v5056_v8 = vpop.eup %5055 }
 0xa2c   :  { %v4721_v9 = vmul.f32 %v5056_v8, %v5054_v53 }
 0xa2e   :  { %4723 = vst [vmem:[#allocation11 + $0x38] sm:$0xff] %v4721_v9 }
 0xa2f   :  { %5156 = shalt.err (!%p5153_p10)
}
 0xa30   :  { %4735 = dma.vmem_to_hbm [thread:$0]  %s4730_s20, 1024, %s8492_s6, [#allocation5], %s5177_s7, %s5177_s7, %s5178_s8  }
 0xa31   :  { %5171 = dma.done.wait [#allocation5], 1024  }
 0xa32   :  { %5172 = vsyncadd [#allocation5], 4294966272 }
 0xa33   :  { %4739 = vsyncpa [#allocation4], 1 }
 0xa34   :  { %4740 = vsyncpa [#allocation7], 1 }
 0xa35   :  { %4741 = vsyncpa [#allocation10], 1 }
 0xa36   :  { %4742 = vsyncpa [#allocation5], 1 }

</bundles_post_ra>
